<compile_context>
chip_gen: v7x
topology: tpu7x:2x2x1
jax: 0.10.0
libtpu: 0.0.40
codegen_flags: <defaults>
</compile_context>

<pallas_src>
import jax
import jax.numpy as jnp
from jax.experimental import pallas as pl
from jax.experimental.pallas import tpu as pltpu

LEAK = 0.2

# generator geometry
H1, W1, C1 = 7, 7, 4            # fc2 output viewed as NCHW (4, 7, 7)
H2, W2, C2 = 14, 14, 32         # conv1 output (NHWC inside the kernel)
HP, WP = H2 + 2, W2 + 2         # zero-padded conv1 rows/cols (16, 16)
H3, W3 = 28, 28                 # conv2 output
ROW = WP * C2                   # 512 lanes per padded row (16 cols * 32 ch)
KFC2 = 256                      # fc2-out / conv1 contraction padded 196 -> 256
NGROUPS = 7                     # conv2 groups (4 output rows each)
KG = 4 * ROW                    # 2048 contraction depth of one grouped conv2 matmul
NG = 4 * W3                     # 112 real outputs per group (4 rows * 28 cols)
NGPAD = 128                     # lane-padded group width
MAX_BT = 128                    # batch-tile cap (fits default scoped VMEM everywhere)


def _leaky(x):
    return jnp.where(x > 0, x, LEAK * x)


def _sigmoid(x):
    # exp and the reciprocal both run in the (otherwise idle) EUP slot.
    return pl.reciprocal(1.0 + jnp.exp(-x), approx=True)


# ------------------------------ fused kernel ------------------------------- #

def generator_kernel(x_ref, w1_ref, b1_ref, w2_ref, b2_ref,
                     wc1_ref, bc1_ref, wc2_ref, bc2_ref, o_ref):
    bf16, f32 = jnp.bfloat16, jnp.float32

    # fc1 + leaky : (BT, L) x (L, 128)
    h = jnp.dot(x_ref[...].astype(bf16), w1_ref[...], preferred_element_type=f32)
    h = _leaky(h + b1_ref[...])

    # fc2 + leaky : (BT, 128) x (128, 256)   (K padded 196 -> 256; pad cols stay 0)
    h = jnp.dot(h.astype(bf16), w2_ref[...], preferred_element_type=f32)
    h = _leaky(h + b2_ref[...])

    # conv1 as ONE dense matmul: (BT, 256) x (256, 16*16*32).
    # Columns are the zero-padded NHWC feature map (col = ph*512 + pw*32 + oc);
    # pad columns have zero weight/bias so leaky keeps them exactly 0.
    c1 = jnp.dot(h.astype(bf16), wc1_ref[...], preferred_element_type=f32)
    c1 = _leaky(c1 + bc1_ref[...]).astype(bf16)              # (BT, 8192)

    # conv2 via grouped polyphase: 4 output rows per matmul.
    # Group g (output rows 4g..4g+3) depends only on padded rows 2g..2g+3, so it is
    # one (BT, 2048) x (2048, 128) matmul with a weight shared across all groups.
    wc2 = wc2_ref[...]
    bc2 = bc2_ref[...]
    for g in range(NGROUPS):                                 # static unroll: 7 groups
        patch = c1[:, 2 * g * ROW: 2 * g * ROW + KG]         # 128-lane-aligned slice
        y = jnp.dot(patch, wc2, preferred_element_type=f32) + bc2
        o_ref[:, g * NGPAD:(g + 1) * NGPAD] = _sigmoid(y)    # lane-aligned store


# ------------------------------ JAX wrapper -------------------------------- #

def _choose_tile(batch):
    """Pad batch to a multiple of 8; pick a tile <=128 with >=2 grid steps if possible."""
    bp = ((batch + 7) // 8) * 8
    if bp <= 8:
        return bp, bp
    for bt in (MAX_BT, 64, 32, 16, 8):
        if bp % bt == 0 and bp // bt >= 2:   # >=2 steps: megacore (v7x) + pipelining
            return bp, bt
    return bp, 8


def generator_forward(x, params):
    B, L = x.shape
    Bp, BT = _choose_tile(B)
    if Bp != B:
        x = jnp.pad(x, ((0, Bp - B), (0, 0)))

    weights = (params["w1t"], params["b1"], params["w2t"], params["b2"],
               params["wc1"], params["bc1"], params["wc2"], params["bc2"])

    in_specs = [pl.BlockSpec((BT, L), lambda i: (i, 0))]
    in_specs += [pl.BlockSpec(w.shape, lambda i: (0, 0)) for w in weights]

    out = pl.pallas_call(
        generator_kernel,
        out_shape=jax.ShapeDtypeStruct((Bp, NGROUPS * NGPAD), jnp.float32),
        grid=(Bp // BT,),
        in_specs=in_specs,
        out_specs=pl.BlockSpec((BT, NGROUPS * NGPAD), lambda i: (i, 0)),
        compiler_params=pltpu.CompilerParams(
            dimension_semantics=("parallel",),
            vmem_limit_bytes=48 * 1024 * 1024),
    )(x, *weights)

    # Strip the 16 pad lanes per group and the batch pad; the remaining flat columns
    # are already NCHW row-major: col = g*112 + r*28 + ow == (4g+r)*28 + ow.
    out = out.reshape(Bp, NGROUPS, NGPAD)[:B, :, :NG]
    return out.reshape(B, 1, H3, W3)


# ------------------------- parameter preparation --------------------------- #

def init_raw_params(key, latent_size):
    ks = jax.random.split(key, 8)

    def u(k, shape, fan_in):
        bound = 1.0 / float(fan_in) ** 0.5
        return jax.random.uniform(k, shape, jnp.float32, -bound, bound)

    return dict(
        w1=u(ks[0], (128, latent_size), latent_size),   # nn.Linear(latent, 128)
        b1=u(ks[1], (128,), latent_size),
        w2=u(ks[2], (196, 128), 128),                   # nn.Linear(128, 196)
        b2=u(ks[3], (196,), 128),
        wt1=u(ks[4], (4, 32, 4, 4), 32 * 16),           # ConvTranspose2d(4, 32, 4, s=2, p=1)
        bt1=u(ks[5], (32,), 32 * 16),
        wt2=u(ks[6], (32, 1, 4, 4), 1 * 16),            # ConvTranspose2d(32, 1, 4, s=2, p=1)
        bt2=u(ks[7], (1,), 1 * 16),
    )


def prepare_params(raw):
    """One-time repack of PyTorch-layout weights into the fused-kernel layout."""
    bf16 = jnp.bfloat16

    # --- fc weights (fc2 output / conv1 contraction padded 196 -> 256) ---
    w1t = raw["w1"].T.astype(bf16)
    b1 = raw["b1"].reshape(1, -1)
    w2t = jnp.pad(raw["w2"].T, ((0, 0), (0, KFC2 - 196))).astype(bf16)     # (128, 256)
    b2 = jnp.pad(raw["b2"].reshape(1, -1), ((0, 0), (0, KFC2 - 196)))      # (1, 256)

    # --- conv1 as a dense (256, 8192) matmul producing zero-padded NHWC rows ---
    eye = jnp.eye(C1 * H1 * W1, dtype=jnp.float32).reshape(-1, C1, H1, W1)
    wk = jnp.flip(raw["wt1"], (2, 3)).transpose(1, 0, 2, 3)       # OIHW regular-conv weight
    basis = jax.lax.conv_general_dilated(
        eye, wk, window_strides=(1, 1), padding=[(2, 2), (2, 2)],
        lhs_dilation=(2, 2), dimension_numbers=("NCHW", "OIHW", "NCHW"))   # (196,32,14,14)
    basis = basis.transpose(0, 2, 3, 1)                           # (196, 14, 14, 32) NHWC
    basis = jnp.pad(basis, ((0, 0), (1, 1), (1, 1), (0, 0)))      # (196, 16, 16, 32)
    wc1 = basis.reshape(C1 * H1 * W1, HP * WP * C2)
    wc1 = jnp.pad(wc1, ((0, KFC2 - 196), (0, 0)))                 # (256, 8192), zero K-pad
    bc1 = jnp.pad(jnp.broadcast_to(raw["bt1"], (H2, W2, C2)),
                  ((1, 1), (1, 1), (0, 0))).reshape(1, HP * WP * C2)

    # --- conv2 grouped polyphase: (2048, 128) banded matmul shared by all groups ---
    # out[4g+r, ow] = sum_{d,pw,ic} xpad[2g+d, pw, ic] * w[ic, r+3-2d, ow+3-2pw]
    # with valid taps 0 <= kh, kw < 4;  K index = (d, pw, ic), N index = (r, ow).
    w2c = raw["wt2"][:, 0]                                        # (32, 4, 4)
    kh = jnp.arange(4)[:, None] + 3 - 2 * jnp.arange(4)[None, :]          # (r, d)
    kw = jnp.arange(W3)[None, :] + 3 - 2 * jnp.arange(WP)[:, None]        # (pw, ow)
    valid = (((kh >= 0) & (kh < 4))[None, :, :, None, None]
             & ((kw >= 0) & (kw < 4))[None, None, None, :, :])
    taps = w2c[:, jnp.clip(kh, 0, 3), :][:, :, :, jnp.clip(kw, 0, 3)]     # (ic,r,d,pw,ow)
    taps = jnp.where(valid, taps, 0.0)
    wc2 = taps.transpose(2, 3, 0, 1, 4).reshape(KG, NG)                   # (2048, 112)
    wc2 = jnp.pad(wc2, ((0, 0), (0, NGPAD - NG)))                         # (2048, 128)
    bc2 = jnp.pad(jnp.full((1, NG), raw["bt2"][0], jnp.float32),
                  ((0, 0), (0, NGPAD - NG)))                              # (1, 128)

    return dict(w1t=w1t, b1=b1, w2t=w2t, b2=b2,
                wc1=wc1.astype(bf16), bc1=bc1,
                wc2=wc2.astype(bf16), bc2=bc2)


# ------------------------- pure-JAX reference check ------------------------ #

def reference_forward(x, raw):
    def convT(x_nchw, wt, b, stride, padding):
        cin, cout, kh, kw = wt.shape
        wk = jnp.flip(wt, (2, 3)).transpose(1, 0, 2, 3)
        y = jax.lax.conv_general_dilated(
            x_nchw, wk, (1, 1),
            [(kh - 1 - padding,) * 2, (kw - 1 - padding,) * 2],
            lhs_dilation=(stride, stride),
            dimension_numbers=("NCHW", "OIHW", "NCHW"))
        return y + b.reshape(1, cout, 1, 1)

    def lrelu(v):
        return jnp.where(v > 0, v, LEAK * v)

    h = lrelu(x @ raw["w1"].T + raw["b1"])
    h = lrelu(h @ raw["w2"].T + raw["b2"])
    h = h.reshape(-1, C1, H1, W1)
    h = lrelu(convT(h, raw["wt1"], raw["bt1"], 2, 1))
    y = convT(h, raw["wt2"], raw["bt2"], 2, 1)
    return 1.0 / (1.0 + jnp.exp(-y))


if __name__ == "__main__":
    latent_size = 32
    batch = 2

    key = jax.random.PRNGKey(0)
    pkey, xkey = jax.random.split(key)
    raw = init_raw_params(pkey, latent_size)
    params = prepare_params(raw)          # one-time repack (outside the hot path)
    x = jax.random.normal(xkey, (batch, latent_size), jnp.float32)

    out = jax.jit(generator_forward)(x, params)
    out = jax.block_until_ready(out)

    assert out.shape == (batch, 1, 28, 28), out.shape
    assert out.dtype == jnp.float32
    # approx EUP reciprocal can overshoot the exact sigmoid by ~1e-3
    assert bool(jnp.all((out > -1e-2) & (out < 1.0 + 1e-2)))

    ref = reference_forward(x, raw)                               # f32 reference
    assert bool(jnp.max(jnp.abs(out - ref)) < 5e-2)               # bf16-tolerant check

    print("KERNEL_OK")
</pallas_src>

<mosaic_0001>
module attributes {stable_mosaic.version = 11 : i64} {
  func.func @generator_kernel(%arg0: i32, %arg1: memref<8x32xf32, #tpu.memory_space<vmem>>, %arg2: memref<32x128xbf16, #tpu.memory_space<vmem>>, %arg3: memref<1x128xf32, #tpu.memory_space<vmem>>, %arg4: memref<128x256xbf16, #tpu.memory_space<vmem>>, %arg5: memref<1x256xf32, #tpu.memory_space<vmem>>, %arg6: memref<256x8192xbf16, #tpu.memory_space<vmem>>, %arg7: memref<1x8192xf32, #tpu.memory_space<vmem>>, %arg8: memref<2048x128xbf16, #tpu.memory_space<vmem>>, %arg9: memref<1x128xf32, #tpu.memory_space<vmem>>, %arg10: memref<8x896xf32, #tpu.memory_space<vmem>>) attributes {dimension_semantics = [#tpu.dimension_semantics<parallel>], iteration_bounds = array<i64: 1>, scalar_prefetch = 0 : i64, scratch_operands = 0 : i64, tpu.core_type = #tpu.core_type<tc>, window_params = [{transform_indices = @transform_0, window_bounds = array<i64: 8, 32>}, {pipeline_mode = #tpu.pipeline_mode<synchronous>, transform_indices = @transform_1, window_bounds = array<i64: 32, 128>}, {pipeline_mode = #tpu.pipeline_mode<synchronous>, transform_indices = @transform_2, window_bounds = array<i64: 1, 128>}, {pipeline_mode = #tpu.pipeline_mode<synchronous>, transform_indices = @transform_3, window_bounds = array<i64: 128, 256>}, {pipeline_mode = #tpu.pipeline_mode<synchronous>, transform_indices = @transform_4, window_bounds = array<i64: 1, 256>}, {pipeline_mode = #tpu.pipeline_mode<synchronous>, transform_indices = @transform_5, window_bounds = array<i64: 256, 8192>}, {pipeline_mode = #tpu.pipeline_mode<synchronous>, transform_indices = @transform_6, window_bounds = array<i64: 1, 8192>}, {pipeline_mode = #tpu.pipeline_mode<synchronous>, transform_indices = @transform_7, window_bounds = array<i64: 2048, 128>}, {pipeline_mode = #tpu.pipeline_mode<synchronous>, transform_indices = @transform_8, window_bounds = array<i64: 1, 128>}, {transform_indices = @transform_9, window_bounds = array<i64: 8, 896>}]} {
    %c0 = arith.constant 0 : index
    %c0_0 = arith.constant 0 : index
    %0 = vector.load %arg1[%c0, %c0_0] : memref<8x32xf32, #tpu.memory_space<vmem>>, vector<8x32xf32>
    %1 = arith.truncf %0 : vector<8x32xf32> to vector<8x32xbf16>
    %c0_1 = arith.constant 0 : index
    %c0_2 = arith.constant 0 : index
    %2 = vector.load %arg2[%c0_1, %c0_2] : memref<32x128xbf16, #tpu.memory_space<vmem>>, vector<32x128xbf16>
    %cst = arith.constant dense<0.000000e+00> : vector<8x128xf32>
    %3 = tpu.matmul %1, %2, %cst {dimension_numbers = #tpu.dot_dimension_numbers<[1], [0], [0], [1], [0, 0, 1, 1], [], []>} : vector<8x32xbf16>, vector<32x128xbf16>, vector<8x128xf32> -> vector<8x128xf32>
    %c0_3 = arith.constant 0 : index
    %c0_4 = arith.constant 0 : index
    %4 = vector.load %arg3[%c0_3, %c0_4] : memref<1x128xf32, #tpu.memory_space<vmem>>, vector<1x128xf32>
    %5 = vector.broadcast %4 : vector<1x128xf32> to vector<8x128xf32>
    %6 = arith.addf %3, %5 : vector<8x128xf32>
    %cst_5 = arith.constant 0.000000e+00 : f32
    %7 = vector.broadcast %cst_5 : f32 to vector<8x128xf32>
    %8 = arith.cmpf ogt, %6, %7 : vector<8x128xf32>
    %cst_6 = arith.constant 2.000000e-01 : f32
    %9 = vector.broadcast %cst_6 : f32 to vector<8x128xf32>
    %10 = arith.mulf %9, %6 : vector<8x128xf32>
    %11 = arith.select %8, %6, %10 : vector<8x128xi1>, vector<8x128xf32>
    %12 = arith.truncf %11 : vector<8x128xf32> to vector<8x128xbf16>
    %c0_7 = arith.constant 0 : index
    %c0_8 = arith.constant 0 : index
    %13 = vector.load %arg4[%c0_7, %c0_8] : memref<128x256xbf16, #tpu.memory_space<vmem>>, vector<128x256xbf16>
    %cst_9 = arith.constant dense<0.000000e+00> : vector<8x256xf32>
    %14 = tpu.matmul %12, %13, %cst_9 {dimension_numbers = #tpu.dot_dimension_numbers<[1], [0], [0], [1], [0, 0, 1, 1], [], []>} : vector<8x128xbf16>, vector<128x256xbf16>, vector<8x256xf32> -> vector<8x256xf32>
    %c0_10 = arith.constant 0 : index
    %c0_11 = arith.constant 0 : index
    %15 = vector.load %arg5[%c0_10, %c0_11] : memref<1x256xf32, #tpu.memory_space<vmem>>, vector<1x256xf32>
    %16 = vector.broadcast %15 : vector<1x256xf32> to vector<8x256xf32>
    %17 = arith.addf %14, %16 : vector<8x256xf32>
    %cst_12 = arith.constant 0.000000e+00 : f32
    %18 = vector.broadcast %cst_12 : f32 to vector<8x256xf32>
    %19 = arith.cmpf ogt, %17, %18 : vector<8x256xf32>
    %cst_13 = arith.constant 2.000000e-01 : f32
    %20 = vector.broadcast %cst_13 : f32 to vector<8x256xf32>
    %21 = arith.mulf %20, %17 : vector<8x256xf32>
    %22 = arith.select %19, %17, %21 : vector<8x256xi1>, vector<8x256xf32>
    %23 = arith.truncf %22 : vector<8x256xf32> to vector<8x256xbf16>
    %c0_14 = arith.constant 0 : index
    %c0_15 = arith.constant 0 : index
    %24 = vector.load %arg6[%c0_14, %c0_15] : memref<256x8192xbf16, #tpu.memory_space<vmem>>, vector<256x8192xbf16>
    %cst_16 = arith.constant dense<0.000000e+00> : vector<8x8192xf32>
    %25 = tpu.matmul %23, %24, %cst_16 {dimension_numbers = #tpu.dot_dimension_numbers<[1], [0], [0], [1], [0, 0, 1, 1], [], []>} : vector<8x256xbf16>, vector<256x8192xbf16>, vector<8x8192xf32> -> vector<8x8192xf32>
    %c0_17 = arith.constant 0 : index
    %c0_18 = arith.constant 0 : index
    %26 = vector.load %arg7[%c0_17, %c0_18] : memref<1x8192xf32, #tpu.memory_space<vmem>>, vector<1x8192xf32>
    %27 = vector.broadcast %26 : vector<1x8192xf32> to vector<8x8192xf32>
    %28 = arith.addf %25, %27 : vector<8x8192xf32>
    %cst_19 = arith.constant 0.000000e+00 : f32
    %29 = vector.broadcast %cst_19 : f32 to vector<8x8192xf32>
    %30 = arith.cmpf ogt, %28, %29 : vector<8x8192xf32>
    %cst_20 = arith.constant 2.000000e-01 : f32
    %31 = vector.broadcast %cst_20 : f32 to vector<8x8192xf32>
    %32 = arith.mulf %31, %28 : vector<8x8192xf32>
    %33 = arith.select %30, %28, %32 : vector<8x8192xi1>, vector<8x8192xf32>
    %34 = arith.truncf %33 : vector<8x8192xf32> to vector<8x8192xbf16>
    %c0_21 = arith.constant 0 : index
    %c0_22 = arith.constant 0 : index
    %35 = vector.load %arg8[%c0_21, %c0_22] : memref<2048x128xbf16, #tpu.memory_space<vmem>>, vector<2048x128xbf16>
    %c0_23 = arith.constant 0 : index
    %c0_24 = arith.constant 0 : index
    %36 = vector.load %arg9[%c0_23, %c0_24] : memref<1x128xf32, #tpu.memory_space<vmem>>, vector<1x128xf32>
    %37 = vector.extract_strided_slice %34 {offsets = [0, 0], sizes = [8, 2048], strides = [1, 1]} : vector<8x8192xbf16> to vector<8x2048xbf16>
    %cst_25 = arith.constant dense<0.000000e+00> : vector<8x128xf32>
    %38 = tpu.matmul %37, %35, %cst_25 {dimension_numbers = #tpu.dot_dimension_numbers<[1], [0], [0], [1], [0, 0, 1, 1], [], []>} : vector<8x2048xbf16>, vector<2048x128xbf16>, vector<8x128xf32> -> vector<8x128xf32>
    %39 = vector.broadcast %36 : vector<1x128xf32> to vector<8x128xf32>
    %40 = arith.addf %38, %39 : vector<8x128xf32>
    %cst_26 = arith.constant 0.000000e+00 : f32
    %41 = vector.broadcast %cst_26 : f32 to vector<8x128xf32>
    %42 = arith.subf %41, %40 : vector<8x128xf32>
    %43 = math.exp %42 : vector<8x128xf32>
    %cst_27 = arith.constant 1.000000e+00 : f32
    %44 = vector.broadcast %cst_27 : f32 to vector<8x128xf32>
    %45 = arith.addf %44, %43 : vector<8x128xf32>
    %46 = tpu.reciprocal %45 {approx = true} : vector<8x128xf32> -> vector<8x128xf32>
    %c0_28 = arith.constant 0 : index
    %c0_29 = arith.constant 0 : index
    %47 = vector.load %arg10[%c0_28, %c0_29] : memref<8x896xf32, #tpu.memory_space<vmem>>, vector<8x128xf32>
    tpu.vector_store %arg10[%c0_28, %c0_29], %46 {strides = array<i32>} : memref<8x896xf32, #tpu.memory_space<vmem>>, vector<8x128xf32>,
    %48 = vector.extract_strided_slice %34 {offsets = [0, 1024], sizes = [8, 2048], strides = [1, 1]} : vector<8x8192xbf16> to vector<8x2048xbf16>
    %cst_30 = arith.constant dense<0.000000e+00> : vector<8x128xf32>
    %49 = tpu.matmul %48, %35, %cst_30 {dimension_numbers = #tpu.dot_dimension_numbers<[1], [0], [0], [1], [0, 0, 1, 1], [], []>} : vector<8x2048xbf16>, vector<2048x128xbf16>, vector<8x128xf32> -> vector<8x128xf32>
    %50 = vector.broadcast %36 : vector<1x128xf32> to vector<8x128xf32>
    %51 = arith.addf %49, %50 : vector<8x128xf32>
    %cst_31 = arith.constant 0.000000e+00 : f32
    %52 = vector.broadcast %cst_31 : f32 to vector<8x128xf32>
    %53 = arith.subf %52, %51 : vector<8x128xf32>
    %54 = math.exp %53 : vector<8x128xf32>
    %cst_32 = arith.constant 1.000000e+00 : f32
    %55 = vector.broadcast %cst_32 : f32 to vector<8x128xf32>
    %56 = arith.addf %55, %54 : vector<8x128xf32>
    %57 = tpu.reciprocal %56 {approx = true} : vector<8x128xf32> -> vector<8x128xf32>
    %c0_33 = arith.constant 0 : index
    %c128 = arith.constant 128 : index
    %58 = vector.load %arg10[%c0_33, %c128] : memref<8x896xf32, #tpu.memory_space<vmem>>, vector<8x128xf32>
    tpu.vector_store %arg10[%c0_33, %c128], %57 {strides = array<i32>} : memref<8x896xf32, #tpu.memory_space<vmem>>, vector<8x128xf32>,
    %59 = vector.extract_strided_slice %34 {offsets = [0, 2048], sizes = [8, 2048], strides = [1, 1]} : vector<8x8192xbf16> to vector<8x2048xbf16>
    %cst_34 = arith.constant dense<0.000000e+00> : vector<8x128xf32>
    %60 = tpu.matmul %59, %35, %cst_34 {dimension_numbers = #tpu.dot_dimension_numbers<[1], [0], [0], [1], [0, 0, 1, 1], [], []>} : vector<8x2048xbf16>, vector<2048x128xbf16>, vector<8x128xf32> -> vector<8x128xf32>
    %61 = vector.broadcast %36 : vector<1x128xf32> to vector<8x128xf32>
    %62 = arith.addf %60, %61 : vector<8x128xf32>
    %cst_35 = arith.constant 0.000000e+00 : f32
    %63 = vector.broadcast %cst_35 : f32 to vector<8x128xf32>
    %64 = arith.subf %63, %62 : vector<8x128xf32>
    %65 = math.exp %64 : vector<8x128xf32>
    %cst_36 = arith.constant 1.000000e+00 : f32
    %66 = vector.broadcast %cst_36 : f32 to vector<8x128xf32>
    %67 = arith.addf %66, %65 : vector<8x128xf32>
    %68 = tpu.reciprocal %67 {approx = true} : vector<8x128xf32> -> vector<8x128xf32>
    %c0_37 = arith.constant 0 : index
    %c256 = arith.constant 256 : index
    %69 = vector.load %arg10[%c0_37, %c256] : memref<8x896xf32, #tpu.memory_space<vmem>>, vector<8x128xf32>
    tpu.vector_store %arg10[%c0_37, %c256], %68 {strides = array<i32>} : memref<8x896xf32, #tpu.memory_space<vmem>>, vector<8x128xf32>,
    %70 = vector.extract_strided_slice %34 {offsets = [0, 3072], sizes = [8, 2048], strides = [1, 1]} : vector<8x8192xbf16> to vector<8x2048xbf16>
    %cst_38 = arith.constant dense<0.000000e+00> : vector<8x128xf32>
    %71 = tpu.matmul %70, %35, %cst_38 {dimension_numbers = #tpu.dot_dimension_numbers<[1], [0], [0], [1], [0, 0, 1, 1], [], []>} : vector<8x2048xbf16>, vector<2048x128xbf16>, vector<8x128xf32> -> vector<8x128xf32>
    %72 = vector.broadcast %36 : vector<1x128xf32> to vector<8x128xf32>
    %73 = arith.addf %71, %72 : vector<8x128xf32>
    %cst_39 = arith.constant 0.000000e+00 : f32
    %74 = vector.broadcast %cst_39 : f32 to vector<8x128xf32>
    %75 = arith.subf %74, %73 : vector<8x128xf32>
    %76 = math.exp %75 : vector<8x128xf32>
    %cst_40 = arith.constant 1.000000e+00 : f32
    %77 = vector.broadcast %cst_40 : f32 to vector<8x128xf32>
    %78 = arith.addf %77, %76 : vector<8x128xf32>
    %79 = tpu.reciprocal %78 {approx = true} : vector<8x128xf32> -> vector<8x128xf32>
    %c0_41 = arith.constant 0 : index
    %c384 = arith.constant 384 : index
    %80 = vector.load %arg10[%c0_41, %c384] : memref<8x896xf32, #tpu.memory_space<vmem>>, vector<8x128xf32>
    tpu.vector_store %arg10[%c0_41, %c384], %79 {strides = array<i32>} : memref<8x896xf32, #tpu.memory_space<vmem>>, vector<8x128xf32>,
    %81 = vector.extract_strided_slice %34 {offsets = [0, 4096], sizes = [8, 2048], strides = [1, 1]} : vector<8x8192xbf16> to vector<8x2048xbf16>
    %cst_42 = arith.constant dense<0.000000e+00> : vector<8x128xf32>
    %82 = tpu.matmul %81, %35, %cst_42 {dimension_numbers = #tpu.dot_dimension_numbers<[1], [0], [0], [1], [0, 0, 1, 1], [], []>} : vector<8x2048xbf16>, vector<2048x128xbf16>, vector<8x128xf32> -> vector<8x128xf32>
    %83 = vector.broadcast %36 : vector<1x128xf32> to vector<8x128xf32>
    %84 = arith.addf %82, %83 : vector<8x128xf32>
    %cst_43 = arith.constant 0.000000e+00 : f32
    %85 = vector.broadcast %cst_43 : f32 to vector<8x128xf32>
    %86 = arith.subf %85, %84 : vector<8x128xf32>
    %87 = math.exp %86 : vector<8x128xf32>
    %cst_44 = arith.constant 1.000000e+00 : f32
    %88 = vector.broadcast %cst_44 : f32 to vector<8x128xf32>
    %89 = arith.addf %88, %87 : vector<8x128xf32>
    %90 = tpu.reciprocal %89 {approx = true} : vector<8x128xf32> -> vector<8x128xf32>
    %c0_45 = arith.constant 0 : index
    %c512 = arith.constant 512 : index
    %91 = vector.load %arg10[%c0_45, %c512] : memref<8x896xf32, #tpu.memory_space<vmem>>, vector<8x128xf32>
    tpu.vector_store %arg10[%c0_45, %c512], %90 {strides = array<i32>} : memref<8x896xf32, #tpu.memory_space<vmem>>, vector<8x128xf32>,
    %92 = vector.extract_strided_slice %34 {offsets = [0, 5120], sizes = [8, 2048], strides = [1, 1]} : vector<8x8192xbf16> to vector<8x2048xbf16>
    %cst_46 = arith.constant dense<0.000000e+00> : vector<8x128xf32>
    %93 = tpu.matmul %92, %35, %cst_46 {dimension_numbers = #tpu.dot_dimension_numbers<[1], [0], [0], [1], [0, 0, 1, 1], [], []>} : vector<8x2048xbf16>, vector<2048x128xbf16>, vector<8x128xf32> -> vector<8x128xf32>
    %94 = vector.broadcast %36 : vector<1x128xf32> to vector<8x128xf32>
    %95 = arith.addf %93, %94 : vector<8x128xf32>
    %cst_47 = arith.constant 0.000000e+00 : f32
    %96 = vector.broadcast %cst_47 : f32 to vector<8x128xf32>
    %97 = arith.subf %96, %95 : vector<8x128xf32>
    %98 = math.exp %97 : vector<8x128xf32>
    %cst_48 = arith.constant 1.000000e+00 : f32
    %99 = vector.broadcast %cst_48 : f32 to vector<8x128xf32>
    %100 = arith.addf %99, %98 : vector<8x128xf32>
    %101 = tpu.reciprocal %100 {approx = true} : vector<8x128xf32> -> vector<8x128xf32>
    %c0_49 = arith.constant 0 : index
    %c640 = arith.constant 640 : index
    %102 = vector.load %arg10[%c0_49, %c640] : memref<8x896xf32, #tpu.memory_space<vmem>>, vector<8x128xf32>
    tpu.vector_store %arg10[%c0_49, %c640], %101 {strides = array<i32>} : memref<8x896xf32, #tpu.memory_space<vmem>>, vector<8x128xf32>,
    %103 = vector.extract_strided_slice %34 {offsets = [0, 6144], sizes = [8, 2048], strides = [1, 1]} : vector<8x8192xbf16> to vector<8x2048xbf16>
    %cst_50 = arith.constant dense<0.000000e+00> : vector<8x128xf32>
    %104 = tpu.matmul %103, %35, %cst_50 {dimension_numbers = #tpu.dot_dimension_numbers<[1], [0], [0], [1], [0, 0, 1, 1], [], []>} : vector<8x2048xbf16>, vector<2048x128xbf16>, vector<8x128xf32> -> vector<8x128xf32>
    %105 = vector.broadcast %36 : vector<1x128xf32> to vector<8x128xf32>
    %106 = arith.addf %104, %105 : vector<8x128xf32>
    %cst_51 = arith.constant 0.000000e+00 : f32
    %107 = vector.broadcast %cst_51 : f32 to vector<8x128xf32>
    %108 = arith.subf %107, %106 : vector<8x128xf32>
    %109 = math.exp %108 : vector<8x128xf32>
    %cst_52 = arith.constant 1.000000e+00 : f32
    %110 = vector.broadcast %cst_52 : f32 to vector<8x128xf32>
    %111 = arith.addf %110, %109 : vector<8x128xf32>
    %112 = tpu.reciprocal %111 {approx = true} : vector<8x128xf32> -> vector<8x128xf32>
    %c0_53 = arith.constant 0 : index
    %c768 = arith.constant 768 : index
    %113 = vector.load %arg10[%c0_53, %c768] : memref<8x896xf32, #tpu.memory_space<vmem>>, vector<8x128xf32>
    tpu.vector_store %arg10[%c0_53, %c768], %112 {strides = array<i32>} : memref<8x896xf32, #tpu.memory_space<vmem>>, vector<8x128xf32>,
    return
  }
  func.func @transform_0(%arg0: i32) -> (i32, i32) {
    %c0_i32 = arith.constant 0 : i32
    %c0_i32_0 = arith.constant 0 : i32
    return %arg0, %c0_i32 : i32, i32
  }
  func.func @transform_1(%arg0: i32) -> (i32, i32) {
    %c0_i32 = arith.constant 0 : i32
    %c0_i32_0 = arith.constant 0 : i32
    %c0_i32_1 = arith.constant 0 : i32
    return %c0_i32, %c0_i32_0 : i32, i32
  }
  func.func @transform_2(%arg0: i32) -> (i32, i32) {
    %c0_i32 = arith.constant 0 : i32
    %c0_i32_0 = arith.constant 0 : i32
    %c0_i32_1 = arith.constant 0 : i32
    return %c0_i32, %c0_i32_0 : i32, i32
  }
  func.func @transform_3(%arg0: i32) -> (i32, i32) {
    %c0_i32 = arith.constant 0 : i32
    %c0_i32_0 = arith.constant 0 : i32
    %c0_i32_1 = arith.constant 0 : i32
    return %c0_i32, %c0_i32_0 : i32, i32
  }
  func.func @transform_4(%arg0: i32) -> (i32, i32) {
    %c0_i32 = arith.constant 0 : i32
    %c0_i32_0 = arith.constant 0 : i32
    %c0_i32_1 = arith.constant 0 : i32
    return %c0_i32, %c0_i32_0 : i32, i32
  }
  func.func @transform_5(%arg0: i32) -> (i32, i32) {
    %c0_i32 = arith.constant 0 : i32
    %c0_i32_0 = arith.constant 0 : i32
    %c0_i32_1 = arith.constant 0 : i32
    return %c0_i32, %c0_i32_0 : i32, i32
  }
  func.func @transform_6(%arg0: i32) -> (i32, i32) {
    %c0_i32 = arith.constant 0 : i32
    %c0_i32_0 = arith.constant 0 : i32
    %c0_i32_1 = arith.constant 0 : i32
    return %c0_i32, %c0_i32_0 : i32, i32
  }
  func.func @transform_7(%arg0: i32) -> (i32, i32) {
    %c0_i32 = arith.constant 0 : i32
    %c0_i32_0 = arith.constant 0 : i32
    %c0_i32_1 = arith.constant 0 : i32
    return %c0_i32, %c0_i32_0 : i32, i32
  }
  func.func @transform_8(%arg0: i32) -> (i32, i32) {
    %c0_i32 = arith.constant 0 : i32
    %c0_i32_0 = arith.constant 0 : i32
    %c0_i32_1 = arith.constant 0 : i32
    return %c0_i32, %c0_i32_0 : i32, i32
  }
  func.func @transform_9(%arg0: i32) -> (i32, i32) {
    %c0_i32 = arith.constant 0 : i32
    %c0_i32_0 = arith.constant 0 : i32
    return %arg0, %c0_i32 : i32, i32
  }
}

</mosaic_0001>

<bundles_post_ra>
// kernel: generator_forward.1
= control target key start
LH: loop header
LB: loop body
LE: loop exit
PB: predicated region body
PF: predicated region fallthrough
CT: control target
= control target key end

     0   :  { %14 = vsyncpa [#allocation3], 0  ;;  %s17154_s0 = inlined_call_operand.vmem [shape: f32[8,32], index: 0, kind: input, shape index: {}]   ;;  %s17155_s1 = inlined_call_operand.hbm [shape: bf16[32,128], index: 1, kind: input, shape index: {}]   ;;  %s17156_s2 = inlined_call_operand.hbm [shape: f32[1,128], index: 2, kind: input, shape index: {}]   ;;  %s17157_s3 = inlined_call_operand.hbm [shape: bf16[128,256], index: 3, kind: input, shape index: {}]   ;;  %s17158_s4 = inlined_call_operand.hbm [shape: f32[1,256], index: 4, kind: input, shape index: {}]   ;;  %s17159_s5 = inlined_call_operand.hbm [shape: bf16[256,8192], index: 5, kind: input, shape index: {}]   ;;  %s17160_s6 = inlined_call_operand.hbm [shape: f32[1,8192], index: 6, kind: input, shape index: {}]   ;;  %s17161_s7 = inlined_call_operand.hbm [shape: bf16[2048,128], index: 7, kind: input, shape index: {}]   ;;  %s17162_s8 = inlined_call_operand.hbm [shape: f32[1,128], index: 8, kind: input, shape index: {}]   ;;  %s17163_s9 = inlined_call_operand.vmem [shape: f32[8,896], index: 9, kind: output, shape index: {}]  }
   0x1   :  { %15 = vsyncpa [#allocation5], 0 }
   0x2   :  { %16 = vsyncpa [#allocation8], 0 }
   0x3   :  { %17 = vsyncpa [#allocation11], 0 }
   0x4   :  { %18 = vsyncpa [#allocation14], 0  ;;  %s14793_s30 = smov [#allocation4]   ;;  %s14794_s11 = smov [#allocation7]  }
   0x5   :  { %s39_s10 = sshll.u32 %s14793_s30, 4  ;;  %s61_s12 = sshll.u32 %s14794_s11, 4  ;;  %s40_s10 = int_to_ptr.vmem [resolvable:$true] %s39_s10  ;;  %s62_s12 = int_to_ptr.vmem [resolvable:$true] %s61_s12 }
   0x6   :  { %s14607_s15 = scalar_lea.hbm %s17156_s2, 16 }
   0x7   :  { %p14608_p0 = scmp.ne.s32.totalorder %s17156_s2, %s14607_s15  ;;  %p14611_p1 = scmp.lt.u32.totalorder %s14607_s15, %s17156_s2 }
   0x9   :  { %p14613_p2 = pnand %p14611_p1, %p14608_p0 }
   0xb   :  { %14616 = shalt.err (!%p14613_p2)
}
   0xc   :  { %s14617_s20 = scalar_lea.vmem %s40_s10, 16  ;;  %s14621_s21 = scalar_lea.vmem %s40_s10, 32 }
   0xd   :  { %p14618_p3 = scmp.ne.s32.totalorder %s40_s10, %s14617_s20  ;;  %p14622_p4 = scmp.lt.s32.totalorder %s40_s10, %s40_s10 }
   0xe   :  { %p14623_p5 = scmp.lt.s32.totalorder %s14621_s21, %s14617_s20 }
  0x10   :  { %p14624_p6 = por %p14623_p5, %p14622_p4 }
  0x12   :  { %p14625_p7 = pnand %p14624_p6, %p14618_p3 }
  0x14   :  { %14628 = shalt.err (!%p14625_p7)
}
  0x15   :  { %42 = dma.hbm_to_vmem [thread:$0]  %s17156_s2, 16, %s40_s10, [#allocation5]  }
  0x16   :  { %s14629_s26 = scalar_lea.hbm %s17158_s4, 32 }
  0x17   :  { %p14630_p8 = scmp.ne.s32.totalorder %s17158_s4, %s14629_s26  ;;  %p14633_p9 = scmp.lt.u32.totalorder %s14629_s26, %s17158_s4 }
  0x19   :  { %p14635_p10 = pnand %p14633_p9, %p14630_p8 }
  0x1b   :  { %14638 = shalt.err (!%p14635_p10)
}
  0x1c   :  { %s14639_s11 = scalar_lea.vmem %s62_s12, 32  ;;  %p14644_p12 = scmp.lt.s32.totalorder %s62_s12, %s62_s12 }
  0x1d   :  { %p14640_p11 = scmp.ne.s32.totalorder %s62_s12, %s14639_s11  ;;  %p14645_p13 = scmp.lt.s32.totalorder %s14639_s11, %s14639_s11 }
  0x1f   :  { %p14646_p0 = por %p14645_p13, %p14644_p12 }
  0x21   :  { %p14647_p1 = pnand %p14646_p0, %p14640_p11 }
  0x23   :  { %14650 = shalt.err (!%p14647_p1)
}
  0x24   :  { %64 = dma.hbm_to_vmem [thread:$0]  %s17158_s4, 32, %s62_s12, [#allocation8]  }
  0x25   :  { %s14795_s13 = smov [#allocation10]   ;;  %s14796_s15 = smov [#allocation2]  }
  0x26   :  { %s83_s14 = sshll.u32 %s14795_s13, 4  ;;  %s26_s16 = sshll.u32 %s14796_s15, 4  ;;  %s84_s14 = int_to_ptr.vmem [resolvable:$true] %s83_s14  ;;  %s14884_s16 = int_to_ptr.vmem [resolvable:$true] %s26_s16 }
  0x27   :  { %s14651_s19 = scalar_lea.hbm %s17160_s6, 1024 }
  0x28   :  { %p14652_p2 = scmp.ne.s32.totalorder %s17160_s6, %s14651_s19  ;;  %p14655_p3 = scmp.lt.u32.totalorder %s14651_s19, %s17160_s6 }
  0x2a   :  { %p14657_p4 = pnand %p14655_p3, %p14652_p2 }
  0x2c   :  { %14660 = shalt.err (!%p14657_p4)
}
  0x2d   :  { %s14661_s4 = scalar_lea.vmem %s84_s14, 1024  ;;  %p14666_p6 = scmp.lt.s32.totalorder %s84_s14, %s84_s14 }
  0x2e   :  { %p14662_p5 = scmp.ne.s32.totalorder %s84_s14, %s14661_s4  ;;  %p14667_p7 = scmp.lt.s32.totalorder %s14661_s4, %s14661_s4 }
  0x30   :  { %p14668_p8 = por %p14667_p7, %p14666_p6 }
  0x32   :  { %p14669_p9 = pnand %p14668_p8, %p14662_p5 }
  0x34   :  { %14672 = shalt.err (!%p14669_p9)
}
  0x35   :  { %86 = dma.hbm_to_vmem [thread:$0]  %s17160_s6, 1024, %s84_s14, [#allocation11]  }
  0x36   :  { %s14673_s27 = scalar_lea.hbm %s17155_s1, 256 }
  0x37   :  { %p14674_p10 = scmp.ne.s32.totalorder %s17155_s1, %s14673_s27  ;;  %p14677_p11 = scmp.lt.u32.totalorder %s14673_s27, %s17155_s1 }
  0x39   :  { %p14679_p12 = pnand %p14677_p11, %p14674_p10 }
  0x3b   :  { %14682 = shalt.err (!%p14679_p12)
}
  0x3c   :  { %s14683_s2 = scalar_lea.vmem %s14884_s16, 256  ;;  %p14688_p0 = scmp.lt.s32.totalorder %s14884_s16, %s14884_s16 }
  0x3d   :  { %p14684_p13 = scmp.ne.s32.totalorder %s14884_s16, %s14683_s2  ;;  %p14689_p1 = scmp.lt.s32.totalorder %s14683_s2, %s14683_s2 }
  0x3f   :  { %p14690_p2 = por %p14689_p1, %p14688_p0 }
  0x41   :  { %p14691_p3 = pnand %p14690_p2, %p14684_p13 }
  0x43   :  { %14694 = shalt.err (!%p14691_p3)
}
  0x44   :  { %s14797_s6 = smov 64   ;;  %s14798_s10 = smov 4  }
  0x45   :  { %32 = dma.hbm_to_vmem [thread:$0]  %s17155_s1, 256, %s14884_s16, [#allocation3], %s14797_s6, %s14797_s6, %s14798_s10  }
  0x46   :  { %s14799_s15 = smov [#allocation6]   ;;  %s14695_s20 = scalar_lea.hbm %s17157_s3, 2048 }
  0x47   :  { %s48_s17 = sshll.u32 %s14799_s15, 4  ;;  %p14696_p4 = scmp.ne.s32.totalorder %s17157_s3, %s14695_s20  ;;  %s49_s17 = int_to_ptr.vmem [resolvable:$true] %s48_s17 }
  0x48   :  { %p14699_p5 = scmp.lt.u32.totalorder %s14695_s20, %s17157_s3 }
  0x4a   :  { %p14701_p6 = pnand %p14699_p5, %p14696_p4 }
  0x4c   :  { %14704 = shalt.err (!%p14701_p6)
}
  0x4d   :  { %s14705_s12 = scalar_lea.vmem %s49_s17, 2048  ;;  %p14710_p8 = scmp.lt.s32.totalorder %s49_s17, %s49_s17 }
  0x4e   :  { %p14706_p7 = scmp.ne.s32.totalorder %s49_s17, %s14705_s12  ;;  %p14711_p9 = scmp.lt.s32.totalorder %s14705_s12, %s14705_s12 }
  0x50   :  { %p14712_p10 = por %p14711_p9, %p14710_p8 }
  0x52   :  { %p14713_p11 = pnand %p14712_p10, %p14706_p7 }
  0x54   :  { %14716 = shalt.err (!%p14713_p11)
}
  0x55   :  { %s14800_s1 = smov 128   ;;  %s14801_s16 = smov 8  }
  0x56   :  { %54 = dma.hbm_to_vmem [thread:$0]  %s17157_s3, 2048, %s49_s17, [#allocation5], %s14800_s1, %s14800_s1, %s14801_s16  }
  0x57   :  { %s14802_s26 = smov [#allocation9]   ;;  %s14717_s30 = scalar_lea.hbm %s17159_s5, 131072 }
  0x58   :  { %s70_s27 = sshll.u32 %s14802_s26, 4  ;;  %p14718_p12 = scmp.ne.s32.totalorder %s17159_s5, %s14717_s30  ;;  %s71_s27 = int_to_ptr.vmem [resolvable:$true] %s70_s27 }
  0x59   :  { %p14721_p13 = scmp.lt.u32.totalorder %s14717_s30, %s17159_s5 }
  0x5b   :  { %p14723_p0 = pnand %p14721_p13, %p14718_p12 }
  0x5d   :  { %14726 = shalt.err (!%p14723_p0)
}
  0x5e   :  { %s14727_s15 = scalar_lea.vmem %s71_s27, 131072  ;;  %p14732_p2 = scmp.lt.s32.totalorder %s71_s27, %s71_s27 }
  0x5f   :  { %p14728_p1 = scmp.ne.s32.totalorder %s71_s27, %s14727_s15  ;;  %p14733_p3 = scmp.lt.s32.totalorder %s14727_s15, %s14727_s15 }
  0x61   :  { %p14734_p4 = por %p14733_p3, %p14732_p2 }
  0x63   :  { %p14735_p5 = pnand %p14734_p4, %p14728_p1 }
  0x65   :  { %14738 = shalt.err (!%p14735_p5)
}
  0x66   :  { %s14803_s3 = smov 4096   ;;  %s14804_s17 = smov 256  }
  0x67   :  { %76 = dma.hbm_to_vmem [thread:$0]  %s17159_s5, 131072, %s71_s27, [#allocation8], %s14803_s3, %s14803_s3, %s14804_s17  }
  0x68   :  { %s14805_s20 = smov [#allocation12]   ;;  %s14806_s22 = smov [#allocation13]  }
  0x69   :  { %s92_s21 = sshll.u32 %s14805_s20, 4  ;;  %s105_s23 = sshll.u32 %s14806_s22, 4  ;;  %s93_s21 = int_to_ptr.vmem [resolvable:$true] %s92_s21  ;;  %s106_s23 = int_to_ptr.vmem [resolvable:$true] %s105_s23 }
  0x6a   :  { %s14739_s1 = scalar_lea.hbm %s17161_s7, 16384 }
  0x6b   :  { %p14740_p6 = scmp.ne.s32.totalorder %s17161_s7, %s14739_s1  ;;  %p14743_p7 = scmp.lt.u32.totalorder %s14739_s1, %s17161_s7 }
  0x6d   :  { %p14745_p8 = pnand %p14743_p7, %p14740_p6 }
  0x6f   :  { %14748 = shalt.err (!%p14745_p8)
}
  0x70   :  { %s14749_s5 = scalar_lea.vmem %s93_s21, 16384  ;;  %p14754_p10 = scmp.lt.s32.totalorder %s93_s21, %s93_s21 }
  0x71   :  { %p14750_p9 = scmp.ne.s32.totalorder %s93_s21, %s14749_s5  ;;  %p14755_p11 = scmp.lt.s32.totalorder %s14749_s5, %s14749_s5 }
  0x73   :  { %p14756_p12 = por %p14755_p11, %p14754_p10 }
  0x75   :  { %p14757_p13 = pnand %p14756_p12, %p14750_p9 }
  0x77   :  { %14760 = shalt.err (!%p14757_p13)
}
  0x78   :  { %98 = dma.hbm_to_vmem [thread:$0]  %s17161_s7, 16384, %s93_s21, [#allocation11], %s14797_s6, %s14797_s6, %s14798_s10  }
  0x79   :  { %s14761_s11 = scalar_lea.hbm %s17162_s8, 16 }
  0x7a   :  { %p14762_p0 = scmp.ne.s32.totalorder %s17162_s8, %s14761_s11  ;;  %p14765_p1 = scmp.lt.u32.totalorder %s14761_s11, %s17162_s8 }
  0x7c   :  { %p14767_p2 = pnand %p14765_p1, %p14762_p0 }
  0x7e   :  { %14770 = shalt.err (!%p14767_p2)
}
  0x7f   :  { %s14771_s3 = scalar_lea.vmem %s106_s23, 16  ;;  %s14775_s17 = scalar_lea.vmem %s106_s23, 32 }
  0x80   :  { %p14772_p3 = scmp.ne.s32.totalorder %s106_s23, %s14771_s3  ;;  %p14776_p4 = scmp.lt.s32.totalorder %s106_s23, %s106_s23 }
  0x81   :  { %p14777_p5 = scmp.lt.s32.totalorder %s14775_s17, %s14771_s3 }
  0x83   :  { %p14778_p6 = por %p14777_p5, %p14776_p4 }
  0x85   :  { %p14779_p7 = pnand %p14778_p6, %p14772_p3 }
  0x87   :  { %14782 = shalt.err (!%p14779_p7)
}
  0x88   :  { %108 = dma.hbm_to_vmem [thread:$0]  %s17162_s8, 16, %s106_s23, [#allocation14]  }
  0x89   :  { %14783 = dma.done.wait [#allocation3], 256  }
  0x8a   :  { %14784 = vsyncadd [#allocation3], 4294967040 }
  0x8b   :  { %14785 = dma.done.wait [#allocation5], 2064  }
  0x8c   :  { %14786 = vsyncadd [#allocation5], 4294965232 }
  0x8d   :  { %14787 = dma.done.wait [#allocation8], 131104  }
  0x8e   :  { %14788 = vsyncadd [#allocation8], 4294836192 }
  0x8f   :  { %14789 = dma.done.wait [#allocation11], 17408  }
  0x90   :  { %14790 = vsyncadd [#allocation11], 4294949888 }
  0x91   :  { %14791 = dma.done.wait [#allocation14], 16  }
  0x92   :  { %14792 = vsyncadd [#allocation14], 4294967280  ;;  %v14807_v0 = vmov 0.0   ;;  %vm14808_vm0 = vmmov 0   ;;  %v14167_v1 = vld [vmem:[#allocation2] sm:$0xff]   ;;  %v14168_v2 = vld [vmem:[#allocation2 + $0x8] sm:$0xff]  }
  0x93   :  { %14142 = vmatprep.subr.bf16.mxu0 %v14807_v0  ;;  %14146 = vmatprep.mubr.msk.bf16.mxu0 %vm14808_vm0, %v14807_v0  ;;  %v134_v3 = vld [vmem:[%s17154_s0] sm:$0xff]  ;;  %v14171_v5 = vld [vmem:[#allocation6] ss:$8 sps:$4 sm:$0xff]   ;;  %vm159_vm1 = vcmask 261120   ;;  %v14809_v21 = vmov 0  }
  0x94   :  { %14143 = vmatpush3.bf16.msra.mxu0 %v14167_v1  ;;  %v14169_v4 = vld [vmem:[#allocation6 + $0x4] ss:$8 sps:$4 sm:$0xff]   ;;  %v14172_v6 = vld [vmem:[#allocation6 + $0x14] ss:$8 sps:$4 sm:$0xff]   ;;  %v135_v7 = vpack.c.bf16 %v134_v3, %v134_v3  ;;  %v14174_v8 = vld [vmem:[#allocation6 + $0x10] ss:$8 sps:$4 sm:$0xff]   ;;  %347 = vmatprep.mubr.bf16.mxu1 %v14809_v21 }
  0x95   :  { %14144 = vmatprep.subr.bf16.mxu0 %v14807_v0  ;;  %315 = vmatprep.subr.bf16.mxu1 %v14169_v4  ;;  %v14175_v9 = vld [vmem:[#allocation6 + $0x24] ss:$8 sps:$4 sm:$0xff]   ;;  %v14177_v10 = vld [vmem:[#allocation6 + $0x20] ss:$8 sps:$4 sm:$0xff]   ;;  %v14178_v11 = vld [vmem:[#allocation6 + $0x34] ss:$8 sps:$4 sm:$0xff]  }
  0x96   :  { %316 = vmatpush1.bf16.msra.mxu1 %v14171_v5  ;;  %v14180_v12 = vld [vmem:[#allocation6 + $0x30] ss:$8 sps:$4 sm:$0xff]   ;;  %v14181_v13 = vld [vmem:[#allocation6 + $0x44] ss:$8 sps:$4 sm:$0xff]   ;;  %v14183_v14 = vld [vmem:[#allocation6 + $0x40] ss:$8 sps:$4 sm:$0xff]  }
  0x97   :  { %317 = vmatprep.subr.bf16.mxu1 %v14172_v6  ;;  %v14184_v15 = vld [vmem:[#allocation6 + $0x54] ss:$8 sps:$4 sm:$0xff]   ;;  %v14186_v16 = vld [vmem:[#allocation6 + $0x50] ss:$8 sps:$4 sm:$0xff]   ;;  %v14187_v17 = vld [vmem:[#allocation6 + $0x64] ss:$8 sps:$4 sm:$0xff]  }
  0x98   :  { %14145 = vmatpush3.bf16.msra.mxu0 %v14168_v2  ;;  %v14189_v18 = vld [vmem:[#allocation6 + $0x60] ss:$8 sps:$4 sm:$0xff]   ;;  %v14190_v19 = vld [vmem:[#allocation6 + $0x74] ss:$8 sps:$4 sm:$0xff]   ;;  %v14192_v20 = vld [vmem:[#allocation6 + $0x70] ss:$8 sps:$4 sm:$0xff]  }
  0x99   :  { %v364_v22 = vld [vmem:[#allocation9] sm:$0xff]  ;;  %v14972_v24 = vld [vmem:[#allocation9 + $0x8] sm:$0xff] }
  0x9a   :  { %318 = vmatpush1.bf16.msra.mxu1 %v14174_v8  ;;  %v396_v23 = vld [vmem:[#allocation9 + $0x100] sm:$0xff]  ;;  %v14974_v27 = vld [vmem:[#allocation9 + $0x108] sm:$0xff] }
  0x9b   :  { %14147 = vmatmul.mubr.msk.bf16.vlgmr.msra.gmra.mrb[0].mxu0 %vm159_vm1, %v135_v7  ;;  %319 = vmatprep.subr.bf16.mxu1 %v14175_v9  ;;  %v11754_v25 = vcombine.low %v364_v22, %v396_v23  ;;  %v11755_v26 = vcombine.high %v364_v22, %v396_v23  ;;  %v428_v28 = vld [vmem:[#allocation9 + $0x200] sm:$0xff]  ;;  %v11756_v30 = vcombine.low %v14972_v24, %v14974_v27 }
  0x9c   :  { %v460_v29 = vld [vmem:[#allocation9 + $0x300] sm:$0xff]  ;;  %v11757_v31 = vcombine.high %v14972_v24, %v14974_v27 }
  0x9d   :  { %v11819_v32 = vcombine.high %v428_v28, %v460_v29  ;;  %6844 = vmatprep.subr.bf16.mxu0 %v11755_v26  ;;  %v11818_v33 = vcombine.low %v428_v28, %v460_v29  ;;  %v492_v34 = vld [vmem:[#allocation9 + $0x400] sm:$0xff]  ;;  %v429_v26 = vld [vmem:[#allocation9 + $0x208] sm:$0xff] }
  0x9e   :  { %320 = vmatpush1.bf16.msra.mxu1 %v14177_v10  ;;  %6845 = vmatpush1.bf16.msra.mxu0 %v11754_v25  ;;  %v524_v35 = vld [vmem:[#allocation9 + $0x500] sm:$0xff]  ;;  %v461_v28 = vld [vmem:[#allocation9 + $0x308] sm:$0xff] }
  0x9f   :  { %321 = vmatprep.subr.bf16.mxu1 %v14178_v11  ;;  %6846 = vmatprep.subr.bf16.mxu0 %v11819_v32  ;;  %v11883_v36 = vcombine.high %v492_v34, %v524_v35  ;;  %v11882_v37 = vcombine.low %v492_v34, %v524_v35  ;;  %v556_v38 = vld [vmem:[#allocation9 + $0x600] sm:$0xff]  ;;  %v11821_v32 = vcombine.high %v429_v26, %v461_v28  ;;  %v525_v34 = vld [vmem:[#allocation9 + $0x508] sm:$0xff] }
  0xa0   :  { %v588_v39 = vld [vmem:[#allocation9 + $0x700] sm:$0xff]  ;;  %v11820_v35 = vcombine.low %v429_v26, %v461_v28  ;;  %v1325_v26 = vld [vmem:[#allocation9 + $0x1e08] sm:$0xff] }
  0xa1   :  { %v11947_v40 = vcombine.high %v556_v38, %v588_v39  ;;  %v11946_v41 = vcombine.low %v556_v38, %v588_v39  ;;  %v620_v42 = vld [vmem:[#allocation9 + $0x800] sm:$0xff]  ;;  %v589_v38 = vld [vmem:[#allocation9 + $0x708] sm:$0xff] }
  0xa2   :  { %322 = vmatpush1.bf16.msra.mxu1 %v14180_v12  ;;  %6847 = vmatpush1.bf16.msra.mxu0 %v11818_v33  ;;  %v652_v43 = vld [vmem:[#allocation9 + $0x900] sm:$0xff]  ;;  %v493_v33 = vld [vmem:[#allocation9 + $0x408] sm:$0xff] }
  0xa3   :  { %323 = vmatprep.subr.bf16.mxu1 %v14181_v13  ;;  %6848 = vmatprep.subr.bf16.mxu0 %v11883_v36  ;;  %v12011_v44 = vcombine.high %v620_v42, %v652_v43  ;;  %v12010_v45 = vcombine.low %v620_v42, %v652_v43  ;;  %v684_v46 = vld [vmem:[#allocation9 + $0xa00] sm:$0xff]  ;;  %v11885_v36 = vcombine.high %v493_v33, %v525_v34  ;;  %v653_v42 = vld [vmem:[#allocation9 + $0x908] sm:$0xff] }
  0xa4   :  { %v716_v47 = vld [vmem:[#allocation9 + $0xb00] sm:$0xff]  ;;  %v11884_v39 = vcombine.low %v493_v33, %v525_v34  ;;  %v366_v34 = vld [vmem:[#allocation9 + $0x10] sm:$0xff] }
  0xa5   :  { %v12075_v48 = vcombine.high %v684_v46, %v716_v47  ;;  %v12074_v49 = vcombine.low %v684_v46, %v716_v47  ;;  %v748_v50 = vld [vmem:[#allocation9 + $0xc00] sm:$0xff]  ;;  %v717_v46 = vld [vmem:[#allocation9 + $0xb08] sm:$0xff] }
  0xa6   :  { %324 = vmatpush1.bf16.msra.mxu1 %v14183_v14  ;;  %6849 = vmatpush1.bf16.msra.mxu0 %v11882_v37  ;;  %v780_v51 = vld [vmem:[#allocation9 + $0xd00] sm:$0xff]  ;;  %v557_v37 = vld [vmem:[#allocation9 + $0x608] sm:$0xff] }
  0xa7   :  { %325 = vmatprep.subr.bf16.mxu1 %v14184_v15  ;;  %6850 = vmatprep.subr.bf16.mxu0 %v11947_v40  ;;  %v12139_v52 = vcombine.high %v748_v50, %v780_v51  ;;  %v12138_v53 = vcombine.low %v748_v50, %v780_v51  ;;  %v812_v54 = vld [vmem:[#allocation9 + $0xe00] sm:$0xff]  ;;  %v11949_v40 = vcombine.high %v557_v37, %v589_v38  ;;  %v781_v47 = vld [vmem:[#allocation9 + $0xd08] sm:$0xff] }
  0xa8   :  { %v844_v55 = vld [vmem:[#allocation9 + $0xf00] sm:$0xff]  ;;  %v11948_v43 = vcombine.low %v557_v37, %v589_v38  ;;  %v813_v50 = vld [vmem:[#allocation9 + $0xe08] sm:$0xff]  ;;  %v399_v38 = vld [vmem:[#allocation9 + $0x118] sm:$0xff] }
  0xa9   :  { %v12203_v56 = vcombine.high %v812_v54, %v844_v55  ;;  %v12202_v57 = vcombine.low %v812_v54, %v844_v55  ;;  %v876_v58 = vld [vmem:[#allocation9 + $0x1000] sm:$0xff]  ;;  %v845_v51 = vld [vmem:[#allocation9 + $0xf08] sm:$0xff] }
  0xaa   :  { %326 = vmatpush1.bf16.msra.mxu1 %v14186_v16  ;;  %6851 = vmatpush1.bf16.msra.mxu0 %v11946_v41  ;;  %v908_v59 = vld [vmem:[#allocation9 + $0x1100] sm:$0xff]  ;;  %v621_v41 = vld [vmem:[#allocation9 + $0x808] sm:$0xff] }
  0xab   :  { %327 = vmatprep.subr.bf16.mxu1 %v14187_v17  ;;  %6852 = vmatprep.subr.bf16.mxu0 %v12011_v44  ;;  %v12267_v60 = vcombine.high %v876_v58, %v908_v59  ;;  %v12266_v61 = vcombine.low %v876_v58, %v908_v59  ;;  %v940_v62 = vld [vmem:[#allocation9 + $0x1200] sm:$0xff]  ;;  %v12013_v44 = vcombine.high %v621_v41, %v653_v42  ;;  %v877_v54 = vld [vmem:[#allocation9 + $0x1008] sm:$0xff] }
  0xac   :  { %v972_v63 = vld [vmem:[#allocation9 + $0x1300] sm:$0xff]  ;;  %v12012_v24 = vcombine.low %v621_v41, %v653_v42  ;;  %v909_v55 = vld [vmem:[#allocation9 + $0x1108] sm:$0xff]  ;;  %v225_v42 = vlaneseq }
  0xad   :  { %v12331_v0 = vcombine.high %v940_v62, %v972_v63  ;;  %v12330_v1 = vcombine.low %v940_v62, %v972_v63  ;;  %v1004_v2 = vld [vmem:[#allocation9 + $0x1400] sm:$0xff]  ;;  %v941_v58 = vld [vmem:[#allocation9 + $0x1208] sm:$0xff] }
  0xae   :  { %328 = vmatpush1.bf16.msra.mxu1 %v14189_v18  ;;  %6853 = vmatpush1.bf16.msra.mxu0 %v12010_v45  ;;  %v1036_v3 = vld [vmem:[#allocation9 + $0x1500] sm:$0xff]  ;;  %v11734_v18 = vld [vmem:[#allocation4] ss:$0 sm:$0xff]  ;;  %v685_v45 = vld [vmem:[#allocation9 + $0xa08] sm:$0xff] }
  0xaf   :  { %329 = vmatprep.subr.bf16.mxu1 %v14190_v19  ;;  %6854 = vmatprep.subr.bf16.mxu0 %v12075_v48  ;;  %v12395_v4 = vcombine.high %v1004_v2, %v1036_v3  ;;  %v12394_v5 = vcombine.low %v1004_v2, %v1036_v3  ;;  %v1068_v6 = vld [vmem:[#allocation9 + $0x1600] sm:$0xff]  ;;  %v12077_v27 = vcombine.high %v685_v45, %v717_v46  ;;  %v973_v59 = vld [vmem:[#allocation9 + $0x1308] sm:$0xff] }
  0xb0   :  { %v1100_v7 = vld [vmem:[#allocation9 + $0x1700] sm:$0xff]  ;;  %v12076_v48 = vcombine.low %v685_v45, %v717_v46  ;;  %v1005_v62 = vld [vmem:[#allocation9 + $0x1408] sm:$0xff]  ;;  %v223_v45 = vld [vmem:[#allocation7] sm:$0x3] }
  0xb1   :  { %v12459_v8 = vcombine.high %v1068_v6, %v1100_v7  ;;  %v12458_v9 = vcombine.low %v1068_v6, %v1100_v7  ;;  %v1132_v10 = vld [vmem:[#allocation9 + $0x1800] sm:$0xff]  ;;  %v1037_v63 = vld [vmem:[#allocation9 + $0x1508] sm:$0xff] }
  0xb2   :  { %330 = vmatpush1.bf16.msra.mxu1 %v14192_v20  ;;  %6855 = vmatpush1.bf16.msra.mxu0 %v12074_v49  ;;  %v1164_v11 = vld [vmem:[#allocation9 + $0x1900] sm:$0xff]  ;;  %v1069_v2 = vld [vmem:[#allocation9 + $0x1608] sm:$0xff] }
  0xb3   :  { %6885 = vmatprep.subr.bf16.mxu1 %v11757_v31  ;;  %6856 = vmatprep.subr.bf16.mxu0 %v12139_v52  ;;  %v12523_v12 = vcombine.high %v1132_v10, %v1164_v11  ;;  %v12522_v13 = vcombine.low %v1132_v10, %v1164_v11  ;;  %v1196_v14 = vld [vmem:[#allocation9 + $0x1a00] sm:$0xff]  ;;  %v1101_v3 = vld [vmem:[#allocation9 + $0x1708] sm:$0xff] }
  0xb4   :  { %v1228_v15 = vld [vmem:[#allocation9 + $0x1b00] sm:$0xff]  ;;  %v1133_v6 = vld [vmem:[#allocation9 + $0x1808] sm:$0xff] }
  0xb5   :  { %v12587_v16 = vcombine.high %v1196_v14, %v1228_v15  ;;  %v12586_v17 = vcombine.low %v1196_v14, %v1228_v15  ;;  %v1165_v7 = vld [vmem:[#allocation9 + $0x1908] sm:$0xff]  ;;  %v1260_v15 = vld [vmem:[#allocation9 + $0x1c00] sm:$0xff] }
  0xb6   :  { %6857 = vmatpush1.bf16.msra.mxu0 %v12138_v53  ;;  %v12205_v53 = vcombine.high %v813_v50, %v845_v51  ;;  %v1197_v10 = vld [vmem:[#allocation9 + $0x1a08] sm:$0xff] }
  0xb7   :  { %6858 = vmatprep.subr.bf16.mxu0 %v12203_v56  ;;  %v12204_v56 = vcombine.low %v813_v50, %v845_v51  ;;  %v1229_v11 = vld [vmem:[#allocation9 + $0x1b08] sm:$0xff] }
  0xb8   :  { %v12588_v14 = vcombine.low %v1197_v10, %v1229_v11 }
  0xba   :  { %6859 = vmatpush1.bf16.msra.mxu0 %v12202_v57  ;;  %v12269_v57 = vcombine.high %v877_v54, %v909_v55 }
  0xbb   :  { %6860 = vmatprep.subr.bf16.mxu0 %v12267_v60  ;;  %v12268_v60 = vcombine.low %v877_v54, %v909_v55  ;;  %v430_v55 = vld [vmem:[#allocation9 + $0x210] sm:$0xff] }
  0xbe   :  { %6861 = vmatpush1.bf16.msra.mxu0 %v12266_v61  ;;  %v12333_v61 = vcombine.high %v941_v58, %v973_v59 }
  0xbf   :  { %6862 = vmatprep.subr.bf16.mxu0 %v12331_v0  ;;  %v12332_v0 = vcombine.low %v941_v58, %v973_v59  ;;  %v431_v58 = vld [vmem:[#allocation9 + $0x218] sm:$0xff] }
  0xc0   :  { %v463_v59 = vld [vmem:[#allocation9 + $0x318] sm:$0xff] }
  0xc2   :  { %6863 = vmatpush1.bf16.msra.mxu0 %v12330_v1  ;;  %v12397_v1 = vcombine.high %v1005_v62, %v1037_v63 }
  0xc3   :  { %6864 = vmatprep.subr.bf16.mxu0 %v12395_v4  ;;  %v12396_v4 = vcombine.low %v1005_v62, %v1037_v63  ;;  %v494_v62 = vld [vmem:[#allocation9 + $0x410] sm:$0xff] }
  0xc6   :  { %6865 = vmatpush1.bf16.msra.mxu0 %v12394_v5  ;;  %v12461_v5 = vcombine.high %v1069_v2, %v1101_v3 }
  0xc7   :  { %6866 = vmatprep.subr.bf16.mxu0 %v12459_v8  ;;  %v12460_v8 = vcombine.low %v1069_v2, %v1101_v3  ;;  %v495_v2 = vld [vmem:[#allocation9 + $0x418] sm:$0xff] }
  0xc8   :  { %v527_v3 = vld [vmem:[#allocation9 + $0x518] sm:$0xff] }
  0xca   :  { %6867 = vmatpush1.bf16.msra.mxu0 %v12458_v9  ;;  %v12525_v9 = vcombine.high %v1133_v6, %v1165_v7 }
  0xcb   :  { %6868 = vmatprep.subr.bf16.mxu0 %v12523_v12  ;;  %v12524_v12 = vcombine.low %v1133_v6, %v1165_v7  ;;  %v11889_v7 = vcombine.high %v495_v2, %v527_v3 }
  0xce   :  { %6869 = vmatpush1.bf16.msra.mxu0 %v12522_v13  ;;  %v12589_v13 = vcombine.high %v1197_v10, %v1229_v11  ;;  %v559_v10 = vld [vmem:[#allocation9 + $0x618] sm:$0xff] }
  0xcf   :  { %6870 = vmatprep.subr.bf16.mxu0 %v12587_v16  ;;  %v1292_v16 = vld [vmem:[#allocation9 + $0x1d00] sm:$0xff]  ;;  %v591_v11 = vld [vmem:[#allocation9 + $0x718] sm:$0xff] }
  0xd2   :  { %6871 = vmatpush1.bf16.msra.mxu0 %v12586_v17  ;;  %v1261_v17 = vld [vmem:[#allocation9 + $0x1c08] sm:$0xff] }
 0x16e   :  { %v197_v19 = vpop.f32.mrb[0].mxu0 }
 0x16f   :  { %v198_v20 = vadd.f32 %v11734_v18, %v197_v19  ;;  %v14148_v21 = vpop.f32.mrb[1].mxu0  ;;  %v12651_v18 = vcombine.high %v1260_v15, %v1292_v16  ;;  %v1293_v19 = vld [vmem:[#allocation9 + $0x1d08] sm:$0xff] }
 0x170   :  { %v200_v22 = vpop.f32.mrb[2].mxu0  ;;  %v12652_v21 = vcombine.low %v1261_v17, %v1293_v19 }
 0x171   :  { %vm203_vm2 = vcmp.gt.f32.partialorder %v198_v20, 0.0  ;;  %v204_v23 = vmul.f32 0.2, %v198_v20  ;;  %v14149_v25 = vpop.f32.mrb[3].mxu0  ;;  %v12653_v22 = vcombine.high %v1261_v17, %v1293_v19  ;;  %6872 = vmatprep.subr.bf16.mxu0 %v12651_v18  ;;  %v654_v17 = vld [vmem:[#allocation9 + $0x910] sm:$0xff]  ;;  %v623_v18 = vld [vmem:[#allocation9 + $0x818] sm:$0xff] }
 0x172   :  { %v1356_v25 = vld [vmem:[#allocation9 + $0x1f00] sm:$0xff]  ;;  %v655_v19 = vld [vmem:[#allocation9 + $0x918] sm:$0xff] }
 0x173   :  { %v205_v29 = vsel %vm203_vm2, %v198_v20, %v204_v23  ;;  %v12650_v20 = vcombine.low %v1260_v15, %v1292_v16  ;;  %v1324_v23 = vld [vmem:[#allocation9 + $0x1e00] sm:$0xff]  ;;  %v11953_v15 = vcombine.high %v559_v10, %v591_v11  ;;  %v622_v16 = vld [vmem:[#allocation9 + $0x810] sm:$0xff] }
 0x174   :  { %v206_v31 = vpack.c.bf16 %v205_v29, %v205_v29  ;;  %v12715_v28 = vcombine.high %v1324_v23, %v1356_v25  ;;  %v1357_v29 = vld [vmem:[#allocation9 + $0x1f08] sm:$0xff] }
 0x175   :  { %6873 = vmatpush1.bf16.msra.mxu0 %v12650_v20  ;;  %v12717_v33 = vcombine.high %v1325_v26, %v1357_v29 }
 0x176   :  { %348 = vmatmul.mubr.bf16.vlgmr.msra.gmra.mrb[0].mxu1 %v206_v31  ;;  %v12714_v31 = vcombine.low %v1324_v23, %v1356_v25  ;;  %6874 = vmatprep.subr.bf16.mxu0 %v12715_v28  ;;  %v12017_v23 = vcombine.high %v623_v18, %v655_v19  ;;  %v686_v25 = vld [vmem:[#allocation9 + $0xa10] sm:$0xff]  ;;  %v687_v28 = vld [vmem:[#allocation9 + $0xa18] sm:$0xff] }
 0x177   :  { %6886 = vmatpush1.bf16.msra.mxu1 %v11756_v30  ;;  %v749_v30 = vld [vmem:[#allocation9 + $0xc08] sm:$0xff] }
 0x178   :  { %6887 = vmatprep.subr.bf16.mxu1 %v11821_v32  ;;  %v12141_v49 = vcombine.high %v749_v30, %v781_v47  ;;  %v12140_v52 = vcombine.low %v749_v30, %v781_v47  ;;  %v12716_v32 = vcombine.low %v1325_v26, %v1357_v29  ;;  %v718_v26 = vld [vmem:[#allocation9 + $0xb10] sm:$0xff]  ;;  %v719_v29 = vld [vmem:[#allocation9 + $0xb18] sm:$0xff] }
 0x179   :  { %6875 = vmatpush1.bf16.msra.mxu0 %v12714_v31  ;;  %v12014_v31 = vcombine.low %v622_v16, %v654_v17 }
 0x17b   :  { %6888 = vmatpush1.bf16.msra.mxu1 %v11820_v35  ;;  %v398_v35 = vld [vmem:[#allocation9 + $0x110] sm:$0xff] }
 0x17c   :  { %6889 = vmatprep.subr.bf16.mxu1 %v11885_v36  ;;  %v367_v36 = vld [vmem:[#allocation9 + $0x18] sm:$0xff]  ;;  %v11759_v37 = vcombine.high %v366_v34, %v398_v35 }
 0x17d   :  { %v11761_v41 = vcombine.high %v367_v36, %v399_v38 }
 0x17e   :  { %6926 = vmatprep.subr.bf16.mxu0 %v11759_v37  ;;  %v751_v37 = vld [vmem:[#allocation9 + $0xc18] sm:$0xff] }
 0x17f   :  { %6890 = vmatpush1.bf16.msra.mxu1 %v11884_v39  ;;  %v11758_v39 = vcombine.low %v366_v34, %v398_v35  ;;  %v12081_v34 = vcombine.high %v687_v28, %v719_v29  ;;  %v750_v35 = vld [vmem:[#allocation9 + $0xc10] sm:$0xff] }
 0x180   :  { %6891 = vmatprep.subr.bf16.mxu1 %v11949_v40  ;;  %v11760_v40 = vcombine.low %v367_v36, %v399_v38  ;;  %v782_v36 = vld [vmem:[#allocation9 + $0xd10] sm:$0xff]  ;;  %v783_v38 = vld [vmem:[#allocation9 + $0xd18] sm:$0xff] }
 0x183   :  { %6892 = vmatpush1.bf16.msra.mxu1 %v11948_v43  ;;  %v14983_v43 = vshrl.u32 %v225_v42, 7  ;;  %v12145_v42 = vcombine.high %v751_v37, %v783_v38 }
 0x184   :  { %6893 = vmatprep.subr.bf16.mxu1 %v12013_v44 }
 0x185   :  { %v14986_v44 = vsub.s32 0, %v14983_v43  ;;  %v14989_v46 = vsub.s32 1, %v14983_v43 }
 0x187   :  { %6894 = vmatpush1.bf16.msra.mxu1 %v12012_v24  ;;  %17576 = vst [vmem:[#allocation20_spill] sm:$0xff] %v14986_v44  ;;  %17577 = vst [vmem:[#allocation21_spill] sm:$0xff] %v14989_v46  ;;  %v228_v24 = vrot.slane %v223_v45, %v14986_v44 }
 0x188   :  { %6895 = vmatprep.subr.bf16.mxu1 %v12077_v27  ;;  %v232_v27 = vrot.slane %v223_v45, %v14989_v46  ;;  %v814_v45 = vld [vmem:[#allocation9 + $0xe10] sm:$0xff] }
 0x18b   :  { %6896 = vmatpush1.bf16.msra.mxu1 %v12076_v48 }
 0x18c   :  { %6897 = vmatprep.subr.bf16.mxu1 %v12141_v49 }
 0x18f   :  { %6898 = vmatpush1.bf16.msra.mxu1 %v12140_v52 }
 0x190   :  { %6899 = vmatprep.subr.bf16.mxu1 %v12205_v53 }
 0x193   :  { %6900 = vmatpush1.bf16.msra.mxu1 %v12204_v56 }
 0x194   :  { %6901 = vmatprep.subr.bf16.mxu1 %v12269_v57  ;;  %v462_v57 = vld [vmem:[#allocation9 + $0x310] sm:$0xff] }
 0x195   :  { %v11823_v63 = vcombine.high %v430_v55, %v462_v57 }
 0x197   :  { %6902 = vmatpush1.bf16.msra.mxu1 %v12268_v60 }
 0x198   :  { %6903 = vmatprep.subr.bf16.mxu1 %v12333_v61 }
 0x19b   :  { %6904 = vmatpush1.bf16.msra.mxu1 %v12332_v0  ;;  %v11825_v0 = vcombine.high %v431_v58, %v463_v59 }
 0x19c   :  { %6905 = vmatprep.subr.bf16.mxu1 %v12397_v1  ;;  %v526_v1 = vld [vmem:[#allocation9 + $0x510] sm:$0xff] }
 0x19d   :  { %v11887_v6 = vcombine.high %v494_v62, %v526_v1 }
 0x19f   :  { %6906 = vmatpush1.bf16.msra.mxu1 %v12396_v4  ;;  %v11822_v4 = vcombine.low %v430_v55, %v462_v57 }
 0x1a0   :  { %6907 = vmatprep.subr.bf16.mxu1 %v12461_v5  ;;  %v11824_v5 = vcombine.low %v431_v58, %v463_v59  ;;  %v942_v59 = vld [vmem:[#allocation9 + $0x1210] sm:$0xff] }
 0x1a3   :  { %6908 = vmatpush1.bf16.msra.mxu1 %v12460_v8  ;;  %v558_v8 = vld [vmem:[#allocation9 + $0x610] sm:$0xff] }
 0x1a4   :  { %6909 = vmatprep.subr.bf16.mxu1 %v12525_v9  ;;  %v590_v9 = vld [vmem:[#allocation9 + $0x710] sm:$0xff] }
 0x1a5   :  { %v11950_v20 = vcombine.low %v558_v8, %v590_v9 }
 0x1a7   :  { %6910 = vmatpush1.bf16.msra.mxu1 %v12524_v12  ;;  %v11886_v12 = vcombine.low %v494_v62, %v526_v1  ;;  %v974_v62 = vld [vmem:[#allocation9 + $0x1310] sm:$0xff] }
 0x1a8   :  { %6911 = vmatprep.subr.bf16.mxu1 %v12589_v13  ;;  %v11888_v13 = vcombine.low %v495_v2, %v527_v3  ;;  %v12335_v3 = vcombine.high %v942_v59, %v974_v62 }
 0x1ab   :  { %6912 = vmatpush1.bf16.msra.mxu1 %v12588_v14  ;;  %v11951_v14 = vcombine.high %v558_v8, %v590_v9  ;;  %v1039_v8 = vld [vmem:[#allocation9 + $0x1518] sm:$0xff]  ;;  %v12334_v9 = vcombine.low %v942_v59, %v974_v62  ;;  %v401_v59 = vld [vmem:[#allocation9 + $0x128] sm:$0xff] }
 0x1ac   :  { %6913 = vmatprep.subr.bf16.mxu1 %v12653_v22  ;;  %v12015_v22 = vcombine.high %v622_v16, %v654_v17  ;;  %v1103_v16 = vld [vmem:[#allocation9 + $0x1718] sm:$0xff] }
 0x1af   :  { %6914 = vmatpush1.bf16.msra.mxu1 %v12652_v21  ;;  %v11952_v21 = vcombine.low %v559_v10, %v591_v11 }
 0x1b0   :  { %6915 = vmatprep.subr.bf16.mxu1 %v12717_v33  ;;  %v12079_v33 = vcombine.high %v686_v25, %v718_v26 }
 0x1b3   :  { %6916 = vmatpush1.bf16.msra.mxu1 %v12716_v32  ;;  %v12016_v32 = vcombine.low %v623_v18, %v655_v19 }
 0x1b4   :  { %6967 = vmatprep.subr.bf16.mxu1 %v11761_v41  ;;  %v12143_v41 = vcombine.high %v750_v35, %v782_v36 }
 0x249   :  { %v349_v30 = vpop.f32.mrb[0].mxu1 }
 0x24a   :  { %v350_v47 = vadd.f32 %v349_v30, %v228_v24  ;;  %v351_v48 = vpop.f32.mrb[1].mxu1  ;;  %v846_v24 = vld [vmem:[#allocation9 + $0xf10] sm:$0xff]  ;;  %v847_v30 = vld [vmem:[#allocation9 + $0xf18] sm:$0xff] }
 0x24b   :  { %v352_v49 = vadd.f32 %v351_v48, %v232_v27  ;;  %v353_v50 = vpop.f32.mrb[2].mxu1  ;;  %v815_v27 = vld [vmem:[#allocation9 + $0xe18] sm:$0xff]  ;;  %v12144_v48 = vcombine.low %v751_v37, %v783_v38  ;;  %v12206_v55 = vcombine.low %v814_v45, %v846_v24 }
 0x24c   :  { %vm356_vm3 = vcmp.gt.f32.partialorder %v350_v47, 0.0  ;;  %v358_v51 = vmul.f32 0.2, %v350_v47  ;;  %v354_v52 = vpop.f32.mrb[3].mxu1  ;;  %v12209_v50 = vcombine.high %v815_v27, %v847_v30 }
 0x24d   :  { %vm357_vm4 = vcmp.gt.f32.partialorder %v352_v49, 0.0  ;;  %v359_v53 = vmul.f32 0.2, %v352_v49  ;;  %v910_v52 = vld [vmem:[#allocation9 + $0x1110] sm:$0xff] }
 0x24e   :  { %v360_v54 = vsel %vm356_vm3, %v350_v47, %v358_v51  ;;  %v12142_v47 = vcombine.low %v750_v35, %v782_v36  ;;  %v878_v51 = vld [vmem:[#allocation9 + $0x1010] sm:$0xff]  ;;  %v1231_v35 = vld [vmem:[#allocation9 + $0x1b18] sm:$0xff] }
 0x24f   :  { %v361_v56 = vsel %vm357_vm4, %v352_v49, %v359_v53  ;;  %v14995_v61 = vpack.c.bf16 %v360_v54, %v360_v54  ;;  %v12207_v49 = vcombine.high %v814_v45, %v846_v24  ;;  %v879_v53 = vld [vmem:[#allocation9 + $0x1018] sm:$0xff]  ;;  %v12271_v57 = vcombine.high %v878_v51, %v910_v52 }
 0x250   :  { %v14993_v60 = vpack.c.bf16 %v361_v56, %v361_v56  ;;  %v911_v54 = vld [vmem:[#allocation9 + $0x1118] sm:$0xff]  ;;  %v12208_v56 = vcombine.low %v815_v27, %v847_v30  ;;  %v12270_v1 = vcombine.low %v878_v51, %v910_v52 }
 0x251   :  { %v12273_v58 = vcombine.high %v879_v53, %v911_v54  ;;  %v12272_v2 = vcombine.low %v879_v53, %v911_v54  ;;  %v1295_v45 = vld [vmem:[#allocation9 + $0x1d18] sm:$0xff] }
 0x252   :  { %6876 = vmatprep.mubr.bf16.mxu0 %v14993_v60  ;;  %6917 = vmatprep.mubr.bf16.mxu1 %v14993_v60  ;;  %v1359_v51 = vld [vmem:[#allocation9 + $0x1f18] sm:$0xff] }
 0x253   :  { %6877 = vmatmul.mubr.bf16.vlgmr.msra.gmra.mrb[4].mxu0 %v14995_v61  ;;  %6918 = vmatmul.mubr.bf16.vlgmr.msra.gmra.mrb[4].mxu1 %v14995_v61 }
 0x254   :  { %6927 = vmatpush1.bf16.msra.mxu0 %v11758_v39  ;;  %6968 = vmatpush1.bf16.msra.mxu1 %v11760_v40  ;;  %v12078_v39 = vcombine.low %v686_v25, %v718_v26  ;;  %v12080_v40 = vcombine.low %v687_v28, %v719_v29  ;;  %v1167_v25 = vld [vmem:[#allocation9 + $0x1918] sm:$0xff] }
 0x255   :  { %6958 = vmatprep.mubr.bf16.mxu0 %v14993_v60  ;;  %6999 = vmatprep.mubr.bf16.mxu1 %v14993_v60 }
 0x256   :  { %6928 = vmatprep.subr.bf16.mxu0 %v11823_v63  ;;  %6969 = vmatprep.subr.bf16.mxu1 %v11825_v0  ;;  %v943_v63 = vld [vmem:[#allocation9 + $0x1218] sm:$0xff] }
 0x257   :  { %v975_v0 = vld [vmem:[#allocation9 + $0x1318] sm:$0xff] }
 0x258   :  { %6929 = vmatpush1.bf16.msra.mxu0 %v11822_v4  ;;  %6970 = vmatpush1.bf16.msra.mxu1 %v11824_v5  ;;  %v12337_v4 = vcombine.high %v943_v63, %v975_v0  ;;  %v1006_v5 = vld [vmem:[#allocation9 + $0x1410] sm:$0xff]  ;;  %v12336_v10 = vcombine.low %v943_v63, %v975_v0 }
 0x259   :  { %6930 = vmatprep.subr.bf16.mxu0 %v11887_v6  ;;  %6971 = vmatprep.subr.bf16.mxu1 %v11889_v7  ;;  %v1038_v6 = vld [vmem:[#allocation9 + $0x1510] sm:$0xff]  ;;  %v1007_v7 = vld [vmem:[#allocation9 + $0x1418] sm:$0xff] }
 0x25a   :  { %v12399_v11 = vcombine.high %v1006_v5, %v1038_v6  ;;  %v12398_v17 = vcombine.low %v1006_v5, %v1038_v6  ;;  %v12400_v18 = vcombine.low %v1007_v7, %v1039_v8  ;;  %v465_v5 = vld [vmem:[#allocation9 + $0x328] sm:$0xff] }
 0x25c   :  { %6931 = vmatpush1.bf16.msra.mxu0 %v11886_v12  ;;  %6972 = vmatpush1.bf16.msra.mxu1 %v11888_v13  ;;  %v12401_v12 = vcombine.high %v1007_v7, %v1039_v8  ;;  %v1070_v13 = vld [vmem:[#allocation9 + $0x1610] sm:$0xff] }
 0x25d   :  { %6932 = vmatprep.subr.bf16.mxu0 %v11951_v14  ;;  %6973 = vmatprep.subr.bf16.mxu1 %v11953_v15  ;;  %v1102_v14 = vld [vmem:[#allocation9 + $0x1710] sm:$0xff]  ;;  %v1071_v15 = vld [vmem:[#allocation9 + $0x1618] sm:$0xff] }
 0x25e   :  { %v12463_v19 = vcombine.high %v1070_v13, %v1102_v14  ;;  %v12462_v26 = vcombine.low %v1070_v13, %v1102_v14  ;;  %v12464_v28 = vcombine.low %v1071_v15, %v1103_v16  ;;  %v529_v13 = vld [vmem:[#allocation9 + $0x528] sm:$0xff] }
 0x260   :  { %6933 = vmatpush1.bf16.msra.mxu0 %v11950_v20  ;;  %6974 = vmatpush1.bf16.msra.mxu1 %v11952_v21  ;;  %v12465_v20 = vcombine.high %v1071_v15, %v1103_v16  ;;  %v1134_v21 = vld [vmem:[#allocation9 + $0x1810] sm:$0xff] }
 0x261   :  { %6934 = vmatprep.subr.bf16.mxu0 %v12015_v22  ;;  %6975 = vmatprep.subr.bf16.mxu1 %v12017_v23  ;;  %v1166_v22 = vld [vmem:[#allocation9 + $0x1910] sm:$0xff]  ;;  %v1135_v23 = vld [vmem:[#allocation9 + $0x1818] sm:$0xff] }
 0x262   :  { %v12527_v29 = vcombine.high %v1134_v21, %v1166_v22  ;;  %v12526_v36 = vcombine.low %v1134_v21, %v1166_v22  ;;  %v12528_v37 = vcombine.low %v1135_v23, %v1167_v25  ;;  %v593_v21 = vld [vmem:[#allocation9 + $0x728] sm:$0xff] }
 0x264   :  { %6935 = vmatpush1.bf16.msra.mxu0 %v12014_v31  ;;  %6976 = vmatpush1.bf16.msra.mxu1 %v12016_v32  ;;  %v12529_v31 = vcombine.high %v1135_v23, %v1167_v25  ;;  %v1198_v32 = vld [vmem:[#allocation9 + $0x1a10] sm:$0xff] }
 0x265   :  { %6936 = vmatprep.subr.bf16.mxu0 %v12079_v33  ;;  %6977 = vmatprep.subr.bf16.mxu1 %v12081_v34  ;;  %v1230_v33 = vld [vmem:[#allocation9 + $0x1b10] sm:$0xff]  ;;  %v1199_v34 = vld [vmem:[#allocation9 + $0x1a18] sm:$0xff] }
 0x266   :  { %v12591_v38 = vcombine.high %v1198_v32, %v1230_v33  ;;  %v12590_v24 = vcombine.low %v1198_v32, %v1230_v33  ;;  %v12592_v27 = vcombine.low %v1199_v34, %v1231_v35  ;;  %v657_v32 = vld [vmem:[#allocation9 + $0x928] sm:$0xff] }
 0x268   :  { %6937 = vmatpush1.bf16.msra.mxu0 %v12078_v39  ;;  %6978 = vmatpush1.bf16.msra.mxu1 %v12080_v40  ;;  %v12593_v39 = vcombine.high %v1199_v34, %v1231_v35  ;;  %v1262_v40 = vld [vmem:[#allocation9 + $0x1c10] sm:$0xff] }
 0x269   :  { %6938 = vmatprep.subr.bf16.mxu0 %v12143_v41  ;;  %6979 = vmatprep.subr.bf16.mxu1 %v12145_v42  ;;  %v1294_v41 = vld [vmem:[#allocation9 + $0x1d10] sm:$0xff]  ;;  %v1263_v42 = vld [vmem:[#allocation9 + $0x1c18] sm:$0xff] }
 0x26a   :  { %v12655_v30 = vcombine.high %v1262_v40, %v1294_v41  ;;  %v12654_v52 = vcombine.low %v1262_v40, %v1294_v41  ;;  %v12656_v53 = vcombine.low %v1263_v42, %v1295_v45  ;;  %v721_v40 = vld [vmem:[#allocation9 + $0xb28] sm:$0xff] }
 0x26c   :  { %6939 = vmatpush1.bf16.msra.mxu0 %v12142_v47  ;;  %6980 = vmatpush1.bf16.msra.mxu1 %v12144_v48  ;;  %v12657_v47 = vcombine.high %v1263_v42, %v1295_v45  ;;  %v1326_v48 = vld [vmem:[#allocation9 + $0x1e10] sm:$0xff] }
 0x26d   :  { %6940 = vmatprep.subr.bf16.mxu0 %v12207_v49  ;;  %6981 = vmatprep.subr.bf16.mxu1 %v12209_v50  ;;  %v1358_v49 = vld [vmem:[#allocation9 + $0x1f10] sm:$0xff]  ;;  %v1327_v50 = vld [vmem:[#allocation9 + $0x1e18] sm:$0xff] }
 0x26e   :  { %v12719_v54 = vcombine.high %v1326_v48, %v1358_v49  ;;  %v12718_v62 = vcombine.low %v1326_v48, %v1358_v49  ;;  %v12720_v63 = vcombine.low %v1327_v50, %v1359_v51  ;;  %v785_v48 = vld [vmem:[#allocation9 + $0xd28] sm:$0xff] }
 0x270   :  { %6941 = vmatpush1.bf16.msra.mxu0 %v12206_v55  ;;  %6982 = vmatpush1.bf16.msra.mxu1 %v12208_v56  ;;  %v12721_v55 = vcombine.high %v1327_v50, %v1359_v51  ;;  %v368_v56 = vld [vmem:[#allocation9 + $0x20] sm:$0xff] }
 0x271   :  { %6942 = vmatprep.subr.bf16.mxu0 %v12271_v57  ;;  %6983 = vmatprep.subr.bf16.mxu1 %v12273_v58  ;;  %v400_v57 = vld [vmem:[#allocation9 + $0x120] sm:$0xff]  ;;  %v369_v58 = vld [vmem:[#allocation9 + $0x28] sm:$0xff] }
 0x272   :  { %v11763_v0 = vcombine.high %v368_v56, %v400_v57  ;;  %v11762_v6 = vcombine.low %v368_v56, %v400_v57  ;;  %v11764_v7 = vcombine.low %v369_v58, %v401_v59  ;;  %v849_v56 = vld [vmem:[#allocation9 + $0xf28] sm:$0xff] }
 0x274   :  { %6943 = vmatpush1.bf16.msra.mxu0 %v12270_v1  ;;  %6984 = vmatpush1.bf16.msra.mxu1 %v12272_v2  ;;  %v11765_v1 = vcombine.high %v369_v58, %v401_v59  ;;  %v432_v2 = vld [vmem:[#allocation9 + $0x220] sm:$0xff] }
 0x275   :  { %6944 = vmatprep.subr.bf16.mxu0 %v12335_v3  ;;  %6985 = vmatprep.subr.bf16.mxu1 %v12337_v4  ;;  %v464_v3 = vld [vmem:[#allocation9 + $0x320] sm:$0xff]  ;;  %v433_v4 = vld [vmem:[#allocation9 + $0x228] sm:$0xff] }
 0x276   :  { %v11827_v8 = vcombine.high %v432_v2, %v464_v3  ;;  %v11826_v14 = vcombine.low %v432_v2, %v464_v3  ;;  %v11828_v15 = vcombine.low %v433_v4, %v465_v5  ;;  %v913_v2 = vld [vmem:[#allocation9 + $0x1128] sm:$0xff] }
 0x278   :  { %6945 = vmatpush1.bf16.msra.mxu0 %v12334_v9  ;;  %6986 = vmatpush1.bf16.msra.mxu1 %v12336_v10  ;;  %v11829_v9 = vcombine.high %v433_v4, %v465_v5  ;;  %v496_v10 = vld [vmem:[#allocation9 + $0x420] sm:$0xff] }
 0x279   :  { %6946 = vmatprep.subr.bf16.mxu0 %v12399_v11  ;;  %6987 = vmatprep.subr.bf16.mxu1 %v12401_v12  ;;  %v528_v11 = vld [vmem:[#allocation9 + $0x520] sm:$0xff]  ;;  %v497_v12 = vld [vmem:[#allocation9 + $0x428] sm:$0xff] }
 0x27a   :  { %v11891_v16 = vcombine.high %v496_v10, %v528_v11  ;;  %v11890_v22 = vcombine.low %v496_v10, %v528_v11  ;;  %v11892_v23 = vcombine.low %v497_v12, %v529_v13  ;;  %v977_v10 = vld [vmem:[#allocation9 + $0x1328] sm:$0xff] }
 0x27c   :  { %6947 = vmatpush1.bf16.msra.mxu0 %v12398_v17  ;;  %6988 = vmatpush1.bf16.msra.mxu1 %v12400_v18  ;;  %v11893_v17 = vcombine.high %v497_v12, %v529_v13  ;;  %v560_v18 = vld [vmem:[#allocation9 + $0x620] sm:$0xff] }
 0x27d   :  { %6948 = vmatprep.subr.bf16.mxu0 %v12463_v19  ;;  %6989 = vmatprep.subr.bf16.mxu1 %v12465_v20  ;;  %v592_v19 = vld [vmem:[#allocation9 + $0x720] sm:$0xff]  ;;  %v561_v20 = vld [vmem:[#allocation9 + $0x628] sm:$0xff] }
 0x27e   :  { %v11955_v25 = vcombine.high %v560_v18, %v592_v19  ;;  %v11954_v33 = vcombine.low %v560_v18, %v592_v19  ;;  %v11956_v34 = vcombine.low %v561_v20, %v593_v21  ;;  %v1041_v18 = vld [vmem:[#allocation9 + $0x1528] sm:$0xff] }
 0x280   :  { %6949 = vmatpush1.bf16.msra.mxu0 %v12462_v26  ;;  %6990 = vmatpush1.bf16.msra.mxu1 %v12464_v28  ;;  %v11957_v26 = vcombine.high %v561_v20, %v593_v21  ;;  %v624_v28 = vld [vmem:[#allocation9 + $0x820] sm:$0xff] }
 0x281   :  { %6950 = vmatprep.subr.bf16.mxu0 %v12527_v29  ;;  %6991 = vmatprep.subr.bf16.mxu1 %v12529_v31  ;;  %v656_v29 = vld [vmem:[#allocation9 + $0x920] sm:$0xff]  ;;  %v625_v31 = vld [vmem:[#allocation9 + $0x828] sm:$0xff] }
 0x282   :  { %v12019_v35 = vcombine.high %v624_v28, %v656_v29  ;;  %v12018_v41 = vcombine.low %v624_v28, %v656_v29  ;;  %v12020_v42 = vcombine.low %v625_v31, %v657_v32  ;;  %v1105_v28 = vld [vmem:[#allocation9 + $0x1728] sm:$0xff] }
 0x284   :  { %6951 = vmatpush1.bf16.msra.mxu0 %v12526_v36  ;;  %6992 = vmatpush1.bf16.msra.mxu1 %v12528_v37  ;;  %v12021_v36 = vcombine.high %v625_v31, %v657_v32  ;;  %v688_v37 = vld [vmem:[#allocation9 + $0xa20] sm:$0xff] }
 0x285   :  { %6952 = vmatprep.subr.bf16.mxu0 %v12591_v38  ;;  %6993 = vmatprep.subr.bf16.mxu1 %v12593_v39  ;;  %v720_v38 = vld [vmem:[#allocation9 + $0xb20] sm:$0xff]  ;;  %v689_v39 = vld [vmem:[#allocation9 + $0xa28] sm:$0xff] }
 0x286   :  { %v12083_v45 = vcombine.high %v688_v37, %v720_v38  ;;  %v12082_v49 = vcombine.low %v688_v37, %v720_v38  ;;  %v12084_v50 = vcombine.low %v689_v39, %v721_v40  ;;  %v1169_v37 = vld [vmem:[#allocation9 + $0x1928] sm:$0xff] }
 0x288   :  { %6953 = vmatpush1.bf16.msra.mxu0 %v12590_v24  ;;  %6994 = vmatpush1.bf16.msra.mxu1 %v12592_v27  ;;  %v12085_v24 = vcombine.high %v689_v39, %v721_v40  ;;  %v752_v27 = vld [vmem:[#allocation9 + $0xc20] sm:$0xff] }
 0x289   :  { %6954 = vmatprep.subr.bf16.mxu0 %v12655_v30  ;;  %6995 = vmatprep.subr.bf16.mxu1 %v12657_v47  ;;  %v784_v30 = vld [vmem:[#allocation9 + $0xd20] sm:$0xff]  ;;  %v753_v47 = vld [vmem:[#allocation9 + $0xc28] sm:$0xff] }
 0x28a   :  { %v12147_v51 = vcombine.high %v752_v27, %v784_v30  ;;  %v12146_v57 = vcombine.low %v752_v27, %v784_v30  ;;  %v12148_v58 = vcombine.low %v753_v47, %v785_v48  ;;  %v1233_v27 = vld [vmem:[#allocation9 + $0x1b28] sm:$0xff] }
 0x28c   :  { %6955 = vmatpush1.bf16.msra.mxu0 %v12654_v52  ;;  %6996 = vmatpush1.bf16.msra.mxu1 %v12656_v53  ;;  %v12149_v52 = vcombine.high %v753_v47, %v785_v48  ;;  %v816_v53 = vld [vmem:[#allocation9 + $0xe20] sm:$0xff] }
 0x28d   :  { %6956 = vmatprep.subr.bf16.mxu0 %v12719_v54  ;;  %6997 = vmatprep.subr.bf16.mxu1 %v12721_v55  ;;  %v848_v54 = vld [vmem:[#allocation9 + $0xf20] sm:$0xff]  ;;  %v817_v55 = vld [vmem:[#allocation9 + $0xe28] sm:$0xff] }
 0x28e   :  { %v12211_v59 = vcombine.high %v816_v53, %v848_v54  ;;  %v12210_v3 = vcombine.low %v816_v53, %v848_v54  ;;  %v12212_v4 = vcombine.low %v817_v55, %v849_v56  ;;  %v1297_v53 = vld [vmem:[#allocation9 + $0x1d28] sm:$0xff] }
 0x290   :  { %6957 = vmatpush1.bf16.msra.mxu0 %v12718_v62  ;;  %6998 = vmatpush1.bf16.msra.mxu1 %v12720_v63  ;;  %v12213_v62 = vcombine.high %v817_v55, %v849_v56  ;;  %v880_v63 = vld [vmem:[#allocation9 + $0x1020] sm:$0xff] }
 0x291   :  { %7008 = vmatprep.subr.bf16.mxu0 %v11763_v0  ;;  %7049 = vmatprep.subr.bf16.mxu1 %v11765_v1  ;;  %v912_v0 = vld [vmem:[#allocation9 + $0x1120] sm:$0xff]  ;;  %v881_v1 = vld [vmem:[#allocation9 + $0x1028] sm:$0xff] }
 0x292   :  { %v12275_v5 = vcombine.high %v880_v63, %v912_v0  ;;  %v12274_v11 = vcombine.low %v880_v63, %v912_v0  ;;  %v12276_v12 = vcombine.low %v881_v1, %v913_v2  ;;  %v1361_v63 = vld [vmem:[#allocation9 + $0x1f28] sm:$0xff] }
 0x293   :  { %6959 = vmatmul.mubr.bf16.vlgmr.msra.gmra.mrb[8].mxu0 %v14995_v61  ;;  %7000 = vmatmul.mubr.bf16.vlgmr.msra.gmra.mrb[8].mxu1 %v14995_v61 }
 0x294   :  { %7009 = vmatpush1.bf16.msra.mxu0 %v11762_v6  ;;  %7040 = vmatprep.mubr.bf16.mxu0 %v14993_v60  ;;  %v12277_v6 = vcombine.high %v881_v1, %v913_v2 }
 0x295   :  { %7050 = vmatpush1.bf16.msra.mxu1 %v11764_v7  ;;  %7081 = vmatprep.mubr.bf16.mxu1 %v14993_v60  ;;  %v944_v7 = vld [vmem:[#allocation9 + $0x1220] sm:$0xff] }
 0x296   :  { %7010 = vmatprep.subr.bf16.mxu0 %v11827_v8  ;;  %7051 = vmatprep.subr.bf16.mxu1 %v11829_v9  ;;  %v976_v8 = vld [vmem:[#allocation9 + $0x1320] sm:$0xff]  ;;  %v945_v9 = vld [vmem:[#allocation9 + $0x1228] sm:$0xff] }
 0x297   :  { %v12339_v13 = vcombine.high %v944_v7, %v976_v8  ;;  %v12338_v19 = vcombine.low %v944_v7, %v976_v8  ;;  %v12340_v20 = vcombine.low %v945_v9, %v977_v10  ;;  %v403_v7 = vld [vmem:[#allocation9 + $0x138] sm:$0xff] }
 0x298   :  { %7011 = vmatpush1.bf16.msra.mxu0 %v11826_v14  ;;  %v12341_v14 = vcombine.high %v945_v9, %v977_v10 }
 0x299   :  { %7052 = vmatpush1.bf16.msra.mxu1 %v11828_v15  ;;  %7012 = vmatprep.subr.bf16.mxu0 %v11891_v16  ;;  %v1008_v15 = vld [vmem:[#allocation9 + $0x1420] sm:$0xff] }
 0x29a   :  { %7053 = vmatprep.subr.bf16.mxu1 %v11893_v17  ;;  %v1040_v16 = vld [vmem:[#allocation9 + $0x1520] sm:$0xff]  ;;  %v1009_v17 = vld [vmem:[#allocation9 + $0x1428] sm:$0xff] }
 0x29b   :  { %v12403_v21 = vcombine.high %v1008_v15, %v1040_v16  ;;  %v12402_v29 = vcombine.low %v1008_v15, %v1040_v16  ;;  %v12404_v31 = vcombine.low %v1009_v17, %v1041_v18  ;;  %v435_v15 = vld [vmem:[#allocation9 + $0x238] sm:$0xff] }
 0x29c   :  { %7013 = vmatpush1.bf16.msra.mxu0 %v11890_v22  ;;  %v12405_v22 = vcombine.high %v1009_v17, %v1041_v18  ;;  %v467_v16 = vld [vmem:[#allocation9 + $0x338] sm:$0xff] }
 0x29d   :  { %7054 = vmatpush1.bf16.msra.mxu1 %v11892_v23  ;;  %7014 = vmatprep.subr.bf16.mxu0 %v11955_v25  ;;  %v1072_v23 = vld [vmem:[#allocation9 + $0x1620] sm:$0xff] }
 0x29e   :  { %7055 = vmatprep.subr.bf16.mxu1 %v11957_v26  ;;  %v1104_v25 = vld [vmem:[#allocation9 + $0x1720] sm:$0xff]  ;;  %v1073_v26 = vld [vmem:[#allocation9 + $0x1628] sm:$0xff] }
 0x29f   :  { %v12467_v32 = vcombine.high %v1072_v23, %v1104_v25  ;;  %v12466_v38 = vcombine.low %v1072_v23, %v1104_v25  ;;  %v12468_v39 = vcombine.low %v1073_v26, %v1105_v28  ;;  %v531_v23 = vld [vmem:[#allocation9 + $0x538] sm:$0xff] }
 0x2a0   :  { %7015 = vmatpush1.bf16.msra.mxu0 %v11954_v33  ;;  %v12469_v33 = vcombine.high %v1073_v26, %v1105_v28  ;;  %v11832_v26 = vcombine.low %v435_v15, %v467_v16 }
 0x2a1   :  { %7056 = vmatpush1.bf16.msra.mxu1 %v11956_v34  ;;  %7016 = vmatprep.subr.bf16.mxu0 %v12019_v35  ;;  %v1136_v34 = vld [vmem:[#allocation9 + $0x1820] sm:$0xff] }
 0x2a2   :  { %7057 = vmatprep.subr.bf16.mxu1 %v12021_v36  ;;  %v1168_v35 = vld [vmem:[#allocation9 + $0x1920] sm:$0xff]  ;;  %v1137_v36 = vld [vmem:[#allocation9 + $0x1828] sm:$0xff] }
 0x2a3   :  { %v12531_v40 = vcombine.high %v1136_v34, %v1168_v35  ;;  %v12530_v30 = vcombine.low %v1136_v34, %v1168_v35  ;;  %v12532_v47 = vcombine.low %v1137_v36, %v1169_v37  ;;  %v595_v34 = vld [vmem:[#allocation9 + $0x738] sm:$0xff] }
 0x2a4   :  { %7017 = vmatpush1.bf16.msra.mxu0 %v12018_v41  ;;  %v12533_v41 = vcombine.high %v1137_v36, %v1169_v37 }
 0x2a5   :  { %7058 = vmatpush1.bf16.msra.mxu1 %v12020_v42  ;;  %7018 = vmatprep.subr.bf16.mxu0 %v12083_v45  ;;  %v1200_v42 = vld [vmem:[#allocation9 + $0x1a20] sm:$0xff] }
 0x2a6   :  { %7059 = vmatprep.subr.bf16.mxu1 %v12085_v24  ;;  %v1232_v45 = vld [vmem:[#allocation9 + $0x1b20] sm:$0xff]  ;;  %v1201_v24 = vld [vmem:[#allocation9 + $0x1a28] sm:$0xff] }
 0x2a7   :  { %v12595_v48 = vcombine.high %v1200_v42, %v1232_v45  ;;  %v12594_v54 = vcombine.low %v1200_v42, %v1232_v45  ;;  %v12596_v55 = vcombine.low %v1201_v24, %v1233_v27  ;;  %v659_v42 = vld [vmem:[#allocation9 + $0x938] sm:$0xff] }
 0x2a8   :  { %7019 = vmatpush1.bf16.msra.mxu0 %v12082_v49  ;;  %v12597_v49 = vcombine.high %v1201_v24, %v1233_v27 }
 0x2a9   :  { %7060 = vmatpush1.bf16.msra.mxu1 %v12084_v50  ;;  %7020 = vmatprep.subr.bf16.mxu0 %v12147_v51  ;;  %v1264_v50 = vld [vmem:[#allocation9 + $0x1c20] sm:$0xff] }
 0x2aa   :  { %7061 = vmatprep.subr.bf16.mxu1 %v12149_v52  ;;  %v1296_v51 = vld [vmem:[#allocation9 + $0x1d20] sm:$0xff]  ;;  %v1265_v52 = vld [vmem:[#allocation9 + $0x1c28] sm:$0xff] }
 0x2ab   :  { %v12659_v56 = vcombine.high %v1264_v50, %v1296_v51  ;;  %v12658_v0 = vcombine.low %v1264_v50, %v1296_v51  ;;  %v12660_v1 = vcombine.low %v1265_v52, %v1297_v53  ;;  %v723_v50 = vld [vmem:[#allocation9 + $0xb38] sm:$0xff] }
 0x2ac   :  { %7021 = vmatpush1.bf16.msra.mxu0 %v12146_v57  ;;  %v12661_v57 = vcombine.high %v1265_v52, %v1297_v53 }
 0x2ad   :  { %7062 = vmatpush1.bf16.msra.mxu1 %v12148_v58  ;;  %7022 = vmatprep.subr.bf16.mxu0 %v12211_v59  ;;  %v1328_v58 = vld [vmem:[#allocation9 + $0x1e20] sm:$0xff] }
 0x2ae   :  { %7063 = vmatprep.subr.bf16.mxu1 %v12213_v62  ;;  %v1360_v59 = vld [vmem:[#allocation9 + $0x1f20] sm:$0xff]  ;;  %v1329_v62 = vld [vmem:[#allocation9 + $0x1e28] sm:$0xff] }
 0x2af   :  { %v12723_v2 = vcombine.high %v1328_v58, %v1360_v59  ;;  %v12722_v8 = vcombine.low %v1328_v58, %v1360_v59  ;;  %v12724_v9 = vcombine.low %v1329_v62, %v1361_v63  ;;  %v787_v58 = vld [vmem:[#allocation9 + $0xd38] sm:$0xff] }
 0x2b0   :  { %7023 = vmatpush1.bf16.msra.mxu0 %v12210_v3  ;;  %v12725_v3 = vcombine.high %v1329_v62, %v1361_v63 }
 0x2b1   :  { %7064 = vmatpush1.bf16.msra.mxu1 %v12212_v4  ;;  %7024 = vmatprep.subr.bf16.mxu0 %v12275_v5  ;;  %v370_v4 = vld [vmem:[#allocation9 + $0x30] sm:$0xff] }
 0x2b2   :  { %7065 = vmatprep.subr.bf16.mxu1 %v12277_v6  ;;  %v402_v5 = vld [vmem:[#allocation9 + $0x130] sm:$0xff]  ;;  %v371_v6 = vld [vmem:[#allocation9 + $0x38] sm:$0xff] }
 0x2b3   :  { %v11767_v10 = vcombine.high %v370_v4, %v402_v5  ;;  %v11768_v17 = vcombine.low %v371_v6, %v403_v7 }
 0x2b4   :  { %7025 = vmatpush1.bf16.msra.mxu0 %v12274_v11  ;;  %v11769_v11 = vcombine.high %v371_v6, %v403_v7 }
 0x2b5   :  { %7066 = vmatpush1.bf16.msra.mxu1 %v12276_v12  ;;  %7026 = vmatprep.subr.bf16.mxu0 %v12339_v13  ;;  %v434_v12 = vld [vmem:[#allocation9 + $0x230] sm:$0xff] }
 0x2b6   :  { %7067 = vmatprep.subr.bf16.mxu1 %v12341_v14  ;;  %v466_v13 = vld [vmem:[#allocation9 + $0x330] sm:$0xff]  ;;  %v11766_v14 = vcombine.low %v370_v4, %v402_v5  ;;  %v851_v4 = vld [vmem:[#allocation9 + $0xf38] sm:$0xff] }
 0x2b7   :  { %v11831_v18 = vcombine.high %v434_v12, %v466_v13  ;;  %v11830_v25 = vcombine.low %v434_v12, %v466_v13  ;;  %v915_v12 = vld [vmem:[#allocation9 + $0x1138] sm:$0xff] }
 0x2b8   :  { %7027 = vmatpush1.bf16.msra.mxu0 %v12338_v19  ;;  %v498_v19 = vld [vmem:[#allocation9 + $0x430] sm:$0xff] }
 0x2b9   :  { %7068 = vmatpush1.bf16.msra.mxu1 %v12340_v20  ;;  %7028 = vmatprep.subr.bf16.mxu0 %v12403_v21  ;;  %v530_v20 = vld [vmem:[#allocation9 + $0x530] sm:$0xff]  ;;  %v11833_v21 = vcombine.high %v435_v15, %v467_v16 }
 0x2ba   :  { %7069 = vmatprep.subr.bf16.mxu1 %v12405_v22  ;;  %v499_v22 = vld [vmem:[#allocation9 + $0x438] sm:$0xff]  ;;  %v11895_v28 = vcombine.high %v498_v19, %v530_v20  ;;  %v11894_v35 = vcombine.low %v498_v19, %v530_v20 }
 0x2bb   :  { %v11896_v36 = vcombine.low %v499_v22, %v531_v23  ;;  %v947_v19 = vld [vmem:[#allocation9 + $0x1238] sm:$0xff] }
 0x2bc   :  { %7029 = vmatpush1.bf16.msra.mxu0 %v12402_v29  ;;  %v11897_v29 = vcombine.high %v499_v22, %v531_v23  ;;  %v979_v20 = vld [vmem:[#allocation9 + $0x1338] sm:$0xff] }
 0x2bd   :  { %7070 = vmatpush1.bf16.msra.mxu1 %v12404_v31  ;;  %7030 = vmatprep.subr.bf16.mxu0 %v12467_v32  ;;  %v562_v31 = vld [vmem:[#allocation9 + $0x630] sm:$0xff] }
 0x2be   :  { %7071 = vmatprep.subr.bf16.mxu1 %v12469_v33  ;;  %v594_v32 = vld [vmem:[#allocation9 + $0x730] sm:$0xff]  ;;  %v563_v33 = vld [vmem:[#allocation9 + $0x638] sm:$0xff] }
 0x2bf   :  { %v11959_v37 = vcombine.high %v562_v31, %v594_v32  ;;  %v11958_v45 = vcombine.low %v562_v31, %v594_v32  ;;  %v11960_v24 = vcombine.low %v563_v33, %v595_v34  ;;  %v1043_v31 = vld [vmem:[#allocation9 + $0x1538] sm:$0xff] }
 0x2c0   :  { %7031 = vmatpush1.bf16.msra.mxu0 %v12466_v38  ;;  %v11961_v38 = vcombine.high %v563_v33, %v595_v34  ;;  %v12344_v33 = vcombine.low %v947_v19, %v979_v20 }
 0x2c1   :  { %7072 = vmatpush1.bf16.msra.mxu1 %v12468_v39  ;;  %7032 = vmatprep.subr.bf16.mxu0 %v12531_v40  ;;  %v626_v39 = vld [vmem:[#allocation9 + $0x830] sm:$0xff] }
 0x2c2   :  { %7073 = vmatprep.subr.bf16.mxu1 %v12533_v41  ;;  %v658_v40 = vld [vmem:[#allocation9 + $0x930] sm:$0xff]  ;;  %v627_v41 = vld [vmem:[#allocation9 + $0x838] sm:$0xff] }
 0x2c3   :  { %v12023_v27 = vcombine.high %v626_v39, %v658_v40  ;;  %v12022_v51 = vcombine.low %v626_v39, %v658_v40  ;;  %v12024_v52 = vcombine.low %v627_v41, %v659_v42  ;;  %v1107_v39 = vld [vmem:[#allocation9 + $0x1738] sm:$0xff] }
 0x2c4   :  { %7033 = vmatpush1.bf16.msra.mxu0 %v12530_v30  ;;  %v12025_v30 = vcombine.high %v627_v41, %v659_v42 }
 0x2c5   :  { %7074 = vmatpush1.bf16.msra.mxu1 %v12532_v47  ;;  %7034 = vmatprep.subr.bf16.mxu0 %v12595_v48  ;;  %v690_v47 = vld [vmem:[#allocation9 + $0xa30] sm:$0xff] }
 0x2c6   :  { %7075 = vmatprep.subr.bf16.mxu1 %v12597_v49  ;;  %v722_v48 = vld [vmem:[#allocation9 + $0xb30] sm:$0xff]  ;;  %v691_v49 = vld [vmem:[#allocation9 + $0xa38] sm:$0xff] }
 0x2c7   :  { %v12087_v53 = vcombine.high %v690_v47, %v722_v48  ;;  %v12086_v59 = vcombine.low %v690_v47, %v722_v48  ;;  %v12088_v62 = vcombine.low %v691_v49, %v723_v50  ;;  %v1171_v47 = vld [vmem:[#allocation9 + $0x1938] sm:$0xff] }
 0x2c8   :  { %7035 = vmatpush1.bf16.msra.mxu0 %v12594_v54  ;;  %v12089_v54 = vcombine.high %v691_v49, %v723_v50 }
 0x2c9   :  { %7076 = vmatpush1.bf16.msra.mxu1 %v12596_v55  ;;  %7036 = vmatprep.subr.bf16.mxu0 %v12659_v56  ;;  %v754_v55 = vld [vmem:[#allocation9 + $0xc30] sm:$0xff] }
 0x2ca   :  { %7077 = vmatprep.subr.bf16.mxu1 %v12661_v57  ;;  %v786_v56 = vld [vmem:[#allocation9 + $0xd30] sm:$0xff]  ;;  %v755_v57 = vld [vmem:[#allocation9 + $0xc38] sm:$0xff] }
 0x2cb   :  { %v12151_v63 = vcombine.high %v754_v55, %v786_v56  ;;  %v12150_v5 = vcombine.low %v754_v55, %v786_v56  ;;  %v12152_v6 = vcombine.low %v755_v57, %v787_v58  ;;  %v1235_v55 = vld [vmem:[#allocation9 + $0x1b38] sm:$0xff] }
 0x2cc   :  { %7037 = vmatpush1.bf16.msra.mxu0 %v12658_v0  ;;  %v12153_v0 = vcombine.high %v755_v57, %v787_v58 }
 0x2cd   :  { %7078 = vmatpush1.bf16.msra.mxu1 %v12660_v1  ;;  %7038 = vmatprep.subr.bf16.mxu0 %v12723_v2  ;;  %v818_v1 = vld [vmem:[#allocation9 + $0xe30] sm:$0xff] }
 0x2ce   :  { %7079 = vmatprep.subr.bf16.mxu1 %v12725_v3  ;;  %v850_v2 = vld [vmem:[#allocation9 + $0xf30] sm:$0xff]  ;;  %v819_v3 = vld [vmem:[#allocation9 + $0xe38] sm:$0xff] }
 0x2cf   :  { %v12215_v7 = vcombine.high %v818_v1, %v850_v2  ;;  %v12214_v13 = vcombine.low %v818_v1, %v850_v2  ;;  %v1299_v1 = vld [vmem:[#allocation9 + $0x1d38] sm:$0xff] }
 0x2d0   :  { %7039 = vmatpush1.bf16.msra.mxu0 %v12722_v8  ;;  %v12217_v8 = vcombine.high %v819_v3, %v851_v4 }
 0x2d1   :  { %7080 = vmatpush1.bf16.msra.mxu1 %v12724_v9  ;;  %7090 = vmatprep.subr.bf16.mxu0 %v11767_v10  ;;  %v882_v9 = vld [vmem:[#allocation9 + $0x1030] sm:$0xff] }
 0x2d2   :  { %7131 = vmatprep.subr.bf16.mxu1 %v11769_v11  ;;  %v914_v10 = vld [vmem:[#allocation9 + $0x1130] sm:$0xff]  ;;  %v883_v11 = vld [vmem:[#allocation9 + $0x1038] sm:$0xff] }
 0x2d3   :  { %7041 = vmatmul.mubr.bf16.vlgmr.msra.gmra.mrb[12].mxu0 %v14995_v61  ;;  %v12279_v15 = vcombine.high %v882_v9, %v914_v10  ;;  %v12281_v16 = vcombine.high %v883_v11, %v915_v12  ;;  %v12280_v22 = vcombine.low %v883_v11, %v915_v12 }
 0x2d4   :  { %7082 = vmatmul.mubr.bf16.vlgmr.msra.gmra.mrb[12].mxu1 %v14995_v61  ;;  %7091 = vmatpush1.bf16.msra.mxu0 %v11766_v14  ;;  %v12216_v14 = vcombine.low %v819_v3, %v851_v4 }
 0x2d5   :  { %7122 = vmatprep.mubr.bf16.mxu0 %v14993_v60  ;;  %7132 = vmatpush1.bf16.msra.mxu1 %v11768_v17  ;;  %v946_v17 = vld [vmem:[#allocation9 + $0x1230] sm:$0xff] }
 0x2d6   :  { %7163 = vmatprep.mubr.bf16.mxu1 %v14993_v60  ;;  %7092 = vmatprep.subr.bf16.mxu0 %v11831_v18  ;;  %v978_v18 = vld [vmem:[#allocation9 + $0x1330] sm:$0xff] }
 0x2d7   :  { %7133 = vmatprep.subr.bf16.mxu1 %v11833_v21  ;;  %v12278_v21 = vcombine.low %v882_v9, %v914_v10  ;;  %v12343_v23 = vcombine.high %v946_v17, %v978_v18  ;;  %v12342_v32 = vcombine.low %v946_v17, %v978_v18  ;;  %v1363_v9 = vld [vmem:[#allocation9 + $0x1f38] sm:$0xff]  ;;  %v405_v17 = vld [vmem:[#allocation9 + $0x148] sm:$0xff] }
 0x2d8   :  { %7093 = vmatpush1.bf16.msra.mxu0 %v11830_v25  ;;  %v12345_v25 = vcombine.high %v947_v19, %v979_v20 }
 0x2d9   :  { %7134 = vmatpush1.bf16.msra.mxu1 %v11832_v26  ;;  %7094 = vmatprep.subr.bf16.mxu0 %v11895_v28  ;;  %v1010_v26 = vld [vmem:[#allocation9 + $0x1430] sm:$0xff] }
 0x2da   :  { %7135 = vmatprep.subr.bf16.mxu1 %v11897_v29  ;;  %v1042_v28 = vld [vmem:[#allocation9 + $0x1530] sm:$0xff]  ;;  %v1011_v29 = vld [vmem:[#allocation9 + $0x1438] sm:$0xff] }
 0x2db   :  { %v12407_v34 = vcombine.high %v1010_v26, %v1042_v28  ;;  %v12406_v40 = vcombine.low %v1010_v26, %v1042_v28  ;;  %v12408_v41 = vcombine.low %v1011_v29, %v1043_v31  ;;  %v437_v26 = vld [vmem:[#allocation9 + $0x248] sm:$0xff] }
 0x2dc   :  { %7095 = vmatpush1.bf16.msra.mxu0 %v11894_v35  ;;  %v12409_v35 = vcombine.high %v1011_v29, %v1043_v31  ;;  %v469_v28 = vld [vmem:[#allocation9 + $0x348] sm:$0xff] }
 0x2dd   :  { %7136 = vmatpush1.bf16.msra.mxu1 %v11896_v36  ;;  %7096 = vmatprep.subr.bf16.mxu0 %v11959_v37  ;;  %v1074_v36 = vld [vmem:[#allocation9 + $0x1630] sm:$0xff] }
 0x2de   :  { %7137 = vmatprep.subr.bf16.mxu1 %v11961_v38  ;;  %v1106_v37 = vld [vmem:[#allocation9 + $0x1730] sm:$0xff]  ;;  %v1075_v38 = vld [vmem:[#allocation9 + $0x1638] sm:$0xff] }
 0x2df   :  { %v12471_v42 = vcombine.high %v1074_v36, %v1106_v37  ;;  %v12470_v48 = vcombine.low %v1074_v36, %v1106_v37  ;;  %v12472_v49 = vcombine.low %v1075_v38, %v1107_v39  ;;  %v533_v36 = vld [vmem:[#allocation9 + $0x548] sm:$0xff] }
 0x2e0   :  { %7097 = vmatpush1.bf16.msra.mxu0 %v11958_v45  ;;  %v12473_v45 = vcombine.high %v1075_v38, %v1107_v39  ;;  %v11836_v38 = vcombine.low %v437_v26, %v469_v28 }
 0x2e1   :  { %7138 = vmatpush1.bf16.msra.mxu1 %v11960_v24  ;;  %7098 = vmatprep.subr.bf16.mxu0 %v12023_v27  ;;  %v1138_v24 = vld [vmem:[#allocation9 + $0x1830] sm:$0xff] }
 0x2e2   :  { %7139 = vmatprep.subr.bf16.mxu1 %v12025_v30  ;;  %v1170_v27 = vld [vmem:[#allocation9 + $0x1930] sm:$0xff]  ;;  %v1139_v30 = vld [vmem:[#allocation9 + $0x1838] sm:$0xff] }
 0x2e3   :  { %v12535_v50 = vcombine.high %v1138_v24, %v1170_v27  ;;  %v12534_v56 = vcombine.low %v1138_v24, %v1170_v27  ;;  %v12536_v57 = vcombine.low %v1139_v30, %v1171_v47  ;;  %v597_v24 = vld [vmem:[#allocation9 + $0x748] sm:$0xff] }
 0x2e4   :  { %7099 = vmatpush1.bf16.msra.mxu0 %v12022_v51  ;;  %v12537_v51 = vcombine.high %v1139_v30, %v1171_v47 }
 0x2e5   :  { %7140 = vmatpush1.bf16.msra.mxu1 %v12024_v52  ;;  %7100 = vmatprep.subr.bf16.mxu0 %v12087_v53  ;;  %v1202_v52 = vld [vmem:[#allocation9 + $0x1a30] sm:$0xff] }
 0x2e6   :  { %7141 = vmatprep.subr.bf16.mxu1 %v12089_v54  ;;  %v1234_v53 = vld [vmem:[#allocation9 + $0x1b30] sm:$0xff]  ;;  %v1203_v54 = vld [vmem:[#allocation9 + $0x1a38] sm:$0xff] }
 0x2e7   :  { %v12599_v58 = vcombine.high %v1202_v52, %v1234_v53  ;;  %v12598_v2 = vcombine.low %v1202_v52, %v1234_v53  ;;  %v12600_v3 = vcombine.low %v1203_v54, %v1235_v55  ;;  %v661_v52 = vld [vmem:[#allocation9 + $0x948] sm:$0xff] }
 0x2e8   :  { %7101 = vmatpush1.bf16.msra.mxu0 %v12086_v59  ;;  %v12601_v59 = vcombine.high %v1203_v54, %v1235_v55 }
 0x2e9   :  { %7142 = vmatpush1.bf16.msra.mxu1 %v12088_v62  ;;  %7102 = vmatprep.subr.bf16.mxu0 %v12151_v63  ;;  %v1266_v62 = vld [vmem:[#allocation9 + $0x1c30] sm:$0xff] }
 0x2ea   :  { %7143 = vmatprep.subr.bf16.mxu1 %v12153_v0  ;;  %v1298_v63 = vld [vmem:[#allocation9 + $0x1d30] sm:$0xff]  ;;  %v1267_v0 = vld [vmem:[#allocation9 + $0x1c38] sm:$0xff] }
 0x2eb   :  { %v12663_v4 = vcombine.high %v1266_v62, %v1298_v63  ;;  %v12662_v10 = vcombine.low %v1266_v62, %v1298_v63  ;;  %v12664_v11 = vcombine.low %v1267_v0, %v1299_v1  ;;  %v725_v62 = vld [vmem:[#allocation9 + $0xb48] sm:$0xff] }
 0x2ec   :  { %7103 = vmatpush1.bf16.msra.mxu0 %v12150_v5  ;;  %v12665_v5 = vcombine.high %v1267_v0, %v1299_v1 }
 0x2ed   :  { %7144 = vmatpush1.bf16.msra.mxu1 %v12152_v6  ;;  %7104 = vmatprep.subr.bf16.mxu0 %v12215_v7  ;;  %v1330_v6 = vld [vmem:[#allocation9 + $0x1e30] sm:$0xff] }
 0x2ee   :  { %7145 = vmatprep.subr.bf16.mxu1 %v12217_v8  ;;  %v1362_v7 = vld [vmem:[#allocation9 + $0x1f30] sm:$0xff]  ;;  %v1331_v8 = vld [vmem:[#allocation9 + $0x1e38] sm:$0xff] }
 0x2ef   :  { %v12727_v12 = vcombine.high %v1330_v6, %v1362_v7  ;;  %v12726_v18 = vcombine.low %v1330_v6, %v1362_v7  ;;  %v12728_v19 = vcombine.low %v1331_v8, %v1363_v9  ;;  %v789_v6 = vld [vmem:[#allocation9 + $0xd48] sm:$0xff] }
 0x2f0   :  { %7105 = vmatpush1.bf16.msra.mxu0 %v12214_v13  ;;  %v12729_v13 = vcombine.high %v1331_v8, %v1363_v9 }
 0x2f1   :  { %7146 = vmatpush1.bf16.msra.mxu1 %v12216_v14  ;;  %7106 = vmatprep.subr.bf16.mxu0 %v12279_v15  ;;  %v372_v14 = vld [vmem:[#allocation9 + $0x40] sm:$0xff] }
 0x2f2   :  { %7147 = vmatprep.subr.bf16.mxu1 %v12281_v16  ;;  %v404_v15 = vld [vmem:[#allocation9 + $0x140] sm:$0xff]  ;;  %v373_v16 = vld [vmem:[#allocation9 + $0x48] sm:$0xff] }
 0x2f3   :  { %v11771_v20 = vcombine.high %v372_v14, %v404_v15  ;;  %v11772_v29 = vcombine.low %v373_v16, %v405_v17 }
 0x2f4   :  { %7107 = vmatpush1.bf16.msra.mxu0 %v12278_v21  ;;  %v11773_v21 = vcombine.high %v373_v16, %v405_v17  ;;  %v821_v17 = vld [vmem:[#allocation9 + $0xe48] sm:$0xff] }
 0x2f5   :  { %7148 = vmatpush1.bf16.msra.mxu1 %v12280_v22  ;;  %7108 = vmatprep.subr.bf16.mxu0 %v12343_v23  ;;  %v436_v22 = vld [vmem:[#allocation9 + $0x240] sm:$0xff] }
 0x2f6   :  { %7149 = vmatprep.subr.bf16.mxu1 %v12345_v25  ;;  %v468_v23 = vld [vmem:[#allocation9 + $0x340] sm:$0xff]  ;;  %v11770_v25 = vcombine.low %v372_v14, %v404_v15 }
 0x2f7   :  { %v11835_v31 = vcombine.high %v436_v22, %v468_v23  ;;  %v11834_v37 = vcombine.low %v436_v22, %v468_v23  ;;  %v852_v14 = vld [vmem:[#allocation9 + $0xf40] sm:$0xff] }
 0x2f8   :  { %7109 = vmatpush1.bf16.msra.mxu0 %v12342_v32  ;;  %v500_v32 = vld [vmem:[#allocation9 + $0x440] sm:$0xff] }
 0x2f9   :  { %7150 = vmatpush1.bf16.msra.mxu1 %v12344_v33  ;;  %7110 = vmatprep.subr.bf16.mxu0 %v12407_v34  ;;  %v532_v33 = vld [vmem:[#allocation9 + $0x540] sm:$0xff]  ;;  %v11837_v34 = vcombine.high %v437_v26, %v469_v28 }
 0x2fa   :  { %7151 = vmatprep.subr.bf16.mxu1 %v12409_v35  ;;  %v501_v35 = vld [vmem:[#allocation9 + $0x448] sm:$0xff]  ;;  %v11899_v39 = vcombine.high %v500_v32, %v532_v33  ;;  %v11898_v27 = vcombine.low %v500_v32, %v532_v33  ;;  %v884_v26 = vld [vmem:[#allocation9 + $0x1040] sm:$0xff] }
 0x2fb   :  { %v11900_v30 = vcombine.low %v501_v35, %v533_v36  ;;  %v916_v28 = vld [vmem:[#allocation9 + $0x1140] sm:$0xff]  ;;  %v885_v32 = vld [vmem:[#allocation9 + $0x1048] sm:$0xff] }
 0x2fc   :  { %7111 = vmatpush1.bf16.msra.mxu0 %v12406_v40  ;;  %v11901_v40 = vcombine.high %v501_v35, %v533_v36  ;;  %v917_v33 = vld [vmem:[#allocation9 + $0x1148] sm:$0xff]  ;;  %v12283_v36 = vcombine.high %v884_v26, %v916_v28 }
 0x2fd   :  { %7152 = vmatpush1.bf16.msra.mxu1 %v12408_v41  ;;  %7112 = vmatprep.subr.bf16.mxu0 %v12471_v42  ;;  %v564_v41 = vld [vmem:[#allocation9 + $0x640] sm:$0xff] }
 0x2fe   :  { %7153 = vmatprep.subr.bf16.mxu1 %v12473_v45  ;;  %v596_v42 = vld [vmem:[#allocation9 + $0x740] sm:$0xff]  ;;  %v565_v45 = vld [vmem:[#allocation9 + $0x648] sm:$0xff] }
 0x2ff   :  { %v11963_v47 = vcombine.high %v564_v41, %v596_v42  ;;  %v11962_v53 = vcombine.low %v564_v41, %v596_v42  ;;  %v11964_v54 = vcombine.low %v565_v45, %v597_v24  ;;  %v981_v41 = vld [vmem:[#allocation9 + $0x1348] sm:$0xff]  ;;  %v12282_v42 = vcombine.low %v884_v26, %v916_v28 }
 0x300   :  { %7113 = vmatpush1.bf16.msra.mxu0 %v12470_v48  ;;  %v11965_v48 = vcombine.high %v565_v45, %v597_v24  ;;  %v12284_v45 = vcombine.low %v885_v32, %v917_v33 }
 0x301   :  { %7154 = vmatpush1.bf16.msra.mxu1 %v12472_v49  ;;  %7114 = vmatprep.subr.bf16.mxu0 %v12535_v50  ;;  %v628_v49 = vld [vmem:[#allocation9 + $0x840] sm:$0xff] }
 0x302   :  { %7155 = vmatprep.subr.bf16.mxu1 %v12537_v51  ;;  %v660_v50 = vld [vmem:[#allocation9 + $0x940] sm:$0xff]  ;;  %v629_v51 = vld [vmem:[#allocation9 + $0x848] sm:$0xff] }
 0x303   :  { %v12027_v55 = vcombine.high %v628_v49, %v660_v50  ;;  %v12026_v63 = vcombine.low %v628_v49, %v660_v50  ;;  %v12028_v0 = vcombine.low %v629_v51, %v661_v52  ;;  %v1045_v49 = vld [vmem:[#allocation9 + $0x1548] sm:$0xff] }
 0x304   :  { %7115 = vmatpush1.bf16.msra.mxu0 %v12534_v56  ;;  %v12029_v56 = vcombine.high %v629_v51, %v661_v52 }
 0x305   :  { %7156 = vmatpush1.bf16.msra.mxu1 %v12536_v57  ;;  %7116 = vmatprep.subr.bf16.mxu0 %v12599_v58  ;;  %v692_v57 = vld [vmem:[#allocation9 + $0xa40] sm:$0xff] }
 0x306   :  { %7157 = vmatprep.subr.bf16.mxu1 %v12601_v59  ;;  %v724_v58 = vld [vmem:[#allocation9 + $0xb40] sm:$0xff]  ;;  %v693_v59 = vld [vmem:[#allocation9 + $0xa48] sm:$0xff] }
 0x307   :  { %v12091_v1 = vcombine.high %v692_v57, %v724_v58  ;;  %v12090_v7 = vcombine.low %v692_v57, %v724_v58  ;;  %v12092_v8 = vcombine.low %v693_v59, %v725_v62  ;;  %v1109_v57 = vld [vmem:[#allocation9 + $0x1748] sm:$0xff] }
 0x308   :  { %7117 = vmatpush1.bf16.msra.mxu0 %v12598_v2  ;;  %v12093_v2 = vcombine.high %v693_v59, %v725_v62 }
 0x309   :  { %7158 = vmatpush1.bf16.msra.mxu1 %v12600_v3  ;;  %7118 = vmatprep.subr.bf16.mxu0 %v12663_v4  ;;  %v756_v3 = vld [vmem:[#allocation9 + $0xc40] sm:$0xff] }
 0x30a   :  { %7159 = vmatprep.subr.bf16.mxu1 %v12665_v5  ;;  %v788_v4 = vld [vmem:[#allocation9 + $0xd40] sm:$0xff]  ;;  %v757_v5 = vld [vmem:[#allocation9 + $0xc48] sm:$0xff] }
 0x30b   :  { %v12155_v9 = vcombine.high %v756_v3, %v788_v4  ;;  %v12156_v22 = vcombine.low %v757_v5, %v789_v6 }
 0x30c   :  { %7119 = vmatpush1.bf16.msra.mxu0 %v12662_v10 }
 0x30d   :  { %7160 = vmatpush1.bf16.msra.mxu1 %v12664_v11  ;;  %7120 = vmatprep.subr.bf16.mxu0 %v12727_v12  ;;  %v12157_v12 = vcombine.high %v757_v5, %v789_v6 }
 0x30e   :  { %7161 = vmatprep.subr.bf16.mxu1 %v12729_v13  ;;  %v820_v13 = vld [vmem:[#allocation9 + $0xe40] sm:$0xff] }
 0x30f   :  { %v12219_v23 = vcombine.high %v820_v13, %v852_v14 }
 0x310   :  { %7121 = vmatpush1.bf16.msra.mxu0 %v12726_v18  ;;  %v853_v18 = vld [vmem:[#allocation9 + $0xf48] sm:$0xff] }
 0x311   :  { %7162 = vmatpush1.bf16.msra.mxu1 %v12728_v19  ;;  %7172 = vmatprep.subr.bf16.mxu0 %v11771_v20  ;;  %v12220_v35 = vcombine.low %v821_v17, %v853_v18 }
 0x312   :  { %7213 = vmatprep.subr.bf16.mxu1 %v11773_v21  ;;  %v12154_v21 = vcombine.low %v756_v3, %v788_v4  ;;  %v1173_v3 = vld [vmem:[#allocation9 + $0x1948] sm:$0xff] }
 0x313   :  { %7123 = vmatmul.mubr.bf16.vlgmr.msra.gmra.mrb[16].mxu0 %v14995_v61 }
 0x314   :  { %7164 = vmatmul.mubr.bf16.vlgmr.msra.gmra.mrb[16].mxu1 %v14995_v61  ;;  %7173 = vmatpush1.bf16.msra.mxu0 %v11770_v25  ;;  %v12221_v25 = vcombine.high %v821_v17, %v853_v18 }
 0x315   :  { %7204 = vmatprep.mubr.bf16.mxu0 %v14993_v60  ;;  %7214 = vmatpush1.bf16.msra.mxu1 %v11772_v29 }
 0x316   :  { %7245 = vmatprep.mubr.bf16.mxu1 %v14993_v60  ;;  %7174 = vmatprep.subr.bf16.mxu0 %v11835_v31 }
 0x317   :  { %7215 = vmatprep.subr.bf16.mxu1 %v11837_v34  ;;  %v12218_v34 = vcombine.low %v820_v13, %v852_v14  ;;  %v1237_v13 = vld [vmem:[#allocation9 + $0x1b48] sm:$0xff] }
 0x318   :  { %7175 = vmatpush1.bf16.msra.mxu0 %v11834_v37  ;;  %v12285_v37 = vcombine.high %v885_v32, %v917_v33  ;;  %v1364_v32 = vld [vmem:[#allocation9 + $0x1f40] sm:$0xff]  ;;  %v1333_v33 = vld [vmem:[#allocation9 + $0x1e48] sm:$0xff] }
 0x319   :  { %7216 = vmatpush1.bf16.msra.mxu1 %v11836_v38  ;;  %7176 = vmatprep.subr.bf16.mxu0 %v11899_v39  ;;  %v948_v38 = vld [vmem:[#allocation9 + $0x1240] sm:$0xff] }
 0x31a   :  { %7217 = vmatprep.subr.bf16.mxu1 %v11901_v40  ;;  %v980_v39 = vld [vmem:[#allocation9 + $0x1340] sm:$0xff]  ;;  %v949_v40 = vld [vmem:[#allocation9 + $0x1248] sm:$0xff] }
 0x31b   :  { %v12347_v24 = vcombine.high %v948_v38, %v980_v39  ;;  %v12346_v50 = vcombine.low %v948_v38, %v980_v39  ;;  %v12348_v51 = vcombine.low %v949_v40, %v981_v41  ;;  %v374_v39 = vld [vmem:[#allocation9 + $0x50] sm:$0xff] }
 0x31c   :  { %7177 = vmatpush1.bf16.msra.mxu0 %v11898_v27  ;;  %v12349_v27 = vcombine.high %v949_v40, %v981_v41  ;;  %v406_v40 = vld [vmem:[#allocation9 + $0x150] sm:$0xff]  ;;  %v375_v41 = vld [vmem:[#allocation9 + $0x58] sm:$0xff] }
 0x31d   :  { %7218 = vmatpush1.bf16.msra.mxu1 %v11900_v30  ;;  %7178 = vmatprep.subr.bf16.mxu0 %v11963_v47  ;;  %v1012_v30 = vld [vmem:[#allocation9 + $0x1440] sm:$0xff] }
 0x31e   :  { %7219 = vmatprep.subr.bf16.mxu1 %v11965_v48  ;;  %v1044_v47 = vld [vmem:[#allocation9 + $0x1540] sm:$0xff]  ;;  %v1013_v48 = vld [vmem:[#allocation9 + $0x1448] sm:$0xff] }
 0x31f   :  { %v12411_v52 = vcombine.high %v1012_v30, %v1044_v47  ;;  %v12410_v58 = vcombine.low %v1012_v30, %v1044_v47  ;;  %v12412_v59 = vcombine.low %v1013_v48, %v1045_v49  ;;  %v438_v47 = vld [vmem:[#allocation9 + $0x250] sm:$0xff] }
 0x320   :  { %7179 = vmatpush1.bf16.msra.mxu0 %v11962_v53  ;;  %v12413_v53 = vcombine.high %v1013_v48, %v1045_v49  ;;  %v470_v48 = vld [vmem:[#allocation9 + $0x350] sm:$0xff]  ;;  %v11774_v49 = vcombine.low %v374_v39, %v406_v40 }
 0x321   :  { %7220 = vmatpush1.bf16.msra.mxu1 %v11964_v54  ;;  %7180 = vmatprep.subr.bf16.mxu0 %v12027_v55  ;;  %v1076_v54 = vld [vmem:[#allocation9 + $0x1640] sm:$0xff] }
 0x322   :  { %7221 = vmatprep.subr.bf16.mxu1 %v12029_v56  ;;  %v1108_v55 = vld [vmem:[#allocation9 + $0x1740] sm:$0xff]  ;;  %v1077_v56 = vld [vmem:[#allocation9 + $0x1648] sm:$0xff] }
 0x323   :  { %v12475_v62 = vcombine.high %v1076_v54, %v1108_v55  ;;  %v12474_v4 = vcombine.low %v1076_v54, %v1108_v55  ;;  %v12476_v5 = vcombine.low %v1077_v56, %v1109_v57  ;;  %v502_v54 = vld [vmem:[#allocation9 + $0x450] sm:$0xff] }
 0x324   :  { %7181 = vmatpush1.bf16.msra.mxu0 %v12026_v63  ;;  %v12477_v63 = vcombine.high %v1077_v56, %v1109_v57  ;;  %v534_v55 = vld [vmem:[#allocation9 + $0x550] sm:$0xff]  ;;  %v503_v57 = vld [vmem:[#allocation9 + $0x458] sm:$0xff] }
 0x325   :  { %7222 = vmatpush1.bf16.msra.mxu1 %v12028_v0  ;;  %7182 = vmatprep.subr.bf16.mxu0 %v12091_v1  ;;  %v1140_v0 = vld [vmem:[#allocation9 + $0x1840] sm:$0xff] }
 0x326   :  { %v15015_v10 = vpop.f32.mrb[4].mxu0  ;;  %v15017_v11 = vpop.f32.mrb[4].mxu1  ;;  %7223 = vmatprep.subr.bf16.mxu1 %v12093_v2  ;;  %v1172_v1 = vld [vmem:[#allocation9 + $0x1940] sm:$0xff]  ;;  %v1141_v2 = vld [vmem:[#allocation9 + $0x1848] sm:$0xff] }
 0x327   :  { %v15019_v15 = vpop.f32.mrb[5].mxu0  ;;  %v15021_v16 = vpop.f32.mrb[5].mxu1  ;;  %v12539_v6 = vcombine.high %v1140_v0, %v1172_v1  ;;  %v12538_v14 = vcombine.low %v1140_v0, %v1172_v1  ;;  %v12540_v17 = vcombine.low %v1141_v2, %v1173_v3  ;;  %v566_v1 = vld [vmem:[#allocation9 + $0x650] sm:$0xff] }
 0x328   :  { %7183 = vmatpush1.bf16.msra.mxu0 %v12090_v7  ;;  %v6882_v19 = vpop.f32.mrb[6].mxu0  ;;  %v6923_v20 = vpop.f32.mrb[6].mxu1  ;;  %v12541_v7 = vcombine.high %v1141_v2, %v1173_v3  ;;  %v598_v2 = vld [vmem:[#allocation9 + $0x750] sm:$0xff]  ;;  %v567_v3 = vld [vmem:[#allocation9 + $0x658] sm:$0xff] }
 0x329   :  { %7224 = vmatpush1.bf16.msra.mxu1 %v12092_v8  ;;  %7184 = vmatprep.subr.bf16.mxu0 %v12155_v9  ;;  %v6883_v29 = vpop.f32.mrb[7].mxu0  ;;  %v6924_v31 = vpop.f32.mrb[7].mxu1  ;;  %v1204_v8 = vld [vmem:[#allocation9 + $0x1a40] sm:$0xff] }
 0x32a   :  { %7225 = vmatprep.subr.bf16.mxu1 %v12157_v12  ;;  %v1236_v9 = vld [vmem:[#allocation9 + $0x1b40] sm:$0xff]  ;;  %v1205_v12 = vld [vmem:[#allocation9 + $0x1a48] sm:$0xff] }
 0x32b   :  { %v12603_v18 = vcombine.high %v1204_v8, %v1236_v9  ;;  %v12605_v19 = vcombine.high %v1205_v12, %v1237_v13  ;;  %v1268_v20 = vld [vmem:[#allocation9 + $0x1c40] sm:$0xff]  ;;  %v12604_v26 = vcombine.low %v1205_v12, %v1237_v13  ;;  %v662_v12 = vld [vmem:[#allocation9 + $0x950] sm:$0xff]  ;;  %v631_v13 = vld [vmem:[#allocation9 + $0x858] sm:$0xff] }
 0x32c   :  { %7185 = vmatpush1.bf16.msra.mxu0 %v12154_v21  ;;  %v1300_v21 = vld [vmem:[#allocation9 + $0x1d40] sm:$0xff] }
 0x32d   :  { %7226 = vmatpush1.bf16.msra.mxu1 %v12156_v22  ;;  %7186 = vmatprep.subr.bf16.mxu0 %v12219_v23  ;;  %v1269_v22 = vld [vmem:[#allocation9 + $0x1c48] sm:$0xff]  ;;  %v12667_v28 = vcombine.high %v1268_v20, %v1300_v21  ;;  %v1332_v31 = vld [vmem:[#allocation9 + $0x1e40] sm:$0xff] }
 0x32e   :  { %7227 = vmatprep.subr.bf16.mxu1 %v12221_v25  ;;  %v1301_v23 = vld [vmem:[#allocation9 + $0x1d48] sm:$0xff]  ;;  %v12602_v25 = vcombine.low %v1204_v8, %v1236_v9  ;;  %v630_v9 = vld [vmem:[#allocation9 + $0x850] sm:$0xff] }
 0x32f   :  { %v12669_v29 = vcombine.high %v1269_v22, %v1301_v23 }
 0x330   :  { %7187 = vmatpush1.bf16.msra.mxu0 %v12218_v34  ;;  %v1365_v34 = vld [vmem:[#allocation9 + $0x1f48] sm:$0xff] }
 0x331   :  { %7228 = vmatpush1.bf16.msra.mxu1 %v12220_v35  ;;  %7188 = vmatprep.subr.bf16.mxu0 %v12283_v36  ;;  %v12666_v35 = vcombine.low %v1268_v20, %v1300_v21  ;;  %v12668_v36 = vcombine.low %v1269_v22, %v1301_v23  ;;  %v12733_v38 = vcombine.high %v1333_v33, %v1365_v34  ;;  %v694_v21 = vld [vmem:[#allocation9 + $0xa50] sm:$0xff]  ;;  %v695_v23 = vld [vmem:[#allocation9 + $0xa58] sm:$0xff] }
 0x332   :  { %7229 = vmatprep.subr.bf16.mxu1 %v12285_v37  ;;  %v12731_v37 = vcombine.high %v1332_v31, %v1364_v32  ;;  %v726_v22 = vld [vmem:[#allocation9 + $0xb50] sm:$0xff] }
 0x334   :  { %7189 = vmatpush1.bf16.msra.mxu0 %v12282_v42  ;;  %v407_v42 = vld [vmem:[#allocation9 + $0x158] sm:$0xff] }
 0x335   :  { %7230 = vmatpush1.bf16.msra.mxu1 %v12284_v45  ;;  %7190 = vmatprep.subr.bf16.mxu0 %v12347_v24  ;;  %v12730_v45 = vcombine.low %v1332_v31, %v1364_v32  ;;  %v12732_v24 = vcombine.low %v1333_v33, %v1365_v34  ;;  %v11777_v30 = vcombine.high %v375_v41, %v407_v42  ;;  %v758_v32 = vld [vmem:[#allocation9 + $0xc50] sm:$0xff]  ;;  %v759_v34 = vld [vmem:[#allocation9 + $0xc58] sm:$0xff] }
 0x336   :  { %7231 = vmatprep.subr.bf16.mxu1 %v12349_v27  ;;  %v11775_v27 = vcombine.high %v374_v39, %v406_v40  ;;  %v790_v33 = vld [vmem:[#allocation9 + $0xd50] sm:$0xff] }
 0x338   :  { %7191 = vmatpush1.bf16.msra.mxu0 %v12346_v50  ;;  %v439_v50 = vld [vmem:[#allocation9 + $0x258] sm:$0xff] }
 0x339   :  { %7232 = vmatpush1.bf16.msra.mxu1 %v12348_v51  ;;  %7192 = vmatprep.subr.bf16.mxu0 %v12411_v52  ;;  %v471_v51 = vld [vmem:[#allocation9 + $0x358] sm:$0xff]  ;;  %v11776_v52 = vcombine.low %v375_v41, %v407_v42  ;;  %v822_v42 = vld [vmem:[#allocation9 + $0xe50] sm:$0xff] }
 0x33a   :  { %7233 = vmatprep.subr.bf16.mxu1 %v12413_v53  ;;  %v11839_v53 = vcombine.high %v438_v47, %v470_v48  ;;  %v11841_v56 = vcombine.high %v439_v50, %v471_v51 }
 0x33c   :  { %7193 = vmatpush1.bf16.msra.mxu0 %v12410_v58  ;;  %v535_v58 = vld [vmem:[#allocation9 + $0x558] sm:$0xff] }
 0x33d   :  { %7234 = vmatpush1.bf16.msra.mxu1 %v12412_v59  ;;  %7194 = vmatprep.subr.bf16.mxu0 %v12475_v62  ;;  %v11838_v59 = vcombine.low %v438_v47, %v470_v48  ;;  %v11840_v62 = vcombine.low %v439_v50, %v471_v51  ;;  %v11905_v0 = vcombine.high %v503_v57, %v535_v58  ;;  %v855_v47 = vld [vmem:[#allocation9 + $0xf58] sm:$0xff] }
 0x33e   :  { %7235 = vmatprep.subr.bf16.mxu1 %v12477_v63  ;;  %v11903_v63 = vcombine.high %v502_v54, %v534_v55  ;;  %v12158_v50 = vcombine.low %v758_v32, %v790_v33 }
 0x340   :  { %7195 = vmatpush1.bf16.msra.mxu0 %v12474_v4  ;;  %v599_v4 = vld [vmem:[#allocation9 + $0x758] sm:$0xff] }
 0x341   :  { %7236 = vmatpush1.bf16.msra.mxu1 %v12476_v5  ;;  %7196 = vmatprep.subr.bf16.mxu0 %v12539_v6  ;;  %v11902_v5 = vcombine.low %v502_v54, %v534_v55  ;;  %v11904_v6 = vcombine.low %v503_v57, %v535_v58  ;;  %v11969_v8 = vcombine.high %v567_v3, %v599_v4  ;;  %v886_v54 = vld [vmem:[#allocation9 + $0x1050] sm:$0xff]  ;;  %v887_v58 = vld [vmem:[#allocation9 + $0x1058] sm:$0xff] }
 0x342   :  { %7237 = vmatprep.subr.bf16.mxu1 %v12541_v7  ;;  %v11967_v7 = vcombine.high %v566_v1, %v598_v2  ;;  %v918_v55 = vld [vmem:[#allocation9 + $0x1150] sm:$0xff] }
 0x344   :  { %7197 = vmatpush1.bf16.msra.mxu0 %v12538_v14  ;;  %v663_v14 = vld [vmem:[#allocation9 + $0x958] sm:$0xff] }
 0x345   :  { %7238 = vmatpush1.bf16.msra.mxu1 %v12540_v17  ;;  %7198 = vmatprep.subr.bf16.mxu0 %v12603_v18  ;;  %v11966_v17 = vcombine.low %v566_v1, %v598_v2  ;;  %v11968_v18 = vcombine.low %v567_v3, %v599_v4  ;;  %v12033_v20 = vcombine.high %v631_v13, %v663_v14  ;;  %v950_v2 = vld [vmem:[#allocation9 + $0x1250] sm:$0xff]  ;;  %v951_v4 = vld [vmem:[#allocation9 + $0x1258] sm:$0xff] }
 0x346   :  { %7239 = vmatprep.subr.bf16.mxu1 %v12605_v19  ;;  %v12031_v19 = vcombine.high %v630_v9, %v662_v12  ;;  %v982_v3 = vld [vmem:[#allocation9 + $0x1350] sm:$0xff] }
 0x348   :  { %7199 = vmatpush1.bf16.msra.mxu0 %v12602_v25  ;;  %v727_v25 = vld [vmem:[#allocation9 + $0xb58] sm:$0xff] }
 0x349   :  { %7240 = vmatpush1.bf16.msra.mxu1 %v12604_v26  ;;  %7200 = vmatprep.subr.bf16.mxu0 %v12667_v28  ;;  %v12030_v26 = vcombine.low %v630_v9, %v662_v12  ;;  %v12032_v28 = vcombine.low %v631_v13, %v663_v14  ;;  %v12097_v31 = vcombine.high %v695_v23, %v727_v25  ;;  %v1014_v12 = vld [vmem:[#allocation9 + $0x1450] sm:$0xff]  ;;  %v1015_v14 = vld [vmem:[#allocation9 + $0x1458] sm:$0xff] }
 0x34a   :  { %7241 = vmatprep.subr.bf16.mxu1 %v12669_v29  ;;  %v12095_v29 = vcombine.high %v694_v21, %v726_v22  ;;  %v1046_v13 = vld [vmem:[#allocation9 + $0x1550] sm:$0xff] }
 0x34c   :  { %7201 = vmatpush1.bf16.msra.mxu0 %v12666_v35  ;;  %v791_v35 = vld [vmem:[#allocation9 + $0xd58] sm:$0xff] }
 0x34d   :  { %7242 = vmatpush1.bf16.msra.mxu1 %v12668_v36  ;;  %7202 = vmatprep.subr.bf16.mxu0 %v12731_v37  ;;  %v12094_v36 = vcombine.low %v694_v21, %v726_v22  ;;  %v12096_v37 = vcombine.low %v695_v23, %v727_v25  ;;  %v12161_v41 = vcombine.high %v759_v34, %v791_v35  ;;  %v1078_v22 = vld [vmem:[#allocation9 + $0x1650] sm:$0xff]  ;;  %v1079_v25 = vld [vmem:[#allocation9 + $0x1658] sm:$0xff] }
 0x34e   :  { %7243 = vmatprep.subr.bf16.mxu1 %v12733_v38  ;;  %v12159_v38 = vcombine.high %v758_v32, %v790_v33  ;;  %v12160_v51 = vcombine.low %v759_v34, %v791_v35  ;;  %v1110_v23 = vld [vmem:[#allocation9 + $0x1750] sm:$0xff]  ;;  %v1143_v35 = vld [vmem:[#allocation9 + $0x1858] sm:$0xff] }
 0x34f   :  { %v1142_v33 = vld [vmem:[#allocation9 + $0x1850] sm:$0xff] }
 0x350   :  { %7203 = vmatpush1.bf16.msra.mxu0 %v12730_v45  ;;  %v854_v45 = vld [vmem:[#allocation9 + $0xf50] sm:$0xff] }
 0x351   :  { %7244 = vmatpush1.bf16.msra.mxu1 %v12732_v24  ;;  %7254 = vmatprep.subr.bf16.mxu0 %v11775_v27  ;;  %v1174_v34 = vld [vmem:[#allocation9 + $0x1950] sm:$0xff] }
 0x352   :  { %7295 = vmatprep.subr.bf16.mxu1 %v11777_v30  ;;  %v823_v30 = vld [vmem:[#allocation9 + $0xe58] sm:$0xff] }
 0x353   :  { %7205 = vmatmul.mubr.bf16.vlgmr.msra.gmra.mrb[20].mxu0 %v14995_v61 }
 0x354   :  { %7246 = vmatmul.mubr.bf16.vlgmr.msra.gmra.mrb[20].mxu1 %v14995_v61  ;;  %7255 = vmatpush1.bf16.msra.mxu0 %v11774_v49 }
 0x355   :  { %7286 = vmatprep.mubr.bf16.mxu0 %v14993_v60  ;;  %7296 = vmatpush1.bf16.msra.mxu1 %v11776_v52  ;;  %v12223_v52 = vcombine.high %v822_v42, %v854_v45 }
 0x356   :  { %7327 = vmatprep.mubr.bf16.mxu1 %v14993_v60  ;;  %7256 = vmatprep.subr.bf16.mxu0 %v11839_v53  ;;  %v12225_v53 = vcombine.high %v823_v30, %v855_v47 }
 0x357   :  { %7297 = vmatprep.subr.bf16.mxu1 %v11841_v56 }
 0x358   :  { %7257 = vmatpush1.bf16.msra.mxu0 %v11838_v59  ;;  %v919_v59 = vld [vmem:[#allocation9 + $0x1158] sm:$0xff] }
 0x359   :  { %7298 = vmatpush1.bf16.msra.mxu1 %v11840_v62  ;;  %7258 = vmatprep.subr.bf16.mxu0 %v11903_v63  ;;  %v12222_v62 = vcombine.low %v822_v42, %v854_v45  ;;  %v12224_v63 = vcombine.low %v823_v30, %v855_v47  ;;  %v12289_v1 = vcombine.high %v887_v58, %v919_v59  ;;  %v1206_v45 = vld [vmem:[#allocation9 + $0x1a50] sm:$0xff]  ;;  %v1207_v47 = vld [vmem:[#allocation9 + $0x1a58] sm:$0xff] }
 0x35a   :  { %7299 = vmatprep.subr.bf16.mxu1 %v11905_v0  ;;  %v12287_v0 = vcombine.high %v886_v54, %v918_v55  ;;  %v1238_v30 = vld [vmem:[#allocation9 + $0x1b50] sm:$0xff] }
 0x35c   :  { %7259 = vmatpush1.bf16.msra.mxu0 %v11902_v5  ;;  %v983_v5 = vld [vmem:[#allocation9 + $0x1358] sm:$0xff] }
 0x35d   :  { %7300 = vmatpush1.bf16.msra.mxu1 %v11904_v6  ;;  %7260 = vmatprep.subr.bf16.mxu0 %v11967_v7  ;;  %v12286_v6 = vcombine.low %v886_v54, %v918_v55  ;;  %v12288_v7 = vcombine.low %v887_v58, %v919_v59  ;;  %v12353_v9 = vcombine.high %v951_v4, %v983_v5  ;;  %v1302_v54 = vld [vmem:[#allocation9 + $0x1d50] sm:$0xff]  ;;  %v1271_v55 = vld [vmem:[#allocation9 + $0x1c58] sm:$0xff] }
 0x35e   :  { %7301 = vmatprep.subr.bf16.mxu1 %v11969_v8  ;;  %v12351_v8 = vcombine.high %v950_v2, %v982_v3 }
 0x360   :  { %7261 = vmatpush1.bf16.msra.mxu0 %v11966_v17  ;;  %v1047_v17 = vld [vmem:[#allocation9 + $0x1558] sm:$0xff] }
 0x361   :  { %7302 = vmatpush1.bf16.msra.mxu1 %v11968_v18  ;;  %7262 = vmatprep.subr.bf16.mxu0 %v12031_v19  ;;  %v12350_v18 = vcombine.low %v950_v2, %v982_v3  ;;  %v12352_v19 = vcombine.low %v951_v4, %v983_v5  ;;  %v12417_v21 = vcombine.high %v1015_v14, %v1047_v17  ;;  %v1367_v2 = vld [vmem:[#allocation9 + $0x1f58] sm:$0xff] }
 0x362   :  { %7303 = vmatprep.subr.bf16.mxu1 %v12033_v20  ;;  %v12415_v20 = vcombine.high %v1014_v12, %v1046_v13 }
 0x364   :  { %7263 = vmatpush1.bf16.msra.mxu0 %v12030_v26  ;;  %v1111_v26 = vld [vmem:[#allocation9 + $0x1758] sm:$0xff] }
 0x365   :  { %7304 = vmatpush1.bf16.msra.mxu1 %v12032_v28  ;;  %7264 = vmatprep.subr.bf16.mxu0 %v12095_v29  ;;  %v12414_v28 = vcombine.low %v1014_v12, %v1046_v13  ;;  %v12416_v29 = vcombine.low %v1015_v14, %v1047_v17  ;;  %v12481_v32 = vcombine.high %v1079_v25, %v1111_v26  ;;  %v409_v12 = vld [vmem:[#allocation9 + $0x168] sm:$0xff] }
 0x366   :  { %v15027_v39 = vpop.f32.mrb[8].mxu0  ;;  %v15029_v40 = vpop.f32.mrb[8].mxu1  ;;  %7305 = vmatprep.subr.bf16.mxu1 %v12097_v31  ;;  %v12479_v31 = vcombine.high %v1078_v22, %v1110_v23 }
 0x367   :  { %v15031_v24 = vpop.f32.mrb[9].mxu0  ;;  %v15033_v27 = vpop.f32.mrb[9].mxu1 }
 0x368   :  { %v6964_v48 = vpop.f32.mrb[10].mxu0  ;;  %v7005_v49 = vpop.f32.mrb[10].mxu1  ;;  %7265 = vmatpush1.bf16.msra.mxu0 %v12094_v36  ;;  %v1175_v36 = vld [vmem:[#allocation9 + $0x1958] sm:$0xff] }
 0x369   :  { %7306 = vmatpush1.bf16.msra.mxu1 %v12096_v37  ;;  %7266 = vmatprep.subr.bf16.mxu0 %v12159_v38  ;;  %v6965_v56 = vpop.f32.mrb[11].mxu0  ;;  %v7006_v57 = vpop.f32.mrb[11].mxu1  ;;  %v12478_v37 = vcombine.low %v1078_v22, %v1110_v23  ;;  %v12480_v38 = vcombine.low %v1079_v25, %v1111_v26  ;;  %v12545_v42 = vcombine.high %v1143_v35, %v1175_v36  ;;  %v1239_v48 = vld [vmem:[#allocation9 + $0x1b58] sm:$0xff]  ;;  %v441_v22 = vld [vmem:[#allocation9 + $0x268] sm:$0xff] }
 0x36a   :  { %7307 = vmatprep.subr.bf16.mxu1 %v12161_v41  ;;  %v12543_v41 = vcombine.high %v1142_v33, %v1174_v34  ;;  %v12542_v49 = vcombine.low %v1142_v33, %v1174_v34  ;;  %v1303_v56 = vld [vmem:[#allocation9 + $0x1d58] sm:$0xff]  ;;  %v12606_v57 = vcombine.low %v1206_v45, %v1238_v30  ;;  %v12608_v58 = vcombine.low %v1207_v47, %v1239_v48  ;;  %v473_v23 = vld [vmem:[#allocation9 + $0x368] sm:$0xff] }
 0x36b   :  { %v12672_v4 = vcombine.low %v1271_v55, %v1303_v56  ;;  %v537_v33 = vld [vmem:[#allocation9 + $0x568] sm:$0xff] }
 0x36c   :  { %7267 = vmatpush1.bf16.msra.mxu0 %v12158_v50  ;;  %v12544_v50 = vcombine.low %v1143_v35, %v1175_v36  ;;  %v11844_v35 = vcombine.low %v441_v22, %v473_v23 }
 0x36d   :  { %7308 = vmatpush1.bf16.msra.mxu1 %v12160_v51  ;;  %7268 = vmatprep.subr.bf16.mxu0 %v12223_v52  ;;  %v12607_v51 = vcombine.high %v1206_v45, %v1238_v30  ;;  %v12609_v52 = vcombine.high %v1207_v47, %v1239_v48  ;;  %v601_v45 = vld [vmem:[#allocation9 + $0x768] sm:$0xff] }
 0x36e   :  { %7309 = vmatprep.subr.bf16.mxu1 %v12225_v53  ;;  %v1270_v53 = vld [vmem:[#allocation9 + $0x1c50] sm:$0xff] }
 0x36f   :  { %v12671_v59 = vcombine.high %v1270_v53, %v1302_v54  ;;  %v12670_v3 = vcombine.low %v1270_v53, %v1302_v54  ;;  %v665_v53 = vld [vmem:[#allocation9 + $0x968] sm:$0xff] }
 0x370   :  { %7269 = vmatpush1.bf16.msra.mxu0 %v12222_v62  ;;  %v12673_v62 = vcombine.high %v1271_v55, %v1303_v56 }
 0x371   :  { %7310 = vmatpush1.bf16.msra.mxu1 %v12224_v63  ;;  %7270 = vmatprep.subr.bf16.mxu0 %v12287_v0  ;;  %v1334_v63 = vld [vmem:[#allocation9 + $0x1e50] sm:$0xff] }
 0x372   :  { %7311 = vmatprep.subr.bf16.mxu1 %v12289_v1  ;;  %v1366_v0 = vld [vmem:[#allocation9 + $0x1f50] sm:$0xff]  ;;  %v1335_v1 = vld [vmem:[#allocation9 + $0x1e58] sm:$0xff] }
 0x373   :  { %v12735_v5 = vcombine.high %v1334_v63, %v1366_v0  ;;  %v12734_v13 = vcombine.low %v1334_v63, %v1366_v0  ;;  %v12736_v14 = vcombine.low %v1335_v1, %v1367_v2  ;;  %v729_v63 = vld [vmem:[#allocation9 + $0xb68] sm:$0xff] }
 0x374   :  { %7271 = vmatpush1.bf16.msra.mxu0 %v12286_v6  ;;  %v12737_v6 = vcombine.high %v1335_v1, %v1367_v2 }
 0x375   :  { %7312 = vmatpush1.bf16.msra.mxu1 %v12288_v7  ;;  %7272 = vmatprep.subr.bf16.mxu0 %v12351_v8  ;;  %v376_v7 = vld [vmem:[#allocation9 + $0x60] sm:$0xff] }
 0x376   :  { %7313 = vmatprep.subr.bf16.mxu1 %v12353_v9  ;;  %v408_v8 = vld [vmem:[#allocation9 + $0x160] sm:$0xff]  ;;  %v377_v9 = vld [vmem:[#allocation9 + $0x68] sm:$0xff] }
 0x377   :  { %v11779_v17 = vcombine.high %v376_v7, %v408_v8  ;;  %v11780_v25 = vcombine.low %v377_v9, %v409_v12 }
 0x378   :  { %7273 = vmatpush1.bf16.msra.mxu0 %v12350_v18  ;;  %v11781_v18 = vcombine.high %v377_v9, %v409_v12 }
 0x379   :  { %7314 = vmatpush1.bf16.msra.mxu1 %v12352_v19  ;;  %7274 = vmatprep.subr.bf16.mxu0 %v12415_v20  ;;  %v440_v19 = vld [vmem:[#allocation9 + $0x260] sm:$0xff] }
 0x37a   :  { %7315 = vmatprep.subr.bf16.mxu1 %v12417_v21  ;;  %v472_v20 = vld [vmem:[#allocation9 + $0x360] sm:$0xff]  ;;  %v11778_v21 = vcombine.low %v376_v7, %v408_v8  ;;  %v793_v7 = vld [vmem:[#allocation9 + $0xd68] sm:$0xff] }
 0x37b   :  { %v11843_v26 = vcombine.high %v440_v19, %v472_v20  ;;  %v11842_v34 = vcombine.low %v440_v19, %v472_v20 }
 0x37c   :  { %7275 = vmatpush1.bf16.msra.mxu0 %v12414_v28  ;;  %v504_v28 = vld [vmem:[#allocation9 + $0x460] sm:$0xff] }
 0x37d   :  { %7316 = vmatpush1.bf16.msra.mxu1 %v12416_v29  ;;  %7276 = vmatprep.subr.bf16.mxu0 %v12479_v31  ;;  %v536_v29 = vld [vmem:[#allocation9 + $0x560] sm:$0xff]  ;;  %v11845_v31 = vcombine.high %v441_v22, %v473_v23  ;;  %v857_v22 = vld [vmem:[#allocation9 + $0xf68] sm:$0xff] }
 0x37e   :  { %7317 = vmatprep.subr.bf16.mxu1 %v12481_v32  ;;  %v505_v32 = vld [vmem:[#allocation9 + $0x468] sm:$0xff]  ;;  %v11907_v36 = vcombine.high %v504_v28, %v536_v29  ;;  %v11906_v30 = vcombine.low %v504_v28, %v536_v29 }
 0x37f   :  { %v11908_v47 = vcombine.low %v505_v32, %v537_v33 }
 0x380   :  { %7277 = vmatpush1.bf16.msra.mxu0 %v12478_v37  ;;  %v11909_v37 = vcombine.high %v505_v32, %v537_v33 }
 0x381   :  { %7318 = vmatpush1.bf16.msra.mxu1 %v12480_v38  ;;  %7278 = vmatprep.subr.bf16.mxu0 %v12543_v41  ;;  %v568_v38 = vld [vmem:[#allocation9 + $0x660] sm:$0xff] }
 0x382   :  { %7319 = vmatprep.subr.bf16.mxu1 %v12545_v42  ;;  %v600_v41 = vld [vmem:[#allocation9 + $0x760] sm:$0xff]  ;;  %v569_v42 = vld [vmem:[#allocation9 + $0x668] sm:$0xff] }
 0x383   :  { %v11971_v48 = vcombine.high %v568_v38, %v600_v41  ;;  %v11970_v54 = vcombine.low %v568_v38, %v600_v41  ;;  %v11972_v55 = vcombine.low %v569_v42, %v601_v45  ;;  %v921_v38 = vld [vmem:[#allocation9 + $0x1168] sm:$0xff] }
 0x384   :  { %7279 = vmatpush1.bf16.msra.mxu0 %v12542_v49  ;;  %v11973_v49 = vcombine.high %v569_v42, %v601_v45 }
 0x385   :  { %7320 = vmatpush1.bf16.msra.mxu1 %v12544_v50  ;;  %7280 = vmatprep.subr.bf16.mxu0 %v12607_v51  ;;  %v632_v50 = vld [vmem:[#allocation9 + $0x860] sm:$0xff] }
 0x386   :  { %7321 = vmatprep.subr.bf16.mxu1 %v12609_v52  ;;  %v664_v51 = vld [vmem:[#allocation9 + $0x960] sm:$0xff]  ;;  %v633_v52 = vld [vmem:[#allocation9 + $0x868] sm:$0xff] }
 0x387   :  { %v12035_v56 = vcombine.high %v632_v50, %v664_v51  ;;  %v12034_v0 = vcombine.low %v632_v50, %v664_v51  ;;  %v12036_v1 = vcombine.low %v633_v52, %v665_v53  ;;  %v985_v50 = vld [vmem:[#allocation9 + $0x1368] sm:$0xff] }
 0x388   :  { %7281 = vmatpush1.bf16.msra.mxu0 %v12606_v57  ;;  %v12037_v57 = vcombine.high %v633_v52, %v665_v53 }
 0x389   :  { %7322 = vmatpush1.bf16.msra.mxu1 %v12608_v58  ;;  %7282 = vmatprep.subr.bf16.mxu0 %v12671_v59  ;;  %v696_v58 = vld [vmem:[#allocation9 + $0xa60] sm:$0xff] }
 0x38a   :  { %7323 = vmatprep.subr.bf16.mxu1 %v12673_v62  ;;  %v728_v59 = vld [vmem:[#allocation9 + $0xb60] sm:$0xff]  ;;  %v697_v62 = vld [vmem:[#allocation9 + $0xa68] sm:$0xff] }
 0x38b   :  { %v12099_v2 = vcombine.high %v696_v58, %v728_v59  ;;  %v12098_v8 = vcombine.low %v696_v58, %v728_v59  ;;  %v12100_v9 = vcombine.low %v697_v62, %v729_v63  ;;  %v1049_v58 = vld [vmem:[#allocation9 + $0x1568] sm:$0xff] }
 0x38c   :  { %7283 = vmatpush1.bf16.msra.mxu0 %v12670_v3  ;;  %v12101_v3 = vcombine.high %v697_v62, %v729_v63 }
 0x38d   :  { %7324 = vmatpush1.bf16.msra.mxu1 %v12672_v4  ;;  %7284 = vmatprep.subr.bf16.mxu0 %v12735_v5  ;;  %v760_v4 = vld [vmem:[#allocation9 + $0xc60] sm:$0xff] }
 0x38e   :  { %7325 = vmatprep.subr.bf16.mxu1 %v12737_v6  ;;  %v792_v5 = vld [vmem:[#allocation9 + $0xd60] sm:$0xff]  ;;  %v761_v6 = vld [vmem:[#allocation9 + $0xc68] sm:$0xff] }
 0x38f   :  { %v12163_v12 = vcombine.high %v760_v4, %v792_v5 }
 0x390   :  { %7285 = vmatpush1.bf16.msra.mxu0 %v12734_v13 }
 0x391   :  { %7326 = vmatpush1.bf16.msra.mxu1 %v12736_v14  ;;  %7336 = vmatprep.subr.bf16.mxu0 %v11779_v17  ;;  %v12165_v14 = vcombine.high %v761_v6, %v793_v7  ;;  %v824_v17 = vld [vmem:[#allocation9 + $0xe60] sm:$0xff] }
 0x392   :  { %7377 = vmatprep.subr.bf16.mxu1 %v11781_v18  ;;  %v856_v18 = vld [vmem:[#allocation9 + $0xf60] sm:$0xff] }
 0x393   :  { %7287 = vmatmul.mubr.bf16.vlgmr.msra.gmra.mrb[24].mxu0 %v14995_v61  ;;  %v12227_v32 = vcombine.high %v824_v17, %v856_v18  ;;  %v12226_v41 = vcombine.low %v824_v17, %v856_v18  ;;  %v1177_v17 = vld [vmem:[#allocation9 + $0x1968] sm:$0xff] }
 0x394   :  { %7328 = vmatmul.mubr.bf16.vlgmr.msra.gmra.mrb[24].mxu1 %v14995_v61  ;;  %7337 = vmatpush1.bf16.msra.mxu0 %v11778_v21  ;;  %v825_v21 = vld [vmem:[#allocation9 + $0xe68] sm:$0xff] }
 0x395   :  { %7368 = vmatprep.mubr.bf16.mxu0 %v14993_v60  ;;  %7378 = vmatpush1.bf16.msra.mxu1 %v11780_v25  ;;  %v12229_v33 = vcombine.high %v825_v21, %v857_v22  ;;  %v12228_v42 = vcombine.low %v825_v21, %v857_v22 }
 0x396   :  { %7409 = vmatprep.mubr.bf16.mxu1 %v14993_v60  ;;  %7338 = vmatprep.subr.bf16.mxu0 %v11843_v26  ;;  %v12162_v26 = vcombine.low %v760_v4, %v792_v5  ;;  %v1113_v4 = vld [vmem:[#allocation9 + $0x1768] sm:$0xff] }
 0x397   :  { %7379 = vmatprep.subr.bf16.mxu1 %v11845_v31  ;;  %v12164_v31 = vcombine.low %v761_v6, %v793_v7 }
 0x398   :  { %7339 = vmatpush1.bf16.msra.mxu0 %v11842_v34  ;;  %v888_v34 = vld [vmem:[#allocation9 + $0x1060] sm:$0xff] }
 0x399   :  { %7380 = vmatpush1.bf16.msra.mxu1 %v11844_v35  ;;  %7340 = vmatprep.subr.bf16.mxu0 %v11907_v36  ;;  %v920_v35 = vld [vmem:[#allocation9 + $0x1160] sm:$0xff] }
 0x39a   :  { %7381 = vmatprep.subr.bf16.mxu1 %v11909_v37  ;;  %v889_v37 = vld [vmem:[#allocation9 + $0x1068] sm:$0xff]  ;;  %v12291_v45 = vcombine.high %v888_v34, %v920_v35  ;;  %v12290_v51 = vcombine.low %v888_v34, %v920_v35 }
 0x39b   :  { %v12292_v52 = vcombine.low %v889_v37, %v921_v38 }
 0x39c   :  { %7341 = vmatpush1.bf16.msra.mxu0 %v11906_v30  ;;  %v12293_v30 = vcombine.high %v889_v37, %v921_v38  ;;  %v1304_v37 = vld [vmem:[#allocation9 + $0x1d60] sm:$0xff]  ;;  %v1273_v38 = vld [vmem:[#allocation9 + $0x1c68] sm:$0xff] }
 0x39d   :  { %7382 = vmatpush1.bf16.msra.mxu1 %v11908_v47  ;;  %7342 = vmatprep.subr.bf16.mxu0 %v11971_v48  ;;  %v952_v47 = vld [vmem:[#allocation9 + $0x1260] sm:$0xff] }
 0x39e   :  { %7383 = vmatprep.subr.bf16.mxu1 %v11973_v49  ;;  %v984_v48 = vld [vmem:[#allocation9 + $0x1360] sm:$0xff]  ;;  %v953_v49 = vld [vmem:[#allocation9 + $0x1268] sm:$0xff] }
 0x39f   :  { %v12355_v53 = vcombine.high %v952_v47, %v984_v48  ;;  %v12354_v59 = vcombine.low %v952_v47, %v984_v48  ;;  %v12356_v62 = vcombine.low %v953_v49, %v985_v50  ;;  %v1336_v48 = vld [vmem:[#allocation9 + $0x1e60] sm:$0xff] }
 0x3a0   :  { %7343 = vmatpush1.bf16.msra.mxu0 %v11970_v54  ;;  %v12357_v54 = vcombine.high %v953_v49, %v985_v50  ;;  %v1368_v49 = vld [vmem:[#allocation9 + $0x1f60] sm:$0xff]  ;;  %v1337_v50 = vld [vmem:[#allocation9 + $0x1e68] sm:$0xff] }
 0x3a1   :  { %7384 = vmatpush1.bf16.msra.mxu1 %v11972_v55  ;;  %7344 = vmatprep.subr.bf16.mxu0 %v12035_v56  ;;  %v1016_v55 = vld [vmem:[#allocation9 + $0x1460] sm:$0xff] }
 0x3a2   :  { %7385 = vmatprep.subr.bf16.mxu1 %v12037_v57  ;;  %v1048_v56 = vld [vmem:[#allocation9 + $0x1560] sm:$0xff]  ;;  %v1017_v57 = vld [vmem:[#allocation9 + $0x1468] sm:$0xff] }
 0x3a3   :  { %v12419_v63 = vcombine.high %v1016_v55, %v1048_v56  ;;  %v12418_v5 = vcombine.low %v1016_v55, %v1048_v56  ;;  %v12420_v6 = vcombine.low %v1017_v57, %v1049_v58  ;;  %v378_v56 = vld [vmem:[#allocation9 + $0x70] sm:$0xff] }
 0x3a4   :  { %7345 = vmatpush1.bf16.msra.mxu0 %v12034_v0  ;;  %v12421_v0 = vcombine.high %v1017_v57, %v1049_v58  ;;  %v410_v57 = vld [vmem:[#allocation9 + $0x170] sm:$0xff]  ;;  %v379_v58 = vld [vmem:[#allocation9 + $0x78] sm:$0xff] }
 0x3a5   :  { %7386 = vmatpush1.bf16.msra.mxu1 %v12036_v1  ;;  %7346 = vmatprep.subr.bf16.mxu0 %v12099_v2  ;;  %v1080_v1 = vld [vmem:[#allocation9 + $0x1660] sm:$0xff] }
 0x3a6   :  { %v15039_v13 = vpop.f32.mrb[12].mxu0  ;;  %7387 = vmatprep.subr.bf16.mxu1 %v12101_v3  ;;  %v1112_v2 = vld [vmem:[#allocation9 + $0x1760] sm:$0xff]  ;;  %v1081_v3 = vld [vmem:[#allocation9 + $0x1668] sm:$0xff] }
 0x3a7   :  { %v15041_v19 = vpop.f32.mrb[12].mxu1  ;;  %v15043_v20 = vpop.f32.mrb[13].mxu0  ;;  %v12483_v7 = vcombine.high %v1080_v1, %v1112_v2  ;;  %v12482_v18 = vcombine.low %v1080_v1, %v1112_v2  ;;  %v12484_v21 = vcombine.low %v1081_v3, %v1113_v4  ;;  %v442_v2 = vld [vmem:[#allocation9 + $0x270] sm:$0xff] }
 0x3a8   :  { %v15045_v23 = vpop.f32.mrb[13].mxu1  ;;  %v7046_v25 = vpop.f32.mrb[14].mxu0  ;;  %7347 = vmatpush1.bf16.msra.mxu0 %v12098_v8  ;;  %v12485_v8 = vcombine.high %v1081_v3, %v1113_v4  ;;  %v474_v3 = vld [vmem:[#allocation9 + $0x370] sm:$0xff]  ;;  %v11782_v4 = vcombine.low %v378_v56, %v410_v57 }
 0x3a9   :  { %v7087_v28 = vpop.f32.mrb[14].mxu1  ;;  %7388 = vmatpush1.bf16.msra.mxu1 %v12100_v9  ;;  %v7047_v29 = vpop.f32.mrb[15].mxu0  ;;  %7348 = vmatprep.subr.bf16.mxu0 %v12163_v12  ;;  %v1144_v9 = vld [vmem:[#allocation9 + $0x1860] sm:$0xff] }
 0x3aa   :  { %7389 = vmatprep.subr.bf16.mxu1 %v12165_v14  ;;  %v7088_v36 = vpop.f32.mrb[15].mxu1  ;;  %v1176_v12 = vld [vmem:[#allocation9 + $0x1960] sm:$0xff]  ;;  %v1145_v14 = vld [vmem:[#allocation9 + $0x1868] sm:$0xff] }
 0x3ab   :  { %v12547_v22 = vcombine.high %v1144_v9, %v1176_v12  ;;  %v12549_v25 = vcombine.high %v1145_v14, %v1177_v17  ;;  %v1240_v28 = vld [vmem:[#allocation9 + $0x1b60] sm:$0xff]  ;;  %v1209_v29 = vld [vmem:[#allocation9 + $0x1a68] sm:$0xff] }
 0x3ac   :  { %7349 = vmatpush1.bf16.msra.mxu0 %v12162_v26  ;;  %v1208_v26 = vld [vmem:[#allocation9 + $0x1a60] sm:$0xff] }
 0x3ad   :  { %7390 = vmatpush1.bf16.msra.mxu1 %v12164_v31  ;;  %7350 = vmatprep.subr.bf16.mxu0 %v12227_v32  ;;  %v1241_v31 = vld [vmem:[#allocation9 + $0x1b68] sm:$0xff]  ;;  %v12546_v32 = vcombine.low %v1144_v9, %v1176_v12  ;;  %v12611_v34 = vcombine.high %v1208_v26, %v1240_v28  ;;  %v1272_v36 = vld [vmem:[#allocation9 + $0x1c60] sm:$0xff]  ;;  %v506_v9 = vld [vmem:[#allocation9 + $0x470] sm:$0xff] }
 0x3ae   :  { %7391 = vmatprep.subr.bf16.mxu1 %v12229_v33  ;;  %v12548_v33 = vcombine.low %v1145_v14, %v1177_v17  ;;  %v12613_v35 = vcombine.high %v1209_v29, %v1241_v31  ;;  %v538_v12 = vld [vmem:[#allocation9 + $0x570] sm:$0xff]  ;;  %v507_v17 = vld [vmem:[#allocation9 + $0x478] sm:$0xff] }
 0x3b0   :  { %7351 = vmatpush1.bf16.msra.mxu0 %v12226_v41  ;;  %v1305_v41 = vld [vmem:[#allocation9 + $0x1d68] sm:$0xff] }
 0x3b1   :  { %7392 = vmatpush1.bf16.msra.mxu1 %v12228_v42  ;;  %7352 = vmatprep.subr.bf16.mxu0 %v12291_v45  ;;  %v12610_v42 = vcombine.low %v1208_v26, %v1240_v28  ;;  %v12612_v45 = vcombine.low %v1209_v29, %v1241_v31  ;;  %v12677_v47 = vcombine.high %v1273_v38, %v1305_v41  ;;  %v570_v28 = vld [vmem:[#allocation9 + $0x670] sm:$0xff]  ;;  %v571_v31 = vld [vmem:[#allocation9 + $0x678] sm:$0xff] }
 0x3b2   :  { %7393 = vmatprep.subr.bf16.mxu1 %v12293_v30  ;;  %v12675_v30 = vcombine.high %v1272_v36, %v1304_v37  ;;  %v602_v29 = vld [vmem:[#allocation9 + $0x770] sm:$0xff] }
 0x3b4   :  { %7353 = vmatpush1.bf16.msra.mxu0 %v12290_v51  ;;  %v1369_v51 = vld [vmem:[#allocation9 + $0x1f68] sm:$0xff] }
 0x3b5   :  { %7394 = vmatpush1.bf16.msra.mxu1 %v12292_v52  ;;  %7354 = vmatprep.subr.bf16.mxu0 %v12355_v53  ;;  %v12674_v52 = vcombine.low %v1272_v36, %v1304_v37  ;;  %v12676_v53 = vcombine.low %v1273_v38, %v1305_v41  ;;  %v12741_v55 = vcombine.high %v1337_v50, %v1369_v51  ;;  %v634_v37 = vld [vmem:[#allocation9 + $0x870] sm:$0xff]  ;;  %v635_v41 = vld [vmem:[#allocation9 + $0x878] sm:$0xff] }
 0x3b6   :  { %7395 = vmatprep.subr.bf16.mxu1 %v12357_v54  ;;  %v12739_v54 = vcombine.high %v1336_v48, %v1368_v49  ;;  %v666_v38 = vld [vmem:[#allocation9 + $0x970] sm:$0xff] }
 0x3b8   :  { %7355 = vmatpush1.bf16.msra.mxu0 %v12354_v59  ;;  %v411_v59 = vld [vmem:[#allocation9 + $0x178] sm:$0xff] }
 0x3b9   :  { %7396 = vmatpush1.bf16.msra.mxu1 %v12356_v62  ;;  %7356 = vmatprep.subr.bf16.mxu0 %v12419_v63  ;;  %v12738_v62 = vcombine.low %v1336_v48, %v1368_v49  ;;  %v12740_v63 = vcombine.low %v1337_v50, %v1369_v51  ;;  %v11785_v1 = vcombine.high %v379_v58, %v411_v59  ;;  %v698_v49 = vld [vmem:[#allocation9 + $0xa70] sm:$0xff]  ;;  %v699_v51 = vld [vmem:[#allocation9 + $0xa78] sm:$0xff] }
 0x3ba   :  { %7397 = vmatprep.subr.bf16.mxu1 %v12421_v0  ;;  %v11783_v0 = vcombine.high %v378_v56, %v410_v57  ;;  %v730_v50 = vld [vmem:[#allocation9 + $0xb70] sm:$0xff] }
 0x3bb   :  { %v762_v57 = vld [vmem:[#allocation9 + $0xc70] sm:$0xff] }
 0x3bc   :  { %7357 = vmatpush1.bf16.msra.mxu0 %v12418_v5  ;;  %v443_v5 = vld [vmem:[#allocation9 + $0x278] sm:$0xff] }
 0x3bd   :  { %7398 = vmatpush1.bf16.msra.mxu1 %v12420_v6  ;;  %7358 = vmatprep.subr.bf16.mxu0 %v12483_v7  ;;  %v475_v6 = vld [vmem:[#allocation9 + $0x378] sm:$0xff]  ;;  %v11784_v7 = vcombine.low %v379_v58, %v411_v59  ;;  %v794_v58 = vld [vmem:[#allocation9 + $0xd70] sm:$0xff] }
 0x3be   :  { %7399 = vmatprep.subr.bf16.mxu1 %v12485_v8  ;;  %v11847_v8 = vcombine.high %v442_v2, %v474_v3  ;;  %v11849_v14 = vcombine.high %v443_v5, %v475_v6  ;;  %v763_v59 = vld [vmem:[#allocation9 + $0xc78] sm:$0xff] }
 0x3c0   :  { %7359 = vmatpush1.bf16.msra.mxu0 %v12482_v18  ;;  %v539_v18 = vld [vmem:[#allocation9 + $0x578] sm:$0xff] }
 0x3c1   :  { %7400 = vmatpush1.bf16.msra.mxu1 %v12484_v21  ;;  %7360 = vmatprep.subr.bf16.mxu0 %v12547_v22  ;;  %v11846_v21 = vcombine.low %v442_v2, %v474_v3  ;;  %v11848_v22 = vcombine.low %v443_v5, %v475_v6  ;;  %v11913_v26 = vcombine.high %v507_v17, %v539_v18  ;;  %v858_v5 = vld [vmem:[#allocation9 + $0xf70] sm:$0xff] }
 0x3c2   :  { %7401 = vmatprep.subr.bf16.mxu1 %v12549_v25  ;;  %v11911_v25 = vcombine.high %v506_v9, %v538_v12 }
 0x3c4   :  { %7361 = vmatpush1.bf16.msra.mxu0 %v12546_v32  ;;  %v603_v32 = vld [vmem:[#allocation9 + $0x778] sm:$0xff] }
 0x3c5   :  { %7402 = vmatpush1.bf16.msra.mxu1 %v12548_v33  ;;  %7362 = vmatprep.subr.bf16.mxu0 %v12611_v34  ;;  %v11910_v33 = vcombine.low %v506_v9, %v538_v12  ;;  %v11912_v34 = vcombine.low %v507_v17, %v539_v18  ;;  %v11977_v36 = vcombine.high %v571_v31, %v603_v32  ;;  %v859_v9 = vld [vmem:[#allocation9 + $0xf78] sm:$0xff] }
 0x3c6   :  { %7403 = vmatprep.subr.bf16.mxu1 %v12613_v35  ;;  %v11975_v35 = vcombine.high %v570_v28, %v602_v29  ;;  %v12166_v17 = vcombine.low %v762_v57, %v794_v58 }
 0x3c8   :  { %7363 = vmatpush1.bf16.msra.mxu0 %v12610_v42  ;;  %v667_v42 = vld [vmem:[#allocation9 + $0x978] sm:$0xff] }
 0x3c9   :  { %7404 = vmatpush1.bf16.msra.mxu1 %v12612_v45  ;;  %7364 = vmatprep.subr.bf16.mxu0 %v12675_v30  ;;  %v11974_v45 = vcombine.low %v570_v28, %v602_v29  ;;  %v11976_v30 = vcombine.low %v571_v31, %v603_v32  ;;  %v12041_v48 = vcombine.high %v635_v41, %v667_v42  ;;  %v890_v28 = vld [vmem:[#allocation9 + $0x1070] sm:$0xff]  ;;  %v891_v32 = vld [vmem:[#allocation9 + $0x1078] sm:$0xff] }
 0x3ca   :  { %7405 = vmatprep.subr.bf16.mxu1 %v12677_v47  ;;  %v12039_v47 = vcombine.high %v634_v37, %v666_v38  ;;  %v922_v29 = vld [vmem:[#allocation9 + $0x1170] sm:$0xff] }
 0x3cc   :  { %7365 = vmatpush1.bf16.msra.mxu0 %v12674_v52  ;;  %v731_v52 = vld [vmem:[#allocation9 + $0xb78] sm:$0xff] }
 0x3cd   :  { %7406 = vmatpush1.bf16.msra.mxu1 %v12676_v53  ;;  %7366 = vmatprep.subr.bf16.mxu0 %v12739_v54  ;;  %v12038_v53 = vcombine.low %v634_v37, %v666_v38  ;;  %v12040_v54 = vcombine.low %v635_v41, %v667_v42  ;;  %v12105_v56 = vcombine.high %v699_v51, %v731_v52  ;;  %v954_v38 = vld [vmem:[#allocation9 + $0x1270] sm:$0xff]  ;;  %v955_v42 = vld [vmem:[#allocation9 + $0x1278] sm:$0xff] }
 0x3ce   :  { %7407 = vmatprep.subr.bf16.mxu1 %v12741_v55  ;;  %v12103_v55 = vcombine.high %v698_v49, %v730_v50  ;;  %v986_v41 = vld [vmem:[#allocation9 + $0x1370] sm:$0xff] }
 0x3d0   :  { %7367 = vmatpush1.bf16.msra.mxu0 %v12738_v62  ;;  %v795_v62 = vld [vmem:[#allocation9 + $0xd78] sm:$0xff] }
 0x3d1   :  { %7408 = vmatpush1.bf16.msra.mxu1 %v12740_v63  ;;  %7418 = vmatprep.subr.bf16.mxu0 %v11783_v0  ;;  %v12102_v63 = vcombine.low %v698_v49, %v730_v50  ;;  %v12104_v0 = vcombine.low %v699_v51, %v731_v52  ;;  %v12169_v3 = vcombine.high %v763_v59, %v795_v62  ;;  %v1018_v50 = vld [vmem:[#allocation9 + $0x1470] sm:$0xff]  ;;  %v1019_v52 = vld [vmem:[#allocation9 + $0x1478] sm:$0xff] }
 0x3d2   :  { %7459 = vmatprep.subr.bf16.mxu1 %v11785_v1  ;;  %v12167_v1 = vcombine.high %v762_v57, %v794_v58  ;;  %v1050_v51 = vld [vmem:[#allocation9 + $0x1570] sm:$0xff] }
 0x3d3   :  { %7369 = vmatmul.mubr.bf16.vlgmr.msra.gmra.mrb[28].mxu0 %v14995_v61  ;;  %v1082_v58 = vld [vmem:[#allocation9 + $0x1670] sm:$0xff] }
 0x3d4   :  { %7410 = vmatmul.mubr.bf16.vlgmr.msra.gmra.mrb[28].mxu1 %v14995_v61  ;;  %7419 = vmatpush1.bf16.msra.mxu0 %v11782_v4  ;;  %v826_v4 = vld [vmem:[#allocation9 + $0xe70] sm:$0xff] }
 0x3d5   :  { %7450 = vmatprep.mubr.bf16.mxu0 %v14993_v60  ;;  %7460 = vmatpush1.bf16.msra.mxu1 %v11784_v7 }
 0x3d6   :  { %7491 = vmatprep.mubr.bf16.mxu1 %v14993_v60  ;;  %7420 = vmatprep.subr.bf16.mxu0 %v11847_v8  ;;  %v827_v8 = vld [vmem:[#allocation9 + $0xe78] sm:$0xff] }
 0x3d7   :  { %7461 = vmatprep.subr.bf16.mxu1 %v11849_v14 }
 0x3d8   :  { %7421 = vmatpush1.bf16.msra.mxu0 %v11846_v21 }
 0x3d9   :  { %7462 = vmatpush1.bf16.msra.mxu1 %v11848_v22  ;;  %7422 = vmatprep.subr.bf16.mxu0 %v11911_v25  ;;  %v12168_v22 = vcombine.low %v763_v59, %v795_v62  ;;  %v12231_v25 = vcombine.high %v826_v4, %v858_v5  ;;  %v1114_v59 = vld [vmem:[#allocation9 + $0x1770] sm:$0xff]  ;;  %v1083_v62 = vld [vmem:[#allocation9 + $0x1678] sm:$0xff] }
 0x3da   :  { %7463 = vmatprep.subr.bf16.mxu1 %v11913_v26  ;;  %v12233_v26 = vcombine.high %v827_v8, %v859_v9 }
 0x3dc   :  { %7423 = vmatpush1.bf16.msra.mxu0 %v11910_v33  ;;  %v923_v33 = vld [vmem:[#allocation9 + $0x1178] sm:$0xff] }
 0x3dd   :  { %7464 = vmatpush1.bf16.msra.mxu1 %v11912_v34  ;;  %7424 = vmatprep.subr.bf16.mxu0 %v11975_v35  ;;  %v12230_v34 = vcombine.low %v826_v4, %v858_v5  ;;  %v12232_v35 = vcombine.low %v827_v8, %v859_v9  ;;  %v12297_v37 = vcombine.high %v891_v32, %v923_v33  ;;  %v1146_v5 = vld [vmem:[#allocation9 + $0x1870] sm:$0xff]  ;;  %v1147_v9 = vld [vmem:[#allocation9 + $0x1878] sm:$0xff] }
 0x3de   :  { %7465 = vmatprep.subr.bf16.mxu1 %v11977_v36  ;;  %v12295_v36 = vcombine.high %v890_v28, %v922_v29  ;;  %v1178_v8 = vld [vmem:[#allocation9 + $0x1970] sm:$0xff] }
 0x3e0   :  { %7425 = vmatpush1.bf16.msra.mxu0 %v11974_v45  ;;  %v987_v45 = vld [vmem:[#allocation9 + $0x1378] sm:$0xff] }
 0x3e1   :  { %7466 = vmatpush1.bf16.msra.mxu1 %v11976_v30  ;;  %7426 = vmatprep.subr.bf16.mxu0 %v12039_v47  ;;  %v12294_v30 = vcombine.low %v890_v28, %v922_v29  ;;  %v12296_v47 = vcombine.low %v891_v32, %v923_v33  ;;  %v12361_v49 = vcombine.high %v955_v42, %v987_v45  ;;  %v1211_v28 = vld [vmem:[#allocation9 + $0x1a78] sm:$0xff] }
 0x3e2   :  { %7467 = vmatprep.subr.bf16.mxu1 %v12041_v48  ;;  %v12359_v48 = vcombine.high %v954_v38, %v986_v41  ;;  %v1243_v29 = vld [vmem:[#allocation9 + $0x1b78] sm:$0xff] }
 0x3e4   :  { %7427 = vmatpush1.bf16.msra.mxu0 %v12038_v53  ;;  %v1051_v53 = vld [vmem:[#allocation9 + $0x1578] sm:$0xff] }
 0x3e5   :  { %7468 = vmatpush1.bf16.msra.mxu1 %v12040_v54  ;;  %7428 = vmatprep.subr.bf16.mxu0 %v12103_v55  ;;  %v12358_v54 = vcombine.low %v954_v38, %v986_v41  ;;  %v12360_v55 = vcombine.low %v955_v42, %v987_v45  ;;  %v12425_v57 = vcombine.high %v1019_v52, %v1051_v53  ;;  %v1307_v38 = vld [vmem:[#allocation9 + $0x1d78] sm:$0xff] }
 0x3e6   :  { %v15051_v2 = vpop.f32.mrb[16].mxu0  ;;  %7469 = vmatprep.subr.bf16.mxu1 %v12105_v56  ;;  %v12423_v56 = vcombine.high %v1018_v50, %v1050_v51  ;;  %v12616_v42 = vcombine.low %v1211_v28, %v1243_v29 }
 0x3e7   :  { %v15053_v6 = vpop.f32.mrb[16].mxu1  ;;  %v15055_v7 = vpop.f32.mrb[17].mxu0 }
 0x3e8   :  { %v15057_v12 = vpop.f32.mrb[17].mxu1  ;;  %v7128_v14 = vpop.f32.mrb[18].mxu0  ;;  %7429 = vmatpush1.bf16.msra.mxu0 %v12102_v63  ;;  %v1115_v63 = vld [vmem:[#allocation9 + $0x1778] sm:$0xff] }
 0x3e9   :  { %v7169_v18 = vpop.f32.mrb[18].mxu1  ;;  %7470 = vmatpush1.bf16.msra.mxu1 %v12104_v0  ;;  %v7129_v21 = vpop.f32.mrb[19].mxu0  ;;  %7430 = vmatprep.subr.bf16.mxu0 %v12167_v1  ;;  %v12422_v0 = vcombine.low %v1018_v50, %v1050_v51  ;;  %v12424_v1 = vcombine.low %v1019_v52, %v1051_v53  ;;  %v12489_v4 = vcombine.high %v1083_v62, %v1115_v63  ;;  %v1179_v14 = vld [vmem:[#allocation9 + $0x1978] sm:$0xff] }
 0x3ea   :  { %7471 = vmatprep.subr.bf16.mxu1 %v12169_v3  ;;  %v7170_v31 = vpop.f32.mrb[19].mxu1  ;;  %v12487_v3 = vcombine.high %v1082_v58, %v1114_v59  ;;  %v12488_v18 = vcombine.low %v1083_v62, %v1115_v63  ;;  %v12551_v21 = vcombine.high %v1146_v5, %v1178_v8  ;;  %v12552_v32 = vcombine.low %v1147_v9, %v1179_v14  ;;  %v1371_v50 = vld [vmem:[#allocation9 + $0x1f78] sm:$0xff] }
 0x3eb   :  { %v12550_v31 = vcombine.low %v1146_v5, %v1178_v8  ;;  %v445_v5 = vld [vmem:[#allocation9 + $0x288] sm:$0xff] }
 0x3ec   :  { %7431 = vmatpush1.bf16.msra.mxu0 %v12166_v17  ;;  %v12486_v17 = vcombine.low %v1082_v58, %v1114_v59  ;;  %v413_v58 = vld [vmem:[#allocation9 + $0x188] sm:$0xff] }
 0x3ed   :  { %7472 = vmatpush1.bf16.msra.mxu1 %v12168_v22  ;;  %7432 = vmatprep.subr.bf16.mxu0 %v12231_v25  ;;  %v12553_v22 = vcombine.high %v1147_v9, %v1179_v14  ;;  %v1210_v25 = vld [vmem:[#allocation9 + $0x1a70] sm:$0xff]  ;;  %v477_v8 = vld [vmem:[#allocation9 + $0x388] sm:$0xff] }
 0x3ee   :  { %7473 = vmatprep.subr.bf16.mxu1 %v12233_v26  ;;  %v1242_v26 = vld [vmem:[#allocation9 + $0x1b70] sm:$0xff] }
 0x3ef   :  { %v12615_v33 = vcombine.high %v1210_v25, %v1242_v26  ;;  %v12614_v41 = vcombine.low %v1210_v25, %v1242_v26  ;;  %v541_v25 = vld [vmem:[#allocation9 + $0x588] sm:$0xff] }
 0x3f0   :  { %7433 = vmatpush1.bf16.msra.mxu0 %v12230_v34  ;;  %v12617_v34 = vcombine.high %v1211_v28, %v1243_v29  ;;  %v11852_v28 = vcombine.low %v445_v5, %v477_v8 }
 0x3f1   :  { %7474 = vmatpush1.bf16.msra.mxu1 %v12232_v35  ;;  %7434 = vmatprep.subr.bf16.mxu0 %v12295_v36  ;;  %v1274_v35 = vld [vmem:[#allocation9 + $0x1c70] sm:$0xff] }
 0x3f2   :  { %7475 = vmatprep.subr.bf16.mxu1 %v12297_v37  ;;  %v1306_v36 = vld [vmem:[#allocation9 + $0x1d70] sm:$0xff]  ;;  %v1275_v37 = vld [vmem:[#allocation9 + $0x1c78] sm:$0xff] }
 0x3f3   :  { %v12679_v45 = vcombine.high %v1274_v35, %v1306_v36  ;;  %v12678_v51 = vcombine.low %v1274_v35, %v1306_v36  ;;  %v12680_v52 = vcombine.low %v1275_v37, %v1307_v38  ;;  %v605_v35 = vld [vmem:[#allocation9 + $0x788] sm:$0xff] }
 0x3f4   :  { %7435 = vmatpush1.bf16.msra.mxu0 %v12294_v30  ;;  %v12681_v30 = vcombine.high %v1275_v37, %v1307_v38 }
 0x3f5   :  { %7476 = vmatpush1.bf16.msra.mxu1 %v12296_v47  ;;  %7436 = vmatprep.subr.bf16.mxu0 %v12359_v48  ;;  %v1338_v47 = vld [vmem:[#allocation9 + $0x1e70] sm:$0xff] }
 0x3f6   :  { %7477 = vmatprep.subr.bf16.mxu1 %v12361_v49  ;;  %v1370_v48 = vld [vmem:[#allocation9 + $0x1f70] sm:$0xff]  ;;  %v1339_v49 = vld [vmem:[#allocation9 + $0x1e78] sm:$0xff] }
 0x3f7   :  { %v12743_v53 = vcombine.high %v1338_v47, %v1370_v48  ;;  %v12742_v59 = vcombine.low %v1338_v47, %v1370_v48  ;;  %v12744_v62 = vcombine.low %v1339_v49, %v1371_v50  ;;  %v669_v47 = vld [vmem:[#allocation9 + $0x988] sm:$0xff] }
 0x3f8   :  { %7437 = vmatpush1.bf16.msra.mxu0 %v12358_v54  ;;  %v12745_v54 = vcombine.high %v1339_v49, %v1371_v50 }
 0x3f9   :  { %7478 = vmatpush1.bf16.msra.mxu1 %v12360_v55  ;;  %7438 = vmatprep.subr.bf16.mxu0 %v12423_v56  ;;  %v380_v55 = vld [vmem:[#allocation9 + $0x80] sm:$0xff] }
 0x3fa   :  { %7479 = vmatprep.subr.bf16.mxu1 %v12425_v57  ;;  %v412_v56 = vld [vmem:[#allocation9 + $0x180] sm:$0xff]  ;;  %v381_v57 = vld [vmem:[#allocation9 + $0x88] sm:$0xff] }
 0x3fb   :  { %v11787_v63 = vcombine.high %v380_v55, %v412_v56  ;;  %v11788_v9 = vcombine.low %v381_v57, %v413_v58 }
 0x3fc   :  { %7439 = vmatpush1.bf16.msra.mxu0 %v12422_v0  ;;  %v11789_v0 = vcombine.high %v381_v57, %v413_v58 }
 0x3fd   :  { %7480 = vmatpush1.bf16.msra.mxu1 %v12424_v1  ;;  %7440 = vmatprep.subr.bf16.mxu0 %v12487_v3  ;;  %v444_v1 = vld [vmem:[#allocation9 + $0x280] sm:$0xff] }
 0x3fe   :  { %7481 = vmatprep.subr.bf16.mxu1 %v12489_v4  ;;  %v476_v3 = vld [vmem:[#allocation9 + $0x380] sm:$0xff]  ;;  %v11786_v4 = vcombine.low %v380_v55, %v412_v56  ;;  %v733_v55 = vld [vmem:[#allocation9 + $0xb88] sm:$0xff] }
 0x3ff   :  { %v11851_v14 = vcombine.high %v444_v1, %v476_v3  ;;  %v11850_v26 = vcombine.low %v444_v1, %v476_v3  ;;  %v797_v1 = vld [vmem:[#allocation9 + $0xd88] sm:$0xff] }
 0x400   :  { %7441 = vmatpush1.bf16.msra.mxu0 %v12486_v17  ;;  %v508_v17 = vld [vmem:[#allocation9 + $0x480] sm:$0xff] }
 0x401   :  { %7482 = vmatpush1.bf16.msra.mxu1 %v12488_v18  ;;  %7442 = vmatprep.subr.bf16.mxu0 %v12551_v21  ;;  %v540_v18 = vld [vmem:[#allocation9 + $0x580] sm:$0xff]  ;;  %v11853_v21 = vcombine.high %v445_v5, %v477_v8 }
 0x402   :  { %7483 = vmatprep.subr.bf16.mxu1 %v12553_v22  ;;  %v509_v22 = vld [vmem:[#allocation9 + $0x488] sm:$0xff]  ;;  %v11915_v29 = vcombine.high %v508_v17, %v540_v18  ;;  %v11914_v36 = vcombine.low %v508_v17, %v540_v18  ;;  %v860_v17 = vld [vmem:[#allocation9 + $0xf80] sm:$0xff] }
 0x403   :  { %v11916_v37 = vcombine.low %v509_v22, %v541_v25 }
 0x404   :  { %7443 = vmatpush1.bf16.msra.mxu0 %v12550_v31  ;;  %v11917_v31 = vcombine.high %v509_v22, %v541_v25  ;;  %v829_v22 = vld [vmem:[#allocation9 + $0xe88] sm:$0xff] }
 0x405   :  { %7484 = vmatpush1.bf16.msra.mxu1 %v12552_v32  ;;  %7444 = vmatprep.subr.bf16.mxu0 %v12615_v33  ;;  %v572_v32 = vld [vmem:[#allocation9 + $0x680] sm:$0xff]  ;;  %v861_v25 = vld [vmem:[#allocation9 + $0xf88] sm:$0xff] }
 0x406   :  { %7485 = vmatprep.subr.bf16.mxu1 %v12617_v34  ;;  %v604_v33 = vld [vmem:[#allocation9 + $0x780] sm:$0xff]  ;;  %v573_v34 = vld [vmem:[#allocation9 + $0x688] sm:$0xff] }
 0x407   :  { %v11979_v38 = vcombine.high %v572_v32, %v604_v33  ;;  %v11978_v48 = vcombine.low %v572_v32, %v604_v33  ;;  %v11980_v49 = vcombine.low %v573_v34, %v605_v35 }
 0x408   :  { %7445 = vmatpush1.bf16.msra.mxu0 %v12614_v41  ;;  %v11981_v41 = vcombine.high %v573_v34, %v605_v35  ;;  %v12237_v35 = vcombine.high %v829_v22, %v861_v25 }
 0x409   :  { %7486 = vmatpush1.bf16.msra.mxu1 %v12616_v42  ;;  %7446 = vmatprep.subr.bf16.mxu0 %v12679_v45  ;;  %v636_v42 = vld [vmem:[#allocation9 + $0x880] sm:$0xff] }
 0x40a   :  { %7487 = vmatprep.subr.bf16.mxu1 %v12681_v30  ;;  %v668_v45 = vld [vmem:[#allocation9 + $0x980] sm:$0xff]  ;;  %v637_v30 = vld [vmem:[#allocation9 + $0x888] sm:$0xff] }
 0x40b   :  { %v12043_v50 = vcombine.high %v636_v42, %v668_v45  ;;  %v12042_v56 = vcombine.low %v636_v42, %v668_v45  ;;  %v12044_v57 = vcombine.low %v637_v30, %v669_v47  ;;  %v925_v42 = vld [vmem:[#allocation9 + $0x1188] sm:$0xff] }
 0x40c   :  { %7447 = vmatpush1.bf16.msra.mxu0 %v12678_v51  ;;  %v12045_v51 = vcombine.high %v637_v30, %v669_v47  ;;  %v12236_v30 = vcombine.low %v829_v22, %v861_v25 }
 0x40d   :  { %7488 = vmatpush1.bf16.msra.mxu1 %v12680_v52  ;;  %7448 = vmatprep.subr.bf16.mxu0 %v12743_v53  ;;  %v700_v52 = vld [vmem:[#allocation9 + $0xa80] sm:$0xff] }
 0x40e   :  { %7489 = vmatprep.subr.bf16.mxu1 %v12745_v54  ;;  %v732_v53 = vld [vmem:[#allocation9 + $0xb80] sm:$0xff]  ;;  %v701_v54 = vld [vmem:[#allocation9 + $0xa88] sm:$0xff] }
 0x40f   :  { %v12107_v58 = vcombine.high %v700_v52, %v732_v53  ;;  %v12106_v3 = vcombine.low %v700_v52, %v732_v53  ;;  %v989_v52 = vld [vmem:[#allocation9 + $0x1388] sm:$0xff] }
 0x410   :  { %7449 = vmatpush1.bf16.msra.mxu0 %v12742_v59  ;;  %v12109_v59 = vcombine.high %v701_v54, %v733_v55 }
 0x411   :  { %7490 = vmatpush1.bf16.msra.mxu1 %v12744_v62  ;;  %7500 = vmatprep.subr.bf16.mxu0 %v11787_v63  ;;  %v764_v62 = vld [vmem:[#allocation9 + $0xc80] sm:$0xff] }
 0x412   :  { %7541 = vmatprep.subr.bf16.mxu1 %v11789_v0  ;;  %v796_v63 = vld [vmem:[#allocation9 + $0xd80] sm:$0xff]  ;;  %v765_v0 = vld [vmem:[#allocation9 + $0xc88] sm:$0xff] }
 0x413   :  { %7451 = vmatmul.mubr.bf16.vlgmr.msra.gmra.mrb[32].mxu0 %v14995_v61  ;;  %v12171_v5 = vcombine.high %v764_v62, %v796_v63  ;;  %v12172_v33 = vcombine.low %v765_v0, %v797_v1 }
 0x414   :  { %7492 = vmatmul.mubr.bf16.vlgmr.msra.gmra.mrb[32].mxu1 %v14995_v61  ;;  %7501 = vmatpush1.bf16.msra.mxu0 %v11786_v4  ;;  %v12108_v4 = vcombine.low %v701_v54, %v733_v55 }
 0x415   :  { %7532 = vmatprep.mubr.bf16.mxu0 %v14993_v60  ;;  %7542 = vmatpush1.bf16.msra.mxu1 %v11788_v9  ;;  %v12173_v9 = vcombine.high %v765_v0, %v797_v1 }
 0x416   :  { %7573 = vmatprep.mubr.bf16.mxu1 %v14993_v60  ;;  %7502 = vmatprep.subr.bf16.mxu0 %v11851_v14  ;;  %v828_v14 = vld [vmem:[#allocation9 + $0xe80] sm:$0xff] }
 0x417   :  { %7543 = vmatprep.subr.bf16.mxu1 %v11853_v21  ;;  %v12235_v34 = vcombine.high %v828_v14, %v860_v17  ;;  %v12234_v45 = vcombine.low %v828_v14, %v860_v17  ;;  %v1117_v14 = vld [vmem:[#allocation9 + $0x1788] sm:$0xff] }
 0x418   :  { %7503 = vmatpush1.bf16.msra.mxu0 %v11850_v26 }
 0x419   :  { %7544 = vmatpush1.bf16.msra.mxu1 %v11852_v28  ;;  %7504 = vmatprep.subr.bf16.mxu0 %v11915_v29  ;;  %v12170_v29 = vcombine.low %v764_v62, %v796_v63  ;;  %v1053_v62 = vld [vmem:[#allocation9 + $0x1588] sm:$0xff] }
 0x41a   :  { %7545 = vmatprep.subr.bf16.mxu1 %v11917_v31 }
 0x41c   :  { %7505 = vmatpush1.bf16.msra.mxu0 %v11914_v36  ;;  %v892_v36 = vld [vmem:[#allocation9 + $0x1080] sm:$0xff] }
 0x41d   :  { %7546 = vmatpush1.bf16.msra.mxu1 %v11916_v37  ;;  %7506 = vmatprep.subr.bf16.mxu0 %v11979_v38  ;;  %v924_v37 = vld [vmem:[#allocation9 + $0x1180] sm:$0xff] }
 0x41e   :  { %7547 = vmatprep.subr.bf16.mxu1 %v11981_v41  ;;  %v893_v41 = vld [vmem:[#allocation9 + $0x1088] sm:$0xff]  ;;  %v12299_v47 = vcombine.high %v892_v36, %v924_v37  ;;  %v12298_v53 = vcombine.low %v892_v36, %v924_v37 }
 0x41f   :  { %v12300_v54 = vcombine.low %v893_v41, %v925_v42 }
 0x420   :  { %7507 = vmatpush1.bf16.msra.mxu0 %v11978_v48  ;;  %v12301_v48 = vcombine.high %v893_v41, %v925_v42  ;;  %v1244_v41 = vld [vmem:[#allocation9 + $0x1b80] sm:$0xff]  ;;  %v1213_v42 = vld [vmem:[#allocation9 + $0x1a88] sm:$0xff] }
 0x421   :  { %7548 = vmatpush1.bf16.msra.mxu1 %v11980_v49  ;;  %7508 = vmatprep.subr.bf16.mxu0 %v12043_v50  ;;  %v956_v49 = vld [vmem:[#allocation9 + $0x1280] sm:$0xff] }
 0x422   :  { %7549 = vmatprep.subr.bf16.mxu1 %v12045_v51  ;;  %v988_v50 = vld [vmem:[#allocation9 + $0x1380] sm:$0xff]  ;;  %v957_v51 = vld [vmem:[#allocation9 + $0x1288] sm:$0xff] }
 0x423   :  { %v12363_v55 = vcombine.high %v956_v49, %v988_v50  ;;  %v12362_v63 = vcombine.low %v956_v49, %v988_v50  ;;  %v12364_v0 = vcombine.low %v957_v51, %v989_v52  ;;  %v1276_v50 = vld [vmem:[#allocation9 + $0x1c80] sm:$0xff] }
 0x424   :  { %7509 = vmatpush1.bf16.msra.mxu0 %v12042_v56  ;;  %v12365_v56 = vcombine.high %v957_v51, %v989_v52  ;;  %v1308_v51 = vld [vmem:[#allocation9 + $0x1d80] sm:$0xff]  ;;  %v1277_v52 = vld [vmem:[#allocation9 + $0x1c88] sm:$0xff] }
 0x425   :  { %7550 = vmatpush1.bf16.msra.mxu1 %v12044_v57  ;;  %7510 = vmatprep.subr.bf16.mxu0 %v12107_v58  ;;  %v1020_v57 = vld [vmem:[#allocation9 + $0x1480] sm:$0xff] }
 0x426   :  { %v15063_v8 = vpop.f32.mrb[20].mxu0  ;;  %7551 = vmatprep.subr.bf16.mxu1 %v12109_v59  ;;  %v1052_v58 = vld [vmem:[#allocation9 + $0x1580] sm:$0xff]  ;;  %v1021_v59 = vld [vmem:[#allocation9 + $0x1488] sm:$0xff] }
 0x427   :  { %17578 = vst [vmem:[#allocation22_spill] sm:$0xff] %v15063_v8  ;;  %v15065_v18 = vpop.f32.mrb[20].mxu1  ;;  %v15067_v21 = vpop.f32.mrb[21].mxu0  ;;  %v12427_v1 = vcombine.high %v1020_v57, %v1052_v58  ;;  %v12426_v17 = vcombine.low %v1020_v57, %v1052_v58  ;;  %v12428_v22 = vcombine.low %v1021_v59, %v1053_v62  ;;  %v1340_v58 = vld [vmem:[#allocation9 + $0x1e80] sm:$0xff] }
 0x428   :  { %17579 = vst [vmem:[#allocation23_spill] sm:$0xff] %v15065_v18  ;;  %17580 = vst [vmem:[#allocation24_spill] sm:$0xff] %v15067_v21  ;;  %v15069_v26 = vpop.f32.mrb[21].mxu1  ;;  %v7210_v28 = vpop.f32.mrb[22].mxu0  ;;  %7511 = vmatpush1.bf16.msra.mxu0 %v12106_v3  ;;  %v12429_v3 = vcombine.high %v1021_v59, %v1053_v62  ;;  %v1372_v59 = vld [vmem:[#allocation9 + $0x1f80] sm:$0xff]  ;;  %v1341_v62 = vld [vmem:[#allocation9 + $0x1e88] sm:$0xff] }
 0x429   :  { %17581 = vst [vmem:[#allocation25_spill] sm:$0xff] %v15069_v26  ;;  %v7251_v31 = vpop.f32.mrb[22].mxu1  ;;  %7552 = vmatpush1.bf16.msra.mxu1 %v12108_v4  ;;  %v7211_v32 = vpop.f32.mrb[23].mxu0  ;;  %7512 = vmatprep.subr.bf16.mxu0 %v12171_v5  ;;  %v1084_v4 = vld [vmem:[#allocation9 + $0x1680] sm:$0xff] }
 0x42a   :  { %7553 = vmatprep.subr.bf16.mxu1 %v12173_v9  ;;  %v7252_v38 = vpop.f32.mrb[23].mxu1  ;;  %v1116_v5 = vld [vmem:[#allocation9 + $0x1780] sm:$0xff]  ;;  %v1085_v9 = vld [vmem:[#allocation9 + $0x1688] sm:$0xff] }
 0x42b   :  { %v12491_v25 = vcombine.high %v1084_v4, %v1116_v5  ;;  %v12493_v28 = vcombine.high %v1085_v9, %v1117_v14  ;;  %v1180_v31 = vld [vmem:[#allocation9 + $0x1980] sm:$0xff]  ;;  %v1149_v32 = vld [vmem:[#allocation9 + $0x1888] sm:$0xff] }
 0x42c   :  { %7513 = vmatpush1.bf16.msra.mxu0 %v12170_v29  ;;  %v1148_v29 = vld [vmem:[#allocation9 + $0x1880] sm:$0xff] }
 0x42d   :  { %7554 = vmatpush1.bf16.msra.mxu1 %v12172_v33  ;;  %7514 = vmatprep.subr.bf16.mxu0 %v12235_v34  ;;  %v1181_v33 = vld [vmem:[#allocation9 + $0x1988] sm:$0xff]  ;;  %v12490_v34 = vcombine.low %v1084_v4, %v1116_v5  ;;  %v12555_v36 = vcombine.high %v1148_v29, %v1180_v31  ;;  %v1212_v38 = vld [vmem:[#allocation9 + $0x1a80] sm:$0xff]  ;;  %v382_v5 = vld [vmem:[#allocation9 + $0x90] sm:$0xff] }
 0x42e   :  { %7555 = vmatprep.subr.bf16.mxu1 %v12237_v35  ;;  %v12492_v35 = vcombine.low %v1085_v9, %v1117_v14  ;;  %v12557_v37 = vcombine.high %v1149_v32, %v1181_v33  ;;  %v414_v9 = vld [vmem:[#allocation9 + $0x190] sm:$0xff]  ;;  %v383_v14 = vld [vmem:[#allocation9 + $0x98] sm:$0xff]  ;;  %v15296_v26 = vld [vmem:[#allocation12 + $0x100] sm:$0xff]  }
 0x42f   :  { %17621 = vst [vmem:[#allocation65_spill] sm:$0xff] %v15296_v26 }
 0x430   :  { %7515 = vmatpush1.bf16.msra.mxu0 %v12234_v45  ;;  %v1245_v45 = vld [vmem:[#allocation9 + $0x1b88] sm:$0xff] }
 0x431   :  { %7556 = vmatpush1.bf16.msra.mxu1 %v12236_v30  ;;  %7516 = vmatprep.subr.bf16.mxu0 %v12299_v47  ;;  %v12554_v30 = vcombine.low %v1148_v29, %v1180_v31  ;;  %v12556_v47 = vcombine.low %v1149_v32, %v1181_v33  ;;  %v12621_v49 = vcombine.high %v1213_v42, %v1245_v45  ;;  %v446_v31 = vld [vmem:[#allocation9 + $0x290] sm:$0xff] }
 0x432   :  { %7557 = vmatprep.subr.bf16.mxu1 %v12301_v48  ;;  %v12619_v48 = vcombine.high %v1212_v38, %v1244_v41  ;;  %v478_v32 = vld [vmem:[#allocation9 + $0x390] sm:$0xff]  ;;  %v11790_v33 = vcombine.low %v382_v5, %v414_v9 }
 0x434   :  { %7517 = vmatpush1.bf16.msra.mxu0 %v12298_v53  ;;  %v1309_v53 = vld [vmem:[#allocation9 + $0x1d88] sm:$0xff] }
 0x435   :  { %7558 = vmatpush1.bf16.msra.mxu1 %v12300_v54  ;;  %7518 = vmatprep.subr.bf16.mxu0 %v12363_v55  ;;  %v12618_v54 = vcombine.low %v1212_v38, %v1244_v41  ;;  %v12620_v55 = vcombine.low %v1213_v42, %v1245_v45  ;;  %v12685_v57 = vcombine.high %v1277_v52, %v1309_v53  ;;  %v510_v38 = vld [vmem:[#allocation9 + $0x490] sm:$0xff]  ;;  %v511_v45 = vld [vmem:[#allocation9 + $0x498] sm:$0xff] }
 0x436   :  { %7559 = vmatprep.subr.bf16.mxu1 %v12365_v56  ;;  %v12683_v56 = vcombine.high %v1276_v50, %v1308_v51  ;;  %v542_v41 = vld [vmem:[#allocation9 + $0x590] sm:$0xff] }
 0x438   :  { %7519 = vmatpush1.bf16.msra.mxu0 %v12362_v63  ;;  %v1373_v63 = vld [vmem:[#allocation9 + $0x1f88] sm:$0xff] }
 0x439   :  { %7560 = vmatpush1.bf16.msra.mxu1 %v12364_v0  ;;  %7520 = vmatprep.subr.bf16.mxu0 %v12427_v1  ;;  %v12682_v0 = vcombine.low %v1276_v50, %v1308_v51  ;;  %v12684_v1 = vcombine.low %v1277_v52, %v1309_v53  ;;  %v12749_v4 = vcombine.high %v1341_v62, %v1373_v63  ;;  %v574_v51 = vld [vmem:[#allocation9 + $0x690] sm:$0xff]  ;;  %v575_v53 = vld [vmem:[#allocation9 + $0x698] sm:$0xff] }
 0x43a   :  { %7561 = vmatprep.subr.bf16.mxu1 %v12429_v3  ;;  %v12747_v3 = vcombine.high %v1340_v58, %v1372_v59  ;;  %v606_v52 = vld [vmem:[#allocation9 + $0x790] sm:$0xff] }
 0x43c   :  { %7521 = vmatpush1.bf16.msra.mxu0 %v12426_v17  ;;  %v415_v17 = vld [vmem:[#allocation9 + $0x198] sm:$0xff] }
 0x43d   :  { %7562 = vmatpush1.bf16.msra.mxu1 %v12428_v22  ;;  %7522 = vmatprep.subr.bf16.mxu0 %v12491_v25  ;;  %v12746_v22 = vcombine.low %v1340_v58, %v1372_v59  ;;  %v12748_v25 = vcombine.low %v1341_v62, %v1373_v63  ;;  %v11793_v29 = vcombine.high %v383_v14, %v415_v17  ;;  %v638_v59 = vld [vmem:[#allocation9 + $0x890] sm:$0xff]  ;;  %v639_v63 = vld [vmem:[#allocation9 + $0x898] sm:$0xff] }
 0x43e   :  { %7563 = vmatprep.subr.bf16.mxu1 %v12493_v28  ;;  %v11791_v28 = vcombine.high %v382_v5, %v414_v9  ;;  %v670_v62 = vld [vmem:[#allocation9 + $0x990] sm:$0xff] }
 0x43f   :  { %v702_v9 = vld [vmem:[#allocation9 + $0xa90] sm:$0xff] }
 0x440   :  { %7523 = vmatpush1.bf16.msra.mxu0 %v12490_v34  ;;  %v447_v34 = vld [vmem:[#allocation9 + $0x298] sm:$0xff] }
 0x441   :  { %7564 = vmatpush1.bf16.msra.mxu1 %v12492_v35  ;;  %7524 = vmatprep.subr.bf16.mxu0 %v12555_v36  ;;  %v479_v35 = vld [vmem:[#allocation9 + $0x398] sm:$0xff]  ;;  %v11792_v36 = vcombine.low %v383_v14, %v415_v17  ;;  %v734_v14 = vld [vmem:[#allocation9 + $0xb90] sm:$0xff] }
 0x442   :  { %7565 = vmatprep.subr.bf16.mxu1 %v12557_v37  ;;  %v11855_v37 = vcombine.high %v446_v31, %v478_v32  ;;  %v11857_v42 = vcombine.high %v447_v34, %v479_v35  ;;  %v703_v17 = vld [vmem:[#allocation9 + $0xa98] sm:$0xff] }
 0x444   :  { %7525 = vmatpush1.bf16.msra.mxu0 %v12554_v30  ;;  %v543_v30 = vld [vmem:[#allocation9 + $0x598] sm:$0xff] }
 0x445   :  { %7566 = vmatpush1.bf16.msra.mxu1 %v12556_v47  ;;  %7526 = vmatprep.subr.bf16.mxu0 %v12619_v48  ;;  %v11854_v47 = vcombine.low %v446_v31, %v478_v32  ;;  %v11856_v48 = vcombine.low %v447_v34, %v479_v35  ;;  %v11921_v50 = vcombine.high %v511_v45, %v543_v30  ;;  %v766_v32 = vld [vmem:[#allocation9 + $0xc90] sm:$0xff]  ;;  %v767_v34 = vld [vmem:[#allocation9 + $0xc98] sm:$0xff] }
 0x446   :  { %7567 = vmatprep.subr.bf16.mxu1 %v12621_v49  ;;  %v11919_v49 = vcombine.high %v510_v38, %v542_v41  ;;  %v799_v35 = vld [vmem:[#allocation9 + $0xd98] sm:$0xff] }
 0x448   :  { %7527 = vmatpush1.bf16.msra.mxu0 %v12618_v54  ;;  %v607_v54 = vld [vmem:[#allocation9 + $0x798] sm:$0xff] }
 0x449   :  { %7568 = vmatpush1.bf16.msra.mxu1 %v12620_v55  ;;  %7528 = vmatprep.subr.bf16.mxu0 %v12683_v56  ;;  %v11918_v55 = vcombine.low %v510_v38, %v542_v41  ;;  %v11920_v56 = vcombine.low %v511_v45, %v543_v30  ;;  %v11985_v58 = vcombine.high %v575_v53, %v607_v54  ;;  %v830_v45 = vld [vmem:[#allocation9 + $0xe90] sm:$0xff] }
 0x44a   :  { %7569 = vmatprep.subr.bf16.mxu1 %v12685_v57  ;;  %v11983_v57 = vcombine.high %v574_v51, %v606_v52  ;;  %v862_v30 = vld [vmem:[#allocation9 + $0xf90] sm:$0xff] }
 0x44c   :  { %7529 = vmatpush1.bf16.msra.mxu0 %v12682_v0  ;;  %v671_v0 = vld [vmem:[#allocation9 + $0x998] sm:$0xff] }
 0x44d   :  { %7570 = vmatpush1.bf16.msra.mxu1 %v12684_v1  ;;  %7530 = vmatprep.subr.bf16.mxu0 %v12747_v3  ;;  %v11982_v1 = vcombine.low %v574_v51, %v606_v52  ;;  %v11984_v3 = vcombine.low %v575_v53, %v607_v54  ;;  %v12049_v5 = vcombine.high %v639_v63, %v671_v0 }
 0x44e   :  { %7571 = vmatprep.subr.bf16.mxu1 %v12749_v4  ;;  %v12047_v4 = vcombine.high %v638_v59, %v670_v62 }
 0x450   :  { %7531 = vmatpush1.bf16.msra.mxu0 %v12746_v22  ;;  %v735_v22 = vld [vmem:[#allocation9 + $0xb98] sm:$0xff] }
 0x451   :  { %7572 = vmatpush1.bf16.msra.mxu1 %v12748_v25  ;;  %7582 = vmatprep.subr.bf16.mxu0 %v11791_v28  ;;  %v12046_v25 = vcombine.low %v638_v59, %v670_v62  ;;  %v12048_v28 = vcombine.low %v639_v63, %v671_v0  ;;  %v12113_v31 = vcombine.high %v703_v17, %v735_v22  ;;  %v894_v59 = vld [vmem:[#allocation9 + $0x1090] sm:$0xff]  ;;  %v895_v0 = vld [vmem:[#allocation9 + $0x1098] sm:$0xff] }
 0x452   :  { %7623 = vmatprep.subr.bf16.mxu1 %v11793_v29  ;;  %v12111_v29 = vcombine.high %v702_v9, %v734_v14  ;;  %v926_v62 = vld [vmem:[#allocation9 + $0x1190] sm:$0xff] }
 0x453   :  { %7533 = vmatmul.mubr.bf16.vlgmr.msra.gmra.mrb[36].mxu0 %v14995_v61 }
 0x454   :  { %7574 = vmatmul.mubr.bf16.vlgmr.msra.gmra.mrb[36].mxu1 %v14995_v61  ;;  %7583 = vmatpush1.bf16.msra.mxu0 %v11790_v33  ;;  %v798_v33 = vld [vmem:[#allocation9 + $0xd90] sm:$0xff] }
 0x455   :  { %7614 = vmatprep.mubr.bf16.mxu0 %v14993_v60  ;;  %7624 = vmatpush1.bf16.msra.mxu1 %v11792_v36  ;;  %v12110_v36 = vcombine.low %v702_v9, %v734_v14  ;;  %v12175_v38 = vcombine.high %v766_v32, %v798_v33  ;;  %v12174_v53 = vcombine.low %v766_v32, %v798_v33  ;;  %v958_v14 = vld [vmem:[#allocation9 + $0x1290] sm:$0xff] }
 0x456   :  { %7655 = vmatprep.mubr.bf16.mxu1 %v14993_v60  ;;  %7584 = vmatprep.subr.bf16.mxu0 %v11855_v37  ;;  %v12112_v37 = vcombine.low %v703_v17, %v735_v22  ;;  %v990_v17 = vld [vmem:[#allocation9 + $0x1390] sm:$0xff]  ;;  %v959_v22 = vld [vmem:[#allocation9 + $0x1298] sm:$0xff] }
 0x457   :  { %7625 = vmatprep.subr.bf16.mxu1 %v11857_v42  ;;  %v12177_v42 = vcombine.high %v767_v34, %v799_v35  ;;  %v1022_v33 = vld [vmem:[#allocation9 + $0x1490] sm:$0xff] }
 0x458   :  { %7585 = vmatpush1.bf16.msra.mxu0 %v11854_v47 }
 0x459   :  { %7626 = vmatpush1.bf16.msra.mxu1 %v11856_v48  ;;  %7586 = vmatprep.subr.bf16.mxu0 %v11919_v49  ;;  %v831_v49 = vld [vmem:[#allocation9 + $0xe98] sm:$0xff] }
 0x45a   :  { %7627 = vmatprep.subr.bf16.mxu1 %v11921_v50  ;;  %v863_v50 = vld [vmem:[#allocation9 + $0xf98] sm:$0xff] }
 0x45c   :  { %7587 = vmatpush1.bf16.msra.mxu0 %v11918_v55 }
 0x45d   :  { %7628 = vmatpush1.bf16.msra.mxu1 %v11920_v56  ;;  %7588 = vmatprep.subr.bf16.mxu0 %v11983_v57  ;;  %v12176_v56 = vcombine.low %v767_v34, %v799_v35  ;;  %v12239_v57 = vcombine.high %v830_v45, %v862_v30  ;;  %v1054_v34 = vld [vmem:[#allocation9 + $0x1590] sm:$0xff]  ;;  %v1023_v35 = vld [vmem:[#allocation9 + $0x1498] sm:$0xff] }
 0x45e   :  { %7629 = vmatprep.subr.bf16.mxu1 %v11985_v58  ;;  %v12241_v58 = vcombine.high %v831_v49, %v863_v50 }
 0x460   :  { %7589 = vmatpush1.bf16.msra.mxu0 %v11982_v1  ;;  %v927_v1 = vld [vmem:[#allocation9 + $0x1198] sm:$0xff] }
 0x461   :  { %7630 = vmatpush1.bf16.msra.mxu1 %v11984_v3  ;;  %7590 = vmatprep.subr.bf16.mxu0 %v12047_v4  ;;  %v12238_v3 = vcombine.low %v830_v45, %v862_v30  ;;  %v12240_v4 = vcombine.low %v831_v49, %v863_v50  ;;  %v12305_v9 = vcombine.high %v895_v0, %v927_v1  ;;  %v1086_v30 = vld [vmem:[#allocation9 + $0x1690] sm:$0xff]  ;;  %v1087_v50 = vld [vmem:[#allocation9 + $0x1698] sm:$0xff] }
 0x462   :  { %7631 = vmatprep.subr.bf16.mxu1 %v12049_v5  ;;  %v12303_v5 = vcombine.high %v894_v59, %v926_v62  ;;  %v1118_v49 = vld [vmem:[#allocation9 + $0x1790] sm:$0xff] }
 0x464   :  { %7591 = vmatpush1.bf16.msra.mxu0 %v12046_v25  ;;  %v991_v25 = vld [vmem:[#allocation9 + $0x1398] sm:$0xff] }
 0x465   :  { %7632 = vmatpush1.bf16.msra.mxu1 %v12048_v28  ;;  %7592 = vmatprep.subr.bf16.mxu0 %v12111_v29  ;;  %v12302_v28 = vcombine.low %v894_v59, %v926_v62  ;;  %v12304_v29 = vcombine.low %v895_v0, %v927_v1  ;;  %v12369_v32 = vcombine.high %v959_v22, %v991_v25  ;;  %v1151_v59 = vld [vmem:[#allocation9 + $0x1898] sm:$0xff] }
 0x466   :  { %v15075_v41 = vpop.f32.mrb[24].mxu0  ;;  %7633 = vmatprep.subr.bf16.mxu1 %v12113_v31  ;;  %v12367_v31 = vcombine.high %v958_v14, %v990_v17  ;;  %v1183_v62 = vld [vmem:[#allocation9 + $0x1998] sm:$0xff] }
 0x467   :  { %17582 = vst [vmem:[#allocation26_spill] sm:$0xff] %v15075_v41  ;;  %v15077_v47 = vpop.f32.mrb[24].mxu1  ;;  %v15079_v48 = vpop.f32.mrb[25].mxu0 }
 0x468   :  { %17583 = vst [vmem:[#allocation27_spill] sm:$0xff] %v15077_v47  ;;  %17584 = vst [vmem:[#allocation28_spill] sm:$0xff] %v15079_v48  ;;  %v15081_v51 = vpop.f32.mrb[25].mxu1  ;;  %v7292_v52 = vpop.f32.mrb[26].mxu0  ;;  %7593 = vmatpush1.bf16.msra.mxu0 %v12110_v36  ;;  %v1055_v36 = vld [vmem:[#allocation9 + $0x1598] sm:$0xff] }
 0x469   :  { %17585 = vst [vmem:[#allocation29_spill] sm:$0xff] %v15081_v51  ;;  %v7333_v54 = vpop.f32.mrb[26].mxu1  ;;  %7634 = vmatpush1.bf16.msra.mxu1 %v12112_v37  ;;  %v7293_v55 = vpop.f32.mrb[27].mxu0  ;;  %7594 = vmatprep.subr.bf16.mxu0 %v12175_v38  ;;  %v12366_v37 = vcombine.low %v958_v14, %v990_v17  ;;  %v12368_v38 = vcombine.low %v959_v22, %v991_v25  ;;  %v1119_v52 = vld [vmem:[#allocation9 + $0x1798] sm:$0xff] }
 0x46a   :  { %7635 = vmatprep.subr.bf16.mxu1 %v12177_v42  ;;  %v7334_v63 = vpop.f32.mrb[27].mxu1  ;;  %v12431_v42 = vcombine.high %v1022_v33, %v1054_v34  ;;  %v12433_v45 = vcombine.high %v1023_v35, %v1055_v36  ;;  %v12432_v54 = vcombine.low %v1023_v35, %v1055_v36  ;;  %v12495_v55 = vcombine.high %v1086_v30, %v1118_v49  ;;  %v1247_v14 = vld [vmem:[#allocation9 + $0x1b98] sm:$0xff] }
 0x46b   :  { %v12494_v63 = vcombine.low %v1086_v30, %v1118_v49  ;;  %v12496_v0 = vcombine.low %v1087_v50, %v1119_v52  ;;  %v12560_v22 = vcombine.low %v1151_v59, %v1183_v62  ;;  %v1375_v30 = vld [vmem:[#allocation9 + $0x1f98] sm:$0xff] }
 0x46c   :  { %7595 = vmatpush1.bf16.msra.mxu0 %v12174_v53  ;;  %v12430_v53 = vcombine.low %v1022_v33, %v1054_v34  ;;  %v1311_v33 = vld [vmem:[#allocation9 + $0x1d98] sm:$0xff] }
 0x46d   :  { %7636 = vmatpush1.bf16.msra.mxu1 %v12176_v56  ;;  %7596 = vmatprep.subr.bf16.mxu0 %v12239_v57  ;;  %v12497_v56 = vcombine.high %v1087_v50, %v1119_v52  ;;  %v1150_v57 = vld [vmem:[#allocation9 + $0x1890] sm:$0xff] }
 0x46e   :  { %7637 = vmatprep.subr.bf16.mxu1 %v12241_v58  ;;  %v1182_v58 = vld [vmem:[#allocation9 + $0x1990] sm:$0xff] }
 0x46f   :  { %v12559_v1 = vcombine.high %v1150_v57, %v1182_v58  ;;  %v12558_v17 = vcombine.low %v1150_v57, %v1182_v58  ;;  %v417_v57 = vld [vmem:[#allocation9 + $0x1a8] sm:$0xff] }
 0x470   :  { %7597 = vmatpush1.bf16.msra.mxu0 %v12238_v3  ;;  %v12561_v3 = vcombine.high %v1151_v59, %v1183_v62 }
 0x471   :  { %7638 = vmatpush1.bf16.msra.mxu1 %v12240_v4  ;;  %7598 = vmatprep.subr.bf16.mxu0 %v12303_v5  ;;  %v1214_v4 = vld [vmem:[#allocation9 + $0x1a90] sm:$0xff] }
 0x472   :  { %7639 = vmatprep.subr.bf16.mxu1 %v12305_v9  ;;  %v1246_v5 = vld [vmem:[#allocation9 + $0x1b90] sm:$0xff]  ;;  %v1215_v9 = vld [vmem:[#allocation9 + $0x1a98] sm:$0xff] }
 0x473   :  { %v12623_v25 = vcombine.high %v1214_v4, %v1246_v5  ;;  %v12622_v34 = vcombine.low %v1214_v4, %v1246_v5  ;;  %v12624_v35 = vcombine.low %v1215_v9, %v1247_v14  ;;  %v449_v4 = vld [vmem:[#allocation9 + $0x2a8] sm:$0xff] }
 0x474   :  { %7599 = vmatpush1.bf16.msra.mxu0 %v12302_v28  ;;  %v12625_v28 = vcombine.high %v1215_v9, %v1247_v14  ;;  %v481_v5 = vld [vmem:[#allocation9 + $0x3a8] sm:$0xff] }
 0x475   :  { %7640 = vmatpush1.bf16.msra.mxu1 %v12304_v29  ;;  %7600 = vmatprep.subr.bf16.mxu0 %v12367_v31  ;;  %v1278_v29 = vld [vmem:[#allocation9 + $0x1c90] sm:$0xff] }
 0x476   :  { %7641 = vmatprep.subr.bf16.mxu1 %v12369_v32  ;;  %v1310_v31 = vld [vmem:[#allocation9 + $0x1d90] sm:$0xff]  ;;  %v1279_v32 = vld [vmem:[#allocation9 + $0x1c98] sm:$0xff] }
 0x477   :  { %v12687_v36 = vcombine.high %v1278_v29, %v1310_v31  ;;  %v12686_v49 = vcombine.low %v1278_v29, %v1310_v31  ;;  %v12688_v50 = vcombine.low %v1279_v32, %v1311_v33  ;;  %v545_v29 = vld [vmem:[#allocation9 + $0x5a8] sm:$0xff] }
 0x478   :  { %7601 = vmatpush1.bf16.msra.mxu0 %v12366_v37  ;;  %v12689_v37 = vcombine.high %v1279_v32, %v1311_v33  ;;  %v11860_v32 = vcombine.low %v449_v4, %v481_v5 }
 0x479   :  { %7642 = vmatpush1.bf16.msra.mxu1 %v12368_v38  ;;  %7602 = vmatprep.subr.bf16.mxu0 %v12431_v42  ;;  %v1342_v38 = vld [vmem:[#allocation9 + $0x1e90] sm:$0xff] }
 0x47a   :  { %7643 = vmatprep.subr.bf16.mxu1 %v12433_v45  ;;  %v1374_v42 = vld [vmem:[#allocation9 + $0x1f90] sm:$0xff]  ;;  %v1343_v45 = vld [vmem:[#allocation9 + $0x1e98] sm:$0xff] }
 0x47b   :  { %v12751_v52 = vcombine.high %v1342_v38, %v1374_v42  ;;  %v12750_v58 = vcombine.low %v1342_v38, %v1374_v42  ;;  %v12752_v59 = vcombine.low %v1343_v45, %v1375_v30  ;;  %v609_v38 = vld [vmem:[#allocation9 + $0x7a8] sm:$0xff] }
 0x47c   :  { %7603 = vmatpush1.bf16.msra.mxu0 %v12430_v53  ;;  %v12753_v53 = vcombine.high %v1343_v45, %v1375_v30 }
 0x47d   :  { %7644 = vmatpush1.bf16.msra.mxu1 %v12432_v54  ;;  %7604 = vmatprep.subr.bf16.mxu0 %v12495_v55  ;;  %v384_v54 = vld [vmem:[#allocation9 + $0xa0] sm:$0xff] }
 0x47e   :  { %7645 = vmatprep.subr.bf16.mxu1 %v12497_v56  ;;  %v416_v55 = vld [vmem:[#allocation9 + $0x1a0] sm:$0xff]  ;;  %v385_v56 = vld [vmem:[#allocation9 + $0xa8] sm:$0xff] }
 0x47f   :  { %v11795_v62 = vcombine.high %v384_v54, %v416_v55  ;;  %v11796_v9 = vcombine.low %v385_v56, %v417_v57 }
 0x480   :  { %7605 = vmatpush1.bf16.msra.mxu0 %v12494_v63  ;;  %v11797_v63 = vcombine.high %v385_v56, %v417_v57 }
 0x481   :  { %7646 = vmatpush1.bf16.msra.mxu1 %v12496_v0  ;;  %7606 = vmatprep.subr.bf16.mxu0 %v12559_v1  ;;  %v448_v0 = vld [vmem:[#allocation9 + $0x2a0] sm:$0xff] }
 0x482   :  { %7647 = vmatprep.subr.bf16.mxu1 %v12561_v3  ;;  %v480_v1 = vld [vmem:[#allocation9 + $0x3a0] sm:$0xff]  ;;  %v11794_v3 = vcombine.low %v384_v54, %v416_v55  ;;  %v673_v54 = vld [vmem:[#allocation9 + $0x9a8] sm:$0xff] }
 0x483   :  { %v11859_v14 = vcombine.high %v448_v0, %v480_v1  ;;  %v11858_v31 = vcombine.low %v448_v0, %v480_v1  ;;  %v737_v0 = vld [vmem:[#allocation9 + $0xba8] sm:$0xff] }
 0x484   :  { %7607 = vmatpush1.bf16.msra.mxu0 %v12558_v17  ;;  %v512_v17 = vld [vmem:[#allocation9 + $0x4a0] sm:$0xff] }
 0x485   :  { %7648 = vmatpush1.bf16.msra.mxu1 %v12560_v22  ;;  %7608 = vmatprep.subr.bf16.mxu0 %v12623_v25  ;;  %v544_v22 = vld [vmem:[#allocation9 + $0x5a0] sm:$0xff]  ;;  %v11861_v25 = vcombine.high %v449_v4, %v481_v5 }
 0x486   :  { %7649 = vmatprep.subr.bf16.mxu1 %v12625_v28  ;;  %v513_v28 = vld [vmem:[#allocation9 + $0x4a8] sm:$0xff]  ;;  %v11923_v33 = vcombine.high %v512_v17, %v544_v22  ;;  %v11922_v42 = vcombine.low %v512_v17, %v544_v22 }
 0x487   :  { %v11924_v45 = vcombine.low %v513_v28, %v545_v29  ;;  %v769_v17 = vld [vmem:[#allocation9 + $0xca8] sm:$0xff] }
 0x488   :  { %7609 = vmatpush1.bf16.msra.mxu0 %v12622_v34  ;;  %v11925_v34 = vcombine.high %v513_v28, %v545_v29  ;;  %v801_v22 = vld [vmem:[#allocation9 + $0xda8] sm:$0xff] }
 0x489   :  { %7650 = vmatpush1.bf16.msra.mxu1 %v12624_v35  ;;  %7610 = vmatprep.subr.bf16.mxu0 %v12687_v36  ;;  %v576_v35 = vld [vmem:[#allocation9 + $0x6a0] sm:$0xff] }
 0x48a   :  { %7651 = vmatprep.subr.bf16.mxu1 %v12689_v37  ;;  %v608_v36 = vld [vmem:[#allocation9 + $0x7a0] sm:$0xff]  ;;  %v577_v37 = vld [vmem:[#allocation9 + $0x6a8] sm:$0xff] }
 0x48b   :  { %v11987_v30 = vcombine.high %v576_v35, %v608_v36  ;;  %v11986_v55 = vcombine.low %v576_v35, %v608_v36  ;;  %v11988_v56 = vcombine.low %v577_v37, %v609_v38 }
 0x48c   :  { %7611 = vmatpush1.bf16.msra.mxu0 %v12686_v49  ;;  %v11989_v49 = vcombine.high %v577_v37, %v609_v38  ;;  %v833_v37 = vld [vmem:[#allocation9 + $0xea8] sm:$0xff] }
 0x48d   :  { %7652 = vmatpush1.bf16.msra.mxu1 %v12688_v50  ;;  %7612 = vmatprep.subr.bf16.mxu0 %v12751_v52  ;;  %v640_v50 = vld [vmem:[#allocation9 + $0x8a0] sm:$0xff]  ;;  %v865_v38 = vld [vmem:[#allocation9 + $0xfa8] sm:$0xff] }
 0x48e   :  { %7653 = vmatprep.subr.bf16.mxu1 %v12753_v53  ;;  %v672_v52 = vld [vmem:[#allocation9 + $0x9a0] sm:$0xff]  ;;  %v641_v53 = vld [vmem:[#allocation9 + $0x8a8] sm:$0xff] }
 0x48f   :  { %v12051_v57 = vcombine.high %v640_v50, %v672_v52  ;;  %v12050_v1 = vcombine.low %v640_v50, %v672_v52  ;;  %v12180_v52 = vcombine.low %v769_v17, %v801_v22 }
 0x490   :  { %7613 = vmatpush1.bf16.msra.mxu0 %v12750_v58  ;;  %v12053_v58 = vcombine.high %v641_v53, %v673_v54 }
 0x491   :  { %7654 = vmatpush1.bf16.msra.mxu1 %v12752_v59  ;;  %7664 = vmatprep.subr.bf16.mxu0 %v11795_v62  ;;  %v704_v59 = vld [vmem:[#allocation9 + $0xaa0] sm:$0xff] }
 0x492   :  { %7705 = vmatprep.subr.bf16.mxu1 %v11797_v63  ;;  %v736_v62 = vld [vmem:[#allocation9 + $0xba0] sm:$0xff]  ;;  %v705_v63 = vld [vmem:[#allocation9 + $0xaa8] sm:$0xff] }
 0x493   :  { %7615 = vmatmul.mubr.bf16.vlgmr.msra.gmra.mrb[40].mxu0 %v14995_v61  ;;  %v12115_v4 = vcombine.high %v704_v59, %v736_v62  ;;  %v12117_v5 = vcombine.high %v705_v63, %v737_v0  ;;  %v12116_v28 = vcombine.low %v705_v63, %v737_v0  ;;  %v12244_v63 = vcombine.low %v833_v37, %v865_v38 }
 0x494   :  { %7656 = vmatmul.mubr.bf16.vlgmr.msra.gmra.mrb[40].mxu1 %v14995_v61  ;;  %7665 = vmatpush1.bf16.msra.mxu0 %v11794_v3  ;;  %v12052_v3 = vcombine.low %v641_v53, %v673_v54  ;;  %v12245_v54 = vcombine.high %v833_v37, %v865_v38 }
 0x495   :  { %7696 = vmatprep.mubr.bf16.mxu0 %v14993_v60  ;;  %7706 = vmatpush1.bf16.msra.mxu1 %v11796_v9  ;;  %v768_v9 = vld [vmem:[#allocation9 + $0xca0] sm:$0xff] }
 0x496   :  { %7737 = vmatprep.mubr.bf16.mxu1 %v14993_v60  ;;  %7666 = vmatprep.subr.bf16.mxu0 %v11859_v14  ;;  %v800_v14 = vld [vmem:[#allocation9 + $0xda0] sm:$0xff] }
 0x497   :  { %7707 = vmatprep.subr.bf16.mxu1 %v11861_v25  ;;  %v12114_v25 = vcombine.low %v704_v59, %v736_v62  ;;  %v12179_v29 = vcombine.high %v768_v9, %v800_v14  ;;  %v929_v59 = vld [vmem:[#allocation9 + $0x11a8] sm:$0xff] }
 0x498   :  { %7667 = vmatpush1.bf16.msra.mxu0 %v11858_v31 }
 0x499   :  { %7708 = vmatpush1.bf16.msra.mxu1 %v11860_v32  ;;  %7668 = vmatprep.subr.bf16.mxu0 %v11923_v33  ;;  %v12181_v32 = vcombine.high %v769_v17, %v801_v22  ;;  %v832_v33 = vld [vmem:[#allocation9 + $0xea0] sm:$0xff] }
 0x49a   :  { %7709 = vmatprep.subr.bf16.mxu1 %v11925_v34  ;;  %v864_v34 = vld [vmem:[#allocation9 + $0xfa0] sm:$0xff] }
 0x49b   :  { %v12243_v53 = vcombine.high %v832_v33, %v864_v34  ;;  %v12242_v62 = vcombine.low %v832_v33, %v864_v34  ;;  %v1057_v33 = vld [vmem:[#allocation9 + $0x15a8] sm:$0xff] }
 0x49c   :  { %7669 = vmatpush1.bf16.msra.mxu0 %v11922_v42 }
 0x49d   :  { %7710 = vmatpush1.bf16.msra.mxu1 %v11924_v45  ;;  %7670 = vmatprep.subr.bf16.mxu0 %v11987_v30  ;;  %v12178_v30 = vcombine.low %v768_v9, %v800_v14  ;;  %v993_v9 = vld [vmem:[#allocation9 + $0x13a8] sm:$0xff] }
 0x49e   :  { %7711 = vmatprep.subr.bf16.mxu1 %v11989_v49 }
 0x4a0   :  { %7671 = vmatpush1.bf16.msra.mxu0 %v11986_v55  ;;  %v896_v55 = vld [vmem:[#allocation9 + $0x10a0] sm:$0xff] }
 0x4a1   :  { %7712 = vmatpush1.bf16.msra.mxu1 %v11988_v56  ;;  %7672 = vmatprep.subr.bf16.mxu0 %v12051_v57  ;;  %v928_v56 = vld [vmem:[#allocation9 + $0x11a0] sm:$0xff] }
 0x4a2   :  { %7713 = vmatprep.subr.bf16.mxu1 %v12053_v58  ;;  %v897_v58 = vld [vmem:[#allocation9 + $0x10a8] sm:$0xff]  ;;  %v12307_v0 = vcombine.high %v896_v55, %v928_v56  ;;  %v12306_v14 = vcombine.low %v896_v55, %v928_v56 }
 0x4a3   :  { %v12308_v17 = vcombine.low %v897_v58, %v929_v59 }
 0x4a4   :  { %7673 = vmatpush1.bf16.msra.mxu0 %v12050_v1  ;;  %v12309_v1 = vcombine.high %v897_v58, %v929_v59  ;;  %v1184_v58 = vld [vmem:[#allocation9 + $0x19a0] sm:$0xff]  ;;  %v1153_v59 = vld [vmem:[#allocation9 + $0x18a8] sm:$0xff] }
 0x4a5   :  { %7714 = vmatpush1.bf16.msra.mxu1 %v12052_v3  ;;  %7674 = vmatprep.subr.bf16.mxu0 %v12115_v4  ;;  %v960_v3 = vld [vmem:[#allocation9 + $0x12a0] sm:$0xff] }
 0x4a6   :  { %v15087_v31 = vpop.f32.mrb[28].mxu0  ;;  %7715 = vmatprep.subr.bf16.mxu1 %v12117_v5  ;;  %v992_v4 = vld [vmem:[#allocation9 + $0x13a0] sm:$0xff]  ;;  %v961_v5 = vld [vmem:[#allocation9 + $0x12a8] sm:$0xff] }
 0x4a7   :  { %17586 = vst [vmem:[#allocation30_spill] sm:$0xff] %v15087_v31  ;;  %v15089_v35 = vpop.f32.mrb[28].mxu1  ;;  %v15091_v36 = vpop.f32.mrb[29].mxu0  ;;  %v12371_v22 = vcombine.high %v960_v3, %v992_v4  ;;  %v12370_v34 = vcombine.low %v960_v3, %v992_v4  ;;  %v12372_v37 = vcombine.low %v961_v5, %v993_v9  ;;  %v1216_v4 = vld [vmem:[#allocation9 + $0x1aa0] sm:$0xff]  ;;  %v15260_v31 = vld [vmem:[#allocation12 + $0xf0] sm:$0xff]  }
 0x4a8   :  { %17587 = vst [vmem:[#allocation31_spill] sm:$0xff] %v15089_v35  ;;  %17588 = vst [vmem:[#allocation32_spill] sm:$0xff] %v15091_v36  ;;  %v15093_v42 = vpop.f32.mrb[29].mxu1  ;;  %v7374_v45 = vpop.f32.mrb[30].mxu0  ;;  %7675 = vmatpush1.bf16.msra.mxu0 %v12114_v25  ;;  %v12373_v25 = vcombine.high %v961_v5, %v993_v9  ;;  %v1248_v5 = vld [vmem:[#allocation9 + $0x1ba0] sm:$0xff]  ;;  %v1217_v9 = vld [vmem:[#allocation9 + $0x1aa8] sm:$0xff] }
 0x4a9   :  { %17589 = vst [vmem:[#allocation33_spill] sm:$0xff] %v15093_v42  ;;  %v7415_v49 = vpop.f32.mrb[30].mxu1  ;;  %7716 = vmatpush1.bf16.msra.mxu1 %v12116_v28  ;;  %v7375_v50 = vpop.f32.mrb[31].mxu0  ;;  %7676 = vmatprep.subr.bf16.mxu0 %v12179_v29  ;;  %v1024_v28 = vld [vmem:[#allocation9 + $0x14a0] sm:$0xff] }
 0x4aa   :  { %7717 = vmatprep.subr.bf16.mxu1 %v12181_v32  ;;  %v7416_v57 = vpop.f32.mrb[31].mxu1  ;;  %v1056_v29 = vld [vmem:[#allocation9 + $0x15a0] sm:$0xff]  ;;  %v1025_v32 = vld [vmem:[#allocation9 + $0x14a8] sm:$0xff] }
 0x4ab   :  { %v12435_v38 = vcombine.high %v1024_v28, %v1056_v29  ;;  %v12437_v45 = vcombine.high %v1025_v32, %v1057_v33  ;;  %v1120_v49 = vld [vmem:[#allocation9 + $0x17a0] sm:$0xff]  ;;  %v1089_v50 = vld [vmem:[#allocation9 + $0x16a8] sm:$0xff] }
 0x4ac   :  { %7677 = vmatpush1.bf16.msra.mxu0 %v12178_v30  ;;  %v1088_v30 = vld [vmem:[#allocation9 + $0x16a0] sm:$0xff] }
 0x4ad   :  { %7718 = vmatpush1.bf16.msra.mxu1 %v12180_v52  ;;  %7678 = vmatprep.subr.bf16.mxu0 %v12243_v53  ;;  %v1121_v52 = vld [vmem:[#allocation9 + $0x17a8] sm:$0xff]  ;;  %v12434_v53 = vcombine.low %v1024_v28, %v1056_v29  ;;  %v12499_v55 = vcombine.high %v1088_v30, %v1120_v49  ;;  %v1152_v57 = vld [vmem:[#allocation9 + $0x18a0] sm:$0xff] }
 0x4ae   :  { %7719 = vmatprep.subr.bf16.mxu1 %v12245_v54  ;;  %v12436_v54 = vcombine.low %v1025_v32, %v1057_v33  ;;  %v12501_v56 = vcombine.high %v1089_v50, %v1121_v52  ;;  %v1280_v29 = vld [vmem:[#allocation9 + $0x1ca0] sm:$0xff]  ;;  %v1281_v33 = vld [vmem:[#allocation9 + $0x1ca8] sm:$0xff] }
 0x4af   :  { %v1312_v32 = vld [vmem:[#allocation9 + $0x1da0] sm:$0xff] }
 0x4b0   :  { %7679 = vmatpush1.bf16.msra.mxu0 %v12242_v62  ;;  %v1185_v62 = vld [vmem:[#allocation9 + $0x19a8] sm:$0xff] }
 0x4b1   :  { %7720 = vmatpush1.bf16.msra.mxu1 %v12244_v63  ;;  %7680 = vmatprep.subr.bf16.mxu0 %v12307_v0  ;;  %v12498_v63 = vcombine.low %v1088_v30, %v1120_v49  ;;  %v12500_v0 = vcombine.low %v1089_v50, %v1121_v52  ;;  %v12565_v3 = vcombine.high %v1153_v59, %v1185_v62  ;;  %v1344_v49 = vld [vmem:[#allocation9 + $0x1ea0] sm:$0xff]  ;;  %v1345_v52 = vld [vmem:[#allocation9 + $0x1ea8] sm:$0xff] }
 0x4b2   :  { %7721 = vmatprep.subr.bf16.mxu1 %v12309_v1  ;;  %v12563_v1 = vcombine.high %v1152_v57, %v1184_v58  ;;  %v1376_v50 = vld [vmem:[#allocation9 + $0x1fa0] sm:$0xff] }
 0x4b4   :  { %7681 = vmatpush1.bf16.msra.mxu0 %v12306_v14  ;;  %v1249_v14 = vld [vmem:[#allocation9 + $0x1ba8] sm:$0xff] }
 0x4b5   :  { %7722 = vmatpush1.bf16.msra.mxu1 %v12308_v17  ;;  %7682 = vmatprep.subr.bf16.mxu0 %v12371_v22  ;;  %v12562_v17 = vcombine.low %v1152_v57, %v1184_v58  ;;  %v12564_v22 = vcombine.low %v1153_v59, %v1185_v62  ;;  %v12629_v28 = vcombine.high %v1217_v9, %v1249_v14  ;;  %v386_v58 = vld [vmem:[#allocation9 + $0xb0] sm:$0xff]  ;;  %v387_v62 = vld [vmem:[#allocation9 + $0xb8] sm:$0xff] }
 0x4b6   :  { %7723 = vmatprep.subr.bf16.mxu1 %v12373_v25  ;;  %v12627_v25 = vcombine.high %v1216_v4, %v1248_v5  ;;  %v418_v59 = vld [vmem:[#allocation9 + $0x1b0] sm:$0xff] }
 0x4b8   :  { %7683 = vmatpush1.bf16.msra.mxu0 %v12370_v34  ;;  %v1313_v34 = vld [vmem:[#allocation9 + $0x1da8] sm:$0xff] }
 0x4b9   :  { %7724 = vmatpush1.bf16.msra.mxu1 %v12372_v37  ;;  %7684 = vmatprep.subr.bf16.mxu0 %v12435_v38  ;;  %v12626_v37 = vcombine.low %v1216_v4, %v1248_v5  ;;  %v12628_v38 = vcombine.low %v1217_v9, %v1249_v14  ;;  %v12693_v30 = vcombine.high %v1281_v33, %v1313_v34  ;;  %v450_v5 = vld [vmem:[#allocation9 + $0x2b0] sm:$0xff] }
 0x4ba   :  { %7725 = vmatprep.subr.bf16.mxu1 %v12437_v45  ;;  %v12691_v45 = vcombine.high %v1280_v29, %v1312_v32  ;;  %v482_v9 = vld [vmem:[#allocation9 + $0x3b0] sm:$0xff]  ;;  %v11798_v14 = vcombine.low %v386_v58, %v418_v59 }
 0x4bc   :  { %7685 = vmatpush1.bf16.msra.mxu0 %v12434_v53  ;;  %v1377_v53 = vld [vmem:[#allocation9 + $0x1fa8] sm:$0xff] }
 0x4bd   :  { %7726 = vmatpush1.bf16.msra.mxu1 %v12436_v54  ;;  %7686 = vmatprep.subr.bf16.mxu0 %v12499_v55  ;;  %v12690_v54 = vcombine.low %v1280_v29, %v1312_v32  ;;  %v12692_v55 = vcombine.low %v1281_v33, %v1313_v34  ;;  %v12757_v57 = vcombine.high %v1345_v52, %v1377_v53  ;;  %v514_v29 = vld [vmem:[#allocation9 + $0x4b0] sm:$0xff]  ;;  %v515_v34 = vld [vmem:[#allocation9 + $0x4b8] sm:$0xff] }
 0x4be   :  { %7727 = vmatprep.subr.bf16.mxu1 %v12501_v56  ;;  %v12755_v56 = vcombine.high %v1344_v49, %v1376_v50  ;;  %v546_v32 = vld [vmem:[#allocation9 + $0x5b0] sm:$0xff] }
 0x4c0   :  { %7687 = vmatpush1.bf16.msra.mxu0 %v12498_v63  ;;  %v419_v63 = vld [vmem:[#allocation9 + $0x1b8] sm:$0xff] }
 0x4c1   :  { %7728 = vmatpush1.bf16.msra.mxu1 %v12500_v0  ;;  %7688 = vmatprep.subr.bf16.mxu0 %v12563_v1  ;;  %v12754_v0 = vcombine.low %v1344_v49, %v1376_v50  ;;  %v12756_v1 = vcombine.low %v1345_v52, %v1377_v53  ;;  %v11801_v4 = vcombine.high %v387_v62, %v419_v63  ;;  %v578_v50 = vld [vmem:[#allocation9 + $0x6b0] sm:$0xff]  ;;  %v579_v53 = vld [vmem:[#allocation9 + $0x6b8] sm:$0xff] }
 0x4c2   :  { %7729 = vmatprep.subr.bf16.mxu1 %v12565_v3  ;;  %v11799_v3 = vcombine.high %v386_v58, %v418_v59  ;;  %v610_v52 = vld [vmem:[#allocation9 + $0x7b0] sm:$0xff] }
 0x4c3   :  { %v642_v59 = vld [vmem:[#allocation9 + $0x8b0] sm:$0xff] }
 0x4c4   :  { %7689 = vmatpush1.bf16.msra.mxu0 %v12562_v17  ;;  %v451_v17 = vld [vmem:[#allocation9 + $0x2b8] sm:$0xff] }
 0x4c5   :  { %7730 = vmatpush1.bf16.msra.mxu1 %v12564_v22  ;;  %7690 = vmatprep.subr.bf16.mxu0 %v12627_v25  ;;  %v483_v22 = vld [vmem:[#allocation9 + $0x3b8] sm:$0xff]  ;;  %v11800_v25 = vcombine.low %v387_v62, %v419_v63  ;;  %v674_v62 = vld [vmem:[#allocation9 + $0x9b0] sm:$0xff] }
 0x4c6   :  { %7731 = vmatprep.subr.bf16.mxu1 %v12629_v28  ;;  %v11863_v28 = vcombine.high %v450_v5, %v482_v9  ;;  %v11865_v33 = vcombine.high %v451_v17, %v483_v22  ;;  %v643_v63 = vld [vmem:[#allocation9 + $0x8b8] sm:$0xff] }
 0x4c8   :  { %7691 = vmatpush1.bf16.msra.mxu0 %v12626_v37  ;;  %v547_v37 = vld [vmem:[#allocation9 + $0x5b8] sm:$0xff] }
 0x4c9   :  { %7732 = vmatpush1.bf16.msra.mxu1 %v12628_v38  ;;  %7692 = vmatprep.subr.bf16.mxu0 %v12691_v45  ;;  %v11862_v38 = vcombine.low %v450_v5, %v482_v9  ;;  %v11864_v45 = vcombine.low %v451_v17, %v483_v22  ;;  %v11929_v49 = vcombine.high %v515_v34, %v547_v37  ;;  %v706_v9 = vld [vmem:[#allocation9 + $0xab0] sm:$0xff]  ;;  %v707_v17 = vld [vmem:[#allocation9 + $0xab8] sm:$0xff] }
 0x4ca   :  { %7733 = vmatprep.subr.bf16.mxu1 %v12693_v30  ;;  %v11927_v30 = vcombine.high %v514_v29, %v546_v32  ;;  %v739_v22 = vld [vmem:[#allocation9 + $0xbb8] sm:$0xff] }
 0x4cc   :  { %7693 = vmatpush1.bf16.msra.mxu0 %v12690_v54  ;;  %v611_v54 = vld [vmem:[#allocation9 + $0x7b8] sm:$0xff] }
 0x4cd   :  { %7734 = vmatpush1.bf16.msra.mxu1 %v12692_v55  ;;  %7694 = vmatprep.subr.bf16.mxu0 %v12755_v56  ;;  %v11926_v55 = vcombine.low %v514_v29, %v546_v32  ;;  %v11928_v56 = vcombine.low %v515_v34, %v547_v37  ;;  %v11993_v58 = vcombine.high %v579_v53, %v611_v54  ;;  %v802_v34 = vld [vmem:[#allocation9 + $0xdb0] sm:$0xff]  ;;  %v771_v37 = vld [vmem:[#allocation9 + $0xcb8] sm:$0xff] }
 0x4ce   :  { %7735 = vmatprep.subr.bf16.mxu1 %v12757_v57  ;;  %v11991_v57 = vcombine.high %v578_v50, %v610_v52  ;;  %v12121_v32 = vcombine.high %v707_v17, %v739_v22 }
 0x4d0   :  { %7695 = vmatpush1.bf16.msra.mxu0 %v12754_v0  ;;  %v675_v0 = vld [vmem:[#allocation9 + $0x9b8] sm:$0xff] }
 0x4d1   :  { %7736 = vmatpush1.bf16.msra.mxu1 %v12756_v1  ;;  %7746 = vmatprep.subr.bf16.mxu0 %v11799_v3  ;;  %v11990_v1 = vcombine.low %v578_v50, %v610_v52  ;;  %v11992_v3 = vcombine.low %v579_v53, %v611_v54  ;;  %v12057_v5 = vcombine.high %v643_v63, %v675_v0  ;;  %v834_v53 = vld [vmem:[#allocation9 + $0xeb0] sm:$0xff] }
 0x4d2   :  { %7787 = vmatprep.subr.bf16.mxu1 %v11801_v4  ;;  %v12055_v4 = vcombine.high %v642_v59, %v674_v62  ;;  %v866_v54 = vld [vmem:[#allocation9 + $0xfb0] sm:$0xff] }
 0x4d3   :  { %7697 = vmatmul.mubr.bf16.vlgmr.msra.gmra.mrb[44].mxu0 %v14995_v61 }
 0x4d4   :  { %7738 = vmatmul.mubr.bf16.vlgmr.msra.gmra.mrb[44].mxu1 %v14995_v61  ;;  %7747 = vmatpush1.bf16.msra.mxu0 %v11798_v14  ;;  %v738_v14 = vld [vmem:[#allocation9 + $0xbb0] sm:$0xff] }
 0x4d5   :  { %7778 = vmatprep.mubr.bf16.mxu0 %v14993_v60  ;;  %7788 = vmatpush1.bf16.msra.mxu1 %v11800_v25  ;;  %v12054_v25 = vcombine.low %v642_v59, %v674_v62  ;;  %v12119_v29 = vcombine.high %v706_v9, %v738_v14 }
 0x4d6   :  { %7819 = vmatprep.mubr.bf16.mxu1 %v14993_v60  ;;  %7748 = vmatprep.subr.bf16.mxu0 %v11863_v28  ;;  %v12056_v28 = vcombine.low %v643_v63, %v675_v0 }
 0x4d7   :  { %7789 = vmatprep.subr.bf16.mxu1 %v11865_v33  ;;  %v770_v33 = vld [vmem:[#allocation9 + $0xcb0] sm:$0xff] }
 0x4d8   :  { %7749 = vmatpush1.bf16.msra.mxu0 %v11862_v38  ;;  %v803_v38 = vld [vmem:[#allocation9 + $0xdb8] sm:$0xff]  ;;  %v12182_v63 = vcombine.low %v770_v33, %v802_v34 }
 0x4d9   :  { %7790 = vmatpush1.bf16.msra.mxu1 %v11864_v45  ;;  %7750 = vmatprep.subr.bf16.mxu0 %v11927_v30  ;;  %v12118_v45 = vcombine.low %v706_v9, %v738_v14  ;;  %v12120_v30 = vcombine.low %v707_v17, %v739_v22  ;;  %v12185_v52 = vcombine.high %v771_v37, %v803_v38  ;;  %v898_v9 = vld [vmem:[#allocation9 + $0x10b0] sm:$0xff]  ;;  %v899_v22 = vld [vmem:[#allocation9 + $0x10b8] sm:$0xff] }
 0x4da   :  { %7791 = vmatprep.subr.bf16.mxu1 %v11929_v49  ;;  %v12183_v49 = vcombine.high %v770_v33, %v802_v34  ;;  %v930_v14 = vld [vmem:[#allocation9 + $0x11b0] sm:$0xff] }
 0x4db   :  { %v962_v34 = vld [vmem:[#allocation9 + $0x12b0] sm:$0xff] }
 0x4dc   :  { %7751 = vmatpush1.bf16.msra.mxu0 %v11926_v55 }
 0x4dd   :  { %7792 = vmatpush1.bf16.msra.mxu1 %v11928_v56  ;;  %7752 = vmatprep.subr.bf16.mxu0 %v11991_v57  ;;  %v835_v57 = vld [vmem:[#allocation9 + $0xeb8] sm:$0xff] }
 0x4de   :  { %7793 = vmatprep.subr.bf16.mxu1 %v11993_v58  ;;  %v867_v58 = vld [vmem:[#allocation9 + $0xfb8] sm:$0xff] }
 0x4e0   :  { %7753 = vmatpush1.bf16.msra.mxu0 %v11990_v1 }
 0x4e1   :  { %7794 = vmatpush1.bf16.msra.mxu1 %v11992_v3  ;;  %7754 = vmatprep.subr.bf16.mxu0 %v12055_v4  ;;  %v12184_v3 = vcombine.low %v771_v37, %v803_v38  ;;  %v12247_v4 = vcombine.high %v834_v53, %v866_v54  ;;  %v995_v37 = vld [vmem:[#allocation9 + $0x13b8] sm:$0xff]  ;;  %v12310_v38 = vcombine.low %v898_v9, %v930_v14 }
 0x4e2   :  { %7795 = vmatprep.subr.bf16.mxu1 %v12057_v5  ;;  %v12249_v5 = vcombine.high %v835_v57, %v867_v58 }
 0x4e4   :  { %7755 = vmatpush1.bf16.msra.mxu0 %v12054_v25  ;;  %v931_v25 = vld [vmem:[#allocation9 + $0x11b8] sm:$0xff] }
 0x4e5   :  { %7796 = vmatpush1.bf16.msra.mxu1 %v12056_v28  ;;  %7756 = vmatprep.subr.bf16.mxu0 %v12119_v29  ;;  %v12246_v28 = vcombine.low %v834_v53, %v866_v54  ;;  %v12248_v29 = vcombine.low %v835_v57, %v867_v58  ;;  %v12313_v33 = vcombine.high %v899_v22, %v931_v25  ;;  %v1058_v53 = vld [vmem:[#allocation9 + $0x15b0] sm:$0xff]  ;;  %v1027_v54 = vld [vmem:[#allocation9 + $0x14b8] sm:$0xff] }
 0x4e6   :  { %v15099_v50 = vpop.f32.mrb[32].mxu0  ;;  %7797 = vmatprep.subr.bf16.mxu1 %v12121_v32  ;;  %v12311_v32 = vcombine.high %v898_v9, %v930_v14  ;;  %v1091_v9 = vld [vmem:[#allocation9 + $0x16b8] sm:$0xff] }
 0x4e7   :  { %17590 = vst [vmem:[#allocation34_spill] sm:$0xff] %v15099_v50  ;;  %v15101_v55 = vpop.f32.mrb[32].mxu1  ;;  %v15103_v56 = vpop.f32.mrb[33].mxu0  ;;  %v1123_v14 = vld [vmem:[#allocation9 + $0x17b8] sm:$0xff]  ;;  %v15252_v50 = vld [vmem:[#allocation12 + $0xa8] sm:$0xff]  }
 0x4e8   :  { %17591 = vst [vmem:[#allocation35_spill] sm:$0xff] %v15101_v55  ;;  %17592 = vst [vmem:[#allocation36_spill] sm:$0xff] %v15103_v56  ;;  %v15105_v59 = vpop.f32.mrb[33].mxu1  ;;  %v7456_v62 = vpop.f32.mrb[34].mxu0  ;;  %7757 = vmatpush1.bf16.msra.mxu0 %v12118_v45  ;;  %v994_v45 = vld [vmem:[#allocation9 + $0x13b0] sm:$0xff] }
 0x4e9   :  { %17593 = vst [vmem:[#allocation37_spill] sm:$0xff] %v15105_v59  ;;  %v7497_v0 = vpop.f32.mrb[34].mxu1  ;;  %7798 = vmatpush1.bf16.msra.mxu1 %v12120_v30  ;;  %v7457_v1 = vpop.f32.mrb[35].mxu0  ;;  %7758 = vmatprep.subr.bf16.mxu0 %v12183_v49  ;;  %v963_v30 = vld [vmem:[#allocation9 + $0x12b8] sm:$0xff]  ;;  %v12312_v49 = vcombine.low %v899_v22, %v931_v25  ;;  %v12374_v57 = vcombine.low %v962_v34, %v994_v45  ;;  %v15254_v59 = vld [vmem:[#allocation12 + $0x70] sm:$0xff]  }
 0x4ea   :  { %7799 = vmatprep.subr.bf16.mxu1 %v12185_v52  ;;  %v7498_v17 = vpop.f32.mrb[35].mxu1  ;;  %v12375_v52 = vcombine.high %v962_v34, %v994_v45  ;;  %v12377_v62 = vcombine.high %v963_v30, %v995_v37  ;;  %v1059_v0 = vld [vmem:[#allocation9 + $0x15b8] sm:$0xff]  ;;  %v12376_v58 = vcombine.low %v963_v30, %v995_v37  ;;  %v12504_v30 = vcombine.low %v1091_v9, %v1123_v14 }
 0x4eb   :  { %v12440_v22 = vcombine.low %v1027_v54, %v1059_v0  ;;  %v1187_v34 = vld [vmem:[#allocation9 + $0x19b8] sm:$0xff] }
 0x4ec   :  { %7759 = vmatpush1.bf16.msra.mxu0 %v12182_v63  ;;  %v1026_v63 = vld [vmem:[#allocation9 + $0x14b0] sm:$0xff] }
 0x4ed   :  { %7800 = vmatpush1.bf16.msra.mxu1 %v12184_v3  ;;  %7760 = vmatprep.subr.bf16.mxu0 %v12247_v4  ;;  %v12439_v1 = vcombine.high %v1026_v63, %v1058_v53  ;;  %v12441_v3 = vcombine.high %v1027_v54, %v1059_v0  ;;  %v1090_v4 = vld [vmem:[#allocation9 + $0x16b0] sm:$0xff]  ;;  %v12438_v17 = vcombine.low %v1026_v63, %v1058_v53  ;;  %v1251_v63 = vld [vmem:[#allocation9 + $0x1bb8] sm:$0xff] }
 0x4ee   :  { %7801 = vmatprep.subr.bf16.mxu1 %v12249_v5  ;;  %v1122_v5 = vld [vmem:[#allocation9 + $0x17b0] sm:$0xff] }
 0x4ef   :  { %v12503_v25 = vcombine.high %v1090_v4, %v1122_v5  ;;  %v12502_v45 = vcombine.low %v1090_v4, %v1122_v5  ;;  %v1315_v4 = vld [vmem:[#allocation9 + $0x1db8] sm:$0xff] }
 0x4f0   :  { %7761 = vmatpush1.bf16.msra.mxu0 %v12246_v28  ;;  %v12505_v28 = vcombine.high %v1091_v9, %v1123_v14 }
 0x4f1   :  { %7802 = vmatpush1.bf16.msra.mxu1 %v12248_v29  ;;  %7762 = vmatprep.subr.bf16.mxu0 %v12311_v32  ;;  %v1154_v29 = vld [vmem:[#allocation9 + $0x18b0] sm:$0xff] }
 0x4f2   :  { %7803 = vmatprep.subr.bf16.mxu1 %v12313_v33  ;;  %v1186_v32 = vld [vmem:[#allocation9 + $0x19b0] sm:$0xff]  ;;  %v1155_v33 = vld [vmem:[#allocation9 + $0x18b8] sm:$0xff] }
 0x4f3   :  { %v12567_v37 = vcombine.high %v1154_v29, %v1186_v32  ;;  %v12566_v53 = vcombine.low %v1154_v29, %v1186_v32  ;;  %v12568_v54 = vcombine.low %v1155_v33, %v1187_v34  ;;  %v1379_v29 = vld [vmem:[#allocation9 + $0x1fb8] sm:$0xff] }
 0x4f4   :  { %7763 = vmatpush1.bf16.msra.mxu0 %v12310_v38  ;;  %v12569_v38 = vcombine.high %v1155_v33, %v1187_v34 }
 0x4f5   :  { %7804 = vmatpush1.bf16.msra.mxu1 %v12312_v49  ;;  %7764 = vmatprep.subr.bf16.mxu0 %v12375_v52  ;;  %v1218_v49 = vld [vmem:[#allocation9 + $0x1ab0] sm:$0xff] }
 0x4f6   :  { %7805 = vmatprep.subr.bf16.mxu1 %v12377_v62  ;;  %v1250_v52 = vld [vmem:[#allocation9 + $0x1bb0] sm:$0xff]  ;;  %v1219_v62 = vld [vmem:[#allocation9 + $0x1ab8] sm:$0xff] }
 0x4f7   :  { %v12631_v0 = vcombine.high %v1218_v49, %v1250_v52  ;;  %v12630_v5 = vcombine.low %v1218_v49, %v1250_v52  ;;  %v12632_v9 = vcombine.low %v1219_v62, %v1251_v63  ;;  %v421_v49 = vld [vmem:[#allocation9 + $0x1c8] sm:$0xff] }
 0x4f8   :  { %7765 = vmatpush1.bf16.msra.mxu0 %v12374_v57  ;;  %v12633_v57 = vcombine.high %v1219_v62, %v1251_v63 }
 0x4f9   :  { %7806 = vmatpush1.bf16.msra.mxu1 %v12376_v58  ;;  %7766 = vmatprep.subr.bf16.mxu0 %v12439_v1  ;;  %v1282_v58 = vld [vmem:[#allocation9 + $0x1cb0] sm:$0xff] }
 0x4fa   :  { %7807 = vmatprep.subr.bf16.mxu1 %v12441_v3  ;;  %v1314_v1 = vld [vmem:[#allocation9 + $0x1db0] sm:$0xff]  ;;  %v1283_v3 = vld [vmem:[#allocation9 + $0x1cb8] sm:$0xff] }
 0x4fb   :  { %v12695_v14 = vcombine.high %v1282_v58, %v1314_v1  ;;  %v12694_v32 = vcombine.low %v1282_v58, %v1314_v1  ;;  %v12696_v33 = vcombine.low %v1283_v3, %v1315_v4  ;;  %v453_v58 = vld [vmem:[#allocation9 + $0x2c8] sm:$0xff] }
 0x4fc   :  { %7767 = vmatpush1.bf16.msra.mxu0 %v12438_v17  ;;  %v12697_v17 = vcombine.high %v1283_v3, %v1315_v4  ;;  %v485_v1 = vld [vmem:[#allocation9 + $0x3c8] sm:$0xff] }
 0x4fd   :  { %7808 = vmatpush1.bf16.msra.mxu1 %v12440_v22  ;;  %7768 = vmatprep.subr.bf16.mxu0 %v12503_v25  ;;  %v1346_v22 = vld [vmem:[#allocation9 + $0x1eb0] sm:$0xff] }
 0x4fe   :  { %7809 = vmatprep.subr.bf16.mxu1 %v12505_v28  ;;  %v1378_v25 = vld [vmem:[#allocation9 + $0x1fb0] sm:$0xff]  ;;  %v1347_v28 = vld [vmem:[#allocation9 + $0x1eb8] sm:$0xff] }
 0x4ff   :  { %v12759_v34 = vcombine.high %v1346_v22, %v1378_v25  ;;  %v12758_v52 = vcombine.low %v1346_v22, %v1378_v25  ;;  %v12760_v62 = vcombine.low %v1347_v28, %v1379_v29  ;;  %v549_v22 = vld [vmem:[#allocation9 + $0x5c8] sm:$0xff] }
 0x500   :  { %7769 = vmatpush1.bf16.msra.mxu0 %v12502_v45  ;;  %v12761_v45 = vcombine.high %v1347_v28, %v1379_v29  ;;  %v11868_v28 = vcombine.low %v453_v58, %v485_v1 }
 0x501   :  { %7810 = vmatpush1.bf16.msra.mxu1 %v12504_v30  ;;  %7770 = vmatprep.subr.bf16.mxu0 %v12567_v37  ;;  %v388_v30 = vld [vmem:[#allocation9 + $0xc0] sm:$0xff] }
 0x502   :  { %7811 = vmatprep.subr.bf16.mxu1 %v12569_v38  ;;  %v420_v37 = vld [vmem:[#allocation9 + $0x1c0] sm:$0xff]  ;;  %v389_v38 = vld [vmem:[#allocation9 + $0xc8] sm:$0xff] }
 0x503   :  { %v11803_v63 = vcombine.high %v388_v30, %v420_v37  ;;  %v11804_v3 = vcombine.low %v389_v38, %v421_v49 }
 0x504   :  { %7771 = vmatpush1.bf16.msra.mxu0 %v12566_v53  ;;  %v11805_v53 = vcombine.high %v389_v38, %v421_v49 }
 0x505   :  { %7812 = vmatpush1.bf16.msra.mxu1 %v12568_v54  ;;  %7772 = vmatprep.subr.bf16.mxu0 %v12631_v0  ;;  %v452_v54 = vld [vmem:[#allocation9 + $0x2c0] sm:$0xff] }
 0x506   :  { %7813 = vmatprep.subr.bf16.mxu1 %v12633_v57  ;;  %v484_v0 = vld [vmem:[#allocation9 + $0x3c0] sm:$0xff]  ;;  %v11802_v57 = vcombine.low %v388_v30, %v420_v37  ;;  %v613_v30 = vld [vmem:[#allocation9 + $0x7c8] sm:$0xff] }
 0x507   :  { %v11867_v4 = vcombine.high %v452_v54, %v484_v0  ;;  %v11866_v25 = vcombine.low %v452_v54, %v484_v0  ;;  %v677_v54 = vld [vmem:[#allocation9 + $0x9c8] sm:$0xff] }
 0x508   :  { %7773 = vmatpush1.bf16.msra.mxu0 %v12630_v5  ;;  %v516_v5 = vld [vmem:[#allocation9 + $0x4c0] sm:$0xff] }
 0x509   :  { %7814 = vmatpush1.bf16.msra.mxu1 %v12632_v9  ;;  %7774 = vmatprep.subr.bf16.mxu0 %v12695_v14  ;;  %v548_v9 = vld [vmem:[#allocation9 + $0x5c0] sm:$0xff]  ;;  %v11869_v14 = vcombine.high %v453_v58, %v485_v1 }
 0x50a   :  { %7815 = vmatprep.subr.bf16.mxu1 %v12697_v17  ;;  %v517_v17 = vld [vmem:[#allocation9 + $0x4c8] sm:$0xff]  ;;  %v11931_v29 = vcombine.high %v516_v5, %v548_v9  ;;  %v11930_v37 = vcombine.low %v516_v5, %v548_v9 }
 0x50b   :  { %v11932_v38 = vcombine.low %v517_v17, %v549_v22  ;;  %v709_v5 = vld [vmem:[#allocation9 + $0xac8] sm:$0xff] }
 0x50c   :  { %7775 = vmatpush1.bf16.msra.mxu0 %v12694_v32  ;;  %v11933_v32 = vcombine.high %v517_v17, %v549_v22  ;;  %v741_v9 = vld [vmem:[#allocation9 + $0xbc8] sm:$0xff] }
 0x50d   :  { %7816 = vmatpush1.bf16.msra.mxu1 %v12696_v33  ;;  %7776 = vmatprep.subr.bf16.mxu0 %v12759_v34  ;;  %v580_v33 = vld [vmem:[#allocation9 + $0x6c0] sm:$0xff] }
 0x50e   :  { %7817 = vmatprep.subr.bf16.mxu1 %v12761_v45  ;;  %v612_v34 = vld [vmem:[#allocation9 + $0x7c0] sm:$0xff]  ;;  %v581_v45 = vld [vmem:[#allocation9 + $0x6c8] sm:$0xff] }
 0x50f   :  { %v11995_v49 = vcombine.high %v580_v33, %v612_v34  ;;  %v11994_v0 = vcombine.low %v580_v33, %v612_v34  ;;  %v805_v33 = vld [vmem:[#allocation9 + $0xdc8] sm:$0xff] }
 0x510   :  { %7777 = vmatpush1.bf16.msra.mxu0 %v12758_v52  ;;  %v11997_v52 = vcombine.high %v581_v45, %v613_v30 }
 0x511   :  { %7818 = vmatpush1.bf16.msra.mxu1 %v12760_v62  ;;  %7828 = vmatprep.subr.bf16.mxu0 %v11803_v63  ;;  %v644_v62 = vld [vmem:[#allocation9 + $0x8c0] sm:$0xff] }
 0x512   :  { %7869 = vmatprep.subr.bf16.mxu1 %v11805_v53  ;;  %v676_v63 = vld [vmem:[#allocation9 + $0x9c0] sm:$0xff]  ;;  %v645_v53 = vld [vmem:[#allocation9 + $0x8c8] sm:$0xff] }
 0x513   :  { %7779 = vmatmul.mubr.bf16.vlgmr.msra.gmra.mrb[48].mxu0 %v14995_v61  ;;  %v12059_v58 = vcombine.high %v644_v62, %v676_v63  ;;  %v12061_v1 = vcombine.high %v645_v53, %v677_v54  ;;  %v12060_v17 = vcombine.low %v645_v53, %v677_v54  ;;  %v837_v53 = vld [vmem:[#allocation9 + $0xec8] sm:$0xff] }
 0x514   :  { %7820 = vmatmul.mubr.bf16.vlgmr.msra.gmra.mrb[48].mxu1 %v14995_v61  ;;  %7829 = vmatpush1.bf16.msra.mxu0 %v11802_v57  ;;  %v11996_v57 = vcombine.low %v581_v45, %v613_v30  ;;  %v12124_v45 = vcombine.low %v709_v5, %v741_v9  ;;  %v869_v54 = vld [vmem:[#allocation9 + $0xfc8] sm:$0xff] }
 0x515   :  { %7860 = vmatprep.mubr.bf16.mxu0 %v14993_v60  ;;  %7870 = vmatpush1.bf16.msra.mxu1 %v11804_v3  ;;  %v708_v3 = vld [vmem:[#allocation9 + $0xac0] sm:$0xff] }
 0x516   :  { %7901 = vmatprep.mubr.bf16.mxu1 %v14993_v60  ;;  %7830 = vmatprep.subr.bf16.mxu0 %v11867_v4  ;;  %v740_v4 = vld [vmem:[#allocation9 + $0xbc0] sm:$0xff] }
 0x517   :  { %7871 = vmatprep.subr.bf16.mxu1 %v11869_v14  ;;  %v12058_v14 = vcombine.low %v644_v62, %v676_v63  ;;  %v12123_v22 = vcombine.high %v708_v3, %v740_v4  ;;  %v12122_v34 = vcombine.low %v708_v3, %v740_v4 }
 0x518   :  { %7831 = vmatpush1.bf16.msra.mxu0 %v11866_v25  ;;  %v12125_v25 = vcombine.high %v709_v5, %v741_v9  ;;  %v12253_v9 = vcombine.high %v837_v53, %v869_v54 }
 0x519   :  { %7872 = vmatpush1.bf16.msra.mxu1 %v11868_v28  ;;  %7832 = vmatprep.subr.bf16.mxu0 %v11931_v29  ;;  %v772_v28 = vld [vmem:[#allocation9 + $0xcc0] sm:$0xff] }
 0x51a   :  { %7873 = vmatprep.subr.bf16.mxu1 %v11933_v32  ;;  %v804_v29 = vld [vmem:[#allocation9 + $0xdc0] sm:$0xff]  ;;  %v773_v32 = vld [vmem:[#allocation9 + $0xcc8] sm:$0xff] }
 0x51b   :  { %v12187_v30 = vcombine.high %v772_v28, %v804_v29  ;;  %v12188_v4 = vcombine.low %v773_v32, %v805_v33 }
 0x51c   :  { %7833 = vmatpush1.bf16.msra.mxu0 %v11930_v37 }
 0x51d   :  { %7874 = vmatpush1.bf16.msra.mxu1 %v11932_v38  ;;  %7834 = vmatprep.subr.bf16.mxu0 %v11995_v49  ;;  %v12189_v38 = vcombine.high %v773_v32, %v805_v33  ;;  %v836_v49 = vld [vmem:[#allocation9 + $0xec0] sm:$0xff]  ;;  %v997_v32 = vld [vmem:[#allocation9 + $0x13c8] sm:$0xff] }
 0x51e   :  { %7875 = vmatprep.subr.bf16.mxu1 %v11997_v52  ;;  %v868_v52 = vld [vmem:[#allocation9 + $0xfc0] sm:$0xff] }
 0x51f   :  { %v12251_v5 = vcombine.high %v836_v49, %v868_v52 }
 0x520   :  { %7835 = vmatpush1.bf16.msra.mxu0 %v11994_v0 }
 0x521   :  { %7876 = vmatpush1.bf16.msra.mxu1 %v11996_v57  ;;  %7836 = vmatprep.subr.bf16.mxu0 %v12059_v58  ;;  %v12186_v58 = vcombine.low %v772_v28, %v804_v29  ;;  %v964_v29 = vld [vmem:[#allocation9 + $0x12c0] sm:$0xff] }
 0x522   :  { %7877 = vmatprep.subr.bf16.mxu1 %v12061_v1 }
 0x524   :  { %7837 = vmatpush1.bf16.msra.mxu0 %v12058_v14  ;;  %v900_v14 = vld [vmem:[#allocation9 + $0x10c0] sm:$0xff] }
 0x525   :  { %7878 = vmatpush1.bf16.msra.mxu1 %v12060_v17  ;;  %7838 = vmatprep.subr.bf16.mxu0 %v12123_v22  ;;  %v932_v17 = vld [vmem:[#allocation9 + $0x11c0] sm:$0xff] }
 0x526   :  { %v15111_v37 = vpop.f32.mrb[36].mxu0  ;;  %7879 = vmatprep.subr.bf16.mxu1 %v12125_v25  ;;  %v901_v25 = vld [vmem:[#allocation9 + $0x10c8] sm:$0xff]  ;;  %v12314_v33 = vcombine.low %v900_v14, %v932_v17 }
 0x527   :  { %17594 = vst [vmem:[#allocation38_spill] sm:$0xff] %v15111_v37  ;;  %v15113_v62 = vpop.f32.mrb[36].mxu1  ;;  %v15115_v63 = vpop.f32.mrb[37].mxu0  ;;  %v12250_v37 = vcombine.low %v836_v49, %v868_v52  ;;  %v1060_v49 = vld [vmem:[#allocation9 + $0x15c0] sm:$0xff]  ;;  %v1029_v52 = vld [vmem:[#allocation9 + $0x14c8] sm:$0xff] }
 0x528   :  { %17595 = vst [vmem:[#allocation39_spill] sm:$0xff] %v15113_v62  ;;  %17596 = vst [vmem:[#allocation40_spill] sm:$0xff] %v15115_v63  ;;  %v15117_v0 = vpop.f32.mrb[37].mxu1  ;;  %v7538_v57 = vpop.f32.mrb[38].mxu0  ;;  %7839 = vmatpush1.bf16.msra.mxu0 %v12122_v34  ;;  %v933_v62 = vld [vmem:[#allocation9 + $0x11c8] sm:$0xff]  ;;  %v12315_v34 = vcombine.high %v900_v14, %v932_v17  ;;  %v1124_v14 = vld [vmem:[#allocation9 + $0x17c0] sm:$0xff] }
 0x529   :  { %17597 = vst [vmem:[#allocation41_spill] sm:$0xff] %v15117_v0  ;;  %v7579_v1 = vpop.f32.mrb[38].mxu1  ;;  %7880 = vmatpush1.bf16.msra.mxu1 %v12124_v45  ;;  %v7539_v3 = vpop.f32.mrb[39].mxu0  ;;  %7840 = vmatprep.subr.bf16.mxu0 %v12187_v30  ;;  %v12252_v57 = vcombine.low %v837_v53, %v869_v54  ;;  %v12317_v28 = vcombine.high %v901_v25, %v933_v62  ;;  %v996_v45 = vld [vmem:[#allocation9 + $0x13c0] sm:$0xff]  ;;  %v965_v30 = vld [vmem:[#allocation9 + $0x12c8] sm:$0xff] }
 0x52a   :  { %7881 = vmatprep.subr.bf16.mxu1 %v12189_v38  ;;  %v7580_v22 = vpop.f32.mrb[39].mxu1  ;;  %v12316_v38 = vcombine.low %v901_v25, %v933_v62  ;;  %v12379_v1 = vcombine.high %v964_v29, %v996_v45  ;;  %v12381_v3 = vcombine.high %v965_v30, %v997_v32  ;;  %v12378_v53 = vcombine.low %v964_v29, %v996_v45  ;;  %v1093_v17 = vld [vmem:[#allocation9 + $0x16c8] sm:$0xff]  ;;  %v1188_v29 = vld [vmem:[#allocation9 + $0x19c0] sm:$0xff] }
 0x52b   :  { %v12380_v54 = vcombine.low %v965_v30, %v997_v32  ;;  %v1125_v22 = vld [vmem:[#allocation9 + $0x17c8] sm:$0xff] }
 0x52c   :  { %7841 = vmatpush1.bf16.msra.mxu0 %v12186_v58  ;;  %v1028_v58 = vld [vmem:[#allocation9 + $0x14c0] sm:$0xff]  ;;  %v1157_v45 = vld [vmem:[#allocation9 + $0x18c8] sm:$0xff]  ;;  %v12508_v32 = vcombine.low %v1093_v17, %v1125_v22 }
 0x52d   :  { %7882 = vmatpush1.bf16.msra.mxu1 %v12188_v4  ;;  %7842 = vmatprep.subr.bf16.mxu0 %v12251_v5  ;;  %v1061_v4 = vld [vmem:[#allocation9 + $0x15c8] sm:$0xff]  ;;  %v12443_v5 = vcombine.high %v1028_v58, %v1060_v49  ;;  %v12442_v62 = vcombine.low %v1028_v58, %v1060_v49  ;;  %v1252_v58 = vld [vmem:[#allocation9 + $0x1bc0] sm:$0xff] }
 0x52e   :  { %7883 = vmatprep.subr.bf16.mxu1 %v12253_v9  ;;  %v12445_v9 = vcombine.high %v1029_v52, %v1061_v4  ;;  %v12444_v25 = vcombine.low %v1029_v52, %v1061_v4  ;;  %v1221_v49 = vld [vmem:[#allocation9 + $0x1ac8] sm:$0xff] }
 0x52f   :  { %v15246_v63 = vld [vmem:[#allocation12 + $0x28] sm:$0xff]  }
 0x530   :  { %7843 = vmatpush1.bf16.msra.mxu0 %v12250_v37  ;;  %v1092_v37 = vld [vmem:[#allocation9 + $0x16c0] sm:$0xff] }
 0x531   :  { %7884 = vmatpush1.bf16.msra.mxu1 %v12252_v57  ;;  %7844 = vmatprep.subr.bf16.mxu0 %v12315_v34  ;;  %v12507_v57 = vcombine.high %v1092_v37, %v1124_v14  ;;  %v12509_v34 = vcombine.high %v1093_v17, %v1125_v22  ;;  %v12506_v30 = vcombine.low %v1092_v37, %v1124_v14  ;;  %v1316_v37 = vld [vmem:[#allocation9 + $0x1dc0] sm:$0xff]  ;;  %v1285_v14 = vld [vmem:[#allocation9 + $0x1cc8] sm:$0xff] }
 0x532   :  { %7885 = vmatprep.subr.bf16.mxu1 %v12317_v28  ;;  %v1156_v28 = vld [vmem:[#allocation9 + $0x18c0] sm:$0xff] }
 0x533   :  { %v12570_v52 = vcombine.low %v1156_v28, %v1188_v29 }
 0x534   :  { %7845 = vmatpush1.bf16.msra.mxu0 %v12314_v33  ;;  %v1189_v33 = vld [vmem:[#allocation9 + $0x19c8] sm:$0xff] }
 0x535   :  { %7886 = vmatpush1.bf16.msra.mxu1 %v12316_v38  ;;  %7846 = vmatprep.subr.bf16.mxu0 %v12379_v1  ;;  %v12571_v38 = vcombine.high %v1156_v28, %v1188_v29  ;;  %v12573_v1 = vcombine.high %v1157_v45, %v1189_v33  ;;  %v12572_v4 = vcombine.low %v1157_v45, %v1189_v33  ;;  %v1380_v28 = vld [vmem:[#allocation9 + $0x1fc0] sm:$0xff]  ;;  %v1349_v29 = vld [vmem:[#allocation9 + $0x1ec8] sm:$0xff] }
 0x536   :  { %7887 = vmatprep.subr.bf16.mxu1 %v12381_v3  ;;  %v1220_v3 = vld [vmem:[#allocation9 + $0x1ac0] sm:$0xff] }
 0x537   :  { %v12634_v17 = vcombine.low %v1220_v3, %v1252_v58 }
 0x538   :  { %7847 = vmatpush1.bf16.msra.mxu0 %v12378_v53  ;;  %v1253_v53 = vld [vmem:[#allocation9 + $0x1bc8] sm:$0xff] }
 0x539   :  { %7888 = vmatpush1.bf16.msra.mxu1 %v12380_v54  ;;  %7848 = vmatprep.subr.bf16.mxu0 %v12443_v5  ;;  %v12635_v54 = vcombine.high %v1220_v3, %v1252_v58  ;;  %v12637_v5 = vcombine.high %v1221_v49, %v1253_v53  ;;  %v12636_v22 = vcombine.low %v1221_v49, %v1253_v53  ;;  %v422_v3 = vld [vmem:[#allocation9 + $0x1d0] sm:$0xff]  ;;  %v391_v58 = vld [vmem:[#allocation9 + $0xd8] sm:$0xff] }
 0x53a   :  { %7889 = vmatprep.subr.bf16.mxu1 %v12445_v9  ;;  %v1284_v9 = vld [vmem:[#allocation9 + $0x1cc0] sm:$0xff] }
 0x53b   :  { %v12698_v45 = vcombine.low %v1284_v9, %v1316_v37 }
 0x53c   :  { %7849 = vmatpush1.bf16.msra.mxu0 %v12442_v62  ;;  %v1317_v62 = vld [vmem:[#allocation9 + $0x1dc8] sm:$0xff] }
 0x53d   :  { %7890 = vmatpush1.bf16.msra.mxu1 %v12444_v25  ;;  %7850 = vmatprep.subr.bf16.mxu0 %v12507_v57  ;;  %v12699_v25 = vcombine.high %v1284_v9, %v1316_v37  ;;  %v12701_v57 = vcombine.high %v1285_v14, %v1317_v62  ;;  %v12700_v33 = vcombine.low %v1285_v14, %v1317_v62  ;;  %v486_v9 = vld [vmem:[#allocation9 + $0x3d0] sm:$0xff]  ;;  %v455_v14 = vld [vmem:[#allocation9 + $0x2d8] sm:$0xff] }
 0x53e   :  { %7891 = vmatprep.subr.bf16.mxu1 %v12509_v34  ;;  %v1348_v34 = vld [vmem:[#allocation9 + $0x1ec0] sm:$0xff]  ;;  %v487_v62 = vld [vmem:[#allocation9 + $0x3d8] sm:$0xff] }
 0x53f   :  { %v12762_v49 = vcombine.low %v1348_v34, %v1380_v28 }
 0x540   :  { %7851 = vmatpush1.bf16.msra.mxu0 %v12506_v30  ;;  %v1381_v30 = vld [vmem:[#allocation9 + $0x1fc8] sm:$0xff] }
 0x541   :  { %7892 = vmatpush1.bf16.msra.mxu1 %v12508_v32  ;;  %7852 = vmatprep.subr.bf16.mxu0 %v12571_v38  ;;  %v12763_v32 = vcombine.high %v1348_v34, %v1380_v28  ;;  %v12765_v38 = vcombine.high %v1349_v29, %v1381_v30  ;;  %v12764_v53 = vcombine.low %v1349_v29, %v1381_v30  ;;  %v519_v28 = vld [vmem:[#allocation9 + $0x4d8] sm:$0xff] }
 0x542   :  { %7893 = vmatprep.subr.bf16.mxu1 %v12573_v1  ;;  %v390_v1 = vld [vmem:[#allocation9 + $0xd0] sm:$0xff]  ;;  %v11873_v34 = vcombine.high %v455_v14, %v487_v62  ;;  %v551_v29 = vld [vmem:[#allocation9 + $0x5d8] sm:$0xff] }
 0x543   :  { %v11806_v37 = vcombine.low %v390_v1, %v422_v3 }
 0x544   :  { %7853 = vmatpush1.bf16.msra.mxu0 %v12570_v52  ;;  %v423_v52 = vld [vmem:[#allocation9 + $0x1d8] sm:$0xff] }
 0x545   :  { %7894 = vmatpush1.bf16.msra.mxu1 %v12572_v4  ;;  %7854 = vmatprep.subr.bf16.mxu0 %v12635_v54  ;;  %v11807_v4 = vcombine.high %v390_v1, %v422_v3  ;;  %v11809_v54 = vcombine.high %v391_v58, %v423_v52  ;;  %v614_v1 = vld [vmem:[#allocation9 + $0x7d0] sm:$0xff]  ;;  %v583_v3 = vld [vmem:[#allocation9 + $0x6d8] sm:$0xff] }
 0x546   :  { %7895 = vmatprep.subr.bf16.mxu1 %v12637_v5  ;;  %v454_v5 = vld [vmem:[#allocation9 + $0x2d0] sm:$0xff] }
 0x547   :  { %v11870_v30 = vcombine.low %v454_v5, %v486_v9 }
 0x548   :  { %7855 = vmatpush1.bf16.msra.mxu0 %v12634_v17  ;;  %v11808_v17 = vcombine.low %v391_v58, %v423_v52  ;;  %v615_v58 = vld [vmem:[#allocation9 + $0x7d8] sm:$0xff] }
 0x549   :  { %7896 = vmatpush1.bf16.msra.mxu1 %v12636_v22  ;;  %7856 = vmatprep.subr.bf16.mxu0 %v12699_v25  ;;  %v11871_v22 = vcombine.high %v454_v5, %v486_v9  ;;  %v518_v25 = vld [vmem:[#allocation9 + $0x4d0] sm:$0xff]  ;;  %v647_v9 = vld [vmem:[#allocation9 + $0x8d8] sm:$0xff] }
 0x54a   :  { %7897 = vmatprep.subr.bf16.mxu1 %v12701_v57  ;;  %v550_v57 = vld [vmem:[#allocation9 + $0x5d0] sm:$0xff] }
 0x54b   :  { %v11934_v52 = vcombine.low %v518_v25, %v550_v57  ;;  %v678_v5 = vld [vmem:[#allocation9 + $0x9d0] sm:$0xff] }
 0x54c   :  { %7857 = vmatpush1.bf16.msra.mxu0 %v12698_v45  ;;  %v11872_v45 = vcombine.low %v455_v14, %v487_v62  ;;  %v12000_v62 = vcombine.low %v583_v3, %v615_v58 }
 0x54d   :  { %7898 = vmatpush1.bf16.msra.mxu1 %v12700_v33  ;;  %7858 = vmatprep.subr.bf16.mxu0 %v12763_v32  ;;  %v11935_v33 = vcombine.high %v518_v25, %v550_v57  ;;  %v11937_v32 = vcombine.high %v519_v28, %v551_v29  ;;  %v742_v25 = vld [vmem:[#allocation9 + $0xbd0] sm:$0xff]  ;;  %v711_v57 = vld [vmem:[#allocation9 + $0xad8] sm:$0xff] }
 0x54e   :  { %7899 = vmatprep.subr.bf16.mxu1 %v12765_v38  ;;  %v582_v38 = vld [vmem:[#allocation9 + $0x6d0] sm:$0xff] }
 0x54f   :  { %v11998_v14 = vcombine.low %v582_v38, %v614_v1 }
 0x550   :  { %7859 = vmatpush1.bf16.msra.mxu0 %v12762_v49  ;;  %v11936_v49 = vcombine.low %v519_v28, %v551_v29 }
 0x551   :  { %7900 = vmatpush1.bf16.msra.mxu1 %v12764_v53  ;;  %7910 = vmatprep.subr.bf16.mxu0 %v11807_v4  ;;  %v11999_v53 = vcombine.high %v582_v38, %v614_v1  ;;  %v12001_v4 = vcombine.high %v583_v3, %v615_v58  ;;  %v806_v38 = vld [vmem:[#allocation9 + $0xdd0] sm:$0xff]  ;;  %v775_v1 = vld [vmem:[#allocation9 + $0xcd8] sm:$0xff] }
 0x552   :  { %7951 = vmatprep.subr.bf16.mxu1 %v11809_v54  ;;  %v646_v54 = vld [vmem:[#allocation9 + $0x8d0] sm:$0xff] }
 0x553   :  { %7861 = vmatmul.mubr.bf16.vlgmr.msra.gmra.mrb[52].mxu0 %v14995_v61  ;;  %v12062_v28 = vcombine.low %v646_v54, %v678_v5 }
 0x554   :  { %7902 = vmatmul.mubr.bf16.vlgmr.msra.gmra.mrb[52].mxu1 %v14995_v61  ;;  %7911 = vmatpush1.bf16.msra.mxu0 %v11806_v37  ;;  %v679_v37 = vld [vmem:[#allocation9 + $0x9d8] sm:$0xff] }
 0x555   :  { %7942 = vmatprep.mubr.bf16.mxu0 %v14993_v60  ;;  %7952 = vmatpush1.bf16.msra.mxu1 %v11808_v17  ;;  %v12063_v17 = vcombine.high %v646_v54, %v678_v5  ;;  %v12064_v29 = vcombine.low %v647_v9, %v679_v37  ;;  %v838_v54 = vld [vmem:[#allocation9 + $0xed0] sm:$0xff] }
 0x556   :  { %7983 = vmatprep.mubr.bf16.mxu1 %v14993_v60  ;;  %7912 = vmatprep.subr.bf16.mxu0 %v11871_v22  ;;  %v12065_v22 = vcombine.high %v647_v9, %v679_v37  ;;  %v870_v5 = vld [vmem:[#allocation9 + $0xfd0] sm:$0xff] }
 0x557   :  { %7953 = vmatprep.subr.bf16.mxu1 %v11873_v34  ;;  %v710_v34 = vld [vmem:[#allocation9 + $0xad0] sm:$0xff]  ;;  %v12254_v0 = vcombine.low %v838_v54, %v870_v5 }
 0x558   :  { %7913 = vmatpush1.bf16.msra.mxu0 %v11870_v30  ;;  %v743_v30 = vld [vmem:[#allocation9 + $0xbd8] sm:$0xff]  ;;  %v12126_v3 = vcombine.low %v710_v34, %v742_v25 }
 0x559   :  { %7954 = vmatpush1.bf16.msra.mxu1 %v11872_v45  ;;  %7914 = vmatprep.subr.bf16.mxu0 %v11935_v33  ;;  %v12127_v45 = vcombine.high %v710_v34, %v742_v25  ;;  %v12129_v33 = vcombine.high %v711_v57, %v743_v30  ;;  %v12128_v58 = vcombine.low %v711_v57, %v743_v30 }
 0x55a   :  { %7955 = vmatprep.subr.bf16.mxu1 %v11937_v32  ;;  %v774_v32 = vld [vmem:[#allocation9 + $0xcd0] sm:$0xff] }
 0x55b   :  { %v12190_v34 = vcombine.low %v774_v32, %v806_v38 }
 0x55c   :  { %7915 = vmatpush1.bf16.msra.mxu0 %v11934_v52  ;;  %v807_v52 = vld [vmem:[#allocation9 + $0xdd8] sm:$0xff] }
 0x55d   :  { %7956 = vmatpush1.bf16.msra.mxu1 %v11936_v49  ;;  %7916 = vmatprep.subr.bf16.mxu0 %v11999_v53  ;;  %v12191_v49 = vcombine.high %v774_v32, %v806_v38  ;;  %v12192_v30 = vcombine.low %v775_v1, %v807_v52  ;;  %v966_v38 = vld [vmem:[#allocation9 + $0x12d0] sm:$0xff] }
 0x55e   :  { %7957 = vmatprep.subr.bf16.mxu1 %v12001_v4  ;;  %v12193_v4 = vcombine.high %v775_v1, %v807_v52  ;;  %v999_v1 = vld [vmem:[#allocation9 + $0x13d8] sm:$0xff] }
 0x560   :  { %7917 = vmatpush1.bf16.msra.mxu0 %v11998_v14  ;;  %v839_v14 = vld [vmem:[#allocation9 + $0xed8] sm:$0xff] }
 0x561   :  { %7958 = vmatpush1.bf16.msra.mxu1 %v12000_v62  ;;  %7918 = vmatprep.subr.bf16.mxu0 %v12063_v17  ;;  %v871_v62 = vld [vmem:[#allocation9 + $0xfd8] sm:$0xff] }
 0x562   :  { %7959 = vmatprep.subr.bf16.mxu1 %v12065_v22 }
 0x564   :  { %7919 = vmatpush1.bf16.msra.mxu0 %v12062_v28  ;;  %v12255_v28 = vcombine.high %v838_v54, %v870_v5  ;;  %v1062_v54 = vld [vmem:[#allocation9 + $0x15d0] sm:$0xff]  ;;  %v1031_v5 = vld [vmem:[#allocation9 + $0x14d8] sm:$0xff] }
 0x565   :  { %7960 = vmatpush1.bf16.msra.mxu1 %v12064_v29  ;;  %7920 = vmatprep.subr.bf16.mxu0 %v12127_v45  ;;  %v12257_v29 = vcombine.high %v839_v14, %v871_v62  ;;  %v902_v45 = vld [vmem:[#allocation9 + $0x10d0] sm:$0xff] }
 0x566   :  { %v15123_v53 = vpop.f32.mrb[40].mxu0  ;;  %7961 = vmatprep.subr.bf16.mxu1 %v12129_v33  ;;  %v934_v33 = vld [vmem:[#allocation9 + $0x11d0] sm:$0xff] }
 0x567   :  { %17598 = vst [vmem:[#allocation42_spill] sm:$0xff] %v15123_v53  ;;  %v15125_v9 = vpop.f32.mrb[40].mxu1  ;;  %v15127_v37 = vpop.f32.mrb[41].mxu0  ;;  %v903_v53 = vld [vmem:[#allocation9 + $0x10d8] sm:$0xff]  ;;  %v12318_v52 = vcombine.low %v902_v45, %v934_v33 }
 0x568   :  { %17599 = vst [vmem:[#allocation43_spill] sm:$0xff] %v15125_v9  ;;  %17600 = vst [vmem:[#allocation44_spill] sm:$0xff] %v15127_v37  ;;  %v15129_v17 = vpop.f32.mrb[41].mxu1  ;;  %v7620_v22 = vpop.f32.mrb[42].mxu0  ;;  %7921 = vmatpush1.bf16.msra.mxu0 %v12126_v3  ;;  %v935_v37 = vld [vmem:[#allocation9 + $0x11d8] sm:$0xff]  ;;  %v12319_v3 = vcombine.high %v902_v45, %v934_v33 }
 0x569   :  { %17601 = vst [vmem:[#allocation45_spill] sm:$0xff] %v15129_v17  ;;  %v7661_v25 = vpop.f32.mrb[42].mxu1  ;;  %7962 = vmatpush1.bf16.msra.mxu1 %v12128_v58  ;;  %v7621_v57 = vpop.f32.mrb[43].mxu0  ;;  %7922 = vmatprep.subr.bf16.mxu0 %v12191_v49  ;;  %v12256_v22 = vcombine.low %v839_v14, %v871_v62  ;;  %v12321_v32 = vcombine.high %v903_v53, %v935_v37  ;;  %v998_v58 = vld [vmem:[#allocation9 + $0x13d0] sm:$0xff]  ;;  %v967_v49 = vld [vmem:[#allocation9 + $0x12d8] sm:$0xff] }
 0x56a   :  { %7963 = vmatprep.subr.bf16.mxu1 %v12193_v4  ;;  %v7662_v9 = vpop.f32.mrb[43].mxu1  ;;  %v12320_v4 = vcombine.low %v903_v53, %v935_v37  ;;  %v12385_v25 = vcombine.high %v967_v49, %v999_v1  ;;  %v1063_v57 = vld [vmem:[#allocation9 + $0x15d8] sm:$0xff]  ;;  %v12382_v14 = vcombine.low %v966_v38, %v998_v58  ;;  %v12384_v62 = vcombine.low %v967_v49, %v999_v1 }
 0x56b   :  { %v12383_v9 = vcombine.high %v966_v38, %v998_v58  ;;  %v1095_v45 = vld [vmem:[#allocation9 + $0x16d8] sm:$0xff]  ;;  %v12448_v37 = vcombine.low %v1031_v5, %v1063_v57  ;;  %v1190_v38 = vld [vmem:[#allocation9 + $0x19d0] sm:$0xff] }
 0x56c   :  { %7923 = vmatpush1.bf16.msra.mxu0 %v12190_v34  ;;  %v1030_v34 = vld [vmem:[#allocation9 + $0x14d0] sm:$0xff]  ;;  %v1127_v33 = vld [vmem:[#allocation9 + $0x17d8] sm:$0xff] }
 0x56d   :  { %7964 = vmatpush1.bf16.msra.mxu1 %v12192_v30  ;;  %7924 = vmatprep.subr.bf16.mxu0 %v12255_v28  ;;  %v12447_v30 = vcombine.high %v1030_v34, %v1062_v54  ;;  %v12449_v28 = vcombine.high %v1031_v5, %v1063_v57  ;;  %v12446_v53 = vcombine.low %v1030_v34, %v1062_v54  ;;  %v1159_v58 = vld [vmem:[#allocation9 + $0x18d8] sm:$0xff]  ;;  %v1254_v34 = vld [vmem:[#allocation9 + $0x1bd0] sm:$0xff] }
 0x56e   :  { %7965 = vmatprep.subr.bf16.mxu1 %v12257_v29  ;;  %v1126_v29 = vld [vmem:[#allocation9 + $0x17d0] sm:$0xff]  ;;  %v12512_v1 = vcombine.low %v1095_v45, %v1127_v33  ;;  %v1223_v54 = vld [vmem:[#allocation9 + $0x1ad8] sm:$0xff] }
 0x570   :  { %7925 = vmatpush1.bf16.msra.mxu0 %v12254_v0  ;;  %v1094_v0 = vld [vmem:[#allocation9 + $0x16d0] sm:$0xff] }
 0x571   :  { %7966 = vmatpush1.bf16.msra.mxu1 %v12256_v22  ;;  %7926 = vmatprep.subr.bf16.mxu0 %v12319_v3  ;;  %v12511_v22 = vcombine.high %v1094_v0, %v1126_v29  ;;  %v12513_v3 = vcombine.high %v1095_v45, %v1127_v33  ;;  %v12510_v49 = vcombine.low %v1094_v0, %v1126_v29  ;;  %v1318_v0 = vld [vmem:[#allocation9 + $0x1dd0] sm:$0xff]  ;;  %v1287_v29 = vld [vmem:[#allocation9 + $0x1cd8] sm:$0xff] }
 0x572   :  { %7967 = vmatprep.subr.bf16.mxu1 %v12321_v32  ;;  %v1158_v32 = vld [vmem:[#allocation9 + $0x18d0] sm:$0xff] }
 0x573   :  { %v12574_v5 = vcombine.low %v1158_v32, %v1190_v38 }
 0x574   :  { %7927 = vmatpush1.bf16.msra.mxu0 %v12318_v52  ;;  %v1191_v52 = vld [vmem:[#allocation9 + $0x19d8] sm:$0xff] }
 0x575   :  { %7968 = vmatpush1.bf16.msra.mxu1 %v12320_v4  ;;  %7928 = vmatprep.subr.bf16.mxu0 %v12383_v9  ;;  %v12575_v4 = vcombine.high %v1158_v32, %v1190_v38  ;;  %v12577_v9 = vcombine.high %v1159_v58, %v1191_v52  ;;  %v12576_v57 = vcombine.low %v1159_v58, %v1191_v52  ;;  %v1382_v32 = vld [vmem:[#allocation9 + $0x1fd0] sm:$0xff]  ;;  %v1351_v38 = vld [vmem:[#allocation9 + $0x1ed8] sm:$0xff] }
 0x576   :  { %7969 = vmatprep.subr.bf16.mxu1 %v12385_v25  ;;  %v1222_v25 = vld [vmem:[#allocation9 + $0x1ad0] sm:$0xff] }
 0x577   :  { %v12638_v45 = vcombine.low %v1222_v25, %v1254_v34 }
 0x578   :  { %7929 = vmatpush1.bf16.msra.mxu0 %v12382_v14  ;;  %v1255_v14 = vld [vmem:[#allocation9 + $0x1bd8] sm:$0xff] }
 0x579   :  { %7970 = vmatpush1.bf16.msra.mxu1 %v12384_v62  ;;  %7930 = vmatprep.subr.bf16.mxu0 %v12447_v30  ;;  %v12639_v62 = vcombine.high %v1222_v25, %v1254_v34  ;;  %v12641_v30 = vcombine.high %v1223_v54, %v1255_v14  ;;  %v12640_v33 = vcombine.low %v1223_v54, %v1255_v14  ;;  %v424_v25 = vld [vmem:[#allocation9 + $0x1e0] sm:$0xff]  ;;  %v393_v34 = vld [vmem:[#allocation9 + $0xe8] sm:$0xff] }
 0x57a   :  { %7971 = vmatprep.subr.bf16.mxu1 %v12449_v28  ;;  %v1286_v28 = vld [vmem:[#allocation9 + $0x1cd0] sm:$0xff] }
 0x57b   :  { %v12702_v58 = vcombine.low %v1286_v28, %v1318_v0 }
 0x57c   :  { %7931 = vmatpush1.bf16.msra.mxu0 %v12446_v53  ;;  %v1319_v53 = vld [vmem:[#allocation9 + $0x1dd8] sm:$0xff] }
 0x57d   :  { %7972 = vmatpush1.bf16.msra.mxu1 %v12448_v37  ;;  %7932 = vmatprep.subr.bf16.mxu0 %v12511_v22  ;;  %v12703_v37 = vcombine.high %v1286_v28, %v1318_v0  ;;  %v12705_v22 = vcombine.high %v1287_v29, %v1319_v53  ;;  %v12704_v52 = vcombine.low %v1287_v29, %v1319_v53  ;;  %v488_v28 = vld [vmem:[#allocation9 + $0x3e0] sm:$0xff]  ;;  %v457_v29 = vld [vmem:[#allocation9 + $0x2e8] sm:$0xff] }
 0x57e   :  { %7973 = vmatprep.subr.bf16.mxu1 %v12513_v3  ;;  %v1350_v3 = vld [vmem:[#allocation9 + $0x1ed0] sm:$0xff]  ;;  %v489_v53 = vld [vmem:[#allocation9 + $0x3e8] sm:$0xff] }
 0x57f   :  { %v12766_v54 = vcombine.low %v1350_v3, %v1382_v32 }
 0x580   :  { %7933 = vmatpush1.bf16.msra.mxu0 %v12510_v49  ;;  %v1383_v49 = vld [vmem:[#allocation9 + $0x1fd8] sm:$0xff] }
 0x581   :  { %7974 = vmatpush1.bf16.msra.mxu1 %v12512_v1  ;;  %7934 = vmatprep.subr.bf16.mxu0 %v12575_v4  ;;  %v12767_v1 = vcombine.high %v1350_v3, %v1382_v32  ;;  %v12769_v4 = vcombine.high %v1351_v38, %v1383_v49  ;;  %v12768_v14 = vcombine.low %v1351_v38, %v1383_v49  ;;  %v521_v32 = vld [vmem:[#allocation9 + $0x4e8] sm:$0xff] }
 0x582   :  { %7975 = vmatprep.subr.bf16.mxu1 %v12577_v9  ;;  %v392_v9 = vld [vmem:[#allocation9 + $0xe0] sm:$0xff]  ;;  %v11877_v3 = vcombine.high %v457_v29, %v489_v53  ;;  %v553_v38 = vld [vmem:[#allocation9 + $0x5e8] sm:$0xff] }
 0x583   :  { %v11810_v0 = vcombine.low %v392_v9, %v424_v25 }
 0x584   :  { %7935 = vmatpush1.bf16.msra.mxu0 %v12574_v5  ;;  %v425_v5 = vld [vmem:[#allocation9 + $0x1e8] sm:$0xff] }
 0x585   :  { %7976 = vmatpush1.bf16.msra.mxu1 %v12576_v57  ;;  %7936 = vmatprep.subr.bf16.mxu0 %v12639_v62  ;;  %v11811_v57 = vcombine.high %v392_v9, %v424_v25  ;;  %v11813_v62 = vcombine.high %v393_v34, %v425_v5  ;;  %v616_v9 = vld [vmem:[#allocation9 + $0x7e0] sm:$0xff]  ;;  %v585_v25 = vld [vmem:[#allocation9 + $0x6e8] sm:$0xff] }
 0x586   :  { %7977 = vmatprep.subr.bf16.mxu1 %v12641_v30  ;;  %v456_v30 = vld [vmem:[#allocation9 + $0x2e0] sm:$0xff] }
 0x587   :  { %v11874_v49 = vcombine.low %v456_v30, %v488_v28 }
 0x588   :  { %7937 = vmatpush1.bf16.msra.mxu0 %v12638_v45  ;;  %v11812_v45 = vcombine.low %v393_v34, %v425_v5  ;;  %v617_v34 = vld [vmem:[#allocation9 + $0x7e8] sm:$0xff] }
 0x589   :  { %7978 = vmatpush1.bf16.msra.mxu1 %v12640_v33  ;;  %7938 = vmatprep.subr.bf16.mxu0 %v12703_v37  ;;  %v11875_v33 = vcombine.high %v456_v30, %v488_v28  ;;  %v520_v37 = vld [vmem:[#allocation9 + $0x4e0] sm:$0xff]  ;;  %v649_v28 = vld [vmem:[#allocation9 + $0x8e8] sm:$0xff] }
 0x58a   :  { %7979 = vmatprep.subr.bf16.mxu1 %v12705_v22  ;;  %v552_v22 = vld [vmem:[#allocation9 + $0x5e0] sm:$0xff] }
 0x58b   :  { %v11938_v5 = vcombine.low %v520_v37, %v552_v22  ;;  %v680_v30 = vld [vmem:[#allocation9 + $0x9e0] sm:$0xff] }
 0x58c   :  { %7939 = vmatpush1.bf16.msra.mxu0 %v12702_v58  ;;  %v11876_v58 = vcombine.low %v457_v29, %v489_v53  ;;  %v12004_v53 = vcombine.low %v585_v25, %v617_v34 }
 0x58d   :  { %7980 = vmatpush1.bf16.msra.mxu1 %v12704_v52  ;;  %7940 = vmatprep.subr.bf16.mxu0 %v12767_v1  ;;  %v11939_v52 = vcombine.high %v520_v37, %v552_v22  ;;  %v11941_v1 = vcombine.high %v521_v32, %v553_v38  ;;  %v744_v37 = vld [vmem:[#allocation9 + $0xbe0] sm:$0xff]  ;;  %v713_v22 = vld [vmem:[#allocation9 + $0xae8] sm:$0xff] }
 0x58e   :  { %7981 = vmatprep.subr.bf16.mxu1 %v12769_v4  ;;  %v584_v4 = vld [vmem:[#allocation9 + $0x6e0] sm:$0xff] }
 0x58f   :  { %v12002_v29 = vcombine.low %v584_v4, %v616_v9 }
 0x590   :  { %7941 = vmatpush1.bf16.msra.mxu0 %v12766_v54  ;;  %v11940_v54 = vcombine.low %v521_v32, %v553_v38 }
 0x591   :  { %7982 = vmatpush1.bf16.msra.mxu1 %v12768_v14  ;;  %7992 = vmatprep.subr.bf16.mxu0 %v11811_v57  ;;  %v12003_v14 = vcombine.high %v584_v4, %v616_v9  ;;  %v12005_v57 = vcombine.high %v585_v25, %v617_v34  ;;  %v808_v4 = vld [vmem:[#allocation9 + $0xde0] sm:$0xff]  ;;  %v777_v9 = vld [vmem:[#allocation9 + $0xce8] sm:$0xff] }
 0x592   :  { %8033 = vmatprep.subr.bf16.mxu1 %v11813_v62  ;;  %v648_v62 = vld [vmem:[#allocation9 + $0x8e0] sm:$0xff] }
 0x593   :  { %7943 = vmatmul.mubr.bf16.vlgmr.msra.gmra.mrb[56].mxu0 %v14995_v61  ;;  %v12066_v32 = vcombine.low %v648_v62, %v680_v30 }
 0x594   :  { %7984 = vmatmul.mubr.bf16.vlgmr.msra.gmra.mrb[56].mxu1 %v14995_v61  ;;  %7993 = vmatpush1.bf16.msra.mxu0 %v11810_v0  ;;  %v681_v0 = vld [vmem:[#allocation9 + $0x9e8] sm:$0xff] }
 0x595   :  { %8024 = vmatprep.mubr.bf16.mxu0 %v14993_v60  ;;  %8034 = vmatpush1.bf16.msra.mxu1 %v11812_v45  ;;  %v12067_v45 = vcombine.high %v648_v62, %v680_v30  ;;  %v12068_v38 = vcombine.low %v649_v28, %v681_v0  ;;  %v840_v62 = vld [vmem:[#allocation9 + $0xee0] sm:$0xff] }
 0x596   :  { %8065 = vmatprep.mubr.bf16.mxu1 %v14993_v60  ;;  %7994 = vmatprep.subr.bf16.mxu0 %v11875_v33  ;;  %v12069_v33 = vcombine.high %v649_v28, %v681_v0  ;;  %v872_v30 = vld [vmem:[#allocation9 + $0xfe0] sm:$0xff] }
 0x597   :  { %8035 = vmatprep.subr.bf16.mxu1 %v11877_v3  ;;  %v712_v3 = vld [vmem:[#allocation9 + $0xae0] sm:$0xff]  ;;  %v12258_v17 = vcombine.low %v840_v62, %v872_v30 }
 0x598   :  { %7995 = vmatpush1.bf16.msra.mxu0 %v11874_v49  ;;  %v745_v49 = vld [vmem:[#allocation9 + $0xbe8] sm:$0xff]  ;;  %v12130_v25 = vcombine.low %v712_v3, %v744_v37 }
 0x599   :  { %8036 = vmatpush1.bf16.msra.mxu1 %v11876_v58  ;;  %7996 = vmatprep.subr.bf16.mxu0 %v11939_v52  ;;  %v12131_v58 = vcombine.high %v712_v3, %v744_v37  ;;  %v12133_v52 = vcombine.high %v713_v22, %v745_v49  ;;  %v12132_v34 = vcombine.low %v713_v22, %v745_v49 }
 0x59a   :  { %8037 = vmatprep.subr.bf16.mxu1 %v11941_v1  ;;  %v776_v1 = vld [vmem:[#allocation9 + $0xce0] sm:$0xff] }
 0x59b   :  { %v12194_v3 = vcombine.low %v776_v1, %v808_v4 }
 0x59c   :  { %7997 = vmatpush1.bf16.msra.mxu0 %v11938_v5  ;;  %v809_v5 = vld [vmem:[#allocation9 + $0xde8] sm:$0xff] }
 0x59d   :  { %8038 = vmatpush1.bf16.msra.mxu1 %v11940_v54  ;;  %7998 = vmatprep.subr.bf16.mxu0 %v12003_v14  ;;  %v12195_v54 = vcombine.high %v776_v1, %v808_v4  ;;  %v12196_v49 = vcombine.low %v777_v9, %v809_v5  ;;  %v968_v4 = vld [vmem:[#allocation9 + $0x12e0] sm:$0xff] }
 0x59e   :  { %8039 = vmatprep.subr.bf16.mxu1 %v12005_v57  ;;  %v12197_v57 = vcombine.high %v777_v9, %v809_v5  ;;  %v1001_v9 = vld [vmem:[#allocation9 + $0x13e8] sm:$0xff] }
 0x5a0   :  { %7999 = vmatpush1.bf16.msra.mxu0 %v12002_v29  ;;  %v841_v29 = vld [vmem:[#allocation9 + $0xee8] sm:$0xff] }
 0x5a1   :  { %8040 = vmatpush1.bf16.msra.mxu1 %v12004_v53  ;;  %8000 = vmatprep.subr.bf16.mxu0 %v12067_v45  ;;  %v873_v53 = vld [vmem:[#allocation9 + $0xfe8] sm:$0xff] }
 0x5a2   :  { %8041 = vmatprep.subr.bf16.mxu1 %v12069_v33 }
 0x5a4   :  { %8001 = vmatpush1.bf16.msra.mxu0 %v12066_v32  ;;  %v12259_v32 = vcombine.high %v840_v62, %v872_v30  ;;  %v1064_v62 = vld [vmem:[#allocation9 + $0x15e0] sm:$0xff]  ;;  %v1033_v30 = vld [vmem:[#allocation9 + $0x14e8] sm:$0xff] }
 0x5a5   :  { %8042 = vmatpush1.bf16.msra.mxu1 %v12068_v38  ;;  %8002 = vmatprep.subr.bf16.mxu0 %v12131_v58  ;;  %v12261_v38 = vcombine.high %v841_v29, %v873_v53  ;;  %v904_v58 = vld [vmem:[#allocation9 + $0x10e0] sm:$0xff] }
 0x5a6   :  { %v15135_v14 = vpop.f32.mrb[44].mxu0  ;;  %8043 = vmatprep.subr.bf16.mxu1 %v12133_v52  ;;  %v936_v52 = vld [vmem:[#allocation9 + $0x11e0] sm:$0xff] }
 0x5a7   :  { %17602 = vst [vmem:[#allocation46_spill] sm:$0xff] %v15135_v14  ;;  %v15137_v28 = vpop.f32.mrb[44].mxu1  ;;  %v15139_v0 = vpop.f32.mrb[45].mxu0  ;;  %v905_v14 = vld [vmem:[#allocation9 + $0x10e8] sm:$0xff]  ;;  %v12322_v5 = vcombine.low %v904_v58, %v936_v52 }
 0x5a8   :  { %17603 = vst [vmem:[#allocation47_spill] sm:$0xff] %v15137_v28  ;;  %17604 = vst [vmem:[#allocation48_spill] sm:$0xff] %v15139_v0  ;;  %v15141_v45 = vpop.f32.mrb[45].mxu1  ;;  %v7702_v33 = vpop.f32.mrb[46].mxu0  ;;  %8003 = vmatpush1.bf16.msra.mxu0 %v12130_v25  ;;  %v937_v0 = vld [vmem:[#allocation9 + $0x11e8] sm:$0xff]  ;;  %v12323_v25 = vcombine.high %v904_v58, %v936_v52 }
 0x5a9   :  { %17605 = vst [vmem:[#allocation49_spill] sm:$0xff] %v15141_v45  ;;  %v7743_v37 = vpop.f32.mrb[46].mxu1  ;;  %8044 = vmatpush1.bf16.msra.mxu1 %v12132_v34  ;;  %v7703_v22 = vpop.f32.mrb[47].mxu0  ;;  %8004 = vmatprep.subr.bf16.mxu0 %v12195_v54  ;;  %v12260_v33 = vcombine.low %v841_v29, %v873_v53  ;;  %v12325_v1 = vcombine.high %v905_v14, %v937_v0  ;;  %v1000_v34 = vld [vmem:[#allocation9 + $0x13e0] sm:$0xff]  ;;  %v969_v54 = vld [vmem:[#allocation9 + $0x12e8] sm:$0xff] }
 0x5aa   :  { %8045 = vmatprep.subr.bf16.mxu1 %v12197_v57  ;;  %v7744_v28 = vpop.f32.mrb[47].mxu1  ;;  %v12324_v57 = vcombine.low %v905_v14, %v937_v0  ;;  %v12389_v37 = vcombine.high %v969_v54, %v1001_v9  ;;  %v1065_v22 = vld [vmem:[#allocation9 + $0x15e8] sm:$0xff]  ;;  %v12386_v29 = vcombine.low %v968_v4, %v1000_v34  ;;  %v12388_v53 = vcombine.low %v969_v54, %v1001_v9  ;;  %v15166_v45 = vld [vmem:[#allocation12 + $0x40] sm:$0xff]  }
 0x5ab   :  { %v12387_v28 = vcombine.high %v968_v4, %v1000_v34  ;;  %v1097_v58 = vld [vmem:[#allocation9 + $0x16e8] sm:$0xff]  ;;  %v12452_v0 = vcombine.low %v1033_v30, %v1065_v22  ;;  %v1192_v4 = vld [vmem:[#allocation9 + $0x19e0] sm:$0xff] }
 0x5ac   :  { %8005 = vmatpush1.bf16.msra.mxu0 %v12194_v3  ;;  %v1032_v3 = vld [vmem:[#allocation9 + $0x14e0] sm:$0xff]  ;;  %v1129_v52 = vld [vmem:[#allocation9 + $0x17e8] sm:$0xff] }
 0x5ad   :  { %8046 = vmatpush1.bf16.msra.mxu1 %v12196_v49  ;;  %8006 = vmatprep.subr.bf16.mxu0 %v12259_v32  ;;  %v12451_v49 = vcombine.high %v1032_v3, %v1064_v62  ;;  %v12453_v32 = vcombine.high %v1033_v30, %v1065_v22  ;;  %v12450_v14 = vcombine.low %v1032_v3, %v1064_v62  ;;  %v1161_v34 = vld [vmem:[#allocation9 + $0x18e8] sm:$0xff]  ;;  %v1256_v3 = vld [vmem:[#allocation9 + $0x1be0] sm:$0xff] }
 0x5ae   :  { %8047 = vmatprep.subr.bf16.mxu1 %v12261_v38  ;;  %v1128_v38 = vld [vmem:[#allocation9 + $0x17e0] sm:$0xff]  ;;  %v12516_v9 = vcombine.low %v1097_v58, %v1129_v52  ;;  %v1225_v62 = vld [vmem:[#allocation9 + $0x1ae8] sm:$0xff] }
 0x5b0   :  { %8007 = vmatpush1.bf16.msra.mxu0 %v12258_v17  ;;  %v1096_v17 = vld [vmem:[#allocation9 + $0x16e0] sm:$0xff] }
 0x5b1   :  { %8048 = vmatpush1.bf16.msra.mxu1 %v12260_v33  ;;  %8008 = vmatprep.subr.bf16.mxu0 %v12323_v25  ;;  %v12515_v33 = vcombine.high %v1096_v17, %v1128_v38  ;;  %v12517_v25 = vcombine.high %v1097_v58, %v1129_v52  ;;  %v12514_v54 = vcombine.low %v1096_v17, %v1128_v38  ;;  %v1320_v17 = vld [vmem:[#allocation9 + $0x1de0] sm:$0xff]  ;;  %v1289_v38 = vld [vmem:[#allocation9 + $0x1ce8] sm:$0xff] }
 0x5b2   :  { %8049 = vmatprep.subr.bf16.mxu1 %v12325_v1  ;;  %v1160_v1 = vld [vmem:[#allocation9 + $0x18e0] sm:$0xff] }
 0x5b3   :  { %v12578_v30 = vcombine.low %v1160_v1, %v1192_v4 }
 0x5b4   :  { %8009 = vmatpush1.bf16.msra.mxu0 %v12322_v5  ;;  %v1193_v5 = vld [vmem:[#allocation9 + $0x19e8] sm:$0xff] }
 0x5b5   :  { %8050 = vmatpush1.bf16.msra.mxu1 %v12324_v57  ;;  %8010 = vmatprep.subr.bf16.mxu0 %v12387_v28  ;;  %v12579_v57 = vcombine.high %v1160_v1, %v1192_v4  ;;  %v12581_v28 = vcombine.high %v1161_v34, %v1193_v5  ;;  %v12580_v22 = vcombine.low %v1161_v34, %v1193_v5  ;;  %v1384_v1 = vld [vmem:[#allocation9 + $0x1fe0] sm:$0xff]  ;;  %v1353_v4 = vld [vmem:[#allocation9 + $0x1ee8] sm:$0xff] }
 0x5b6   :  { %8051 = vmatprep.subr.bf16.mxu1 %v12389_v37  ;;  %v1224_v37 = vld [vmem:[#allocation9 + $0x1ae0] sm:$0xff] }
 0x5b7   :  { %v12642_v58 = vcombine.low %v1224_v37, %v1256_v3 }
 0x5b8   :  { %8011 = vmatpush1.bf16.msra.mxu0 %v12386_v29  ;;  %v1257_v29 = vld [vmem:[#allocation9 + $0x1be8] sm:$0xff] }
 0x5b9   :  { %8052 = vmatpush1.bf16.msra.mxu1 %v12388_v53  ;;  %8012 = vmatprep.subr.bf16.mxu0 %v12451_v49  ;;  %v12643_v53 = vcombine.high %v1224_v37, %v1256_v3  ;;  %v12645_v49 = vcombine.high %v1225_v62, %v1257_v29  ;;  %v12644_v52 = vcombine.low %v1225_v62, %v1257_v29  ;;  %v426_v37 = vld [vmem:[#allocation9 + $0x1f0] sm:$0xff]  ;;  %v395_v3 = vld [vmem:[#allocation9 + $0xf8] sm:$0xff] }
 0x5ba   :  { %8053 = vmatprep.subr.bf16.mxu1 %v12453_v32  ;;  %v1288_v32 = vld [vmem:[#allocation9 + $0x1ce0] sm:$0xff] }
 0x5bb   :  { %v12706_v34 = vcombine.low %v1288_v32, %v1320_v17 }
 0x5bc   :  { %8013 = vmatpush1.bf16.msra.mxu0 %v12450_v14  ;;  %v1321_v14 = vld [vmem:[#allocation9 + $0x1de8] sm:$0xff] }
 0x5bd   :  { %8054 = vmatpush1.bf16.msra.mxu1 %v12452_v0  ;;  %8014 = vmatprep.subr.bf16.mxu0 %v12515_v33  ;;  %v12707_v0 = vcombine.high %v1288_v32, %v1320_v17  ;;  %v12709_v33 = vcombine.high %v1289_v38, %v1321_v14  ;;  %v12708_v5 = vcombine.low %v1289_v38, %v1321_v14  ;;  %v490_v32 = vld [vmem:[#allocation9 + $0x3f0] sm:$0xff]  ;;  %v459_v38 = vld [vmem:[#allocation9 + $0x2f8] sm:$0xff] }
 0x5be   :  { %8055 = vmatprep.subr.bf16.mxu1 %v12517_v25  ;;  %v1352_v25 = vld [vmem:[#allocation9 + $0x1ee0] sm:$0xff]  ;;  %v491_v14 = vld [vmem:[#allocation9 + $0x3f8] sm:$0xff] }
 0x5bf   :  { %v12770_v62 = vcombine.low %v1352_v25, %v1384_v1 }
 0x5c0   :  { %8015 = vmatpush1.bf16.msra.mxu0 %v12514_v54  ;;  %v1385_v54 = vld [vmem:[#allocation9 + $0x1fe8] sm:$0xff] }
 0x5c1   :  { %8056 = vmatpush1.bf16.msra.mxu1 %v12516_v9  ;;  %8016 = vmatprep.subr.bf16.mxu0 %v12579_v57  ;;  %v12771_v9 = vcombine.high %v1352_v25, %v1384_v1  ;;  %v12773_v57 = vcombine.high %v1353_v4, %v1385_v54  ;;  %v12772_v29 = vcombine.low %v1353_v4, %v1385_v54  ;;  %v523_v1 = vld [vmem:[#allocation9 + $0x4f8] sm:$0xff] }
 0x5c2   :  { %8057 = vmatprep.subr.bf16.mxu1 %v12581_v28  ;;  %v394_v28 = vld [vmem:[#allocation9 + $0xf0] sm:$0xff]  ;;  %v11881_v25 = vcombine.high %v459_v38, %v491_v14  ;;  %v555_v4 = vld [vmem:[#allocation9 + $0x5f8] sm:$0xff] }
 0x5c3   :  { %v11814_v17 = vcombine.low %v394_v28, %v426_v37 }
 0x5c4   :  { %8017 = vmatpush1.bf16.msra.mxu0 %v12578_v30  ;;  %v427_v30 = vld [vmem:[#allocation9 + $0x1f8] sm:$0xff] }
 0x5c5   :  { %8058 = vmatpush1.bf16.msra.mxu1 %v12580_v22  ;;  %8018 = vmatprep.subr.bf16.mxu0 %v12643_v53  ;;  %v11815_v22 = vcombine.high %v394_v28, %v426_v37  ;;  %v11817_v53 = vcombine.high %v395_v3, %v427_v30  ;;  %v618_v28 = vld [vmem:[#allocation9 + $0x7f0] sm:$0xff]  ;;  %v587_v37 = vld [vmem:[#allocation9 + $0x6f8] sm:$0xff] }
 0x5c6   :  { %8059 = vmatprep.subr.bf16.mxu1 %v12645_v49  ;;  %v458_v49 = vld [vmem:[#allocation9 + $0x2f0] sm:$0xff] }
 0x5c7   :  { %v11878_v54 = vcombine.low %v458_v49, %v490_v32 }
 0x5c8   :  { %8019 = vmatpush1.bf16.msra.mxu0 %v12642_v58  ;;  %v11816_v58 = vcombine.low %v395_v3, %v427_v30  ;;  %v619_v3 = vld [vmem:[#allocation9 + $0x7f8] sm:$0xff] }
 0x5c9   :  { %8060 = vmatpush1.bf16.msra.mxu1 %v12644_v52  ;;  %8020 = vmatprep.subr.bf16.mxu0 %v12707_v0  ;;  %v11879_v52 = vcombine.high %v458_v49, %v490_v32  ;;  %v522_v0 = vld [vmem:[#allocation9 + $0x4f0] sm:$0xff]  ;;  %v651_v32 = vld [vmem:[#allocation9 + $0x8f8] sm:$0xff] }
 0x5ca   :  { %8061 = vmatprep.subr.bf16.mxu1 %v12709_v33  ;;  %v554_v33 = vld [vmem:[#allocation9 + $0x5f0] sm:$0xff] }
 0x5cb   :  { %v11942_v30 = vcombine.low %v522_v0, %v554_v33  ;;  %v682_v49 = vld [vmem:[#allocation9 + $0x9f0] sm:$0xff] }
 0x5cc   :  { %8021 = vmatpush1.bf16.msra.mxu0 %v12706_v34  ;;  %v11880_v34 = vcombine.low %v459_v38, %v491_v14  ;;  %v12008_v38 = vcombine.low %v587_v37, %v619_v3 }
 0x5cd   :  { %8062 = vmatpush1.bf16.msra.mxu1 %v12708_v5  ;;  %8022 = vmatprep.subr.bf16.mxu0 %v12771_v9  ;;  %v11943_v5 = vcombine.high %v522_v0, %v554_v33  ;;  %v11945_v9 = vcombine.high %v523_v1, %v555_v4  ;;  %v746_v0 = vld [vmem:[#allocation9 + $0xbf0] sm:$0xff]  ;;  %v715_v33 = vld [vmem:[#allocation9 + $0xaf8] sm:$0xff] }
 0x5ce   :  { %8063 = vmatprep.subr.bf16.mxu1 %v12773_v57  ;;  %v586_v57 = vld [vmem:[#allocation9 + $0x6f0] sm:$0xff] }
 0x5d0   :  { %8023 = vmatpush1.bf16.msra.mxu0 %v12770_v62  ;;  %v11944_v62 = vcombine.low %v523_v1, %v555_v4 }
 0x5d1   :  { %8064 = vmatpush1.bf16.msra.mxu1 %v12772_v29  ;;  %8074 = vmatprep.subr.bf16.mxu0 %v11815_v22  ;;  %v12007_v29 = vcombine.high %v586_v57, %v618_v28  ;;  %v12009_v22 = vcombine.high %v587_v37, %v619_v3 }
 0x5d2   :  { %8115 = vmatprep.subr.bf16.mxu1 %v11817_v53  ;;  %v650_v53 = vld [vmem:[#allocation9 + $0x8f0] sm:$0xff] }
 0x5d3   :  { %8025 = vmatmul.mubr.bf16.vlgmr.msra.gmra.mrb[60].mxu0 %v14995_v61  ;;  %v12071_v14 = vcombine.high %v650_v53, %v682_v49  ;;  %v12070_v1 = vcombine.low %v650_v53, %v682_v49  ;;  %v874_v53 = vld [vmem:[#allocation9 + $0xff0] sm:$0xff] }
 0x5d4   :  { %8066 = vmatmul.mubr.bf16.vlgmr.msra.gmra.mrb[60].mxu1 %v14995_v61  ;;  %8075 = vmatpush1.bf16.msra.mxu0 %v11814_v17  ;;  %v683_v17 = vld [vmem:[#allocation9 + $0x9f8] sm:$0xff] }
 0x5d5   :  { %8106 = vmatprep.mubr.bf16.mxu0 %v14993_v60  ;;  %8116 = vmatpush1.bf16.msra.mxu1 %v11816_v58  ;;  %v12073_v58 = vcombine.high %v651_v32, %v683_v17  ;;  %v12072_v4 = vcombine.low %v651_v32, %v683_v17  ;;  %v843_v17 = vld [vmem:[#allocation9 + $0xef8] sm:$0xff] }
 0x5d6   :  { %8147 = vmatprep.mubr.bf16.mxu1 %v14993_v60  ;;  %8076 = vmatprep.subr.bf16.mxu0 %v11879_v52  ;;  %v12006_v60 = vcombine.low %v586_v57, %v618_v28  ;;  %v714_v52 = vld [vmem:[#allocation9 + $0xaf0] sm:$0xff]  ;;  %v779_v57 = vld [vmem:[#allocation9 + $0xcf8] sm:$0xff] }
 0x5d7   :  { %8117 = vmatprep.subr.bf16.mxu1 %v11881_v25  ;;  %v747_v25 = vld [vmem:[#allocation9 + $0xbf8] sm:$0xff]  ;;  %v12134_v37 = vcombine.low %v714_v52, %v746_v0 }
 0x5d8   :  { %8077 = vmatpush1.bf16.msra.mxu0 %v11878_v54  ;;  %v12135_v54 = vcombine.high %v714_v52, %v746_v0  ;;  %v811_v28 = vld [vmem:[#allocation9 + $0xdf8] sm:$0xff]  ;;  %v12136_v3 = vcombine.low %v715_v33, %v747_v25 }
 0x5d9   :  { %8118 = vmatpush1.bf16.msra.mxu1 %v11880_v34  ;;  %8078 = vmatprep.subr.bf16.mxu0 %v11943_v5  ;;  %v12137_v34 = vcombine.high %v715_v33, %v747_v25  ;;  %v778_v5 = vld [vmem:[#allocation9 + $0xcf0] sm:$0xff]  ;;  %v12200_v33 = vcombine.low %v779_v57, %v811_v28 }
 0x5da   :  { %8119 = vmatprep.subr.bf16.mxu1 %v11945_v9  ;;  %v810_v9 = vld [vmem:[#allocation9 + $0xdf0] sm:$0xff] }
 0x5dc   :  { %8079 = vmatpush1.bf16.msra.mxu0 %v11942_v30  ;;  %v12199_v30 = vcombine.high %v778_v5, %v810_v9 }
 0x5dd   :  { %8120 = vmatpush1.bf16.msra.mxu1 %v11944_v62  ;;  %8080 = vmatprep.subr.bf16.mxu0 %v12007_v29  ;;  %v12201_v29 = vcombine.high %v779_v57, %v811_v28  ;;  %v1003_v57 = vld [vmem:[#allocation9 + $0x13f8] sm:$0xff] }
 0x5de   :  { %8121 = vmatprep.subr.bf16.mxu1 %v12009_v22  ;;  %v842_v22 = vld [vmem:[#allocation9 + $0xef0] sm:$0xff] }
 0x5df   :  { %v12263_v25 = vcombine.high %v842_v22, %v874_v53 }
 0x5e0   :  { %8081 = vmatpush1.bf16.msra.mxu0 %v12006_v60  ;;  %v875_v60 = vld [vmem:[#allocation9 + $0xff8] sm:$0xff] }
 0x5e1   :  { %8122 = vmatpush1.bf16.msra.mxu1 %v12008_v38  ;;  %8082 = vmatprep.subr.bf16.mxu0 %v12071_v14 }
 0x5e2   :  { %8123 = vmatprep.subr.bf16.mxu1 %v12073_v58  ;;  %v12198_v58 = vcombine.low %v778_v5, %v810_v9  ;;  %v970_v9 = vld [vmem:[#allocation9 + $0x12f0] sm:$0xff] }
 0x5e4   :  { %8083 = vmatpush1.bf16.msra.mxu0 %v12070_v1  ;;  %v12265_v1 = vcombine.high %v843_v17, %v875_v60 }
 0x5e5   :  { %8124 = vmatpush1.bf16.msra.mxu1 %v12072_v4  ;;  %8084 = vmatprep.subr.bf16.mxu0 %v12135_v54  ;;  %v906_v4 = vld [vmem:[#allocation9 + $0x10f0] sm:$0xff] }
 0x5e6   :  { %v15147_v62 = vpop.f32.mrb[48].mxu0  ;;  %8125 = vmatprep.subr.bf16.mxu1 %v12137_v34  ;;  %v938_v54 = vld [vmem:[#allocation9 + $0x11f0] sm:$0xff] }
 0x5e7   :  { %17606 = vst [vmem:[#allocation50_spill] sm:$0xff] %v15147_v62  ;;  %v15149_v49 = vpop.f32.mrb[48].mxu1  ;;  %v15151_v32 = vpop.f32.mrb[49].mxu0  ;;  %v939_v62 = vld [vmem:[#allocation9 + $0x11f8] sm:$0xff]  ;;  %v12326_v28 = vcombine.low %v906_v4, %v938_v54 }
 0x5e8   :  { %17607 = vst [vmem:[#allocation51_spill] sm:$0xff] %v15149_v49  ;;  %17608 = vst [vmem:[#allocation52_spill] sm:$0xff] %v15151_v32  ;;  %v15153_v38 = vpop.f32.mrb[49].mxu1  ;;  %v7784_v14 = vpop.f32.mrb[50].mxu0  ;;  %8085 = vmatpush1.bf16.msra.mxu0 %v12134_v37  ;;  %v907_v49 = vld [vmem:[#allocation9 + $0x10f8] sm:$0xff]  ;;  %v12262_v32 = vcombine.low %v842_v22, %v874_v53  ;;  %v12327_v37 = vcombine.high %v906_v4, %v938_v54  ;;  %v1066_v22 = vld [vmem:[#allocation9 + $0x15f0] sm:$0xff] }
 0x5e9   :  { %17609 = vst [vmem:[#allocation53_spill] sm:$0xff] %v15153_v38  ;;  %v7825_v52 = vpop.f32.mrb[50].mxu1  ;;  %8126 = vmatpush1.bf16.msra.mxu1 %v12136_v3  ;;  %v7785_v0 = vpop.f32.mrb[51].mxu0  ;;  %8086 = vmatprep.subr.bf16.mxu0 %v12199_v30  ;;  %v12264_v14 = vcombine.low %v843_v17, %v875_v60  ;;  %v12329_v5 = vcombine.high %v907_v49, %v939_v62  ;;  %v1002_v3 = vld [vmem:[#allocation9 + $0x13f0] sm:$0xff]  ;;  %v971_v30 = vld [vmem:[#allocation9 + $0x12f8] sm:$0xff] }
 0x5ea   :  { %8127 = vmatprep.subr.bf16.mxu1 %v12201_v29  ;;  %v7826_v34 = vpop.f32.mrb[51].mxu1  ;;  %v12328_v29 = vcombine.low %v907_v49, %v939_v62  ;;  %v12391_v52 = vcombine.high %v970_v9, %v1002_v3  ;;  %v12393_v0 = vcombine.high %v971_v30, %v1003_v57  ;;  %v1035_v53 = vld [vmem:[#allocation9 + $0x14f8] sm:$0xff]  ;;  %v12390_v17 = vcombine.low %v970_v9, %v1002_v3  ;;  %v1130_v4 = vld [vmem:[#allocation9 + $0x17f0] sm:$0xff] }
 0x5eb   :  { %v12392_v60 = vcombine.low %v971_v30, %v1003_v57  ;;  %v1099_v54 = vld [vmem:[#allocation9 + $0x16f8] sm:$0xff]  ;;  %v1194_v9 = vld [vmem:[#allocation9 + $0x19f0] sm:$0xff] }
 0x5ec   :  { %8087 = vmatpush1.bf16.msra.mxu0 %v12198_v58  ;;  %v1034_v58 = vld [vmem:[#allocation9 + $0x14f0] sm:$0xff]  ;;  %v1131_v34 = vld [vmem:[#allocation9 + $0x17f8] sm:$0xff] }
 0x5ed   :  { %8128 = vmatpush1.bf16.msra.mxu1 %v12200_v33  ;;  %8088 = vmatprep.subr.bf16.mxu0 %v12263_v25  ;;  %v1067_v33 = vld [vmem:[#allocation9 + $0x15f8] sm:$0xff]  ;;  %v12455_v25 = vcombine.high %v1034_v58, %v1066_v22  ;;  %v12454_v62 = vcombine.low %v1034_v58, %v1066_v22  ;;  %v12520_v57 = vcombine.low %v1099_v54, %v1131_v34  ;;  %v1258_v58 = vld [vmem:[#allocation9 + $0x1bf0] sm:$0xff] }
 0x5ee   :  { %8129 = vmatprep.subr.bf16.mxu1 %v12265_v1  ;;  %v12457_v1 = vcombine.high %v1035_v53, %v1067_v33  ;;  %v12456_v49 = vcombine.low %v1035_v53, %v1067_v33  ;;  %v1163_v3 = vld [vmem:[#allocation9 + $0x18f8] sm:$0xff]  ;;  %v15155_v33 = vld [vmem:[#allocation10] sm:$0xff] }
 0x5ef   :  { %v1227_v22 = vld [vmem:[#allocation9 + $0x1af8] sm:$0xff] }
 0x5f0   :  { %8089 = vmatpush1.bf16.msra.mxu0 %v12262_v32  ;;  %v1098_v32 = vld [vmem:[#allocation9 + $0x16f0] sm:$0xff] }
 0x5f1   :  { %8130 = vmatpush1.bf16.msra.mxu1 %v12264_v14  ;;  %8090 = vmatprep.subr.bf16.mxu0 %v12327_v37  ;;  %v12519_v14 = vcombine.high %v1098_v32, %v1130_v4  ;;  %v12521_v37 = vcombine.high %v1099_v54, %v1131_v34  ;;  %v12518_v30 = vcombine.low %v1098_v32, %v1130_v4  ;;  %v1290_v4 = vld [vmem:[#allocation9 + $0x1cf0] sm:$0xff]  ;;  %v1291_v34 = vld [vmem:[#allocation9 + $0x1cf8] sm:$0xff] }
 0x5f2   :  { %8131 = vmatprep.subr.bf16.mxu1 %v12329_v5  ;;  %v1162_v5 = vld [vmem:[#allocation9 + $0x18f0] sm:$0xff] }
 0x5f3   :  { %v12582_v53 = vcombine.low %v1162_v5, %v1194_v9  ;;  %v1322_v54 = vld [vmem:[#allocation9 + $0x1df0] sm:$0xff] }
 0x5f4   :  { %8091 = vmatpush1.bf16.msra.mxu0 %v12326_v28  ;;  %v1195_v28 = vld [vmem:[#allocation9 + $0x19f8] sm:$0xff]  ;;  %v12710_v38 = vcombine.low %v1290_v4, %v1322_v54 }
 0x5f5   :  { %8132 = vmatpush1.bf16.msra.mxu1 %v12328_v29  ;;  %8092 = vmatprep.subr.bf16.mxu0 %v12391_v52  ;;  %v12583_v29 = vcombine.high %v1162_v5, %v1194_v9  ;;  %v12585_v52 = vcombine.high %v1163_v3, %v1195_v28  ;;  %v12711_v9 = vcombine.high %v1290_v4, %v1322_v54 }
 0x5f6   :  { %8133 = vmatprep.subr.bf16.mxu1 %v12393_v0  ;;  %v1226_v0 = vld [vmem:[#allocation9 + $0x1af0] sm:$0xff] }
 0x5f8   :  { %8093 = vmatpush1.bf16.msra.mxu0 %v12390_v17  ;;  %v1259_v17 = vld [vmem:[#allocation9 + $0x1bf8] sm:$0xff] }
 0x5f9   :  { %8134 = vmatpush1.bf16.msra.mxu1 %v12392_v60  ;;  %8094 = vmatprep.subr.bf16.mxu0 %v12455_v25  ;;  %v15158_v60 = vsub.s32 3, %v14983_v43  ;;  %v12584_v25 = vcombine.low %v1163_v3, %v1195_v28  ;;  %v12649_v32 = vcombine.high %v1227_v22, %v1259_v17  ;;  %v12648_v5 = vcombine.low %v1227_v22, %v1259_v17  ;;  %v1354_v28 = vld [vmem:[#allocation9 + $0x1ef0] sm:$0xff] }
 0x5fa   :  { %8135 = vmatprep.subr.bf16.mxu1 %v12457_v1  ;;  %v12647_v1 = vcombine.high %v1226_v0, %v1258_v58 }
 0x5fb   :  { %17610 = vst [vmem:[#allocation54_spill] sm:$0xff] %v15158_v60 }
 0x5fc   :  { %8095 = vmatpush1.bf16.msra.mxu0 %v12454_v62  ;;  %v1323_v62 = vld [vmem:[#allocation9 + $0x1df8] sm:$0xff] }
 0x5fd   :  { %8136 = vmatpush1.bf16.msra.mxu1 %v12456_v49  ;;  %8096 = vmatprep.subr.bf16.mxu0 %v12519_v14  ;;  %v1411_v49 = vrot.slane %v15155_v33, %v14989_v46  ;;  %v12646_v14 = vcombine.low %v1226_v0, %v1258_v58  ;;  %v12713_v3 = vcombine.high %v1291_v34, %v1323_v62 }
 0x5fe   :  { %8137 = vmatprep.subr.bf16.mxu1 %v12521_v37  ;;  %v1419_v37 = vrot.slane %v15155_v33, %v15158_v60  ;;  %v12712_v0 = vcombine.low %v1291_v34, %v1323_v62  ;;  %v15176_v34 = vld [vmem:[#allocation12 + $0x48] sm:$0xff]  }
 0x600   :  { %8097 = vmatpush1.bf16.msra.mxu0 %v12518_v30  ;;  %v1386_v30 = vld [vmem:[#allocation9 + $0x1ff0] sm:$0xff] }
 0x601   :  { %8138 = vmatpush1.bf16.msra.mxu1 %v12520_v57  ;;  %8098 = vmatprep.subr.bf16.mxu0 %v12583_v29  ;;  %v1355_v57 = vld [vmem:[#allocation9 + $0x1ef8] sm:$0xff]  ;;  %v12775_v58 = vcombine.high %v1354_v28, %v1386_v30  ;;  %v12774_v17 = vcombine.low %v1354_v28, %v1386_v30  ;;  %v15199_v28 = vld [vmem:[#allocation12 + $0x90] sm:$0xff]  }
 0x602   :  { %8139 = vmatprep.subr.bf16.mxu1 %v12585_v52  ;;  %v1387_v29 = vld [vmem:[#allocation9 + $0x1ff8] sm:$0xff]  ;;  %v6881_v52 = vadd.f32 %v15019_v15, %v1411_v49  ;;  %v15168_v15 = vld [vmem:[#allocation12 + $0xc0] sm:$0xff]   ;;  %v15179_v49 = vld [vmem:[#allocation12 + $0xc8] sm:$0xff]  }
 0x603   :  { %v15201_v30 = vld [vmem:[#allocation12 + $0x58] sm:$0xff]  }
 0x604   :  { %8099 = vmatpush1.bf16.msra.mxu0 %v12582_v53  ;;  %v6922_v53 = vadd.f32 %v15021_v16, %v1419_v37  ;;  %v8221_v22 = vmul.f32 0.2, %v6881_v52  ;;  %vm8157_vm5 = vcmp.gt.f32.partialorder %v6881_v52, 0.0  ;;  %v15170_v16 = vld [vmem:[#allocation12] sm:$0xff]   ;;  %v15183_v37 = vld [vmem:[#allocation12 + $0x8] sm:$0xff]  }
 0x605   :  { %8140 = vmatpush1.bf16.msra.mxu1 %v12584_v25  ;;  %8100 = vmatprep.subr.bf16.mxu0 %v12647_v1  ;;  %v12777_v25 = vcombine.high %v1355_v57, %v1387_v29 }
 0x606   :  { %8141 = vmatprep.subr.bf16.mxu1 %v12649_v32  ;;  %v8223_v1 = vmul.f32 0.2, %v6922_v53  ;;  %v12776_v32 = vcombine.low %v1355_v57, %v1387_v29  ;;  %vm8159_vm6 = vcmp.gt.f32.partialorder %v6922_v53, 0.0  ;;  %v8285_v4 = vsel %vm8157_vm5, %v6881_v52, %v8221_v22  ;;  %v15204_v57 = vld [vmem:[#allocation12 + $0xd8] sm:$0xff]   ;;  %v15225_v22 = vld [vmem:[#allocation12 + $0x20] sm:$0xff]  }
 0x607   :  { %v8349_v62 = vpack.c.bf16 %v8285_v4, %v8285_v4  ;;  %v15207_v29 = vld [vmem:[#allocation12 + $0x18] sm:$0xff]   ;;  %v1407_v4 = vrot.slane %v15155_v33, %v14986_v44 }
 0x608   :  { %8101 = vmatpush1.bf16.msra.mxu0 %v12646_v14  ;;  %v8287_v54 = vsel %vm8159_vm6, %v6922_v53, %v8223_v1  ;;  %v15211_v52 = vld [vmem:[#allocation12 + $0x98] sm:$0xff]   ;;  %v15213_v53 = vld [vmem:[#allocation12 + $0x60] sm:$0xff]  }
 0x609   :  { %8142 = vmatpush1.bf16.msra.mxu1 %v12648_v5  ;;  %8102 = vmatprep.subr.bf16.mxu0 %v12711_v9  ;;  %v8351_v14 = vpack.c.bf16 %v8287_v54, %v8287_v54  ;;  %v15186_v5 = vld [vmem:[#allocation12 + $0x88] sm:$0xff]   ;;  %v15188_v9 = vld [vmem:[#allocation12 + $0x50] sm:$0xff]   ;;  %v15232_v1 = vld [vmem:[#allocation12 + $0xa0] sm:$0xff]   ;;  %v6879_v56 = vadd.f32 %v15015_v10, %v1407_v4 }
 0x60a   :  { %8143 = vmatprep.subr.bf16.mxu1 %v12713_v3  ;;  %v15191_v3 = vld [vmem:[#allocation12 + $0xd0] sm:$0xff]   ;;  %v15239_v54 = vld [vmem:[#allocation12 + $0xe8] sm:$0xff]  }
 0x60b   :  { %v15271_v10 = vld [vmem:[#allocation12 + $0x30] sm:$0xff]   ;;  %vm8156_vm7 = vcmp.gt.f32.partialorder %v6879_v56, 0.0 }
 0x60c   :  { %8103 = vmatpush1.bf16.msra.mxu0 %v12710_v38  ;;  %v15173_v38 = vld [vmem:[#allocation12 + $0x80] sm:$0xff]   ;;  %17618 = vst [vmem:[#allocation62_spill] sm:$0xff] %v15271_v10 }
 0x60d   :  { %8144 = vmatpush1.bf16.msra.mxu1 %v12712_v0  ;;  %8104 = vmatprep.subr.bf16.mxu0 %v12775_v58  ;;  %v15216_v0 = vld [vmem:[#allocation12 + $0xe0] sm:$0xff]   ;;  %v15219_v58 = vsub.s32 2, %v14983_v43 }
 0x60e   :  { %8145 = vmatprep.subr.bf16.mxu1 %v12777_v25  ;;  %v15222_v25 = vsub.s32 5, %v14983_v43 }
 0x60f   :  { %17611 = vst [vmem:[#allocation55_spill] sm:$0xff] %v15219_v58 }
 0x610   :  { %8105 = vmatpush1.bf16.msra.mxu0 %v12774_v17  ;;  %17612 = vst [vmem:[#allocation56_spill] sm:$0xff] %v15222_v25  ;;  %v15228_v17 = vsub.s32 7, %v14983_v43 }
 0x611   :  { %8146 = vmatpush1.bf16.msra.mxu1 %v12776_v32  ;;  %12910 = vmatprep.subr.bf16.mxu0 %v15166_v45  ;;  %v15234_v32 = vld [vmem:[#allocation12 + $0x68] sm:$0xff]  }
 0x612   :  { %12932 = vmatprep.subr.bf16.mxu1 %v15168_v15  ;;  %17613 = vst [vmem:[#allocation57_spill] sm:$0xff] %v15228_v17  ;;  %v1435_v55 = vrot.slane %v15155_v33, %v15228_v17 }
 0x613   :  { %8107 = vmatmul.mubr.bf16.vlgmr.msra.gmra.mrb[64].mxu0 %v14995_v61 }
 0x614   :  { %8148 = vmatmul.mubr.bf16.vlgmr.msra.gmra.mrb[64].mxu1 %v14995_v61  ;;  %12911 = vmatpush3.bf16.msra.mxu0 %v15170_v16  ;;  %v15195_v61 = vld [vmem:[#allocation12 + $0x10] sm:$0xff]   ;;  %v7004_v4 = vadd.f32 %v15033_v27, %v1435_v55  ;;  %v15288_v55 = vld [vmem:[#allocation12 + $0xb8] sm:$0xff]  }
 0x615   :  { %9475 = vmatprep.mubr.bf16.mxu0 %v8349_v62  ;;  %12933 = vmatpush3.bf16.msra.mxu1 %v15173_v38  ;;  %v1415_v62 = vrot.slane %v15155_v33, %v15219_v58 }
 0x616   :  { %9515 = vmatprep.mubr.bf16.mxu1 %v8351_v14  ;;  %12912 = vmatprep.subr.bf16.mxu0 %v15176_v34  ;;  %v1427_v14 = vrot.slane %v15155_v33, %v15222_v25  ;;  %vm8163_vm10 = vcmp.gt.f32.partialorder %v7004_v4, 0.0 }
 0x617   :  { %12934 = vmatprep.subr.bf16.mxu1 %v15179_v49  ;;  %v6920_v42 = vadd.f32 %v15017_v11, %v1415_v62  ;;  %v15276_v11 = vld [vmem:[#allocation12 + $0xb0] sm:$0xff]   ;;  %v15278_v62 = vld [vmem:[#allocation12 + $0x78] sm:$0xff]  }
 0x618   :  { %12913 = vmatpush3.bf16.msra.mxu0 %v15183_v37  ;;  %v6963_v41 = vadd.f32 %v15031_v24, %v1427_v14  ;;  %17619 = vst [vmem:[#allocation63_spill] sm:$0xff] %v15276_v11  ;;  %17620 = vst [vmem:[#allocation64_spill] sm:$0xff] %v15278_v62  ;;  %v8220_v24 = vmul.f32 0.2, %v6879_v56 }
 0x619   :  { %12935 = vmatpush3.bf16.msra.mxu1 %v15186_v5  ;;  %12914 = vmatprep.subr.bf16.mxu0 %v15188_v9  ;;  %v8222_v14 = vmul.f32 0.2, %v6920_v42  ;;  %vm8158_vm8 = vcmp.gt.f32.partialorder %v6920_v42, 0.0 }
 0x61a   :  { %12936 = vmatprep.subr.bf16.mxu1 %v15191_v3  ;;  %v8225_v27 = vmul.f32 0.2, %v6963_v41  ;;  %vm8161_vm9 = vcmp.gt.f32.partialorder %v6963_v41, 0.0 }
 0x61b   :  { %v8286_v8 = vsel %vm8158_vm8, %v6920_v42, %v8222_v14  ;;  %v15305_v14 = vld [vmem:[#allocation12 + $0x1c8] sm:$0xff]  }
 0x61c   :  { %12915 = vmatpush3.bf16.msra.mxu0 %v15195_v61  ;;  %v8289_v21 = vsel %vm8161_vm9, %v6963_v41, %v8225_v27  ;;  %17624 = vst [vmem:[#allocation68_spill] sm:$0xff] %v15305_v14  ;;  %v15311_v27 = vld [vmem:[#allocation12 + $0x188] sm:$0xff]  }
 0x61d   :  { %12937 = vmatpush3.bf16.msra.mxu1 %v15199_v28  ;;  %12916 = vmatprep.subr.bf16.mxu0 %v15201_v30  ;;  %v8353_v42 = vpack.c.bf16 %v8289_v21, %v8289_v21  ;;  %17626 = vst [vmem:[#allocation70_spill] sm:$0xff] %v15311_v27  ;;  %v15320_v21 = vld [vmem:[#allocation12 + $0x110] sm:$0xff]  }
 0x61e   :  { %12938 = vmatprep.subr.bf16.mxu1 %v15204_v57  ;;  %17629 = vst [vmem:[#allocation73_spill] sm:$0xff] %v15320_v21 }
 0x620   :  { %12917 = vmatpush3.bf16.msra.mxu0 %v15207_v29 }
 0x621   :  { %12939 = vmatpush3.bf16.msra.mxu1 %v15211_v52  ;;  %12918 = vmatprep.subr.bf16.mxu0 %v15213_v53 }
 0x622   :  { %12940 = vmatprep.subr.bf16.mxu1 %v15216_v0 }
 0x624   :  { %12919 = vmatpush3.bf16.msra.mxu0 %v15225_v22 }
 0x625   :  { %12941 = vmatpush3.bf16.msra.mxu1 %v15232_v1  ;;  %12920 = vmatprep.subr.bf16.mxu0 %v15234_v32 }
 0x626   :  { %v15257_v35 = vpop.f32.mrb[52].mxu0  ;;  %12942 = vmatprep.subr.bf16.mxu1 %v15239_v54 }
 0x627   :  { %17614 = vst [vmem:[#allocation58_spill] sm:$0xff] %v15257_v35  ;;  %v15263_v36 = vpop.f32.mrb[52].mxu1  ;;  %v15265_v47 = vpop.f32.mrb[53].mxu0 }
 0x628   :  { %17615 = vst [vmem:[#allocation59_spill] sm:$0xff] %v15263_v36  ;;  %17616 = vst [vmem:[#allocation60_spill] sm:$0xff] %v15265_v47  ;;  %v15268_v51 = vpop.f32.mrb[53].mxu1  ;;  %v7866_v48 = vpop.f32.mrb[54].mxu0  ;;  %12921 = vmatpush3.bf16.msra.mxu0 %v15246_v63  ;;  %v8284_v47 = vsel %vm8156_vm7, %v6879_v56, %v8220_v24  ;;  %v8350_v56 = vpack.c.bf16 %v8286_v8, %v8286_v8  ;;  %v15303_v24 = vld [vmem:[#allocation12 + $0x148] sm:$0xff]   ;;  %v15313_v8 = vld [vmem:[#allocation12 + $0x150] sm:$0xff]  }
 0x629   :  { %17617 = vst [vmem:[#allocation61_spill] sm:$0xff] %v15268_v51  ;;  %v7907_v35 = vpop.f32.mrb[54].mxu1  ;;  %12943 = vmatpush3.bf16.msra.mxu1 %v15252_v50  ;;  %v7867_v18 = vpop.f32.mrb[55].mxu0  ;;  %12922 = vmatprep.subr.bf16.mxu0 %v15254_v59  ;;  %v15281_v48 = vld [vmem:[#allocation12 + $0xf8] sm:$0xff]   ;;  %v15290_v51 = vld [vmem:[#allocation12 + $0x140] sm:$0xff]   ;;  %17623 = vst [vmem:[#allocation67_spill] sm:$0xff] %v15303_v24 }
 0x62a   :  { %12944 = vmatprep.subr.bf16.mxu1 %v15260_v31  ;;  %v7908_v36 = vpop.f32.mrb[55].mxu1  ;;  %v15284_v35 = vld [vmem:[#allocation12 + $0x38] sm:$0xff]   ;;  %v8227_v18 = vmul.f32 0.2, %v7004_v4  ;;  %17627 = vst [vmem:[#allocation71_spill] sm:$0xff] %v15313_v8 }
 0x62b   :  { %v15293_v36 = vld [vmem:[#allocation12 + $0x1c0] sm:$0xff]  }
 0x62c   :  { %12923 = vmatpush3.bf16.msra.mxu0 %v15271_v10  ;;  %v8348_v10 = vpack.c.bf16 %v8284_v47, %v8284_v47  ;;  %v15308_v47 = vld [vmem:[#allocation12 + $0x108] sm:$0xff]  }
 0x62d   :  { %12945 = vmatpush3.bf16.msra.mxu1 %v15276_v11  ;;  %12924 = vmatprep.subr.bf16.mxu0 %v15278_v62  ;;  %v15300_v62 = vld [vmem:[#allocation12 + $0x180] sm:$0xff]   ;;  %v8291_v11 = vsel %vm8163_vm10, %v7004_v4, %v8227_v18  ;;  %17625 = vst [vmem:[#allocation69_spill] sm:$0xff] %v15308_v47  ;;  %v15324_v4 = vld [vmem:[#allocation12 + $0x190] sm:$0xff]   ;;  %v15329_v18 = vld [vmem:[#allocation12 + $0x1d8] sm:$0xff]  }
 0x62e   :  { %12946 = vmatprep.subr.bf16.mxu1 %v15281_v48  ;;  %17622 = vst [vmem:[#allocation66_spill] sm:$0xff] %v15300_v62  ;;  %v8355_v41 = vpack.c.bf16 %v8291_v11, %v8291_v11  ;;  %17630 = vst [vmem:[#allocation74_spill] sm:$0xff] %v15324_v4  ;;  %v15326_v11 = vld [vmem:[#allocation12 + $0x158] sm:$0xff]  }
 0x62f   :  { %17631 = vst [vmem:[#allocation75_spill] sm:$0xff] %v15326_v11  ;;  %17632 = vst [vmem:[#allocation76_spill] sm:$0xff] %v15329_v18 }
 0x630   :  { %12925 = vmatpush3.bf16.msra.mxu0 %v15284_v35 }
 0x631   :  { %12947 = vmatpush3.bf16.msra.mxu1 %v15288_v55  ;;  %12954 = vmatprep.subr.bf16.mxu0 %v15290_v51 }
 0x632   :  { %12976 = vmatprep.subr.bf16.mxu1 %v15293_v36 }
 0x633   :  { %9476 = vmatmul.mubr.bf16.vlgmr.msra.gmra.mrb[68].mxu0 %v8348_v10  ;;  %v15316_v10 = vld [vmem:[#allocation12 + $0x1d0] sm:$0xff]  }
 0x634   :  { %9516 = vmatmul.mubr.bf16.vlgmr.msra.gmra.mrb[68].mxu1 %v8350_v56  ;;  %12955 = vmatpush3.bf16.msra.mxu0 %v15296_v26  ;;  %17628 = vst [vmem:[#allocation72_spill] sm:$0xff] %v15316_v10  ;;  %v15332_v56 = vld [vmem:[#allocation12 + $0x118] sm:$0xff]  }
 0x635   :  { %9555 = vmatprep.mubr.bf16.mxu0 %v8353_v42  ;;  %12977 = vmatpush3.bf16.msra.mxu1 %v15300_v62  ;;  %17633 = vst [vmem:[#allocation77_spill] sm:$0xff] %v15332_v56  ;;  %v15336_v42 = vld [vmem:[#allocation12 + $0x198] sm:$0xff]  }
 0x636   :  { %9595 = vmatprep.mubr.bf16.mxu1 %v8355_v41  ;;  %12956 = vmatprep.subr.bf16.mxu0 %v15303_v24  ;;  %17634 = vst [vmem:[#allocation78_spill] sm:$0xff] %v15336_v42  ;;  %v15338_v41 = vld [vmem:[#allocation12 + $0x160] sm:$0xff]   ;;  %v15378_v24 = vld [vmem:[#allocation12 + $0x170] sm:$0xff]  }
 0x637   :  { %12978 = vmatprep.subr.bf16.mxu1 %v15305_v14  ;;  %17635 = vst [vmem:[#allocation79_spill] sm:$0xff] %v15338_v41  ;;  %17645 = vst [vmem:[#allocation89_spill] sm:$0xff] %v15378_v24 }
 0x638   :  { %12957 = vmatpush3.bf16.msra.mxu0 %v15308_v47  ;;  %v15358_v47 = vld [vmem:[#allocation12 + $0x168] sm:$0xff]  }
 0x639   :  { %12979 = vmatpush3.bf16.msra.mxu1 %v15311_v27  ;;  %12958 = vmatprep.subr.bf16.mxu0 %v15313_v8  ;;  %v15341_v8 = vsub.s32 4, %v14983_v43  ;;  %v15347_v27 = vsub.s32 6, %v14983_v43  ;;  %17641 = vst [vmem:[#allocation85_spill] sm:$0xff] %v15358_v47  ;;  %v15363_v43 = vld [vmem:[#allocation12 + $0x1e8] sm:$0xff]  }
 0x63a   :  { %12980 = vmatprep.subr.bf16.mxu1 %v15316_v10  ;;  %v15344_v10 = vld [vmem:[#allocation12 + $0x1e0] sm:$0xff]   ;;  %17642 = vst [vmem:[#allocation86_spill] sm:$0xff] %v15363_v43 }
 0x63b   :  { %17636 = vst [vmem:[#allocation80_spill] sm:$0xff] %v15341_v8  ;;  %17637 = vst [vmem:[#allocation81_spill] sm:$0xff] %v15344_v10 }
 0x63c   :  { %12959 = vmatpush3.bf16.msra.mxu0 %v15320_v21  ;;  %17638 = vst [vmem:[#allocation82_spill] sm:$0xff] %v15347_v27  ;;  %v15350_v21 = vld [vmem:[#allocation12 + $0x120] sm:$0xff]  }
 0x63d   :  { %12981 = vmatpush3.bf16.msra.mxu1 %v15324_v4  ;;  %12960 = vmatprep.subr.bf16.mxu0 %v15326_v11  ;;  %17639 = vst [vmem:[#allocation83_spill] sm:$0xff] %v15350_v21  ;;  %v15352_v4 = vld [vmem:[#allocation10 + $0x8] sm:$0xff]  ;;  %v15356_v11 = vld [vmem:[#allocation12 + $0x1a0] sm:$0xff]  }
 0x63e   :  { %12982 = vmatprep.subr.bf16.mxu1 %v15329_v18  ;;  %17640 = vst [vmem:[#allocation84_spill] sm:$0xff] %v15356_v11  ;;  %v1423_v18 = vrot.slane %v15155_v33, %v15341_v8  ;;  %v1443_v14 = vrot.slane %v15352_v4, %v14989_v46  ;;  %v15382_v46 = vld [vmem:[#allocation12 + $0x1f0] sm:$0xff]  }
 0x63f   :  { %17646 = vst [vmem:[#allocation90_spill] sm:$0xff] %v15382_v46 }
 0x640   :  { %12961 = vmatpush3.bf16.msra.mxu0 %v15332_v56  ;;  %v1431_v56 = vrot.slane %v15155_v33, %v15347_v27  ;;  %v6961_v33 = vadd.f32 %v15027_v39, %v1423_v18  ;;  %v7045_v62 = vadd.f32 %v15043_v20, %v1443_v14  ;;  %v15394_v39 = vld [vmem:[#allocation12 + $0x178] sm:$0xff]  }
 0x641   :  { %12983 = vmatpush3.bf16.msra.mxu1 %v15336_v42  ;;  %12962 = vmatprep.subr.bf16.mxu0 %v15338_v41  ;;  %v15370_v41 = vld [vmem:[#allocation12 + $0x128] sm:$0xff]   ;;  %v1451_v42 = vrot.slane %v15352_v4, %v15158_v60  ;;  %v15387_v60 = vld [vmem:[#allocation12 + $0x130] sm:$0xff]   ;;  %17649 = vst [vmem:[#allocation93_spill] sm:$0xff] %v15394_v39 }
 0x642   :  { %12984 = vmatprep.subr.bf16.mxu1 %v15344_v10  ;;  %17643 = vst [vmem:[#allocation87_spill] sm:$0xff] %v15370_v41  ;;  %v15376_v10 = vld [vmem:[#allocation12 + $0x1a8] sm:$0xff]   ;;  %17647 = vst [vmem:[#allocation91_spill] sm:$0xff] %v15387_v60  ;;  %v8224_v18 = vmul.f32 0.2, %v6961_v33  ;;  %vm8160_vm11 = vcmp.gt.f32.partialorder %v6961_v33, 0.0 }
 0x643   :  { %17644 = vst [vmem:[#allocation88_spill] sm:$0xff] %v15376_v10  ;;  %v8229_v14 = vmul.f32 0.2, %v7045_v62  ;;  %vm8165_vm13 = vcmp.gt.f32.partialorder %v7045_v62, 0.0 }
 0x644   :  { %12963 = vmatpush3.bf16.msra.mxu0 %v15350_v21  ;;  %v7002_v21 = vadd.f32 %v15029_v40, %v1431_v56  ;;  %v15397_v40 = vld [vmem:[#allocation12 + $0x1f8] sm:$0xff]  }
 0x645   :  { %12985 = vmatpush3.bf16.msra.mxu1 %v15356_v11  ;;  %12964 = vmatprep.subr.bf16.mxu0 %v15358_v47  ;;  %v7086_v47 = vadd.f32 %v15045_v23, %v1451_v42  ;;  %v15392_v11 = vld [vmem:[#allocation12 + $0x1b0] sm:$0xff]   ;;  %v15400_v23 = vld [vmem:[#allocation12 + $0x138] sm:$0xff]  }
 0x646   :  { %12986 = vmatprep.subr.bf16.mxu1 %v15363_v43  ;;  %17648 = vst [vmem:[#allocation92_spill] sm:$0xff] %v15392_v11  ;;  %v8226_v20 = vmul.f32 0.2, %v7002_v21  ;;  %vm8162_vm12 = vcmp.gt.f32.partialorder %v7002_v21, 0.0  ;;  %v15404_v42 = vld [vmem:[#allocation12 + $0x1b8] sm:$0xff]   ;;  %v8293_v43 = vsel %vm8165_vm13, %v7045_v62, %v8229_v14  ;;  %v15428_v62 = vld [vmem:[#allocation12 + $0x208] sm:$0xff]  }
 0x647   :  { %v8231_v56 = vmul.f32 0.2, %v7086_v47  ;;  %vm8167_vm14 = vcmp.gt.f32.partialorder %v7086_v47, 0.0  ;;  %17654 = vst [vmem:[#allocation98_spill] sm:$0xff] %v15428_v62  ;;  %v15448_v14 = vld [vmem:[#allocation12 + $0x258] sm:$0xff]  }
 0x648   :  { %12965 = vmatpush3.bf16.msra.mxu0 %v15370_v41  ;;  %v8290_v41 = vsel %vm8162_vm12, %v7002_v21, %v8226_v20  ;;  %v15421_v21 = vpack.c.bf16 %v8293_v43, %v8293_v43  ;;  %v15423_v20 = vld [vmem:[#allocation12 + $0x2c8] sm:$0xff]   ;;  %v15446_v43 = vld [vmem:[#allocation12 + $0x290] sm:$0xff]   ;;  %17660 = vst [vmem:[#allocation104_spill] sm:$0xff] %v15448_v14 }
 0x649   :  { %12987 = vmatpush3.bf16.msra.mxu1 %v15376_v10  ;;  %12966 = vmatprep.subr.bf16.mxu0 %v15378_v24  ;;  %v15406_v24 = vld [vmem:[#allocation12 + $0x240] sm:$0xff]   ;;  %17653 = vst [vmem:[#allocation97_spill] sm:$0xff] %v15423_v20  ;;  %17659 = vst [vmem:[#allocation103_spill] sm:$0xff] %v15446_v43 }
 0x64a   :  { %12988 = vmatprep.subr.bf16.mxu1 %v15382_v46  ;;  %v8288_v46 = vsel %vm8160_vm11, %v6961_v33, %v8224_v18  ;;  %v15409_v10 = vld [vmem:[#allocation12 + $0x2c0] sm:$0xff]   ;;  %v8354_v33 = vpack.c.bf16 %v8290_v41, %v8290_v41  ;;  %v15419_v18 = vld [vmem:[#allocation12 + $0x248] sm:$0xff]   ;;  %v15434_v41 = vld [vmem:[#allocation12 + $0x250] sm:$0xff]  }
 0x64b   :  { %v8352_v26 = vpack.c.bf16 %v8288_v46, %v8288_v46  ;;  %17652 = vst [vmem:[#allocation96_spill] sm:$0xff] %v15419_v18  ;;  %17656 = vst [vmem:[#allocation100_spill] sm:$0xff] %v15434_v41 }
 0x64c   :  { %12967 = vmatpush3.bf16.msra.mxu0 %v15387_v60  ;;  %v15412_v60 = vld [vmem:[#allocation12 + $0x200] sm:$0xff]  }
 0x64d   :  { %12989 = vmatpush3.bf16.msra.mxu1 %v15392_v11  ;;  %12968 = vmatprep.subr.bf16.mxu0 %v15394_v39  ;;  %17650 = vst [vmem:[#allocation94_spill] sm:$0xff] %v15412_v60  ;;  %v15416_v39 = vld [vmem:[#allocation12 + $0x280] sm:$0xff]   ;;  %v8295_v11 = vsel %vm8167_vm14, %v7086_v47, %v8231_v56  ;;  %v15432_v47 = vld [vmem:[#allocation12 + $0x288] sm:$0xff]   ;;  %v15451_v56 = vld [vmem:[#allocation12 + $0x2d8] sm:$0xff]  }
 0x64e   :  { %12990 = vmatprep.subr.bf16.mxu1 %v15397_v40  ;;  %17651 = vst [vmem:[#allocation95_spill] sm:$0xff] %v15416_v39  ;;  %v15426_v46 = vpack.c.bf16 %v8295_v11, %v8295_v11  ;;  %17655 = vst [vmem:[#allocation99_spill] sm:$0xff] %v15432_v47  ;;  %v15442_v11 = vld [vmem:[#allocation12 + $0x210] sm:$0xff]  }
 0x64f   :  { %17658 = vst [vmem:[#allocation102_spill] sm:$0xff] %v15442_v11  ;;  %17661 = vst [vmem:[#allocation105_spill] sm:$0xff] %v15451_v56 }
 0x650   :  { %12969 = vmatpush3.bf16.msra.mxu0 %v15400_v23 }
 0x651   :  { %12991 = vmatpush3.bf16.msra.mxu1 %v15404_v42  ;;  %12998 = vmatprep.subr.bf16.mxu0 %v15406_v24 }
 0x652   :  { %13020 = vmatprep.subr.bf16.mxu1 %v15409_v10 }
 0x653   :  { %9556 = vmatmul.mubr.bf16.vlgmr.msra.gmra.mrb[72].mxu0 %v8352_v26  ;;  %v15438_v26 = vld [vmem:[#allocation12 + $0x2d0] sm:$0xff]  }
 0x654   :  { %9596 = vmatmul.mubr.bf16.vlgmr.msra.gmra.mrb[72].mxu1 %v8354_v33  ;;  %12999 = vmatpush3.bf16.msra.mxu0 %v15412_v60  ;;  %17657 = vst [vmem:[#allocation101_spill] sm:$0xff] %v15438_v26  ;;  %v15454_v33 = vld [vmem:[#allocation12 + $0x218] sm:$0xff]  }
 0x655   :  { %9635 = vmatprep.mubr.bf16.mxu0 %v15421_v21  ;;  %13021 = vmatpush3.bf16.msra.mxu1 %v15416_v39  ;;  %17662 = vst [vmem:[#allocation106_spill] sm:$0xff] %v15454_v33 }
 0x656   :  { %9675 = vmatprep.mubr.bf16.mxu1 %v15426_v46  ;;  %13000 = vmatprep.subr.bf16.mxu0 %v15419_v18 }
 0x657   :  { %13022 = vmatprep.subr.bf16.mxu1 %v15423_v20  ;;  %v1459_v20 = vrot.slane %v15352_v4, %v15222_v25 }
 0x658   :  { %13001 = vmatpush3.bf16.msra.mxu0 %v15428_v62  ;;  %v15458_v62 = vld [vmem:[#allocation12 + $0x298] sm:$0xff]  }
 0x659   :  { %13023 = vmatpush3.bf16.msra.mxu1 %v15432_v47  ;;  %13002 = vmatprep.subr.bf16.mxu0 %v15434_v41  ;;  %17663 = vst [vmem:[#allocation107_spill] sm:$0xff] %v15458_v62  ;;  %v15460_v47 = vld [vmem:[#allocation12 + $0x260] sm:$0xff]  }
 0x65a   :  { %13024 = vmatprep.subr.bf16.mxu1 %v15438_v26  ;;  %17664 = vst [vmem:[#allocation108_spill] sm:$0xff] %v15460_v47  ;;  %v15463_v41 = vld [vmem:[#allocation12 + $0x2e0] sm:$0xff]  }
 0x65b   :  { %17665 = vst [vmem:[#allocation109_spill] sm:$0xff] %v15463_v41  ;;  %v15466_v26 = vld [vmem:[#allocation12 + $0x220] sm:$0xff]  }
 0x65c   :  { %13003 = vmatpush3.bf16.msra.mxu0 %v15442_v11  ;;  %17666 = vst [vmem:[#allocation110_spill] sm:$0xff] %v15466_v26  ;;  %v15470_v11 = vld [vmem:[#allocation12 + $0x2a0] sm:$0xff]  }
 0x65d   :  { %13025 = vmatpush3.bf16.msra.mxu1 %v15446_v43  ;;  %13004 = vmatprep.subr.bf16.mxu0 %v15448_v14  ;;  %17667 = vst [vmem:[#allocation111_spill] sm:$0xff] %v15470_v11  ;;  %v15472_v43 = vld [vmem:[#allocation12 + $0x268] sm:$0xff]   ;;  %v1439_v14 = vrot.slane %v15352_v4, %v14986_v44  ;;  %v15492_v44 = vld [vmem:[#allocation12 + $0x270] sm:$0xff]  }
 0x65e   :  { %13026 = vmatprep.subr.bf16.mxu1 %v15451_v56  ;;  %17668 = vst [vmem:[#allocation112_spill] sm:$0xff] %v15472_v43  ;;  %v15477_v56 = vld [vmem:[#allocation12 + $0x2e8] sm:$0xff]   ;;  %17671 = vst [vmem:[#allocation115_spill] sm:$0xff] %v15492_v44 }
 0x65f   :  { %17669 = vst [vmem:[#allocation113_spill] sm:$0xff] %v15477_v56 }
 0x660   :  { %13005 = vmatpush3.bf16.msra.mxu0 %v15454_v33  ;;  %v1447_v33 = vrot.slane %v15352_v4, %v15219_v58  ;;  %v7043_v58 = vadd.f32 %v15039_v13, %v1439_v14  ;;  %v15509_v13 = vld [vmem:[#allocation12 + $0x230] sm:$0xff]  }
 0x661   :  { %13027 = vmatpush3.bf16.msra.mxu1 %v15458_v62  ;;  %13006 = vmatprep.subr.bf16.mxu0 %v15460_v47  ;;  %v15484_v47 = vld [vmem:[#allocation12 + $0x228] sm:$0xff]   ;;  %v1467_v62 = vrot.slane %v15352_v4, %v15228_v17  ;;  %17677 = vst [vmem:[#allocation121_spill] sm:$0xff] %v15509_v13 }
 0x662   :  { %13028 = vmatprep.subr.bf16.mxu1 %v15463_v41  ;;  %v15490_v41 = vld [vmem:[#allocation12 + $0x2a8] sm:$0xff]   ;;  %v7084_v25 = vadd.f32 %v15041_v19, %v1447_v33  ;;  %v15514_v19 = vld [vmem:[#allocation12 + $0x2b0] sm:$0xff]   ;;  %v15516_v33 = vld [vmem:[#allocation12 + $0x278] sm:$0xff]   ;;  %vm8164_vm15 = vcmp.gt.f32.partialorder %v7043_v58, 0.0 }
 0x663   :  { %17670 = vst [vmem:[#allocation114_spill] sm:$0xff] %v15490_v41  ;;  %v7168_v14 = vadd.f32 %v15057_v12, %v1467_v62  ;;  %17678 = vst [vmem:[#allocation122_spill] sm:$0xff] %v15516_v33 }
 0x664   :  { %13007 = vmatpush3.bf16.msra.mxu0 %v15466_v26  ;;  %v15498_v26 = vld [vmem:[#allocation12 + $0x2f0] sm:$0xff]   ;;  %vm8166_vm0 = vcmp.gt.f32.partialorder %v7084_v25, 0.0 }
 0x665   :  { %13029 = vmatpush3.bf16.msra.mxu1 %v15470_v11  ;;  %13008 = vmatprep.subr.bf16.mxu0 %v15472_v43  ;;  %17673 = vst [vmem:[#allocation117_spill] sm:$0xff] %v15498_v26  ;;  %v7127_v43 = vadd.f32 %v15055_v7, %v1459_v20  ;;  %v8228_v7 = vmul.f32 0.2, %v7043_v58  ;;  %v8230_v20 = vmul.f32 0.2, %v7084_v25  ;;  %vm8171_vm2 = vcmp.gt.f32.partialorder %v7168_v14, 0.0 }
 0x666   :  { %v15495_v18 = vpop.f32.mrb[56].mxu0  ;;  %13030 = vmatprep.subr.bf16.mxu1 %v15477_v56  ;;  %v8235_v62 = vmul.f32 0.2, %v7168_v14 }
 0x667   :  { %17672 = vst [vmem:[#allocation116_spill] sm:$0xff] %v15495_v18  ;;  %v15501_v39 = vpop.f32.mrb[56].mxu1  ;;  %v15503_v17 = vpop.f32.mrb[57].mxu0  ;;  %v8233_v12 = vmul.f32 0.2, %v7127_v43  ;;  %vm8169_vm1 = vcmp.gt.f32.partialorder %v7127_v43, 0.0 }
 0x668   :  { %17674 = vst [vmem:[#allocation118_spill] sm:$0xff] %v15501_v39  ;;  %17675 = vst [vmem:[#allocation119_spill] sm:$0xff] %v15503_v17  ;;  %v15506_v11 = vpop.f32.mrb[57].mxu1  ;;  %v7948_v60 = vpop.f32.mrb[58].mxu0  ;;  %13009 = vmatpush3.bf16.msra.mxu0 %v15484_v47  ;;  %v8292_v17 = vsel %vm8164_vm15, %v7043_v58, %v8228_v7  ;;  %v8299_v58 = vsel %vm8171_vm2, %v7168_v14, %v8235_v62  ;;  %v15562_v14 = vld [vmem:[#allocation12 + $0x350] sm:$0xff]  }
 0x669   :  { %17676 = vst [vmem:[#allocation120_spill] sm:$0xff] %v15506_v11  ;;  %v7989_v18 = vpop.f32.mrb[58].mxu1  ;;  %13031 = vmatpush3.bf16.msra.mxu1 %v15490_v41  ;;  %v7949_v56 = vpop.f32.mrb[59].mxu0  ;;  %13010 = vmatprep.subr.bf16.mxu0 %v15492_v44  ;;  %v15519_v60 = vld [vmem:[#allocation12 + $0x2f8] sm:$0xff]   ;;  %v15528_v11 = vld [vmem:[#allocation12 + $0x340] sm:$0xff]   ;;  %v8297_v44 = vsel %vm8169_vm1, %v7127_v43, %v8233_v12  ;;  %v15536_v41 = vpack.c.bf16 %v8292_v17, %v8292_v17  ;;  %v15550_v43 = vld [vmem:[#allocation12 + $0x3c8] sm:$0xff]  }
 0x66a   :  { %13032 = vmatprep.subr.bf16.mxu1 %v15498_v26  ;;  %17679 = vst [vmem:[#allocation123_spill] sm:$0xff] %v15519_v60  ;;  %v7990_v39 = vpop.f32.mrb[59].mxu1  ;;  %v15522_v18 = vld [vmem:[#allocation12 + $0x238] sm:$0xff]   ;;  %v8294_v26 = vsel %vm8166_vm0, %v7084_v25, %v8230_v20  ;;  %v15548_v25 = vpack.c.bf16 %v8297_v44, %v8297_v44  ;;  %17684 = vst [vmem:[#allocation128_spill] sm:$0xff] %v15550_v43  ;;  %v15554_v17 = vpack.c.bf16 %v8299_v58, %v8299_v58  ;;  %v15556_v20 = vld [vmem:[#allocation12 + $0x308] sm:$0xff]  }
 0x66b   :  { %v15526_v56 = vld [vmem:[#allocation12 + $0x2b8] sm:$0xff]   ;;  %v15531_v39 = vld [vmem:[#allocation12 + $0x3c0] sm:$0xff]   ;;  %v15542_v7 = vpack.c.bf16 %v8294_v26, %v8294_v26  ;;  %17685 = vst [vmem:[#allocation129_spill] sm:$0xff] %v15556_v20  ;;  %v15560_v26 = vld [vmem:[#allocation12 + $0x388] sm:$0xff]  }
 0x66c   :  { %13011 = vmatpush3.bf16.msra.mxu0 %v15509_v13  ;;  %17680 = vst [vmem:[#allocation124_spill] sm:$0xff] %v15531_v39  ;;  %v15534_v13 = vld [vmem:[#allocation12 + $0x300] sm:$0xff]   ;;  %17686 = vst [vmem:[#allocation130_spill] sm:$0xff] %v15560_v26  ;;  %v15566_v44 = vld [vmem:[#allocation12 + $0x3d0] sm:$0xff]  }
 0x66d   :  { %13033 = vmatpush3.bf16.msra.mxu1 %v15514_v19  ;;  %13012 = vmatprep.subr.bf16.mxu0 %v15516_v33  ;;  %17681 = vst [vmem:[#allocation125_spill] sm:$0xff] %v15534_v13  ;;  %v15540_v33 = vld [vmem:[#allocation12 + $0x380] sm:$0xff]   ;;  %17687 = vst [vmem:[#allocation131_spill] sm:$0xff] %v15562_v14  ;;  %v15570_v12 = vld [vmem:[#allocation12 + $0x310] sm:$0xff]  }
 0x66e   :  { %13034 = vmatprep.subr.bf16.mxu1 %v15519_v60  ;;  %17682 = vst [vmem:[#allocation126_spill] sm:$0xff] %v15540_v33  ;;  %v15545_v60 = vld [vmem:[#allocation12 + $0x348] sm:$0xff]   ;;  %17688 = vst [vmem:[#allocation132_spill] sm:$0xff] %v15566_v44  ;;  %v15574_v62 = vld [vmem:[#allocation12 + $0x390] sm:$0xff]  }
 0x66f   :  { %17683 = vst [vmem:[#allocation127_spill] sm:$0xff] %v15545_v60  ;;  %17689 = vst [vmem:[#allocation133_spill] sm:$0xff] %v15570_v12  ;;  %v15576_v58 = vld [vmem:[#allocation12 + $0x358] sm:$0xff]  }
 0x670   :  { %13013 = vmatpush3.bf16.msra.mxu0 %v15522_v18  ;;  %17690 = vst [vmem:[#allocation134_spill] sm:$0xff] %v15574_v62  ;;  %17691 = vst [vmem:[#allocation135_spill] sm:$0xff] %v15576_v58 }
 0x671   :  { %13035 = vmatpush3.bf16.msra.mxu1 %v15526_v56  ;;  %13042 = vmatprep.subr.bf16.mxu0 %v15528_v11 }
 0x672   :  { %13064 = vmatprep.subr.bf16.mxu1 %v15531_v39 }
 0x673   :  { %9636 = vmatmul.mubr.bf16.vlgmr.msra.gmra.mrb[76].mxu0 %v15536_v41 }
 0x674   :  { %9676 = vmatmul.mubr.bf16.vlgmr.msra.gmra.mrb[76].mxu1 %v15542_v7  ;;  %13043 = vmatpush3.bf16.msra.mxu0 %v15534_v13 }
 0x675   :  { %9715 = vmatprep.mubr.bf16.mxu0 %v15548_v25  ;;  %13065 = vmatpush3.bf16.msra.mxu1 %v15540_v33  ;;  %v15579_v33 = vld [vmem:[#allocation12 + $0x3d8] sm:$0xff]  }
 0x676   :  { %9755 = vmatprep.mubr.bf16.mxu1 %v15554_v17  ;;  %13044 = vmatprep.subr.bf16.mxu0 %v15545_v60  ;;  %17692 = vst [vmem:[#allocation136_spill] sm:$0xff] %v15579_v33  ;;  %v15582_v60 = vld [vmem:[#allocation12 + $0x318] sm:$0xff]  }
 0x677   :  { %13066 = vmatprep.subr.bf16.mxu1 %v15550_v43  ;;  %17693 = vst [vmem:[#allocation137_spill] sm:$0xff] %v15582_v60  ;;  %v15610_v43 = vld [vmem:[#allocation12 + $0x328] sm:$0xff]  }
 0x678   :  { %13045 = vmatpush3.bf16.msra.mxu0 %v15556_v20  ;;  %v15586_v20 = vld [vmem:[#allocation12 + $0x398] sm:$0xff]  }
 0x679   :  { %13067 = vmatpush3.bf16.msra.mxu1 %v15560_v26  ;;  %13046 = vmatprep.subr.bf16.mxu0 %v15562_v14  ;;  %17694 = vst [vmem:[#allocation138_spill] sm:$0xff] %v15586_v20  ;;  %v15588_v26 = vld [vmem:[#allocation12 + $0x360] sm:$0xff]  }
 0x67a   :  { %13068 = vmatprep.subr.bf16.mxu1 %v15566_v44  ;;  %17695 = vst [vmem:[#allocation139_spill] sm:$0xff] %v15588_v26  ;;  %v15591_v14 = vld [vmem:[#allocation12 + $0x3e0] sm:$0xff]  }
 0x67b   :  { %17696 = vst [vmem:[#allocation140_spill] sm:$0xff] %v15591_v14  ;;  %v15594_v44 = vld [vmem:[#allocation12 + $0x320] sm:$0xff]  }
 0x67c   :  { %13047 = vmatpush3.bf16.msra.mxu0 %v15570_v12  ;;  %17697 = vst [vmem:[#allocation141_spill] sm:$0xff] %v15594_v44  ;;  %v15598_v12 = vld [vmem:[#allocation12 + $0x3a0] sm:$0xff]  }
 0x67d   :  { %13069 = vmatpush3.bf16.msra.mxu1 %v15574_v62  ;;  %13048 = vmatprep.subr.bf16.mxu0 %v15576_v58  ;;  %17698 = vst [vmem:[#allocation142_spill] sm:$0xff] %v15598_v12  ;;  %v15600_v62 = vld [vmem:[#allocation12 + $0x368] sm:$0xff]   ;;  %v1455_v58 = vrot.slane %v15352_v4, %v15341_v8 }
 0x67e   :  { %13070 = vmatprep.subr.bf16.mxu1 %v15579_v33  ;;  %17699 = vst [vmem:[#allocation143_spill] sm:$0xff] %v15600_v62  ;;  %v15605_v33 = vld [vmem:[#allocation12 + $0x3e8] sm:$0xff]  }
 0x67f   :  { %17700 = vst [vmem:[#allocation144_spill] sm:$0xff] %v15605_v33  ;;  %v7125_v8 = vadd.f32 %v15051_v2, %v1455_v58  ;;  %v15633_v2 = vld [vmem:[#allocation12 + $0x3f8] sm:$0xff]  }
 0x680   :  { %13049 = vmatpush3.bf16.msra.mxu0 %v15582_v60  ;;  %v1463_v60 = vrot.slane %v15352_v4, %v15347_v27 }
 0x681   :  { %13071 = vmatpush3.bf16.msra.mxu1 %v15586_v20  ;;  %13050 = vmatprep.subr.bf16.mxu0 %v15588_v26  ;;  %v15614_v26 = vld [vmem:[#allocation12 + $0x3a8] sm:$0xff]   ;;  %v15616_v20 = vld [vmem:[#allocation12 + $0x370] sm:$0xff]   ;;  %v8232_v27 = vmul.f32 0.2, %v7125_v8  ;;  %vm8168_vm3 = vcmp.gt.f32.partialorder %v7125_v8, 0.0 }
 0x682   :  { %13072 = vmatprep.subr.bf16.mxu1 %v15591_v14  ;;  %17701 = vst [vmem:[#allocation145_spill] sm:$0xff] %v15614_v26  ;;  %17702 = vst [vmem:[#allocation146_spill] sm:$0xff] %v15616_v20  ;;  %v15620_v14 = vld [vmem:[#allocation12 + $0x3f0] sm:$0xff]   ;;  %v7166_v4 = vadd.f32 %v15053_v6, %v1463_v60  ;;  %v15636_v6 = vld [vmem:[#allocation12 + $0x338] sm:$0xff]  }
 0x683   :  { %17703 = vst [vmem:[#allocation147_spill] sm:$0xff] %v15620_v14  ;;  %v15640_v60 = vld [vmem:[#allocation12 + $0x3b8] sm:$0xff]  }
 0x684   :  { %13051 = vmatpush3.bf16.msra.mxu0 %v15594_v44  ;;  %v15624_v44 = vld [vmem:[#allocation12 + $0x330] sm:$0xff]   ;;  %v8234_v58 = vmul.f32 0.2, %v7166_v4  ;;  %vm8170_vm4 = vcmp.gt.f32.partialorder %v7166_v4, 0.0 }
 0x685   :  { %13073 = vmatpush3.bf16.msra.mxu1 %v15598_v12  ;;  %13052 = vmatprep.subr.bf16.mxu0 %v15600_v62  ;;  %17704 = vst [vmem:[#allocation148_spill] sm:$0xff] %v15624_v44  ;;  %v15628_v62 = vld [vmem:[#allocation12 + $0x3b0] sm:$0xff]   ;;  %v15630_v12 = vld [vmem:[#allocation12 + $0x378] sm:$0xff]  }
 0x686   :  { %13074 = vmatprep.subr.bf16.mxu1 %v15605_v33 }
 0x688   :  { %13053 = vmatpush3.bf16.msra.mxu0 %v15610_v43 }
 0x689   :  { %13075 = vmatpush3.bf16.msra.mxu1 %v15614_v26  ;;  %13054 = vmatprep.subr.bf16.mxu0 %v15616_v20  ;;  %v8296_v20 = vsel %vm8168_vm3, %v7125_v8, %v8232_v27  ;;  %v8298_v26 = vsel %vm8170_vm4, %v7166_v4, %v8234_v58  ;;  %v17730_v27 = vld [vmem:[#allocation54_spill] sm:$0xff]  ;;  %v17737_v4 = vld [vmem:[#allocation88_spill] sm:$0xff]  ;;  %v17738_v58 = vld [vmem:[#allocation89_spill] sm:$0xff] }
 0x68a   :  { %13076 = vmatprep.subr.bf16.mxu1 %v15620_v14  ;;  %v15644_v14 = vpack.c.bf16 %v8296_v20, %v8296_v20  ;;  %v17736_v20 = vld [vmem:[#allocation25_spill] sm:$0xff] }
 0x68c   :  { %13055 = vmatpush3.bf16.msra.mxu0 %v15624_v44  ;;  %v15648_v44 = vpack.c.bf16 %v8298_v26, %v8298_v26 }
 0x68d   :  { %13077 = vmatpush3.bf16.msra.mxu1 %v15628_v62  ;;  %13056 = vmatprep.subr.bf16.mxu0 %v15630_v12 }
 0x68e   :  { %13078 = vmatprep.subr.bf16.mxu1 %v15633_v2 }
 0x690   :  { %13057 = vmatpush3.bf16.msra.mxu0 %v15636_v6 }
 0x691   :  { %13079 = vmatpush3.bf16.msra.mxu1 %v15640_v60  ;;  %13086 = vmatprep.subr.bf16.mxu0 %v15166_v45 }
 0x692   :  { %13108 = vmatprep.subr.bf16.mxu1 %v15168_v15 }
 0x693   :  { %9716 = vmatmul.mubr.bf16.vlgmr.msra.gmra.mrb[80].mxu0 %v15644_v14 }
 0x694   :  { %9756 = vmatmul.mubr.bf16.vlgmr.msra.gmra.mrb[80].mxu1 %v15648_v44  ;;  %13087 = vmatpush3.bf16.msra.mxu0 %v15170_v16 }
 0x695   :  { %9801 = vmatprep.mubr.bf16.mxu0 %v15421_v21  ;;  %13109 = vmatpush3.bf16.msra.mxu1 %v15173_v38  ;;  %v17731_v21 = vld [vmem:[#allocation84_spill] sm:$0xff] }
 0x696   :  { %9841 = vmatprep.mubr.bf16.mxu1 %v15426_v46  ;;  %13088 = vmatprep.subr.bf16.mxu0 %v15176_v34  ;;  %v17732_v46 = vld [vmem:[#allocation85_spill] sm:$0xff] }
 0x697   :  { %13110 = vmatprep.subr.bf16.mxu1 %v15179_v49 }
 0x698   :  { %13089 = vmatpush3.bf16.msra.mxu0 %v15183_v37 }
 0x699   :  { %13111 = vmatpush3.bf16.msra.mxu1 %v15186_v5  ;;  %13090 = vmatprep.subr.bf16.mxu0 %v15188_v9  ;;  %v17709_v9 = vld [vmem:[#allocation62_spill] sm:$0xff] }
 0x69a   :  { %13112 = vmatprep.subr.bf16.mxu1 %v15191_v3  ;;  %v17710_v3 = vld [vmem:[#allocation63_spill] sm:$0xff] }
 0x69c   :  { %13091 = vmatpush3.bf16.msra.mxu0 %v15195_v61  ;;  %v17711_v61 = vld [vmem:[#allocation64_spill] sm:$0xff] }
 0x69d   :  { %13113 = vmatpush3.bf16.msra.mxu1 %v15199_v28  ;;  %13092 = vmatprep.subr.bf16.mxu0 %v15201_v30  ;;  %v17716_v28 = vld [vmem:[#allocation69_spill] sm:$0xff]  ;;  %v17718_v30 = vld [vmem:[#allocation71_spill] sm:$0xff] }
 0x69e   :  { %13114 = vmatprep.subr.bf16.mxu1 %v15204_v57  ;;  %v17719_v57 = vld [vmem:[#allocation72_spill] sm:$0xff] }
 0x6a0   :  { %13093 = vmatpush3.bf16.msra.mxu0 %v15207_v29  ;;  %v17720_v29 = vld [vmem:[#allocation73_spill] sm:$0xff] }
 0x6a1   :  { %13115 = vmatpush3.bf16.msra.mxu1 %v15211_v52  ;;  %13094 = vmatprep.subr.bf16.mxu0 %v15213_v53  ;;  %v17721_v52 = vld [vmem:[#allocation74_spill] sm:$0xff]  ;;  %v17722_v53 = vld [vmem:[#allocation75_spill] sm:$0xff] }
 0x6a2   :  { %13116 = vmatprep.subr.bf16.mxu1 %v15216_v0  ;;  %v17723_v0 = vld [vmem:[#allocation76_spill] sm:$0xff] }
 0x6a4   :  { %13095 = vmatpush3.bf16.msra.mxu0 %v15225_v22  ;;  %v17724_v22 = vld [vmem:[#allocation77_spill] sm:$0xff] }
 0x6a5   :  { %13117 = vmatpush3.bf16.msra.mxu1 %v15232_v1  ;;  %13096 = vmatprep.subr.bf16.mxu0 %v15234_v32  ;;  %v15712_v1 = vld [vmem:[#allocation10 + $0x10] sm:$0xff] }
 0x6a6   :  { %v15674_v45 = vpop.f32.mrb[60].mxu0  ;;  %13118 = vmatprep.subr.bf16.mxu1 %v15239_v54  ;;  %v17725_v32 = vld [vmem:[#allocation78_spill] sm:$0xff]  ;;  %v17726_v54 = vld [vmem:[#allocation79_spill] sm:$0xff]  ;;  %v1483_v8 = vrot.slane %v15712_v1, %v17730_v27 }
 0x6a7   :  { %17705 = vst [vmem:[#allocation149_spill] sm:$0xff] %v15674_v45  ;;  %v15677_v15 = vpop.f32.mrb[60].mxu1  ;;  %v15679_v16 = vpop.f32.mrb[61].mxu0  ;;  %v17793_v45 = vld [vmem:[#allocation138_spill] sm:$0xff] }
 0x6a8   :  { %17706 = vst [vmem:[#allocation150_spill] sm:$0xff] %v15677_v15  ;;  %17707 = vst [vmem:[#allocation151_spill] sm:$0xff] %v15679_v16  ;;  %v15681_v38 = vpop.f32.mrb[61].mxu1  ;;  %v8030_v34 = vpop.f32.mrb[62].mxu0  ;;  %13097 = vmatpush3.bf16.msra.mxu0 %v15246_v63  ;;  %v17715_v63 = vld [vmem:[#allocation68_spill] sm:$0xff]  ;;  %v7250_v26 = vadd.f32 %v17736_v20, %v1483_v8  ;;  %v17762_v8 = vld [vmem:[#allocation110_spill] sm:$0xff] }
 0x6a9   :  { %17708 = vst [vmem:[#allocation152_spill] sm:$0xff] %v15681_v38  ;;  %v8071_v49 = vpop.f32.mrb[62].mxu1  ;;  %13119 = vmatpush3.bf16.msra.mxu1 %v15252_v50  ;;  %v8031_v37 = vpop.f32.mrb[63].mxu0  ;;  %13098 = vmatprep.subr.bf16.mxu0 %v15254_v59  ;;  %v17713_v50 = vld [vmem:[#allocation66_spill] sm:$0xff]  ;;  %v17714_v59 = vld [vmem:[#allocation67_spill] sm:$0xff]  ;;  %v17792_v15 = vld [vmem:[#allocation137_spill] sm:$0xff] }
 0x6aa   :  { %13120 = vmatprep.subr.bf16.mxu1 %v15260_v31  ;;  %v8072_v5 = vpop.f32.mrb[63].mxu1  ;;  %v17712_v31 = vld [vmem:[#allocation65_spill] sm:$0xff]  ;;  %v17739_v34 = vld [vmem:[#allocation90_spill] sm:$0xff]  ;;  %v17740_v37 = vld [vmem:[#allocation91_spill] sm:$0xff]  ;;  %vm8175_vm6 = vcmp.gt.f32.partialorder %v7250_v26, 0.0 }
 0x6ab   :  { %v8239_v5 = vmul.f32 0.2, %v7250_v26  ;;  %v17794_v38 = vld [vmem:[#allocation139_spill] sm:$0xff]  ;;  %v17795_v16 = vld [vmem:[#allocation80_spill] sm:$0xff] }
 0x6ac   :  { %13099 = vmatpush3.bf16.msra.mxu0 %v17709_v9  ;;  %v17741_v9 = vld [vmem:[#allocation92_spill] sm:$0xff] }
 0x6ad   :  { %13121 = vmatpush3.bf16.msra.mxu1 %v17710_v3  ;;  %13100 = vmatprep.subr.bf16.mxu0 %v17711_v61  ;;  %v17742_v3 = vld [vmem:[#allocation93_spill] sm:$0xff] }
 0x6ae   :  { %13122 = vmatprep.subr.bf16.mxu1 %v15281_v48  ;;  %v17727_v48 = vld [vmem:[#allocation81_spill] sm:$0xff] }
 0x6b0   :  { %13101 = vmatpush3.bf16.msra.mxu0 %v15284_v35  ;;  %v17728_v35 = vld [vmem:[#allocation21_spill] sm:$0xff] }
 0x6b1   :  { %13123 = vmatpush3.bf16.msra.mxu1 %v15288_v55  ;;  %13130 = vmatprep.subr.bf16.mxu0 %v15290_v51  ;;  %v17717_v51 = vld [vmem:[#allocation70_spill] sm:$0xff]  ;;  %v1475_v55 = vrot.slane %v15712_v1, %v17728_v35 }
 0x6b2   :  { %13152 = vmatprep.subr.bf16.mxu1 %v15293_v36  ;;  %v17729_v36 = vld [vmem:[#allocation83_spill] sm:$0xff] }
 0x6b3   :  { %9802 = vmatmul.mubr.bf16.vlgmr.msra.gmra.mrb[84].mxu0 %v15536_v41  ;;  %v17733_v41 = vld [vmem:[#allocation86_spill] sm:$0xff] }
 0x6b4   :  { %9842 = vmatmul.mubr.bf16.vlgmr.msra.gmra.mrb[84].mxu1 %v15542_v7  ;;  %13131 = vmatpush3.bf16.msra.mxu0 %v17712_v31  ;;  %v17734_v7 = vld [vmem:[#allocation24_spill] sm:$0xff]  ;;  %v8303_v31 = vsel %vm8175_vm6, %v7250_v26, %v8239_v5  ;;  %v17768_v26 = vld [vmem:[#allocation113_spill] sm:$0xff] }
 0x6b5   :  { %9881 = vmatprep.mubr.bf16.mxu0 %v15548_v25  ;;  %13153 = vmatpush3.bf16.msra.mxu1 %v17713_v50  ;;  %v7209_v25 = vadd.f32 %v17734_v7, %v1475_v55  ;;  %v17761_v55 = vld [vmem:[#allocation56_spill] sm:$0xff] }
 0x6b6   :  { %9921 = vmatprep.mubr.bf16.mxu1 %v15554_v17  ;;  %13132 = vmatprep.subr.bf16.mxu0 %v17714_v59  ;;  %v17735_v17 = vld [vmem:[#allocation87_spill] sm:$0xff]  ;;  %v17743_v59 = vld [vmem:[#allocation94_spill] sm:$0xff]  ;;  %v17765_v7 = vld [vmem:[#allocation112_spill] sm:$0xff] }
 0x6b7   :  { %13154 = vmatprep.subr.bf16.mxu1 %v17715_v63  ;;  %v8237_v49 = vmul.f32 0.2, %v7209_v25  ;;  %vm8173_vm5 = vcmp.gt.f32.partialorder %v7209_v25, 0.0  ;;  %v15744_v63 = vpack.c.bf16 %v8303_v31, %v8303_v31 }
 0x6b8   :  { %13133 = vmatpush3.bf16.msra.mxu0 %v17716_v28  ;;  %v17751_v28 = vld [vmem:[#allocation102_spill] sm:$0xff] }
 0x6b9   :  { %13155 = vmatpush3.bf16.msra.mxu1 %v17717_v51  ;;  %13134 = vmatprep.subr.bf16.mxu0 %v17718_v30  ;;  %v8301_v61 = vsel %vm8173_vm5, %v7209_v25, %v8237_v49  ;;  %v17752_v51 = vld [vmem:[#allocation103_spill] sm:$0xff]  ;;  %v17753_v30 = vld [vmem:[#allocation104_spill] sm:$0xff]  ;;  %v17766_v25 = vld [vmem:[#allocation22_spill] sm:$0xff] }
 0x6ba   :  { %13156 = vmatprep.subr.bf16.mxu1 %v17719_v57  ;;  %v15740_v50 = vpack.c.bf16 %v8301_v61, %v8301_v61  ;;  %v17754_v57 = vld [vmem:[#allocation105_spill] sm:$0xff] }
 0x6bb   :  { %v17774_v61 = vld [vmem:[#allocation29_spill] sm:$0xff] }
 0x6bc   :  { %13135 = vmatpush3.bf16.msra.mxu0 %v17720_v29  ;;  %v17755_v29 = vld [vmem:[#allocation106_spill] sm:$0xff] }
 0x6bd   :  { %13157 = vmatpush3.bf16.msra.mxu1 %v17721_v52  ;;  %13136 = vmatprep.subr.bf16.mxu0 %v17722_v53  ;;  %v17756_v52 = vld [vmem:[#allocation107_spill] sm:$0xff]  ;;  %v17757_v53 = vld [vmem:[#allocation108_spill] sm:$0xff] }
 0x6be   :  { %13158 = vmatprep.subr.bf16.mxu1 %v17723_v0  ;;  %v17758_v0 = vld [vmem:[#allocation20_spill] sm:$0xff] }
 0x6c0   :  { %13137 = vmatpush3.bf16.msra.mxu0 %v17724_v22  ;;  %v1471_v22 = vrot.slane %v15712_v1, %v17758_v0 }
 0x6c1   :  { %13159 = vmatpush3.bf16.msra.mxu1 %v17725_v32  ;;  %13138 = vmatprep.subr.bf16.mxu0 %v17726_v54  ;;  %v17759_v32 = vld [vmem:[#allocation109_spill] sm:$0xff]  ;;  %v17760_v54 = vld [vmem:[#allocation55_spill] sm:$0xff] }
 0x6c2   :  { %13160 = vmatprep.subr.bf16.mxu1 %v17727_v48  ;;  %v1479_v48 = vrot.slane %v15712_v1, %v17760_v54 }
 0x6c4   :  { %13139 = vmatpush3.bf16.msra.mxu0 %v17729_v36  ;;  %v1491_v36 = vrot.slane %v15712_v1, %v17761_v55 }
 0x6c5   :  { %13161 = vmatpush3.bf16.msra.mxu1 %v17731_v21  ;;  %13140 = vmatprep.subr.bf16.mxu0 %v17732_v46  ;;  %v17763_v21 = vld [vmem:[#allocation57_spill] sm:$0xff] }
 0x6c6   :  { %13162 = vmatprep.subr.bf16.mxu1 %v17733_v41  ;;  %v1499_v46 = vrot.slane %v15712_v1, %v17763_v21  ;;  %v17764_v41 = vld [vmem:[#allocation111_spill] sm:$0xff] }
 0x6c8   :  { %13141 = vmatpush3.bf16.msra.mxu0 %v17735_v17  ;;  %v7207_v17 = vadd.f32 %v17766_v25, %v1471_v22  ;;  %v7332_v31 = vadd.f32 %v17774_v61, %v1499_v46  ;;  %v17779_v46 = vld [vmem:[#allocation122_spill] sm:$0xff] }
 0x6c9   :  { %13163 = vmatpush3.bf16.msra.mxu1 %v17737_v4  ;;  %13142 = vmatprep.subr.bf16.mxu0 %v17738_v58  ;;  %v17769_v4 = vld [vmem:[#allocation23_spill] sm:$0xff] }
 0x6ca   :  { %13164 = vmatprep.subr.bf16.mxu1 %v17739_v34  ;;  %v7248_v58 = vadd.f32 %v17769_v4, %v1479_v48  ;;  %v8236_v22 = vmul.f32 0.2, %v7207_v17  ;;  %v17777_v48 = vld [vmem:[#allocation117_spill] sm:$0xff]  ;;  %vm8172_vm7 = vcmp.gt.f32.partialorder %v7207_v17, 0.0  ;;  %vm8179_vm10 = vcmp.gt.f32.partialorder %v7332_v31, 0.0 }
 0x6cc   :  { %13143 = vmatpush3.bf16.msra.mxu0 %v17740_v37  ;;  %v17772_v37 = vld [vmem:[#allocation28_spill] sm:$0xff]  ;;  %v8238_v25 = vmul.f32 0.2, %v7248_v58  ;;  %vm8174_vm8 = vcmp.gt.f32.partialorder %v7248_v58, 0.0  ;;  %v8300_v61 = vsel %vm8172_vm7, %v7207_v17, %v8236_v22 }
 0x6cd   :  { %13165 = vmatpush3.bf16.msra.mxu1 %v17741_v9  ;;  %13144 = vmatprep.subr.bf16.mxu0 %v17742_v3  ;;  %v7291_v5 = vadd.f32 %v17772_v37, %v1491_v36  ;;  %v17778_v37 = vld [vmem:[#allocation121_spill] sm:$0xff]  ;;  %v17783_v22 = vld [vmem:[#allocation128_spill] sm:$0xff] }
 0x6ce   :  { %13166 = vmatprep.subr.bf16.mxu1 %v15397_v40  ;;  %v17744_v40 = vld [vmem:[#allocation95_spill] sm:$0xff] }
 0x6cf   :  { %v8241_v36 = vmul.f32 0.2, %v7291_v5  ;;  %vm8177_vm9 = vcmp.gt.f32.partialorder %v7291_v5, 0.0 }
 0x6d0   :  { %13145 = vmatpush3.bf16.msra.mxu0 %v15400_v23  ;;  %v17746_v23 = vld [vmem:[#allocation97_spill] sm:$0xff] }
 0x6d1   :  { %13167 = vmatpush3.bf16.msra.mxu1 %v15404_v42  ;;  %13174 = vmatprep.subr.bf16.mxu0 %v15406_v24  ;;  %v17745_v24 = vld [vmem:[#allocation96_spill] sm:$0xff]  ;;  %v17748_v42 = vld [vmem:[#allocation99_spill] sm:$0xff] }
 0x6d2   :  { %13196 = vmatprep.subr.bf16.mxu1 %v15409_v10  ;;  %v17747_v10 = vld [vmem:[#allocation98_spill] sm:$0xff] }
 0x6d3   :  { %9882 = vmatmul.mubr.bf16.vlgmr.msra.gmra.mrb[88].mxu0 %v15644_v14  ;;  %v17749_v14 = vld [vmem:[#allocation100_spill] sm:$0xff] }
 0x6d4   :  { %9922 = vmatmul.mubr.bf16.vlgmr.msra.gmra.mrb[88].mxu1 %v15648_v44  ;;  %13175 = vmatpush3.bf16.msra.mxu0 %v17743_v59  ;;  %v17750_v44 = vld [vmem:[#allocation101_spill] sm:$0xff] }
 0x6d5   :  { %9961 = vmatprep.mubr.bf16.mxu0 %v15740_v50  ;;  %13197 = vmatpush3.bf16.msra.mxu1 %v17744_v40  ;;  %v17775_v40 = vld [vmem:[#allocation114_spill] sm:$0xff] }
 0x6d6   :  { %10001 = vmatprep.mubr.bf16.mxu1 %v15744_v63  ;;  %13176 = vmatprep.subr.bf16.mxu0 %v17745_v24 }
 0x6d7   :  { %13198 = vmatprep.subr.bf16.mxu1 %v17746_v23  ;;  %v17776_v23 = vld [vmem:[#allocation115_spill] sm:$0xff] }
 0x6d8   :  { %13177 = vmatpush3.bf16.msra.mxu0 %v17747_v10 }
 0x6d9   :  { %13199 = vmatpush3.bf16.msra.mxu1 %v17748_v42  ;;  %13178 = vmatprep.subr.bf16.mxu0 %v17749_v14 }
 0x6da   :  { %13200 = vmatprep.subr.bf16.mxu1 %v17750_v44 }
 0x6dc   :  { %13179 = vmatpush3.bf16.msra.mxu0 %v17751_v28 }
 0x6dd   :  { %13201 = vmatpush3.bf16.msra.mxu1 %v17752_v51  ;;  %13180 = vmatprep.subr.bf16.mxu0 %v17753_v30 }
 0x6de   :  { %13202 = vmatprep.subr.bf16.mxu1 %v17754_v57 }
 0x6e0   :  { %13181 = vmatpush3.bf16.msra.mxu0 %v17755_v29 }
 0x6e1   :  { %13203 = vmatpush3.bf16.msra.mxu1 %v17756_v52  ;;  %13182 = vmatprep.subr.bf16.mxu0 %v17757_v53 }
 0x6e2   :  { %13204 = vmatprep.subr.bf16.mxu1 %v17759_v32 }
 0x6e4   :  { %13183 = vmatpush3.bf16.msra.mxu0 %v17762_v8 }
 0x6e5   :  { %13205 = vmatpush3.bf16.msra.mxu1 %v17764_v41  ;;  %13184 = vmatprep.subr.bf16.mxu0 %v17765_v7 }
 0x6e6   :  { %v15775_v20 = vpop.f32.mrb[64].mxu0  ;;  %13206 = vmatprep.subr.bf16.mxu1 %v17768_v26 }
 0x6e7   :  { %17767 = vst [vmem:[#allocation62_spill] sm:$0xff] %v15775_v20  ;;  %v15779_v34 = vpop.f32.mrb[64].mxu1  ;;  %v15781_v49 = vpop.f32.mrb[65].mxu0  ;;  %v15796_v20 = vpack.c.bf16 %v8300_v61, %v8300_v61  ;;  %v17788_v61 = vld [vmem:[#allocation133_spill] sm:$0xff] }
 0x6e8   :  { %17770 = vst [vmem:[#allocation63_spill] sm:$0xff] %v15779_v34  ;;  %17771 = vst [vmem:[#allocation64_spill] sm:$0xff] %v15781_v49  ;;  %v15784_v9 = vpop.f32.mrb[65].mxu1  ;;  %v8112_v3 = vpop.f32.mrb[66].mxu0  ;;  %13185 = vmatpush3.bf16.msra.mxu0 %v15484_v47  ;;  %v8305_v34 = vsel %vm8177_vm9, %v7291_v5, %v8241_v36  ;;  %v17781_v5 = vld [vmem:[#allocation126_spill] sm:$0xff]  ;;  %v17786_v36 = vld [vmem:[#allocation131_spill] sm:$0xff] }
 0x6e9   :  { %17773 = vst [vmem:[#allocation65_spill] sm:$0xff] %v15784_v9  ;;  %v8153_v59 = vpop.f32.mrb[66].mxu1  ;;  %13207 = vmatpush3.bf16.msra.mxu1 %v17775_v40  ;;  %v8113_v24 = vpop.f32.mrb[67].mxu0  ;;  %13186 = vmatprep.subr.bf16.mxu0 %v17776_v23  ;;  %v8243_v3 = vmul.f32 0.2, %v7332_v31  ;;  %v15804_v17 = vpack.c.bf16 %v8305_v34, %v8305_v34  ;;  %v17785_v34 = vld [vmem:[#allocation130_spill] sm:$0xff] }
 0x6ea   :  { %13208 = vmatprep.subr.bf16.mxu1 %v17777_v48  ;;  %v8154_v4 = vpop.f32.mrb[67].mxu1  ;;  %v17780_v59 = vld [vmem:[#allocation123_spill] sm:$0xff]  ;;  %v8302_v24 = vsel %vm8174_vm8, %v7248_v58, %v8238_v25  ;;  %v17784_v25 = vld [vmem:[#allocation129_spill] sm:$0xff]  ;;  %v17791_v49 = vld [vmem:[#allocation136_spill] sm:$0xff] }
 0x6eb   :  { %v8307_v4 = vsel %vm8179_vm10, %v7332_v31, %v8243_v3  ;;  %v15800_v9 = vpack.c.bf16 %v8302_v24, %v8302_v24  ;;  %v17782_v31 = vld [vmem:[#allocation127_spill] sm:$0xff]  ;;  %v17787_v3 = vld [vmem:[#allocation132_spill] sm:$0xff]  ;;  %v17789_v24 = vld [vmem:[#allocation134_spill] sm:$0xff] }
 0x6ec   :  { %13187 = vmatpush3.bf16.msra.mxu0 %v17778_v37  ;;  %v15808_v58 = vpack.c.bf16 %v8307_v4, %v8307_v4  ;;  %v17790_v4 = vld [vmem:[#allocation135_spill] sm:$0xff] }
 0x6ed   :  { %13209 = vmatpush3.bf16.msra.mxu1 %v15514_v19  ;;  %13188 = vmatprep.subr.bf16.mxu0 %v17779_v46 }
 0x6ee   :  { %13210 = vmatprep.subr.bf16.mxu1 %v17780_v59 }
 0x6f0   :  { %13189 = vmatpush3.bf16.msra.mxu0 %v15522_v18 }
 0x6f1   :  { %13211 = vmatpush3.bf16.msra.mxu1 %v15526_v56  ;;  %13218 = vmatprep.subr.bf16.mxu0 %v15528_v11 }
 0x6f2   :  { %13240 = vmatprep.subr.bf16.mxu1 %v15531_v39 }
 0x6f3   :  { %9962 = vmatmul.mubr.bf16.vlgmr.msra.gmra.mrb[92].mxu0 %v15796_v20 }
 0x6f4   :  { %10002 = vmatmul.mubr.bf16.vlgmr.msra.gmra.mrb[92].mxu1 %v15800_v9  ;;  %13219 = vmatpush3.bf16.msra.mxu0 %v15534_v13 }
 0x6f5   :  { %10041 = vmatprep.mubr.bf16.mxu0 %v15804_v17  ;;  %13241 = vmatpush3.bf16.msra.mxu1 %v17781_v5 }
 0x6f6   :  { %10081 = vmatprep.mubr.bf16.mxu1 %v15808_v58  ;;  %13220 = vmatprep.subr.bf16.mxu0 %v17782_v31 }
 0x6f7   :  { %13242 = vmatprep.subr.bf16.mxu1 %v17783_v22 }
 0x6f8   :  { %13221 = vmatpush3.bf16.msra.mxu0 %v17784_v25  ;;  %v17798_v25 = vld [vmem:[#allocation141_spill] sm:$0xff] }
 0x6f9   :  { %13243 = vmatpush3.bf16.msra.mxu1 %v17785_v34  ;;  %13222 = vmatprep.subr.bf16.mxu0 %v17786_v36  ;;  %v1487_v34 = vrot.slane %v15712_v1, %v17795_v16  ;;  %v17796_v36 = vld [vmem:[#allocation140_spill] sm:$0xff]  ;;  %v15837_v16 = vld [vmem:[#allocation13] ss:$0 sm:$0xff] }
 0x6fa   :  { %13244 = vmatprep.subr.bf16.mxu1 %v17787_v3  ;;  %v17797_v3 = vld [vmem:[#allocation82_spill] sm:$0xff] }
 0x6fc   :  { %13223 = vmatpush3.bf16.msra.mxu0 %v17788_v61  ;;  %v1495_v61 = vrot.slane %v15712_v1, %v17797_v3  ;;  %v17803_v3 = vld [vmem:[#allocation145_spill] sm:$0xff] }
 0x6fd   :  { %13245 = vmatpush3.bf16.msra.mxu1 %v17789_v24  ;;  %13224 = vmatprep.subr.bf16.mxu0 %v17790_v4  ;;  %v17799_v24 = vld [vmem:[#allocation142_spill] sm:$0xff]  ;;  %v17800_v4 = vld [vmem:[#allocation143_spill] sm:$0xff] }
 0x6fe   :  { %13246 = vmatprep.subr.bf16.mxu1 %v17791_v49  ;;  %v17801_v49 = vld [vmem:[#allocation26_spill] sm:$0xff] }
 0x700   :  { %13225 = vmatpush3.bf16.msra.mxu0 %v17792_v15  ;;  %v7289_v15 = vadd.f32 %v17801_v49, %v1487_v34  ;;  %v17804_v49 = vld [vmem:[#allocation146_spill] sm:$0xff] }
 0x701   :  { %13247 = vmatpush3.bf16.msra.mxu1 %v17793_v45  ;;  %13226 = vmatprep.subr.bf16.mxu0 %v17794_v38  ;;  %v17802_v38 = vld [vmem:[#allocation27_spill] sm:$0xff] }
 0x702   :  { %13248 = vmatprep.subr.bf16.mxu1 %v17796_v36  ;;  %v7330_v45 = vadd.f32 %v17802_v38, %v1495_v61  ;;  %v8240_v34 = vmul.f32 0.2, %v7289_v15  ;;  %v17805_v61 = vld [vmem:[#allocation147_spill] sm:$0xff]  ;;  %vm8176_vm11 = vcmp.gt.f32.partialorder %v7289_v15, 0.0 }
 0x704   :  { %13227 = vmatpush3.bf16.msra.mxu0 %v17798_v25  ;;  %v8242_v39 = vmul.f32 0.2, %v7330_v45  ;;  %vm8178_vm12 = vcmp.gt.f32.partialorder %v7330_v45, 0.0 }
 0x705   :  { %13249 = vmatpush3.bf16.msra.mxu1 %v17799_v24  ;;  %13228 = vmatprep.subr.bf16.mxu0 %v17800_v4 }
 0x706   :  { %v12926_v22 = vpop.f32.mrb[68].mxu0  ;;  %13250 = vmatprep.subr.bf16.mxu1 %v15605_v33 }
 0x707   :  { %v12948_v31 = vpop.f32.mrb[68].mxu1  ;;  %v12927_v36 = vpop.f32.mrb[69].mxu0 }
 0x708   :  { %v12928_v5 = vadd.f32 %v12927_v36, %v12926_v22  ;;  %v12949_v13 = vpop.f32.mrb[69].mxu1  ;;  %v12929_v1 = vpop.f32.mrb[70].mxu0  ;;  %13229 = vmatpush3.bf16.msra.mxu0 %v15610_v43  ;;  %v17806_v36 = vld [vmem:[#allocation148_spill] sm:$0xff] }
 0x709   :  { %v12950_v25 = vadd.f32 %v12949_v13, %v12948_v31  ;;  %v12951_v24 = vpop.f32.mrb[70].mxu1  ;;  %13251 = vmatpush3.bf16.msra.mxu1 %v17803_v3  ;;  %v12930_v4 = vpop.f32.mrb[71].mxu0  ;;  %13230 = vmatprep.subr.bf16.mxu0 %v17804_v49  ;;  %v8304_v13 = vsel %vm8176_vm11, %v7289_v15, %v8240_v34  ;;  %v8306_v31 = vsel %vm8178_vm12, %v7330_v45, %v8242_v39  ;;  %v15864_v39 = vld [vmem:[#allocation12] sm:$0xff]   ;;  %v15872_v15 = vld [vmem:[#allocation12 + $0x48] sm:$0xff]  }
 0x70a   :  { %v9478_v33 = vadd.f32 %v12928_v5, %v15837_v16  ;;  %v12952_v38 = vpop.f32.mrb[71].mxu1  ;;  %13252 = vmatprep.subr.bf16.mxu1 %v17805_v61  ;;  %v15851_v5 = vpack.c.bf16 %v8304_v13, %v8304_v13  ;;  %v15854_v24 = vld [vmem:[#allocation12 + $0x40] sm:$0xff]   ;;  %17809 = vst [vmem:[#allocation68_spill] sm:$0xff] %v15864_v39  ;;  %17811 = vst [vmem:[#allocation70_spill] sm:$0xff] %v15872_v15  ;;  %v15875_v4 = vld [vmem:[#allocation12 + $0xc8] sm:$0xff]  }
 0x70b   :  { %17807 = vst [vmem:[#allocation66_spill] sm:$0xff] %v15854_v24  ;;  %v15868_v45 = vld [vmem:[#allocation12 + $0x80] sm:$0xff]   ;;  %17812 = vst [vmem:[#allocation71_spill] sm:$0xff] %v15875_v4  ;;  %v15878_v1 = vld [vmem:[#allocation12 + $0x8] sm:$0xff]  }
 0x70c   :  { %v15844_v22 = vadd.f32 %v12950_v25, %v9478_v33  ;;  %13231 = vmatpush3.bf16.msra.mxu0 %v17806_v36  ;;  %v15857_v33 = vpack.c.bf16 %v8306_v31, %v8306_v31  ;;  %v15859_v25 = vld [vmem:[#allocation12 + $0xc0] sm:$0xff]   ;;  %17810 = vst [vmem:[#allocation69_spill] sm:$0xff] %v15868_v45  ;;  %17813 = vst [vmem:[#allocation72_spill] sm:$0xff] %v15878_v1  ;;  %v15881_v34 = vld [vmem:[#allocation12 + $0x88] sm:$0xff]  }
 0x70d   :  { %13253 = vmatpush3.bf16.msra.mxu1 %v15628_v62  ;;  %13232 = vmatprep.subr.bf16.mxu0 %v15630_v12  ;;  %17808 = vst [vmem:[#allocation67_spill] sm:$0xff] %v15859_v25  ;;  %17814 = vst [vmem:[#allocation73_spill] sm:$0xff] %v15881_v34  ;;  %v15890_v38 = vld [vmem:[#allocation12 + $0x10] sm:$0xff]   ;;  %v15896_v31 = vld [vmem:[#allocation12 + $0x58] sm:$0xff]  }
 0x70e   :  { %13254 = vmatprep.subr.bf16.mxu1 %v15633_v2  ;;  %17817 = vst [vmem:[#allocation76_spill] sm:$0xff] %v15890_v38  ;;  %v15893_v13 = vld [vmem:[#allocation12 + $0x90] sm:$0xff]   ;;  %17819 = vst [vmem:[#allocation78_spill] sm:$0xff] %v15896_v31 }
 0x70f   :  { %17818 = vst [vmem:[#allocation77_spill] sm:$0xff] %v15893_v13 }
 0x710   :  { %13233 = vmatpush3.bf16.msra.mxu0 %v15636_v6 }
 0x711   :  { %13255 = vmatpush3.bf16.msra.mxu1 %v15640_v60  ;;  %13262 = vmatprep.subr.bf16.mxu0 %v15854_v24  ;;  %v15932_v24 = vld [vmem:[#allocation12 + $0x70] sm:$0xff]  }
 0x712   :  { %13284 = vmatprep.subr.bf16.mxu1 %v15859_v25  ;;  %v15929_v25 = vld [vmem:[#allocation12 + $0xa8] sm:$0xff]   ;;  %17831 = vst [vmem:[#allocation90_spill] sm:$0xff] %v15932_v24 }
 0x713   :  { %10042 = vmatmul.mubr.bf16.vlgmr.msra.gmra.mrb[96].mxu0 %v15851_v5  ;;  %17830 = vst [vmem:[#allocation89_spill] sm:$0xff] %v15929_v25 }
 0x714   :  { %10082 = vmatmul.mubr.bf16.vlgmr.msra.gmra.mrb[96].mxu1 %v15857_v33  ;;  %13263 = vmatpush3.bf16.msra.mxu0 %v15864_v39  ;;  %v15926_v39 = vld [vmem:[#allocation12 + $0x28] sm:$0xff]  }
 0x715   :  { %10127 = vmatprep.mubr.bf16.mxu0 %v15740_v50  ;;  %13285 = vmatpush3.bf16.msra.mxu1 %v15868_v45  ;;  %v15884_v50 = vld [vmem:[#allocation12 + $0x50] sm:$0xff]   ;;  %17829 = vst [vmem:[#allocation88_spill] sm:$0xff] %v15926_v39 }
 0x716   :  { %10167 = vmatprep.mubr.bf16.mxu1 %v15744_v63  ;;  %13264 = vmatprep.subr.bf16.mxu0 %v15872_v15  ;;  %17815 = vst [vmem:[#allocation74_spill] sm:$0xff] %v15884_v50  ;;  %v15887_v63 = vld [vmem:[#allocation12 + $0xd0] sm:$0xff]  }
 0x717   :  { %13286 = vmatprep.subr.bf16.mxu1 %v15875_v4  ;;  %17816 = vst [vmem:[#allocation75_spill] sm:$0xff] %v15887_v63 }
 0x718   :  { %13265 = vmatpush3.bf16.msra.mxu0 %v15878_v1  ;;  %v15923_v1 = vld [vmem:[#allocation12 + $0xe8] sm:$0xff]  }
 0x719   :  { %13287 = vmatpush3.bf16.msra.mxu1 %v15881_v34  ;;  %13266 = vmatprep.subr.bf16.mxu0 %v15884_v50  ;;  %v15899_v34 = vld [vmem:[#allocation12 + $0xd8] sm:$0xff]   ;;  %17828 = vst [vmem:[#allocation25_spill] sm:$0xff] %v15923_v1 }
 0x71a   :  { %13288 = vmatprep.subr.bf16.mxu1 %v15887_v63  ;;  %17820 = vst [vmem:[#allocation79_spill] sm:$0xff] %v15899_v34  ;;  %v15902_v50 = vld [vmem:[#allocation12 + $0x18] sm:$0xff]  }
 0x71b   :  { %17821 = vst [vmem:[#allocation81_spill] sm:$0xff] %v15902_v50  ;;  %v15905_v63 = vld [vmem:[#allocation12 + $0x98] sm:$0xff]  }
 0x71c   :  { %13267 = vmatpush3.bf16.msra.mxu0 %v15890_v38  ;;  %17822 = vst [vmem:[#allocation83_spill] sm:$0xff] %v15905_v63  ;;  %v15908_v38 = vld [vmem:[#allocation12 + $0x60] sm:$0xff]  }
 0x71d   :  { %13289 = vmatpush3.bf16.msra.mxu1 %v15893_v13  ;;  %13268 = vmatprep.subr.bf16.mxu0 %v15896_v31  ;;  %17823 = vst [vmem:[#allocation84_spill] sm:$0xff] %v15908_v38  ;;  %v15911_v13 = vld [vmem:[#allocation12 + $0xe0] sm:$0xff]  }
 0x71e   :  { %13290 = vmatprep.subr.bf16.mxu1 %v15899_v34  ;;  %17824 = vst [vmem:[#allocation85_spill] sm:$0xff] %v15911_v13  ;;  %v15914_v31 = vld [vmem:[#allocation12 + $0x20] sm:$0xff]  }
 0x71f   :  { %17825 = vst [vmem:[#allocation86_spill] sm:$0xff] %v15914_v31  ;;  %v15917_v34 = vld [vmem:[#allocation12 + $0xa0] sm:$0xff]  }
 0x720   :  { %13269 = vmatpush3.bf16.msra.mxu0 %v15902_v50  ;;  %17826 = vst [vmem:[#allocation24_spill] sm:$0xff] %v15917_v34  ;;  %v15920_v50 = vld [vmem:[#allocation12 + $0x68] sm:$0xff]  }
 0x721   :  { %13291 = vmatpush3.bf16.msra.mxu1 %v15905_v63  ;;  %13270 = vmatprep.subr.bf16.mxu0 %v15908_v38  ;;  %17827 = vst [vmem:[#allocation87_spill] sm:$0xff] %v15920_v50 }
 0x722   :  { %13292 = vmatprep.subr.bf16.mxu1 %v15911_v13 }
 0x724   :  { %13271 = vmatpush3.bf16.msra.mxu0 %v15914_v31 }
 0x725   :  { %13293 = vmatpush3.bf16.msra.mxu1 %v15917_v34  ;;  %13272 = vmatprep.subr.bf16.mxu0 %v15920_v50 }
 0x726   :  { %v12970_v63 = vpop.f32.mrb[72].mxu0  ;;  %13294 = vmatprep.subr.bf16.mxu1 %v15923_v1 }
 0x727   :  { %v12992_v38 = vpop.f32.mrb[72].mxu1  ;;  %v12971_v4 = vpop.f32.mrb[73].mxu0 }
 0x728   :  { %v12972_v13 = vadd.f32 %v12971_v4, %v12970_v63  ;;  %v12993_v15 = vpop.f32.mrb[73].mxu1  ;;  %v12973_v45 = vpop.f32.mrb[74].mxu0  ;;  %13273 = vmatpush3.bf16.msra.mxu0 %v15926_v39  ;;  %v15936_v63 = vld [vmem:[#allocation12 + $0xf0] sm:$0xff]  }
 0x729   :  { %v12994_v31 = vadd.f32 %v12993_v15, %v12992_v38  ;;  %v12995_v34 = vpop.f32.mrb[74].mxu1  ;;  %13295 = vmatpush3.bf16.msra.mxu1 %v15929_v25  ;;  %v12974_v50 = vpop.f32.mrb[75].mxu0  ;;  %13274 = vmatprep.subr.bf16.mxu0 %v15932_v24  ;;  %17832 = vst [vmem:[#allocation91_spill] sm:$0xff] %v15936_v63  ;;  %v15941_v15 = vld [vmem:[#allocation12 + $0x30] sm:$0xff]   ;;  %v15953_v38 = vld [vmem:[#allocation12 + $0x38] sm:$0xff]   ;;  %v16040_v25 = vld [vmem:[#allocation12 + $0x1a8] sm:$0xff]  }
 0x72a   :  { %v9558_v1 = vadd.f32 %v12972_v13, %v15844_v22  ;;  %v12996_v4 = vpop.f32.mrb[75].mxu1  ;;  %13296 = vmatprep.subr.bf16.mxu1 %v15936_v63  ;;  %17833 = vst [vmem:[#allocation92_spill] sm:$0xff] %v15941_v15  ;;  %v15944_v34 = vld [vmem:[#allocation12 + $0xb0] sm:$0xff]   ;;  %v15947_v50 = vld [vmem:[#allocation12 + $0x78] sm:$0xff]   ;;  %17837 = vst [vmem:[#allocation96_spill] sm:$0xff] %v15953_v38 }
 0x72b   :  { %17834 = vst [vmem:[#allocation93_spill] sm:$0xff] %v15944_v34  ;;  %17835 = vst [vmem:[#allocation94_spill] sm:$0xff] %v15947_v50  ;;  %v15950_v22 = vld [vmem:[#allocation12 + $0xf8] sm:$0xff]   ;;  %v15959_v13 = vld [vmem:[#allocation12 + $0x140] sm:$0xff]  }
 0x72c   :  { %v15939_v45 = vadd.f32 %v12994_v31, %v9558_v1  ;;  %13275 = vmatpush3.bf16.msra.mxu0 %v15941_v15  ;;  %17836 = vst [vmem:[#allocation95_spill] sm:$0xff] %v15950_v22  ;;  %v15956_v1 = vld [vmem:[#allocation12 + $0xb8] sm:$0xff]   ;;  %17839 = vst [vmem:[#allocation98_spill] sm:$0xff] %v15959_v13  ;;  %v15962_v31 = vld [vmem:[#allocation12 + $0x1c0] sm:$0xff]  }
 0x72d   :  { %13297 = vmatpush3.bf16.msra.mxu1 %v15944_v34  ;;  %13276 = vmatprep.subr.bf16.mxu0 %v15947_v50  ;;  %17838 = vst [vmem:[#allocation97_spill] sm:$0xff] %v15956_v1  ;;  %17840 = vst [vmem:[#allocation99_spill] sm:$0xff] %v15962_v31  ;;  %v15967_v4 = vld [vmem:[#allocation12 + $0x100] sm:$0xff]   ;;  %v16036_v15 = vld [vmem:[#allocation12 + $0x128] sm:$0xff]  }
 0x72e   :  { %13298 = vmatprep.subr.bf16.mxu1 %v15950_v22  ;;  %17841 = vst [vmem:[#allocation100_spill] sm:$0xff] %v15967_v4  ;;  %v17861_v22 = vld [vmem:[#allocation32_spill] sm:$0xff]  ;;  %v16043_v39 = vld [vmem:[#allocation12 + $0x170] sm:$0xff]  }
 0x730   :  { %13277 = vmatpush3.bf16.msra.mxu0 %v15953_v38  ;;  %v15971_v38 = vld [vmem:[#allocation12 + $0x180] sm:$0xff]  }
 0x731   :  { %13299 = vmatpush3.bf16.msra.mxu1 %v15956_v1  ;;  %13306 = vmatprep.subr.bf16.mxu0 %v15959_v13  ;;  %17842 = vst [vmem:[#allocation101_spill] sm:$0xff] %v15971_v38  ;;  %v15975_v13 = vld [vmem:[#allocation12 + $0x148] sm:$0xff]  }
 0x732   :  { %13328 = vmatprep.subr.bf16.mxu1 %v15962_v31  ;;  %17843 = vst [vmem:[#allocation102_spill] sm:$0xff] %v15975_v13  ;;  %v15978_v31 = vld [vmem:[#allocation12 + $0x1c8] sm:$0xff]  }
 0x733   :  { %10128 = vmatmul.mubr.bf16.vlgmr.msra.gmra.mrb[100].mxu0 %v15796_v20  ;;  %17844 = vst [vmem:[#allocation103_spill] sm:$0xff] %v15978_v31  ;;  %v15981_v20 = vld [vmem:[#allocation12 + $0x108] sm:$0xff]  }
 0x734   :  { %10168 = vmatmul.mubr.bf16.vlgmr.msra.gmra.mrb[100].mxu1 %v15800_v9  ;;  %13307 = vmatpush3.bf16.msra.mxu0 %v15967_v4  ;;  %17845 = vst [vmem:[#allocation104_spill] sm:$0xff] %v15981_v20  ;;  %v15984_v9 = vld [vmem:[#allocation12 + $0x188] sm:$0xff]   ;;  %v16026_v4 = vld [vmem:[#allocation12 + $0x1a0] sm:$0xff]  }
 0x735   :  { %10207 = vmatprep.mubr.bf16.mxu0 %v15804_v17  ;;  %13329 = vmatpush3.bf16.msra.mxu1 %v15971_v38  ;;  %17846 = vst [vmem:[#allocation105_spill] sm:$0xff] %v15984_v9  ;;  %v15987_v17 = vld [vmem:[#allocation12 + $0x150] sm:$0xff]   ;;  %v16010_v38 = vld [vmem:[#allocation12 + $0x198] sm:$0xff]   ;;  %17858 = vst [vmem:[#allocation29_spill] sm:$0xff] %v16026_v4 }
 0x736   :  { %10247 = vmatprep.mubr.bf16.mxu1 %v15808_v58  ;;  %13308 = vmatprep.subr.bf16.mxu0 %v15975_v13  ;;  %17847 = vst [vmem:[#allocation106_spill] sm:$0xff] %v15987_v17  ;;  %v15990_v58 = vld [vmem:[#allocation12 + $0x1d0] sm:$0xff]   ;;  %17854 = vst [vmem:[#allocation22_spill] sm:$0xff] %v16010_v38 }
 0x737   :  { %13330 = vmatprep.subr.bf16.mxu1 %v15978_v31  ;;  %17848 = vst [vmem:[#allocation107_spill] sm:$0xff] %v15990_v58  ;;  %v15993_v13 = vld [vmem:[#allocation12 + $0x110] sm:$0xff]  }
 0x738   :  { %13309 = vmatpush3.bf16.msra.mxu0 %v15981_v20  ;;  %17849 = vst [vmem:[#allocation108_spill] sm:$0xff] %v15993_v13  ;;  %v15996_v31 = vld [vmem:[#allocation12 + $0x190] sm:$0xff]   ;;  %v15999_v20 = vld [vmem:[#allocation12 + $0x158] sm:$0xff]  }
 0x739   :  { %13331 = vmatpush3.bf16.msra.mxu1 %v15984_v9  ;;  %13310 = vmatprep.subr.bf16.mxu0 %v15987_v17  ;;  %17850 = vst [vmem:[#allocation109_spill] sm:$0xff] %v15996_v31  ;;  %17851 = vst [vmem:[#allocation110_spill] sm:$0xff] %v15999_v20  ;;  %v16002_v9 = vld [vmem:[#allocation12 + $0x1d8] sm:$0xff]  }
 0x73a   :  { %13332 = vmatprep.subr.bf16.mxu1 %v15990_v58  ;;  %17852 = vst [vmem:[#allocation111_spill] sm:$0xff] %v16002_v9  ;;  %v16005_v17 = vld [vmem:[#allocation12 + $0x118] sm:$0xff]  }
 0x73b   :  { %17853 = vst [vmem:[#allocation112_spill] sm:$0xff] %v16005_v17  ;;  %v16008_v58 = vld [vmem:[#allocation10 + $0x18] sm:$0xff] }
 0x73c   :  { %13311 = vmatpush3.bf16.msra.mxu0 %v15993_v13  ;;  %v16013_v13 = vld [vmem:[#allocation12 + $0x160] sm:$0xff]  }
 0x73d   :  { %13333 = vmatpush3.bf16.msra.mxu1 %v15996_v31  ;;  %13312 = vmatprep.subr.bf16.mxu0 %v15999_v20  ;;  %17855 = vst [vmem:[#allocation113_spill] sm:$0xff] %v16013_v13  ;;  %v16016_v31 = vld [vmem:[#allocation12 + $0x1e0] sm:$0xff]  }
 0x73e   :  { %13334 = vmatprep.subr.bf16.mxu1 %v16002_v9  ;;  %17856 = vst [vmem:[#allocation23_spill] sm:$0xff] %v16016_v31  ;;  %v1507_v9 = vrot.slane %v16008_v58, %v17728_v35  ;;  %v16021_v20 = vld [vmem:[#allocation12 + $0x120] sm:$0xff]  }
 0x73f   :  { %17857 = vst [vmem:[#allocation28_spill] sm:$0xff] %v16021_v20 }
 0x740   :  { %13313 = vmatpush3.bf16.msra.mxu0 %v16005_v17  ;;  %v1515_v17 = vrot.slane %v16008_v58, %v17730_v27 }
 0x741   :  { %13335 = vmatpush3.bf16.msra.mxu1 %v16010_v38  ;;  %13314 = vmatprep.subr.bf16.mxu0 %v16013_v13  ;;  %v16029_v38 = vld [vmem:[#allocation12 + $0x168] sm:$0xff]  }
 0x742   :  { %13336 = vmatprep.subr.bf16.mxu1 %v16016_v31  ;;  %17859 = vst [vmem:[#allocation114_spill] sm:$0xff] %v16029_v38  ;;  %v16032_v31 = vld [vmem:[#allocation12 + $0x1e8] sm:$0xff]  }
 0x743   :  { %17860 = vst [vmem:[#allocation115_spill] sm:$0xff] %v16032_v31 }
 0x744   :  { %13315 = vmatpush3.bf16.msra.mxu0 %v16021_v20  ;;  %v7373_v20 = vadd.f32 %v17861_v22, %v1507_v9  ;;  %v16067_v9 = vld [vmem:[#allocation12 + $0x1b8] sm:$0xff]  }
 0x745   :  { %13337 = vmatpush3.bf16.msra.mxu1 %v16026_v4  ;;  %13316 = vmatprep.subr.bf16.mxu0 %v16029_v38  ;;  %v17862_v4 = vld [vmem:[#allocation33_spill] sm:$0xff] }
 0x746   :  { %v13014_v13 = vpop.f32.mrb[76].mxu0  ;;  %13338 = vmatprep.subr.bf16.mxu1 %v16032_v31  ;;  %v7414_v63 = vadd.f32 %v17862_v4, %v1515_v17  ;;  %vm8181_vm13 = vcmp.gt.f32.partialorder %v7373_v20, 0.0  ;;  %v16070_v17 = vld [vmem:[#allocation12 + $0x240] sm:$0xff]  }
 0x747   :  { %v13036_v35 = vpop.f32.mrb[76].mxu1  ;;  %v13015_v1 = vpop.f32.mrb[77].mxu0  ;;  %17864 = vst [vmem:[#allocation121_spill] sm:$0xff] %v16070_v17 }
 0x748   :  { %v13016_v50 = vadd.f32 %v13015_v1, %v13014_v13  ;;  %v13037_v34 = vpop.f32.mrb[77].mxu1  ;;  %v13017_v27 = vpop.f32.mrb[78].mxu0  ;;  %13317 = vmatpush3.bf16.msra.mxu0 %v16036_v15  ;;  %v16047_v1 = vld [vmem:[#allocation12 + $0x1f0] sm:$0xff]   ;;  %v8245_v13 = vmul.f32 0.2, %v7373_v20  ;;  %vm8183_vm14 = vcmp.gt.f32.partialorder %v7414_v63, 0.0 }
 0x749   :  { %v13038_v24 = vadd.f32 %v13037_v34, %v13036_v35  ;;  %v13039_v38 = vpop.f32.mrb[78].mxu1  ;;  %13339 = vmatpush3.bf16.msra.mxu1 %v16040_v25  ;;  %v13018_v31 = vpop.f32.mrb[79].mxu0  ;;  %13318 = vmatprep.subr.bf16.mxu0 %v16043_v39  ;;  %v16052_v35 = vld [vmem:[#allocation12 + $0x130] sm:$0xff]   ;;  %v8247_v34 = vmul.f32 0.2, %v7414_v63 }
 0x74a   :  { %v9638_v22 = vadd.f32 %v13016_v50, %v15939_v45  ;;  %v13040_v27 = vpop.f32.mrb[79].mxu1  ;;  %13340 = vmatprep.subr.bf16.mxu1 %v16047_v1  ;;  %v16055_v38 = vld [vmem:[#allocation12 + $0x1b0] sm:$0xff]   ;;  %v16058_v31 = vld [vmem:[#allocation12 + $0x178] sm:$0xff]   ;;  %v8309_v50 = vsel %vm8181_vm13, %v7373_v20, %v8245_v13  ;;  %v16080_v20 = vld [vmem:[#allocation12 + $0x200] sm:$0xff]  }
 0x74b   :  { %v16061_v45 = vld [vmem:[#allocation12 + $0x1f8] sm:$0xff]   ;;  %v16073_v27 = vld [vmem:[#allocation12 + $0x2c0] sm:$0xff]  }
 0x74c   :  { %v16050_v4 = vadd.f32 %v13038_v24, %v9638_v22  ;;  %13319 = vmatpush3.bf16.msra.mxu0 %v16052_v35  ;;  %17863 = vst [vmem:[#allocation117_spill] sm:$0xff] %v16061_v45  ;;  %v16064_v24 = vld [vmem:[#allocation12 + $0x138] sm:$0xff]   ;;  %v8311_v22 = vsel %vm8183_vm14, %v7414_v63, %v8247_v34  ;;  %v16090_v63 = vld [vmem:[#allocation12 + $0x248] sm:$0xff]  }
 0x74d   :  { %13341 = vmatpush3.bf16.msra.mxu1 %v16055_v38  ;;  %13320 = vmatprep.subr.bf16.mxu0 %v16058_v31  ;;  %v16083_v13 = vpack.c.bf16 %v8311_v22, %v8311_v22  ;;  %17865 = vst [vmem:[#allocation122_spill] sm:$0xff] %v16090_v63  ;;  %v17870_v22 = vld [vmem:[#allocation37_spill] sm:$0xff] }
 0x74e   :  { %13342 = vmatprep.subr.bf16.mxu1 %v16061_v45  ;;  %v16077_v45 = vpack.c.bf16 %v8309_v50, %v8309_v50 }
 0x750   :  { %13321 = vmatpush3.bf16.msra.mxu0 %v16064_v24 }
 0x751   :  { %13343 = vmatpush3.bf16.msra.mxu1 %v16067_v9  ;;  %13350 = vmatprep.subr.bf16.mxu0 %v16070_v17  ;;  %v16086_v17 = vld [vmem:[#allocation12 + $0x280] sm:$0xff]  }
 0x752   :  { %13372 = vmatprep.subr.bf16.mxu1 %v16073_v27 }
 0x753   :  { %10208 = vmatmul.mubr.bf16.vlgmr.msra.gmra.mrb[104].mxu0 %v15851_v5  ;;  %v16093_v5 = vld [vmem:[#allocation12 + $0x2c8] sm:$0xff]  }
 0x754   :  { %10248 = vmatmul.mubr.bf16.vlgmr.msra.gmra.mrb[104].mxu1 %v15857_v33  ;;  %13351 = vmatpush3.bf16.msra.mxu0 %v16080_v20  ;;  %17866 = vst [vmem:[#allocation123_spill] sm:$0xff] %v16093_v5 }
 0x755   :  { %10287 = vmatprep.mubr.bf16.mxu0 %v16077_v45  ;;  %13373 = vmatpush3.bf16.msra.mxu1 %v16086_v17 }
 0x756   :  { %10327 = vmatprep.mubr.bf16.mxu1 %v16083_v13  ;;  %13352 = vmatprep.subr.bf16.mxu0 %v16090_v63 }
 0x757   :  { %13374 = vmatprep.subr.bf16.mxu1 %v16093_v5 }
 0x758   :  { %13353 = vmatpush3.bf16.msra.mxu0 %v17747_v10  ;;  %v1503_v10 = vrot.slane %v16008_v58, %v17758_v0 }
 0x759   :  { %13375 = vmatpush3.bf16.msra.mxu1 %v17748_v42  ;;  %13354 = vmatprep.subr.bf16.mxu0 %v17749_v14  ;;  %v1511_v42 = vrot.slane %v16008_v58, %v17760_v54  ;;  %v1523_v14 = vrot.slane %v16008_v58, %v17761_v55 }
 0x75a   :  { %13376 = vmatprep.subr.bf16.mxu1 %v17750_v44  ;;  %v1531_v44 = vrot.slane %v16008_v58, %v17763_v21 }
 0x75c   :  { %13355 = vmatpush3.bf16.msra.mxu0 %v17751_v28  ;;  %v17867_v28 = vld [vmem:[#allocation30_spill] sm:$0xff] }
 0x75d   :  { %13377 = vmatpush3.bf16.msra.mxu1 %v17752_v51  ;;  %13356 = vmatprep.subr.bf16.mxu0 %v17753_v30  ;;  %v7371_v51 = vadd.f32 %v17867_v28, %v1503_v10 }
 0x75e   :  { %13378 = vmatprep.subr.bf16.mxu1 %v17754_v57  ;;  %v17868_v57 = vld [vmem:[#allocation31_spill] sm:$0xff] }
 0x75f   :  { %vm8180_vm15 = vcmp.gt.f32.partialorder %v7371_v51, 0.0 }
 0x760   :  { %13357 = vmatpush3.bf16.msra.mxu0 %v17755_v29  ;;  %v7412_v29 = vadd.f32 %v17868_v57, %v1511_v42 }
 0x761   :  { %13379 = vmatpush3.bf16.msra.mxu1 %v17756_v52  ;;  %13358 = vmatprep.subr.bf16.mxu0 %v17757_v53 }
 0x762   :  { %13380 = vmatprep.subr.bf16.mxu1 %v17759_v32  ;;  %v17869_v32 = vld [vmem:[#allocation36_spill] sm:$0xff]  ;;  %vm8182_vm0 = vcmp.gt.f32.partialorder %v7412_v29, 0.0 }
 0x763   :  { %v7455_v33 = vadd.f32 %v17869_v32, %v1523_v14  ;;  %v8246_v14 = vmul.f32 0.2, %v7412_v29  ;;  %v17878_v32 = vld [vmem:[#allocation131_spill] sm:$0xff] }
 0x764   :  { %13359 = vmatpush3.bf16.msra.mxu0 %v17762_v8 }
 0x765   :  { %13381 = vmatpush3.bf16.msra.mxu1 %v17764_v41  ;;  %13360 = vmatprep.subr.bf16.mxu0 %v17765_v7  ;;  %v7496_v41 = vadd.f32 %v17870_v22, %v1531_v44  ;;  %vm8185_vm1 = vcmp.gt.f32.partialorder %v7455_v33, 0.0  ;;  %v17881_v22 = vld [vmem:[#allocation134_spill] sm:$0xff] }
 0x766   :  { %v13058_v30 = vpop.f32.mrb[80].mxu0  ;;  %13382 = vmatprep.subr.bf16.mxu1 %v17768_v26  ;;  %v8244_v26 = vmul.f32 0.2, %v7371_v51 }
 0x767   :  { %v13080_v52 = vpop.f32.mrb[80].mxu1  ;;  %v13059_v53 = vpop.f32.mrb[81].mxu0  ;;  %v8251_v44 = vmul.f32 0.2, %v7496_v41  ;;  %vm8187_vm2 = vcmp.gt.f32.partialorder %v7496_v41, 0.0 }
 0x768   :  { %v13060_v34 = vadd.f32 %v13059_v53, %v13058_v30  ;;  %v13081_v8 = vpop.f32.mrb[81].mxu1  ;;  %v13061_v50 = vpop.f32.mrb[82].mxu0  ;;  %13361 = vmatpush3.bf16.msra.mxu0 %v15484_v47  ;;  %v8249_v30 = vmul.f32 0.2, %v7455_v33  ;;  %v17877_v53 = vld [vmem:[#allocation130_spill] sm:$0xff] }
 0x769   :  { %v13082_v21 = vadd.f32 %v13081_v8, %v13080_v52  ;;  %v13083_v7 = vpop.f32.mrb[82].mxu1  ;;  %13383 = vmatpush3.bf16.msra.mxu1 %v17775_v40  ;;  %v13062_v10 = vpop.f32.mrb[83].mxu0  ;;  %13362 = vmatprep.subr.bf16.mxu0 %v17776_v23  ;;  %v8308_v40 = vsel %vm8180_vm15, %v7371_v51, %v8244_v26  ;;  %v17875_v51 = vld [vmem:[#allocation128_spill] sm:$0xff]  ;;  %v17880_v8 = vld [vmem:[#allocation133_spill] sm:$0xff]  ;;  %v17885_v26 = vld [vmem:[#allocation138_spill] sm:$0xff] }
 0x76a   :  { %v9718_v42 = vadd.f32 %v13060_v34, %v16050_v4  ;;  %v13084_v28 = vpop.f32.mrb[83].mxu1  ;;  %13384 = vmatprep.subr.bf16.mxu1 %v17777_v48  ;;  %v8310_v4 = vsel %vm8182_vm0, %v7412_v29, %v8246_v14  ;;  %v8313_v57 = vsel %vm8185_vm1, %v7455_v33, %v8249_v30  ;;  %v16134_v52 = vpack.c.bf16 %v8308_v40, %v8308_v40  ;;  %v17876_v29 = vld [vmem:[#allocation129_spill] sm:$0xff]  ;;  %v17879_v33 = vld [vmem:[#allocation132_spill] sm:$0xff] }
 0x76b   :  { %v17883_v7 = vld [vmem:[#allocation136_spill] sm:$0xff]  ;;  %v17884_v10 = vld [vmem:[#allocation137_spill] sm:$0xff] }
 0x76c   :  { %v9758_v47 = vadd.f32 %v13082_v21, %v9718_v42  ;;  %13363 = vmatpush3.bf16.msra.mxu0 %v17778_v37  ;;  %v8315_v21 = vsel %vm8187_vm2, %v7496_v41, %v8251_v44  ;;  %v17871_v37 = vld [vmem:[#allocation124_spill] sm:$0xff]  ;;  %v17882_v41 = vld [vmem:[#allocation135_spill] sm:$0xff]  ;;  %v17890_v40 = vld [vmem:[#allocation141_spill] sm:$0xff] }
 0x76d   :  { %13385 = vmatpush3.bf16.msra.mxu1 %v15514_v19  ;;  %13364 = vmatprep.subr.bf16.mxu0 %v17779_v46  ;;  %v16138_v19 = vpack.c.bf16 %v8310_v4, %v8310_v4  ;;  %v16142_v46 = vpack.c.bf16 %v8313_v57, %v8313_v57  ;;  %v17886_v42 = vld [vmem:[#allocation139_spill] sm:$0xff]  ;;  %v17887_v28 = vld [vmem:[#allocation80_spill] sm:$0xff] }
 0x76e   :  { %v9763_v23 = vsub.f32 0.0, %v9758_v47  ;;  %13386 = vmatprep.subr.bf16.mxu1 %v17780_v59  ;;  %v16146_v59 = vpack.c.bf16 %v8315_v21, %v8315_v21  ;;  %v1519_v14 = vrot.slane %v16008_v58, %v17887_v28  ;;  %v17888_v30 = vld [vmem:[#allocation140_spill] sm:$0xff]  ;;  %v17889_v47 = vld [vmem:[#allocation82_spill] sm:$0xff]  ;;  %v17892_v4 = vld [vmem:[#allocation143_spill] sm:$0xff] }
 0x76f   :  { %v1527_v44 = vrot.slane %v16008_v58, %v17889_v47 }
 0x770   :  { %v9764_v48 = vmul.f32 1.442695, %v9763_v23  ;;  %13365 = vmatpush3.bf16.msra.mxu0 %v15522_v18  ;;  %v17872_v18 = vld [vmem:[#allocation125_spill] sm:$0xff]  ;;  %v17891_v23 = vld [vmem:[#allocation142_spill] sm:$0xff] }
 0x771   :  { %13387 = vmatpush3.bf16.msra.mxu1 %v15526_v56  ;;  %13394 = vmatprep.subr.bf16.mxu0 %v15528_v11  ;;  %v17873_v56 = vld [vmem:[#allocation126_spill] sm:$0xff]  ;;  %v17874_v11 = vld [vmem:[#allocation127_spill] sm:$0xff] }
 0x772   :  { %14321 = vpow2.f32 %v9764_v48  ;;  %13416 = vmatprep.subr.bf16.mxu1 %v17871_v37  ;;  %v17893_v48 = vld [vmem:[#allocation34_spill] sm:$0xff]  ;;  %v17894_v37 = vld [vmem:[#allocation144_spill] sm:$0xff] }
 0x773   :  { %10288 = vmatmul.mubr.bf16.vlgmr.msra.gmra.mrb[108].mxu0 %v16134_v52  ;;  %v7453_v57 = vadd.f32 %v17893_v48, %v1519_v14  ;;  %v17904_v14 = vld [vmem:[#allocation74_spill] sm:$0xff]  ;;  %v17912_v48 = vld [vmem:[#allocation84_spill] sm:$0xff] }
 0x774   :  { %10328 = vmatmul.mubr.bf16.vlgmr.msra.gmra.mrb[108].mxu1 %v16138_v19  ;;  %13395 = vmatpush3.bf16.msra.mxu0 %v17872_v18  ;;  %v17895_v18 = vld [vmem:[#allocation35_spill] sm:$0xff] }
 0x775   :  { %10367 = vmatprep.mubr.bf16.mxu0 %v16142_v46  ;;  %13417 = vmatpush3.bf16.msra.mxu1 %v17873_v56  ;;  %v7494_v56 = vadd.f32 %v17895_v18, %v1527_v44  ;;  %vm8184_vm3 = vcmp.gt.f32.partialorder %v7453_v57, 0.0  ;;  %v17906_v44 = vld [vmem:[#allocation76_spill] sm:$0xff]  ;;  %v17916_v18 = vld [vmem:[#allocation87_spill] sm:$0xff] }
 0x776   :  { %10407 = vmatprep.mubr.bf16.mxu1 %v16146_v59  ;;  %13396 = vmatprep.subr.bf16.mxu0 %v17874_v11 }
 0x777   :  { %13418 = vmatprep.subr.bf16.mxu1 %v17875_v51  ;;  %vm8186_vm4 = vcmp.gt.f32.partialorder %v7494_v56, 0.0 }
 0x778   :  { %13397 = vmatpush3.bf16.msra.mxu0 %v17876_v29 }
 0x779   :  { %13419 = vmatpush3.bf16.msra.mxu1 %v17877_v53  ;;  %13398 = vmatprep.subr.bf16.mxu0 %v17878_v32 }
 0x77a   :  { %13420 = vmatprep.subr.bf16.mxu1 %v17879_v33 }
 0x77c   :  { %v14322_v34 = vpop.eup %14321  ;;  %13399 = vmatpush3.bf16.msra.mxu0 %v17880_v8 }
 0x77d   :  { %v9766_v50 = vadd.f32 1.0, %v14322_v34  ;;  %13421 = vmatpush3.bf16.msra.mxu1 %v17881_v22  ;;  %13400 = vmatprep.subr.bf16.mxu0 %v17882_v41 }
 0x77e   :  { %13422 = vmatprep.subr.bf16.mxu1 %v17883_v7 }
 0x77f   :  { %14323 = vrcp.f32 %v9766_v50  ;;  %v8248_v50 = vmul.f32 0.2, %v7453_v57 }
 0x780   :  { %13401 = vmatpush3.bf16.msra.mxu0 %v17884_v10 }
 0x781   :  { %13423 = vmatpush3.bf16.msra.mxu1 %v17885_v26  ;;  %13402 = vmatprep.subr.bf16.mxu0 %v17886_v42  ;;  %v17897_v42 = vld [vmem:[#allocation67_spill] sm:$0xff] }
 0x782   :  { %13424 = vmatprep.subr.bf16.mxu1 %v17888_v30  ;;  %v17905_v30 = vld [vmem:[#allocation75_spill] sm:$0xff] }
 0x784   :  { %13403 = vmatpush3.bf16.msra.mxu0 %v17890_v40  ;;  %v17907_v40 = vld [vmem:[#allocation77_spill] sm:$0xff] }
 0x785   :  { %13425 = vmatpush3.bf16.msra.mxu1 %v17891_v23  ;;  %13404 = vmatprep.subr.bf16.mxu0 %v17892_v4  ;;  %v17909_v23 = vld [vmem:[#allocation79_spill] sm:$0xff] }
 0x786   :  { %v13102_v21 = vpop.f32.mrb[84].mxu0  ;;  %13426 = vmatprep.subr.bf16.mxu1 %v17894_v37  ;;  %v17911_v4 = vld [vmem:[#allocation83_spill] sm:$0xff]  ;;  %v17915_v37 = vld [vmem:[#allocation24_spill] sm:$0xff] }
 0x787   :  { %v13124_v11 = vpop.f32.mrb[84].mxu1  ;;  %v13103_v51 = vpop.f32.mrb[85].mxu0 }
 0x788   :  { %v13104_v29 = vadd.f32 %v13103_v51, %v13102_v21  ;;  %v13125_v53 = vpop.f32.mrb[85].mxu1  ;;  %v13105_v32 = vpop.f32.mrb[86].mxu0  ;;  %13405 = vmatpush3.bf16.msra.mxu0 %v15610_v43  ;;  %v8250_v43 = vmul.f32 0.2, %v7494_v56  ;;  %v17914_v21 = vld [vmem:[#allocation86_spill] sm:$0xff] }
 0x789   :  { %v14324_v58 = vpop.eup %14323  ;;  %v13126_v33 = vadd.f32 %v13125_v53, %v13124_v11  ;;  %v13127_v34 = vpop.f32.mrb[86].mxu1  ;;  %13427 = vmatpush3.bf16.msra.mxu1 %v17803_v3  ;;  %13406 = vmatprep.subr.bf16.mxu0 %v17804_v49  ;;  %v8312_v3 = vsel %vm8184_vm3, %v7453_v57, %v8248_v50  ;;  %v17913_v57 = vld [vmem:[#allocation85_spill] sm:$0xff] }
 0x78a   :  { %v13106_v8 = vpop.f32.mrb[87].mxu0  ;;  %9768 = vst [vmem:[%s17163_s9] sm:$0xff] %v14324_v58  ;;  %v9804_v22 = vadd.f32 %v13104_v29, %v15837_v16  ;;  %v13128_v41 = vpop.f32.mrb[87].mxu1  ;;  %13428 = vmatprep.subr.bf16.mxu1 %v17805_v61  ;;  %v8314_v49 = vsel %vm8186_vm4, %v7494_v56, %v8250_v43  ;;  %v16188_v10 = vpack.c.bf16 %v8312_v3, %v8312_v3  ;;  %v17896_v61 = vld [vmem:[#allocation66_spill] sm:$0xff]  ;;  %v17917_v11 = vld [vmem:[#allocation25_spill] sm:$0xff] }
 0x78b   :  { %v16192_v26 = vpack.c.bf16 %v8314_v49, %v8314_v49  ;;  %v17919_v50 = vld [vmem:[#allocation89_spill] sm:$0xff]  ;;  %v17920_v41 = vld [vmem:[#allocation90_spill] sm:$0xff]  ;;  %v17921_v49 = vld [vmem:[#allocation91_spill] sm:$0xff] }
 0x78c   :  { %v9844_v7 = vadd.f32 %v13126_v33, %v9804_v22  ;;  %13407 = vmatpush3.bf16.msra.mxu0 %v17806_v36  ;;  %v17903_v36 = vld [vmem:[#allocation73_spill] sm:$0xff]  ;;  %v17918_v33 = vld [vmem:[#allocation88_spill] sm:$0xff] }
 0x78d   :  { %13429 = vmatpush3.bf16.msra.mxu1 %v15628_v62  ;;  %13408 = vmatprep.subr.bf16.mxu0 %v15630_v12  ;;  %v17898_v12 = vld [vmem:[#allocation68_spill] sm:$0xff]  ;;  %v17899_v62 = vld [vmem:[#allocation69_spill] sm:$0xff] }
 0x78e   :  { %13430 = vmatprep.subr.bf16.mxu1 %v15633_v2  ;;  %v17900_v2 = vld [vmem:[#allocation70_spill] sm:$0xff] }
 0x790   :  { %13409 = vmatpush3.bf16.msra.mxu0 %v15636_v6  ;;  %v17901_v6 = vld [vmem:[#allocation71_spill] sm:$0xff] }
 0x791   :  { %13431 = vmatpush3.bf16.msra.mxu1 %v15640_v60  ;;  %13438 = vmatprep.subr.bf16.mxu0 %v17896_v61  ;;  %v17902_v60 = vld [vmem:[#allocation72_spill] sm:$0xff] }
 0x792   :  { %13460 = vmatprep.subr.bf16.mxu1 %v17897_v42 }
 0x793   :  { %10368 = vmatmul.mubr.bf16.vlgmr.msra.gmra.mrb[112].mxu0 %v16188_v10 }
 0x794   :  { %10408 = vmatmul.mubr.bf16.vlgmr.msra.gmra.mrb[112].mxu1 %v16192_v26  ;;  %13439 = vmatpush3.bf16.msra.mxu0 %v17898_v12 }
 0x795   :  { %10453 = vmatprep.mubr.bf16.mxu0 %v16077_v45  ;;  %13461 = vmatpush3.bf16.msra.mxu1 %v17899_v62  ;;  %v17908_v45 = vld [vmem:[#allocation78_spill] sm:$0xff] }
 0x796   :  { %10493 = vmatprep.mubr.bf16.mxu1 %v16083_v13  ;;  %13440 = vmatprep.subr.bf16.mxu0 %v17900_v2  ;;  %v17910_v13 = vld [vmem:[#allocation81_spill] sm:$0xff] }
 0x797   :  { %13462 = vmatprep.subr.bf16.mxu1 %v17901_v6 }
 0x798   :  { %13441 = vmatpush3.bf16.msra.mxu0 %v17902_v60 }
 0x799   :  { %13463 = vmatpush3.bf16.msra.mxu1 %v17903_v36  ;;  %13442 = vmatprep.subr.bf16.mxu0 %v17904_v14 }
 0x79a   :  { %13464 = vmatprep.subr.bf16.mxu1 %v17905_v30 }
 0x79c   :  { %13443 = vmatpush3.bf16.msra.mxu0 %v17906_v44 }
 0x79d   :  { %13465 = vmatpush3.bf16.msra.mxu1 %v17907_v40  ;;  %13444 = vmatprep.subr.bf16.mxu0 %v17908_v45 }
 0x79e   :  { %13466 = vmatprep.subr.bf16.mxu1 %v17909_v23 }
 0x7a0   :  { %13445 = vmatpush3.bf16.msra.mxu0 %v17910_v13 }
 0x7a1   :  { %13467 = vmatpush3.bf16.msra.mxu1 %v17911_v4  ;;  %13446 = vmatprep.subr.bf16.mxu0 %v17912_v48 }
 0x7a2   :  { %13468 = vmatprep.subr.bf16.mxu1 %v17913_v57 }
 0x7a4   :  { %13447 = vmatpush3.bf16.msra.mxu0 %v17914_v21 }
 0x7a5   :  { %13469 = vmatpush3.bf16.msra.mxu1 %v17915_v37  ;;  %13448 = vmatprep.subr.bf16.mxu0 %v17916_v18  ;;  %v17923_v37 = vld [vmem:[#allocation93_spill] sm:$0xff] }
 0x7a6   :  { %v13146_v56 = vpop.f32.mrb[88].mxu0  ;;  %13470 = vmatprep.subr.bf16.mxu1 %v17917_v11  ;;  %v17922_v11 = vld [vmem:[#allocation92_spill] sm:$0xff] }
 0x7a7   :  { %v13168_v51 = vpop.f32.mrb[88].mxu1  ;;  %v13147_v29 = vpop.f32.mrb[89].mxu0 }
 0x7a8   :  { %v13148_v53 = vadd.f32 %v13147_v29, %v13146_v56  ;;  %v13169_v32 = vpop.f32.mrb[89].mxu1  ;;  %v13149_v58 = vpop.f32.mrb[90].mxu0  ;;  %13449 = vmatpush3.bf16.msra.mxu0 %v17918_v33  ;;  %v17924_v56 = vld [vmem:[#allocation94_spill] sm:$0xff]  ;;  %v17925_v29 = vld [vmem:[#allocation95_spill] sm:$0xff] }
 0x7a9   :  { %v13170_v34 = vadd.f32 %v13169_v32, %v13168_v51  ;;  %v13171_v8 = vpop.f32.mrb[90].mxu1  ;;  %13471 = vmatpush3.bf16.msra.mxu1 %v17919_v50  ;;  %v13150_v22 = vpop.f32.mrb[91].mxu0  ;;  %13450 = vmatprep.subr.bf16.mxu0 %v17920_v41  ;;  %v17926_v51 = vld [vmem:[#allocation96_spill] sm:$0xff]  ;;  %v17927_v32 = vld [vmem:[#allocation97_spill] sm:$0xff]  ;;  %v17928_v58 = vld [vmem:[#allocation98_spill] sm:$0xff] }
 0x7aa   :  { %v9884_v43 = vadd.f32 %v13148_v53, %v9844_v7  ;;  %v13172_v3 = vpop.f32.mrb[91].mxu1  ;;  %13472 = vmatprep.subr.bf16.mxu1 %v17921_v49  ;;  %v17929_v8 = vld [vmem:[#allocation99_spill] sm:$0xff]  ;;  %v17930_v7 = vld [vmem:[#allocation100_spill] sm:$0xff]  ;;  %v17931_v53 = vld [vmem:[#allocation101_spill] sm:$0xff] }
 0x7ab   :  { %v17933_v22 = vld [vmem:[#allocation103_spill] sm:$0xff]  ;;  %v17935_v3 = vld [vmem:[#allocation105_spill] sm:$0xff] }
 0x7ac   :  { %v9924_v18 = vadd.f32 %v13170_v34, %v9884_v43  ;;  %13451 = vmatpush3.bf16.msra.mxu0 %v17922_v11  ;;  %v17932_v34 = vld [vmem:[#allocation102_spill] sm:$0xff]  ;;  %v17934_v43 = vld [vmem:[#allocation104_spill] sm:$0xff] }
 0x7ad   :  { %13473 = vmatpush3.bf16.msra.mxu1 %v17923_v37  ;;  %13452 = vmatprep.subr.bf16.mxu0 %v17924_v56 }
 0x7ae   :  { %13474 = vmatprep.subr.bf16.mxu1 %v17925_v29 }
 0x7b0   :  { %13453 = vmatpush3.bf16.msra.mxu0 %v17926_v51 }
 0x7b1   :  { %13475 = vmatpush3.bf16.msra.mxu1 %v17927_v32  ;;  %13482 = vmatprep.subr.bf16.mxu0 %v17928_v58  ;;  %v17949_v58 = vld [vmem:[#allocation29_spill] sm:$0xff]  ;;  %v17951_v32 = vld [vmem:[#allocation115_spill] sm:$0xff] }
 0x7b2   :  { %13504 = vmatprep.subr.bf16.mxu1 %v17929_v8  ;;  %v17936_v8 = vld [vmem:[#allocation106_spill] sm:$0xff] }
 0x7b3   :  { %10454 = vmatmul.mubr.bf16.vlgmr.msra.gmra.mrb[116].mxu0 %v16134_v52  ;;  %v17937_v52 = vld [vmem:[#allocation107_spill] sm:$0xff] }
 0x7b4   :  { %10494 = vmatmul.mubr.bf16.vlgmr.msra.gmra.mrb[116].mxu1 %v16138_v19  ;;  %13483 = vmatpush3.bf16.msra.mxu0 %v17930_v7  ;;  %v17938_v19 = vld [vmem:[#allocation108_spill] sm:$0xff]  ;;  %v17939_v7 = vld [vmem:[#allocation109_spill] sm:$0xff] }
 0x7b5   :  { %10533 = vmatprep.mubr.bf16.mxu0 %v16142_v46  ;;  %13505 = vmatpush3.bf16.msra.mxu1 %v17931_v53  ;;  %v17940_v46 = vld [vmem:[#allocation110_spill] sm:$0xff]  ;;  %v17941_v53 = vld [vmem:[#allocation111_spill] sm:$0xff] }
 0x7b6   :  { %10573 = vmatprep.mubr.bf16.mxu1 %v16146_v59  ;;  %13484 = vmatprep.subr.bf16.mxu0 %v17932_v34  ;;  %v17942_v59 = vld [vmem:[#allocation112_spill] sm:$0xff] }
 0x7b7   :  { %13506 = vmatprep.subr.bf16.mxu1 %v17933_v22  ;;  %v16248_v34 = vld [vmem:[#allocation10 + $0x20] sm:$0xff]  ;;  %v17943_v22 = vld [vmem:[#allocation22_spill] sm:$0xff] }
 0x7b8   :  { %13485 = vmatpush3.bf16.msra.mxu0 %v17934_v43  ;;  %v17944_v43 = vld [vmem:[#allocation113_spill] sm:$0xff] }
 0x7b9   :  { %13507 = vmatpush3.bf16.msra.mxu1 %v17935_v3  ;;  %13486 = vmatprep.subr.bf16.mxu0 %v17936_v8  ;;  %v17945_v3 = vld [vmem:[#allocation23_spill] sm:$0xff]  ;;  %v17946_v8 = vld [vmem:[#allocation21_spill] sm:$0xff] }
 0x7ba   :  { %13508 = vmatprep.subr.bf16.mxu1 %v17937_v52  ;;  %v1539_v52 = vrot.slane %v16248_v34, %v17946_v8 }
 0x7bc   :  { %13487 = vmatpush3.bf16.msra.mxu0 %v17938_v19  ;;  %v17947_v19 = vld [vmem:[#allocation28_spill] sm:$0xff] }
 0x7bd   :  { %13509 = vmatpush3.bf16.msra.mxu1 %v17939_v7  ;;  %13488 = vmatprep.subr.bf16.mxu0 %v17940_v46  ;;  %v17948_v7 = vld [vmem:[#allocation54_spill] sm:$0xff] }
 0x7be   :  { %13510 = vmatprep.subr.bf16.mxu1 %v17941_v53  ;;  %v1547_v46 = vrot.slane %v16248_v34, %v17948_v7  ;;  %v17950_v53 = vld [vmem:[#allocation114_spill] sm:$0xff] }
 0x7c0   :  { %13489 = vmatpush3.bf16.msra.mxu0 %v17942_v59 }
 0x7c1   :  { %13511 = vmatpush3.bf16.msra.mxu1 %v17943_v22  ;;  %13490 = vmatprep.subr.bf16.mxu0 %v17944_v43  ;;  %v17952_v43 = vld [vmem:[#allocation40_spill] sm:$0xff] }
 0x7c2   :  { %13512 = vmatprep.subr.bf16.mxu1 %v17945_v3  ;;  %v7537_v29 = vadd.f32 %v17952_v43, %v1539_v52  ;;  %v16316_v52 = vld [vmem:[#allocation12 + $0x298] sm:$0xff]  }
 0x7c3   :  { %17965 = vst [vmem:[#allocation31_spill] sm:$0xff] %v16316_v52 }
 0x7c4   :  { %13491 = vmatpush3.bf16.msra.mxu0 %v17947_v19  ;;  %v17953_v19 = vld [vmem:[#allocation41_spill] sm:$0xff]  ;;  %v8253_v49 = vmul.f32 0.2, %v7537_v29  ;;  %vm8189_vm5 = vcmp.gt.f32.partialorder %v7537_v29, 0.0 }
 0x7c5   :  { %13513 = vmatpush3.bf16.msra.mxu1 %v17949_v58  ;;  %13492 = vmatprep.subr.bf16.mxu0 %v17950_v53  ;;  %v7578_v8 = vadd.f32 %v17953_v19, %v1547_v46  ;;  %v16319_v19 = vld [vmem:[#allocation12 + $0x260] sm:$0xff]   ;;  %v1535_v46 = vrot.slane %v16248_v34, %v17758_v0  ;;  %v16339_v0 = vld [vmem:[#allocation12 + $0x268] sm:$0xff]  }
 0x7c6   :  { %v13190_v59 = vpop.f32.mrb[92].mxu0  ;;  %13514 = vmatprep.subr.bf16.mxu1 %v17951_v32  ;;  %17966 = vst [vmem:[#allocation36_spill] sm:$0xff] %v16319_v19  ;;  %17971 = vst [vmem:[#allocation126_spill] sm:$0xff] %v16339_v0 }
 0x7c7   :  { %v13212_v22 = vpop.f32.mrb[92].mxu1  ;;  %v13191_v51 = vpop.f32.mrb[93].mxu0  ;;  %vm8191_vm6 = vcmp.gt.f32.partialorder %v7578_v8, 0.0 }
 0x7c8   :  { %v13192_v3 = vadd.f32 %v13191_v51, %v13190_v59  ;;  %v13213_v56 = vpop.f32.mrb[93].mxu1  ;;  %v13193_v37 = vpop.f32.mrb[94].mxu0  ;;  %13493 = vmatpush3.bf16.msra.mxu0 %v16036_v15  ;;  %v17955_v51 = vld [vmem:[#allocation121_spill] sm:$0xff]  ;;  %v16324_v59 = vld [vmem:[#allocation12 + $0x2e0] sm:$0xff]  }
 0x7c9   :  { %v13214_v11 = vadd.f32 %v13213_v56, %v13212_v22  ;;  %v13215_v7 = vpop.f32.mrb[94].mxu1  ;;  %13515 = vmatpush3.bf16.msra.mxu1 %v16040_v25  ;;  %v13194_v58 = vpop.f32.mrb[95].mxu0  ;;  %13494 = vmatprep.subr.bf16.mxu0 %v16043_v39  ;;  %v8255_v37 = vmul.f32 0.2, %v7578_v8  ;;  %v17954_v56 = vld [vmem:[#allocation117_spill] sm:$0xff]  ;;  %v16310_v22 = vld [vmem:[#allocation12 + $0x2d8] sm:$0xff]  }
 0x7ca   :  { %v9964_v53 = vadd.f32 %v13192_v3, %v9924_v18  ;;  %v13216_v32 = vpop.f32.mrb[95].mxu1  ;;  %13516 = vmatprep.subr.bf16.mxu1 %v16047_v1  ;;  %v8317_v18 = vsel %vm8189_vm5, %v7537_v29, %v8253_v49  ;;  %v16289_v49 = vld [vmem:[#allocation12 + $0x208] sm:$0xff]   ;;  %v16298_v29 = vld [vmem:[#allocation12 + $0x2d0] sm:$0xff]   ;;  %17963 = vst [vmem:[#allocation33_spill] sm:$0xff] %v16310_v22  ;;  %v16313_v3 = vld [vmem:[#allocation12 + $0x218] sm:$0xff]  }
 0x7cb   :  { %v16278_v32 = vpack.c.bf16 %v8317_v18, %v8317_v18  ;;  %17956 = vst [vmem:[#allocation26_spill] sm:$0xff] %v16289_v49  ;;  %17959 = vst [vmem:[#allocation146_spill] sm:$0xff] %v16298_v29  ;;  %v16304_v7 = vld [vmem:[#allocation12 + $0x290] sm:$0xff]   ;;  %v1555_v18 = vrot.slane %v16248_v34, %v17761_v55  ;;  %v17973_v55 = vld [vmem:[#allocation39_spill] sm:$0xff] }
 0x7cc   :  { %v16267_v43 = vadd.f32 %v13214_v11, %v9964_v53  ;;  %13495 = vmatpush3.bf16.msra.mxu0 %v16052_v35  ;;  %v8319_v11 = vsel %vm8191_vm6, %v7578_v8, %v8255_v37  ;;  %v16301_v8 = vld [vmem:[#allocation12 + $0x210] sm:$0xff]   ;;  %17961 = vst [vmem:[#allocation148_spill] sm:$0xff] %v16304_v7  ;;  %v16307_v53 = vld [vmem:[#allocation12 + $0x258] sm:$0xff]   ;;  %17964 = vst [vmem:[#allocation30_spill] sm:$0xff] %v16313_v3  ;;  %v1543_v37 = vrot.slane %v16248_v34, %v17760_v54 }
 0x7cd   :  { %13517 = vmatpush3.bf16.msra.mxu1 %v16055_v38  ;;  %13496 = vmatprep.subr.bf16.mxu0 %v16058_v31  ;;  %v16282_v58 = vpack.c.bf16 %v8319_v11, %v8319_v11  ;;  %17960 = vst [vmem:[#allocation147_spill] sm:$0xff] %v16301_v8  ;;  %17962 = vst [vmem:[#allocation32_spill] sm:$0xff] %v16307_v53  ;;  %v16331_v11 = vld [vmem:[#allocation12 + $0x220] sm:$0xff]  }
 0x7ce   :  { %13518 = vmatprep.subr.bf16.mxu1 %v17954_v56  ;;  %17967 = vst [vmem:[#allocation37_spill] sm:$0xff] %v16324_v59  ;;  %17968 = vst [vmem:[#allocation124_spill] sm:$0xff] %v16331_v11 }
 0x7d0   :  { %13497 = vmatpush3.bf16.msra.mxu0 %v16064_v24 }
 0x7d1   :  { %13519 = vmatpush3.bf16.msra.mxu1 %v16067_v9  ;;  %13526 = vmatprep.subr.bf16.mxu0 %v17955_v51 }
 0x7d2   :  { %13548 = vmatprep.subr.bf16.mxu1 %v16073_v27 }
 0x7d3   :  { %10534 = vmatmul.mubr.bf16.vlgmr.msra.gmra.mrb[120].mxu0 %v16188_v10  ;;  %v16292_v10 = vld [vmem:[#allocation12 + $0x288] sm:$0xff]  }
 0x7d4   :  { %10574 = vmatmul.mubr.bf16.vlgmr.msra.gmra.mrb[120].mxu1 %v16192_v26  ;;  %13527 = vmatpush3.bf16.msra.mxu0 %v16080_v20  ;;  %17957 = vst [vmem:[#allocation27_spill] sm:$0xff] %v16292_v10  ;;  %v16295_v26 = vld [vmem:[#allocation12 + $0x250] sm:$0xff]  }
 0x7d5   :  { %10613 = vmatprep.mubr.bf16.mxu0 %v16278_v32  ;;  %13549 = vmatpush3.bf16.msra.mxu1 %v16086_v17  ;;  %17958 = vst [vmem:[#allocation145_spill] sm:$0xff] %v16295_v26 }
 0x7d6   :  { %10653 = vmatprep.mubr.bf16.mxu1 %v16282_v58  ;;  %13528 = vmatprep.subr.bf16.mxu0 %v16090_v63  ;;  %v16352_v63 = vld [vmem:[#allocation12 + $0x2a8] sm:$0xff]  }
 0x7d7   :  { %13550 = vmatprep.subr.bf16.mxu1 %v16093_v5 }
 0x7d8   :  { %13529 = vmatpush3.bf16.msra.mxu0 %v16289_v49  ;;  %v16348_v49 = vld [vmem:[#allocation12 + $0x228] sm:$0xff]  }
 0x7d9   :  { %13551 = vmatpush3.bf16.msra.mxu1 %v16292_v10  ;;  %13530 = vmatprep.subr.bf16.mxu0 %v16295_v26 }
 0x7da   :  { %13552 = vmatprep.subr.bf16.mxu1 %v16298_v29 }
 0x7dc   :  { %13531 = vmatpush3.bf16.msra.mxu0 %v16301_v8 }
 0x7dd   :  { %13553 = vmatpush3.bf16.msra.mxu1 %v16304_v7  ;;  %13532 = vmatprep.subr.bf16.mxu0 %v16307_v53  ;;  %v16343_v53 = vld [vmem:[#allocation12 + $0x2e8] sm:$0xff]  }
 0x7de   :  { %13554 = vmatprep.subr.bf16.mxu1 %v16310_v22 }
 0x7e0   :  { %13533 = vmatpush3.bf16.msra.mxu0 %v16313_v3  ;;  %v16336_v3 = vld [vmem:[#allocation12 + $0x2a0] sm:$0xff]  }
 0x7e1   :  { %13555 = vmatpush3.bf16.msra.mxu1 %v16316_v52  ;;  %13534 = vmatprep.subr.bf16.mxu0 %v16319_v19  ;;  %v17969_v52 = vld [vmem:[#allocation57_spill] sm:$0xff]  ;;  %17970 = vst [vmem:[#allocation125_spill] sm:$0xff] %v16336_v3 }
 0x7e2   :  { %13556 = vmatprep.subr.bf16.mxu1 %v16324_v59  ;;  %v1563_v19 = vrot.slane %v16248_v34, %v17969_v52  ;;  %v17972_v59 = vld [vmem:[#allocation38_spill] sm:$0xff]  ;;  %v17974_v52 = vld [vmem:[#allocation44_spill] sm:$0xff] }
 0x7e3   :  { %v7535_v54 = vadd.f32 %v17972_v59, %v1535_v46  ;;  %v7619_v29 = vadd.f32 %v17974_v52, %v1555_v18  ;;  %v16359_v52 = vld [vmem:[#allocation12 + $0x2f0] sm:$0xff]  }
 0x7e4   :  { %13535 = vmatpush3.bf16.msra.mxu0 %v16331_v11  ;;  %v7576_v11 = vadd.f32 %v17973_v55, %v1543_v37  ;;  %v16355_v37 = vld [vmem:[#allocation12 + $0x270] sm:$0xff]   ;;  %17977 = vst [vmem:[#allocation128_spill] sm:$0xff] %v16359_v52 }
 0x7e5   :  { %13557 = vmatpush3.bf16.msra.mxu1 %v16336_v3  ;;  %13536 = vmatprep.subr.bf16.mxu0 %v16339_v0  ;;  %v17975_v0 = vld [vmem:[#allocation45_spill] sm:$0xff]  ;;  %17976 = vst [vmem:[#allocation127_spill] sm:$0xff] %v16355_v37  ;;  %vm8188_vm7 = vcmp.gt.f32.partialorder %v7535_v54, 0.0  ;;  %vm8193_vm9 = vcmp.gt.f32.partialorder %v7619_v29, 0.0 }
 0x7e6   :  { %v13234_v22 = vpop.f32.mrb[96].mxu0  ;;  %13558 = vmatprep.subr.bf16.mxu1 %v16343_v53  ;;  %v7660_v46 = vadd.f32 %v17975_v0, %v1563_v19  ;;  %v8254_v0 = vmul.f32 0.2, %v7576_v11  ;;  %vm8190_vm8 = vcmp.gt.f32.partialorder %v7576_v11, 0.0  ;;  %v16365_v18 = vld [vmem:[#allocation12 + $0x2b0] sm:$0xff]  }
 0x7e7   :  { %v13256_v7 = vpop.f32.mrb[96].mxu1  ;;  %v13235_v8 = vpop.f32.mrb[97].mxu0  ;;  %17979 = vst [vmem:[#allocation130_spill] sm:$0xff] %v16365_v18 }
 0x7e8   :  { %v13236_v26 = vadd.f32 %v13235_v8, %v13234_v22  ;;  %v13257_v10 = vpop.f32.mrb[97].mxu1  ;;  %v13237_v3 = vpop.f32.mrb[98].mxu0  ;;  %13537 = vmatpush3.bf16.msra.mxu0 %v16348_v49  ;;  %v8252_v8 = vmul.f32 0.2, %v7535_v54  ;;  %v8259_v19 = vmul.f32 0.2, %v7660_v46 }
 0x7e9   :  { %v13258_v59 = vadd.f32 %v13257_v10, %v13256_v7  ;;  %v13259_v5 = vpop.f32.mrb[98].mxu1  ;;  %13559 = vmatpush3.bf16.msra.mxu1 %v16352_v63  ;;  %v13238_v55 = vpop.f32.mrb[99].mxu0  ;;  %13538 = vmatprep.subr.bf16.mxu0 %v16355_v37  ;;  %v16362_v7 = vld [vmem:[#allocation12 + $0x230] sm:$0xff]   ;;  %vm8195_vm10 = vcmp.gt.f32.partialorder %v7660_v46, 0.0  ;;  %v16380_v37 = vld [vmem:[#allocation12 + $0x2b8] sm:$0xff]  }
 0x7ea   :  { %v10044_v22 = vadd.f32 %v13236_v26, %v16267_v43  ;;  %v13260_v3 = vpop.f32.mrb[99].mxu1  ;;  %13560 = vmatprep.subr.bf16.mxu1 %v16359_v52  ;;  %v8257_v5 = vmul.f32 0.2, %v7619_v29  ;;  %17978 = vst [vmem:[#allocation129_spill] sm:$0xff] %v16362_v7  ;;  %v16368_v43 = vld [vmem:[#allocation12 + $0x278] sm:$0xff]   ;;  %v8316_v26 = vsel %vm8188_vm7, %v7535_v54, %v8252_v8  ;;  %17982 = vst [vmem:[#allocation133_spill] sm:$0xff] %v16380_v37 }
 0x7eb   :  { %v16371_v3 = vld [vmem:[#allocation12 + $0x2f8] sm:$0xff]   ;;  %v16383_v54 = vld [vmem:[#allocation12 + $0x340] sm:$0xff]   ;;  %v8323_v8 = vsel %vm8195_vm10, %v7660_v46, %v8259_v19  ;;  %v16405_v19 = vld [vmem:[#allocation12 + $0x348] sm:$0xff]  }
 0x7ec   :  { %v10084_v10 = vadd.f32 %v13258_v59, %v10044_v22  ;;  %13539 = vmatpush3.bf16.msra.mxu0 %v16362_v7  ;;  %17980 = vst [vmem:[#allocation131_spill] sm:$0xff] %v16371_v3  ;;  %v8318_v59 = vsel %vm8190_vm8, %v7576_v11, %v8254_v0  ;;  %v16375_v7 = vld [vmem:[#allocation12 + $0x238] sm:$0xff]   ;;  %v8321_v52 = vsel %vm8193_vm9, %v7619_v29, %v8257_v5  ;;  %17983 = vst [vmem:[#allocation134_spill] sm:$0xff] %v16383_v54  ;;  %v16388_v11 = vld [vmem:[#allocation12 + $0x3c0] sm:$0xff]  }
 0x7ed   :  { %13561 = vmatpush3.bf16.msra.mxu1 %v16365_v18  ;;  %13540 = vmatprep.subr.bf16.mxu0 %v16368_v43  ;;  %17981 = vst [vmem:[#allocation132_spill] sm:$0xff] %v16375_v7  ;;  %v16378_v18 = vpack.c.bf16 %v8316_v26, %v8316_v26  ;;  %17984 = vst [vmem:[#allocation135_spill] sm:$0xff] %v16388_v11  ;;  %v16392_v29 = vpack.c.bf16 %v8321_v52, %v8321_v52  ;;  %v16395_v0 = vld [vmem:[#allocation12 + $0x300] sm:$0xff]   ;;  %v16408_v52 = vld [vmem:[#allocation12 + $0x3c8] sm:$0xff]  }
 0x7ee   :  { %v10089_v55 = vsub.f32 0.0, %v10084_v10  ;;  %13562 = vmatprep.subr.bf16.mxu1 %v16371_v3  ;;  %v16386_v10 = vpack.c.bf16 %v8318_v59, %v8318_v59  ;;  %17985 = vst [vmem:[#allocation136_spill] sm:$0xff] %v16395_v0  ;;  %v16398_v5 = vpack.c.bf16 %v8323_v8, %v8323_v8  ;;  %v16401_v46 = vld [vmem:[#allocation12 + $0x380] sm:$0xff]   ;;  %17987 = vst [vmem:[#allocation138_spill] sm:$0xff] %v16405_v19  ;;  %v16411_v26 = vld [vmem:[#allocation12 + $0x308] sm:$0xff]  }
 0x7ef   :  { %17986 = vst [vmem:[#allocation137_spill] sm:$0xff] %v16401_v46  ;;  %17988 = vst [vmem:[#allocation139_spill] sm:$0xff] %v16408_v52  ;;  %v16417_v59 = vld [vmem:[#allocation12 + $0x350] sm:$0xff]  }
 0x7f0   :  { %v10090_v22 = vmul.f32 1.442695, %v10089_v55  ;;  %13541 = vmatpush3.bf16.msra.mxu0 %v16375_v7  ;;  %17989 = vst [vmem:[#allocation140_spill] sm:$0xff] %v16411_v26  ;;  %v16414_v55 = vld [vmem:[#allocation12 + $0x388] sm:$0xff]   ;;  %17991 = vst [vmem:[#allocation142_spill] sm:$0xff] %v16417_v59 }
 0x7f1   :  { %13563 = vmatpush3.bf16.msra.mxu1 %v16380_v37  ;;  %13570 = vmatprep.subr.bf16.mxu0 %v16383_v54  ;;  %17990 = vst [vmem:[#allocation141_spill] sm:$0xff] %v16414_v55  ;;  %v16465_v7 = vld [vmem:[#allocation12 + $0x328] sm:$0xff]  }
 0x7f2   :  { %14325 = vpow2.f32 %v10090_v22  ;;  %13592 = vmatprep.subr.bf16.mxu1 %v16388_v11  ;;  %v16420_v22 = vld [vmem:[#allocation12 + $0x3d0] sm:$0xff]  }
 0x7f3   :  { %10614 = vmatmul.mubr.bf16.vlgmr.msra.gmra.mrb[124].mxu0 %v16378_v18  ;;  %17992 = vst [vmem:[#allocation143_spill] sm:$0xff] %v16420_v22 }
 0x7f4   :  { %10654 = vmatmul.mubr.bf16.vlgmr.msra.gmra.mrb[124].mxu1 %v16386_v10  ;;  %13571 = vmatpush3.bf16.msra.mxu0 %v16395_v0  ;;  %v16461_v0 = vld [vmem:[#allocation12 + $0x3e8] sm:$0xff]  }
 0x7f5   :  { %10693 = vmatprep.mubr.bf16.mxu0 %v16392_v29  ;;  %13593 = vmatpush3.bf16.msra.mxu1 %v16401_v46  ;;  %v16426_v46 = vld [vmem:[#allocation12 + $0x390] sm:$0xff]   ;;  %18005 = vst [vmem:[#allocation74_spill] sm:$0xff] %v16461_v0 }
 0x7f6   :  { %10733 = vmatprep.mubr.bf16.mxu1 %v16398_v5  ;;  %13572 = vmatprep.subr.bf16.mxu0 %v16405_v19  ;;  %v16423_v19 = vld [vmem:[#allocation12 + $0x310] sm:$0xff]   ;;  %17994 = vst [vmem:[#allocation144_spill] sm:$0xff] %v16426_v46 }
 0x7f7   :  { %13594 = vmatprep.subr.bf16.mxu1 %v16408_v52  ;;  %17993 = vst [vmem:[#allocation34_spill] sm:$0xff] %v16423_v19 }
 0x7f8   :  { %13573 = vmatpush3.bf16.msra.mxu0 %v16411_v26  ;;  %v16429_v26 = vld [vmem:[#allocation12 + $0x358] sm:$0xff]  }
 0x7f9   :  { %13595 = vmatpush3.bf16.msra.mxu1 %v16414_v55  ;;  %13574 = vmatprep.subr.bf16.mxu0 %v16417_v59  ;;  %17995 = vst [vmem:[#allocation35_spill] sm:$0xff] %v16429_v26  ;;  %v16432_v55 = vld [vmem:[#allocation12 + $0x3d8] sm:$0xff]  }
 0x7fa   :  { %13596 = vmatprep.subr.bf16.mxu1 %v16420_v22  ;;  %17996 = vst [vmem:[#allocation66_spill] sm:$0xff] %v16432_v55  ;;  %v16435_v22 = vld [vmem:[#allocation12 + $0x318] sm:$0xff]  }
 0x7fb   :  { %17997 = vst [vmem:[#allocation67_spill] sm:$0xff] %v16435_v22  ;;  %v16438_v59 = vld [vmem:[#allocation12 + $0x398] sm:$0xff]  }
 0x7fc   :  { %v14326_v8 = vpop.eup %14325  ;;  %13575 = vmatpush3.bf16.msra.mxu0 %v16423_v19  ;;  %17998 = vst [vmem:[#allocation68_spill] sm:$0xff] %v16438_v59 }
 0x7fd   :  { %v10092_v52 = vadd.f32 1.0, %v14326_v8  ;;  %13597 = vmatpush3.bf16.msra.mxu1 %v16426_v46  ;;  %13576 = vmatprep.subr.bf16.mxu0 %v16429_v26  ;;  %v16441_v8 = vld [vmem:[#allocation12 + $0x360] sm:$0xff]   ;;  %v1551_v26 = vrot.slane %v16248_v34, %v17887_v28  ;;  %v18004_v28 = vld [vmem:[#allocation42_spill] sm:$0xff] }
 0x7fe   :  { %13598 = vmatprep.subr.bf16.mxu1 %v16432_v55  ;;  %17999 = vst [vmem:[#allocation69_spill] sm:$0xff] %v16441_v8  ;;  %v16446_v46 = vld [vmem:[#allocation12 + $0x3e0] sm:$0xff]  }
 0x7ff   :  { %14327 = vrcp.f32 %v10092_v52  ;;  %18000 = vst [vmem:[#allocation70_spill] sm:$0xff] %v16446_v46  ;;  %v1559_v52 = vrot.slane %v16248_v34, %v17889_v47  ;;  %v16451_v55 = vld [vmem:[#allocation12 + $0x320] sm:$0xff]  }
 0x800   :  { %13577 = vmatpush3.bf16.msra.mxu0 %v16435_v22  ;;  %18001 = vst [vmem:[#allocation71_spill] sm:$0xff] %v16451_v55  ;;  %v16454_v22 = vld [vmem:[#allocation12 + $0x3a0] sm:$0xff]  }
 0x801   :  { %13599 = vmatpush3.bf16.msra.mxu1 %v16438_v59  ;;  %13578 = vmatprep.subr.bf16.mxu0 %v16441_v8  ;;  %18002 = vst [vmem:[#allocation72_spill] sm:$0xff] %v16454_v22  ;;  %v16457_v59 = vld [vmem:[#allocation12 + $0x368] sm:$0xff]   ;;  %v7617_v8 = vadd.f32 %v18004_v28, %v1551_v26  ;;  %v18006_v34 = vld [vmem:[#allocation43_spill] sm:$0xff] }
 0x802   :  { %13600 = vmatprep.subr.bf16.mxu1 %v16446_v46  ;;  %18003 = vst [vmem:[#allocation73_spill] sm:$0xff] %v16457_v59  ;;  %v7658_v47 = vadd.f32 %v18006_v34, %v1559_v52  ;;  %v16468_v28 = vld [vmem:[#allocation12 + $0x3a8] sm:$0xff]   ;;  %v16484_v34 = vld [vmem:[#allocation12 + $0x3b0] sm:$0xff]  }
 0x803   :  { %v8256_v52 = vmul.f32 0.2, %v7617_v8  ;;  %vm8192_vm11 = vcmp.gt.f32.partialorder %v7617_v8, 0.0  ;;  %18007 = vst [vmem:[#allocation75_spill] sm:$0xff] %v16484_v34 }
 0x804   :  { %13579 = vmatpush3.bf16.msra.mxu0 %v16451_v55  ;;  %vm8194_vm12 = vcmp.gt.f32.partialorder %v7658_v47, 0.0 }
 0x805   :  { %13601 = vmatpush3.bf16.msra.mxu1 %v16454_v22  ;;  %13580 = vmatprep.subr.bf16.mxu0 %v16457_v59 }
 0x806   :  { %v13278_v19 = vpop.f32.mrb[100].mxu0  ;;  %13602 = vmatprep.subr.bf16.mxu1 %v16461_v0  ;;  %v16471_v0 = vld [vmem:[#allocation12 + $0x370] sm:$0xff]  }
 0x807   :  { %v13300_v46 = vpop.f32.mrb[100].mxu1  ;;  %v13279_v11 = vpop.f32.mrb[101].mxu0 }
 0x808   :  { %v13280_v55 = vadd.f32 %v13279_v11, %v13278_v19  ;;  %v13301_v54 = vpop.f32.mrb[101].mxu1  ;;  %v13281_v37 = vpop.f32.mrb[102].mxu0  ;;  %13581 = vmatpush3.bf16.msra.mxu0 %v16465_v7  ;;  %v16478_v19 = vld [vmem:[#allocation12 + $0x3f0] sm:$0xff]  }
 0x809   :  { %v14328_v22 = vpop.eup %14327  ;;  %v13302_v59 = vadd.f32 %v13301_v54, %v13300_v46  ;;  %v13303_v3 = vpop.f32.mrb[102].mxu1  ;;  %13603 = vmatpush3.bf16.msra.mxu1 %v16468_v28  ;;  %13582 = vmatprep.subr.bf16.mxu0 %v16471_v0  ;;  %v16481_v46 = vld [vmem:[#allocation12 + $0x330] sm:$0xff]  }
 0x80a   :  { %v13282_v26 = vpop.f32.mrb[103].mxu0  ;;  %10094 = vst [vmem:[%s17163_s9 + $0x8] sm:$0xff] %v14328_v22  ;;  %v10130_v37 = vadd.f32 %v13280_v55, %v15837_v16  ;;  %v13304_v11 = vpop.f32.mrb[103].mxu1  ;;  %13604 = vmatprep.subr.bf16.mxu1 %v16478_v19  ;;  %v8258_v3 = vmul.f32 0.2, %v7658_v47  ;;  %v16487_v22 = vld [vmem:[#allocation12 + $0x378] sm:$0xff]   ;;  %v8320_v16 = vsel %vm8192_vm11, %v7617_v8, %v8256_v52 }
 0x80b   :  { %v16490_v55 = vld [vmem:[#allocation12 + $0x3f8] sm:$0xff]   ;;  %v18021_v8 = vld [vmem:[#allocation101_spill] sm:$0xff] }
 0x80c   :  { %v10170_v54 = vadd.f32 %v13302_v59, %v10130_v37  ;;  %13583 = vmatpush3.bf16.msra.mxu0 %v16481_v46  ;;  %v8322_v26 = vsel %vm8194_vm12, %v7658_v47, %v8258_v3  ;;  %v16493_v11 = vld [vmem:[#allocation12 + $0x338] sm:$0xff]   ;;  %v16496_v59 = vpack.c.bf16 %v8320_v16, %v8320_v16  ;;  %v18008_v47 = vld [vmem:[#allocation24_spill] sm:$0xff]  ;;  %v18025_v16 = vld [vmem:[#allocation105_spill] sm:$0xff] }
 0x80d   :  { %13605 = vmatpush3.bf16.msra.mxu1 %v16484_v34  ;;  %13584 = vmatprep.subr.bf16.mxu0 %v16487_v22  ;;  %v16498_v37 = vld [vmem:[#allocation12 + $0x3b8] sm:$0xff]   ;;  %v16502_v34 = vpack.c.bf16 %v8322_v26, %v8322_v26 }
 0x80e   :  { %13606 = vmatprep.subr.bf16.mxu1 %v16490_v55  ;;  %v18022_v52 = vld [vmem:[#allocation102_spill] sm:$0xff]  ;;  %v18023_v3 = vld [vmem:[#allocation103_spill] sm:$0xff] }
 0x80f   :  { %v18026_v26 = vld [vmem:[#allocation106_spill] sm:$0xff] }
 0x810   :  { %13585 = vmatpush3.bf16.msra.mxu0 %v16493_v11 }
 0x811   :  { %13607 = vmatpush3.bf16.msra.mxu1 %v16498_v37  ;;  %13614 = vmatprep.subr.bf16.mxu0 %v17896_v61  ;;  %v18009_v61 = vld [vmem:[#allocation87_spill] sm:$0xff] }
 0x812   :  { %13636 = vmatprep.subr.bf16.mxu1 %v17897_v42 }
 0x813   :  { %10694 = vmatmul.mubr.bf16.vlgmr.msra.gmra.mrb[128].mxu0 %v16496_v59 }
 0x814   :  { %10734 = vmatmul.mubr.bf16.vlgmr.msra.gmra.mrb[128].mxu1 %v16502_v34  ;;  %13615 = vmatpush3.bf16.msra.mxu0 %v17898_v12  ;;  %v18010_v12 = vld [vmem:[#allocation25_spill] sm:$0xff] }
 0x815   :  { %10779 = vmatprep.mubr.bf16.mxu0 %v16278_v32  ;;  %13637 = vmatpush3.bf16.msra.mxu1 %v17899_v62  ;;  %v18017_v32 = vld [vmem:[#allocation97_spill] sm:$0xff] }
 0x816   :  { %10819 = vmatprep.mubr.bf16.mxu1 %v16282_v58  ;;  %13616 = vmatprep.subr.bf16.mxu0 %v17900_v2  ;;  %v18020_v58 = vld [vmem:[#allocation100_spill] sm:$0xff] }
 0x817   :  { %13638 = vmatprep.subr.bf16.mxu1 %v17901_v6 }
 0x818   :  { %13617 = vmatpush3.bf16.msra.mxu0 %v17902_v60 }
 0x819   :  { %13639 = vmatpush3.bf16.msra.mxu1 %v17903_v36  ;;  %13618 = vmatprep.subr.bf16.mxu0 %v17904_v14 }
 0x81a   :  { %13640 = vmatprep.subr.bf16.mxu1 %v17905_v30 }
 0x81c   :  { %13619 = vmatpush3.bf16.msra.mxu0 %v17906_v44 }
 0x81d   :  { %13641 = vmatpush3.bf16.msra.mxu1 %v17907_v40  ;;  %13620 = vmatprep.subr.bf16.mxu0 %v17908_v45 }
 0x81e   :  { %13642 = vmatprep.subr.bf16.mxu1 %v17909_v23  ;;  %v18011_v23 = vld [vmem:[#allocation91_spill] sm:$0xff] }
 0x820   :  { %13621 = vmatpush3.bf16.msra.mxu0 %v17910_v13 }
 0x821   :  { %13643 = vmatpush3.bf16.msra.mxu1 %v17911_v4  ;;  %13622 = vmatprep.subr.bf16.mxu0 %v17912_v48  ;;  %v18012_v4 = vld [vmem:[#allocation92_spill] sm:$0xff]  ;;  %v18013_v48 = vld [vmem:[#allocation93_spill] sm:$0xff] }
 0x822   :  { %13644 = vmatprep.subr.bf16.mxu1 %v17913_v57  ;;  %v18014_v57 = vld [vmem:[#allocation94_spill] sm:$0xff] }
 0x824   :  { %13623 = vmatpush3.bf16.msra.mxu0 %v17914_v21  ;;  %v18015_v21 = vld [vmem:[#allocation95_spill] sm:$0xff] }
 0x825   :  { %13645 = vmatpush3.bf16.msra.mxu1 %v18008_v47  ;;  %13624 = vmatprep.subr.bf16.mxu0 %v18009_v61  ;;  %v18029_v47 = vld [vmem:[#allocation109_spill] sm:$0xff]  ;;  %v18031_v61 = vld [vmem:[#allocation111_spill] sm:$0xff] }
 0x826   :  { %v13322_v42 = vpop.f32.mrb[104].mxu0  ;;  %13646 = vmatprep.subr.bf16.mxu1 %v18010_v12  ;;  %v18033_v12 = vld [vmem:[#allocation22_spill] sm:$0xff] }
 0x827   :  { %v13344_v62 = vpop.f32.mrb[104].mxu1  ;;  %v13323_v2 = vpop.f32.mrb[105].mxu0 }
 0x828   :  { %v13324_v6 = vadd.f32 %v13323_v2, %v13322_v42  ;;  %v13345_v60 = vpop.f32.mrb[105].mxu1  ;;  %v13325_v36 = vpop.f32.mrb[106].mxu0  ;;  %13625 = vmatpush3.bf16.msra.mxu0 %v17918_v33  ;;  %v18016_v33 = vld [vmem:[#allocation96_spill] sm:$0xff]  ;;  %v18035_v2 = vld [vmem:[#allocation23_spill] sm:$0xff] }
 0x829   :  { %v13346_v14 = vadd.f32 %v13345_v60, %v13344_v62  ;;  %v13347_v30 = vpop.f32.mrb[106].mxu1  ;;  %13647 = vmatpush3.bf16.msra.mxu1 %v17919_v50  ;;  %v13326_v44 = vpop.f32.mrb[107].mxu0  ;;  %13626 = vmatprep.subr.bf16.mxu0 %v17920_v41  ;;  %v18018_v50 = vld [vmem:[#allocation98_spill] sm:$0xff]  ;;  %v18019_v41 = vld [vmem:[#allocation99_spill] sm:$0xff]  ;;  %v16558_v42 = vld [vmem:[#allocation10 + $0x28] sm:$0xff] }
 0x82a   :  { %v10210_v40 = vadd.f32 %v13324_v6, %v10170_v54  ;;  %v13348_v45 = vpop.f32.mrb[107].mxu1  ;;  %13648 = vmatprep.subr.bf16.mxu1 %v18011_v23  ;;  %v18024_v54 = vld [vmem:[#allocation104_spill] sm:$0xff]  ;;  %v18034_v62 = vld [vmem:[#allocation113_spill] sm:$0xff]  ;;  %v18041_v23 = vld [vmem:[#allocation115_spill] sm:$0xff] }
 0x82b   :  { %v18036_v6 = vld [vmem:[#allocation21_spill] sm:$0xff]  ;;  %v18037_v36 = vld [vmem:[#allocation28_spill] sm:$0xff] }
 0x82c   :  { %v10250_v13 = vadd.f32 %v13346_v14, %v10210_v40  ;;  %13627 = vmatpush3.bf16.msra.mxu0 %v18012_v4  ;;  %v1571_v60 = vrot.slane %v16558_v42, %v18036_v6  ;;  %v18038_v14 = vld [vmem:[#allocation54_spill] sm:$0xff]  ;;  %v18039_v44 = vld [vmem:[#allocation29_spill] sm:$0xff] }
 0x82d   :  { %13649 = vmatpush3.bf16.msra.mxu1 %v18013_v48  ;;  %13628 = vmatprep.subr.bf16.mxu0 %v18014_v57  ;;  %v1579_v30 = vrot.slane %v16558_v42, %v18038_v14  ;;  %v18040_v40 = vld [vmem:[#allocation114_spill] sm:$0xff]  ;;  %v18042_v57 = vld [vmem:[#allocation48_spill] sm:$0xff] }
 0x82e   :  { %13650 = vmatprep.subr.bf16.mxu1 %v18015_v21  ;;  %v7701_v21 = vadd.f32 %v18042_v57, %v1571_v60  ;;  %v18061_v60 = vld [vmem:[#allocation124_spill] sm:$0xff] }
 0x830   :  { %13629 = vmatpush3.bf16.msra.mxu0 %v18016_v33  ;;  %vm8197_vm13 = vcmp.gt.f32.partialorder %v7701_v21, 0.0 }
 0x831   :  { %13651 = vmatpush3.bf16.msra.mxu1 %v18017_v32  ;;  %13658 = vmatprep.subr.bf16.mxu0 %v18018_v50 }
 0x832   :  { %13680 = vmatprep.subr.bf16.mxu1 %v18019_v41  ;;  %v18043_v41 = vld [vmem:[#allocation49_spill] sm:$0xff] }
 0x833   :  { %10780 = vmatmul.mubr.bf16.vlgmr.msra.gmra.mrb[132].mxu0 %v16378_v18  ;;  %v18027_v18 = vld [vmem:[#allocation107_spill] sm:$0xff] }
 0x834   :  { %10820 = vmatmul.mubr.bf16.vlgmr.msra.gmra.mrb[132].mxu1 %v16386_v10  ;;  %13659 = vmatpush3.bf16.msra.mxu0 %v18020_v58  ;;  %v18028_v10 = vld [vmem:[#allocation108_spill] sm:$0xff]  ;;  %v7742_v58 = vadd.f32 %v18043_v41, %v1579_v30 }
 0x835   :  { %10859 = vmatprep.mubr.bf16.mxu0 %v16392_v29  ;;  %13681 = vmatpush3.bf16.msra.mxu1 %v18021_v8  ;;  %v18030_v29 = vld [vmem:[#allocation110_spill] sm:$0xff] }
 0x836   :  { %10899 = vmatprep.mubr.bf16.mxu1 %v16398_v5  ;;  %13660 = vmatprep.subr.bf16.mxu0 %v18022_v52  ;;  %v18032_v5 = vld [vmem:[#allocation112_spill] sm:$0xff]  ;;  %vm8199_vm14 = vcmp.gt.f32.partialorder %v7742_v58, 0.0 }
 0x837   :  { %13682 = vmatprep.subr.bf16.mxu1 %v18023_v3 }
 0x838   :  { %13661 = vmatpush3.bf16.msra.mxu0 %v18024_v54 }
 0x839   :  { %13683 = vmatpush3.bf16.msra.mxu1 %v18025_v16  ;;  %13662 = vmatprep.subr.bf16.mxu0 %v18026_v26  ;;  %v8261_v26 = vmul.f32 0.2, %v7701_v21 }
 0x83a   :  { %13684 = vmatprep.subr.bf16.mxu1 %v18027_v18 }
 0x83c   :  { %13663 = vmatpush3.bf16.msra.mxu0 %v18028_v10  ;;  %v8263_v10 = vmul.f32 0.2, %v7742_v58 }
 0x83d   :  { %13685 = vmatpush3.bf16.msra.mxu1 %v18029_v47  ;;  %13664 = vmatprep.subr.bf16.mxu0 %v18030_v29  ;;  %v18057_v47 = vld [vmem:[#allocation20_spill] sm:$0xff] }
 0x83e   :  { %13686 = vmatprep.subr.bf16.mxu1 %v18031_v61  ;;  %v1567_v29 = vrot.slane %v16558_v42, %v18057_v47  ;;  %v18058_v61 = vld [vmem:[#allocation37_spill] sm:$0xff] }
 0x840   :  { %13665 = vmatpush3.bf16.msra.mxu0 %v18032_v5  ;;  %v18059_v5 = vld [vmem:[#allocation55_spill] sm:$0xff] }
 0x841   :  { %13687 = vmatpush3.bf16.msra.mxu1 %v18033_v12  ;;  %13666 = vmatprep.subr.bf16.mxu0 %v18034_v62  ;;  %v1575_v12 = vrot.slane %v16558_v42, %v18059_v5  ;;  %v18060_v62 = vld [vmem:[#allocation56_spill] sm:$0xff] }
 0x842   :  { %13688 = vmatprep.subr.bf16.mxu1 %v18035_v2  ;;  %v1587_v2 = vrot.slane %v16558_v42, %v18060_v62 }
 0x844   :  { %13667 = vmatpush3.bf16.msra.mxu0 %v18037_v36  ;;  %v18062_v36 = vld [vmem:[#allocation57_spill] sm:$0xff] }
 0x845   :  { %13689 = vmatpush3.bf16.msra.mxu1 %v18039_v44  ;;  %13668 = vmatprep.subr.bf16.mxu0 %v18040_v40  ;;  %v1595_v30 = vrot.slane %v16558_v42, %v18062_v36  ;;  %v18063_v44 = vld [vmem:[#allocation125_spill] sm:$0xff]  ;;  %v18064_v40 = vld [vmem:[#allocation126_spill] sm:$0xff] }
 0x846   :  { %v13366_v45 = vpop.f32.mrb[108].mxu0  ;;  %13690 = vmatprep.subr.bf16.mxu1 %v18041_v23 }
 0x847   :  { %v13388_v4 = vpop.f32.mrb[108].mxu1  ;;  %v13367_v48 = vpop.f32.mrb[109].mxu0 }
 0x848   :  { %v13368_v33 = vadd.f32 %v13367_v48, %v13366_v45  ;;  %v13389_v32 = vpop.f32.mrb[109].mxu1  ;;  %v13369_v50 = vpop.f32.mrb[110].mxu0  ;;  %13669 = vmatpush3.bf16.msra.mxu0 %v16036_v15  ;;  %v18065_v45 = vld [vmem:[#allocation46_spill] sm:$0xff]  ;;  %v18066_v48 = vld [vmem:[#allocation47_spill] sm:$0xff] }
 0x849   :  { %v13390_v8 = vadd.f32 %v13389_v32, %v13388_v4  ;;  %v13391_v52 = vpop.f32.mrb[110].mxu1  ;;  %13691 = vmatpush3.bf16.msra.mxu1 %v16040_v25  ;;  %v13370_v3 = vpop.f32.mrb[111].mxu0  ;;  %13670 = vmatprep.subr.bf16.mxu0 %v16043_v39  ;;  %v8325_v25 = vsel %vm8197_vm13, %v7701_v21, %v8261_v26  ;;  %v8327_v39 = vsel %vm8199_vm14, %v7742_v58, %v8263_v10  ;;  %v18067_v32 = vld [vmem:[#allocation52_spill] sm:$0xff]  ;;  %v18069_v10 = vld [vmem:[#allocation127_spill] sm:$0xff] }
 0x84a   :  { %v10290_v54 = vadd.f32 %v13368_v33, %v10250_v13  ;;  %v13392_v16 = vpop.f32.mrb[111].mxu1  ;;  %13692 = vmatprep.subr.bf16.mxu1 %v16047_v1  ;;  %v16586_v15 = vpack.c.bf16 %v8325_v25, %v8325_v25  ;;  %v16590_v1 = vpack.c.bf16 %v8327_v39, %v8327_v39  ;;  %v18056_v13 = vld [vmem:[#allocation36_spill] sm:$0xff]  ;;  %v7699_v23 = vadd.f32 %v18065_v45, %v1567_v29  ;;  %v18068_v52 = vld [vmem:[#allocation53_spill] sm:$0xff] }
 0x84b   :  { %v7740_v57 = vadd.f32 %v18066_v48, %v1575_v12  ;;  %v7783_v50 = vadd.f32 %v18067_v32, %v1587_v2  ;;  %v7824_v3 = vadd.f32 %v18068_v52, %v1595_v30  ;;  %v18071_v45 = vld [vmem:[#allocation129_spill] sm:$0xff] }
 0x84c   :  { %v10330_v18 = vadd.f32 %v13390_v8, %v10290_v54  ;;  %13671 = vmatpush3.bf16.msra.mxu0 %v16052_v35  ;;  %v18044_v35 = vld [vmem:[#allocation122_spill] sm:$0xff]  ;;  %v8260_v25 = vmul.f32 0.2, %v7699_v23  ;;  %vm8196_vm15 = vcmp.gt.f32.partialorder %v7699_v23, 0.0  ;;  %v18075_v52 = vld [vmem:[#allocation133_spill] sm:$0xff] }
 0x84d   :  { %13693 = vmatpush3.bf16.msra.mxu1 %v16055_v38  ;;  %13672 = vmatprep.subr.bf16.mxu0 %v16058_v31  ;;  %v18045_v38 = vld [vmem:[#allocation123_spill] sm:$0xff]  ;;  %v18046_v31 = vld [vmem:[#allocation26_spill] sm:$0xff]  ;;  %v8262_v29 = vmul.f32 0.2, %v7740_v57  ;;  %vm8198_vm0 = vcmp.gt.f32.partialorder %v7740_v57, 0.0  ;;  %vm8201_vm1 = vcmp.gt.f32.partialorder %v7783_v50, 0.0 }
 0x84e   :  { %13694 = vmatprep.subr.bf16.mxu1 %v17954_v56  ;;  %v18051_v56 = vld [vmem:[#allocation148_spill] sm:$0xff]  ;;  %v8265_v12 = vmul.f32 0.2, %v7783_v50  ;;  %v8267_v30 = vmul.f32 0.2, %v7824_v3  ;;  %v8324_v48 = vsel %vm8196_vm15, %v7699_v23, %v8260_v25  ;;  %vm8203_vm2 = vcmp.gt.f32.partialorder %v7824_v3, 0.0 }
 0x84f   :  { %v18077_v23 = vld [vmem:[#allocation135_spill] sm:$0xff] }
 0x850   :  { %13673 = vmatpush3.bf16.msra.mxu0 %v16064_v24  ;;  %v18047_v24 = vld [vmem:[#allocation27_spill] sm:$0xff] }
 0x851   :  { %13695 = vmatpush3.bf16.msra.mxu1 %v16067_v9  ;;  %13702 = vmatprep.subr.bf16.mxu0 %v17955_v51  ;;  %v18048_v9 = vld [vmem:[#allocation145_spill] sm:$0xff]  ;;  %v18052_v51 = vld [vmem:[#allocation32_spill] sm:$0xff] }
 0x852   :  { %13724 = vmatprep.subr.bf16.mxu1 %v16073_v27  ;;  %v18049_v27 = vld [vmem:[#allocation146_spill] sm:$0xff] }
 0x853   :  { %10860 = vmatmul.mubr.bf16.vlgmr.msra.gmra.mrb[136].mxu0 %v16496_v59  ;;  %v18055_v59 = vld [vmem:[#allocation31_spill] sm:$0xff] }
 0x854   :  { %10900 = vmatmul.mubr.bf16.vlgmr.msra.gmra.mrb[136].mxu1 %v16502_v34  ;;  %13703 = vmatpush3.bf16.msra.mxu0 %v16080_v20  ;;  %v18050_v20 = vld [vmem:[#allocation147_spill] sm:$0xff]  ;;  %v18054_v34 = vld [vmem:[#allocation30_spill] sm:$0xff] }
 0x855   :  { %10939 = vmatprep.mubr.bf16.mxu0 %v16586_v15  ;;  %13725 = vmatpush3.bf16.msra.mxu1 %v16086_v17  ;;  %v18053_v17 = vld [vmem:[#allocation33_spill] sm:$0xff] }
 0x856   :  { %10979 = vmatprep.mubr.bf16.mxu1 %v16590_v1  ;;  %13704 = vmatprep.subr.bf16.mxu0 %v18044_v35 }
 0x857   :  { %13726 = vmatprep.subr.bf16.mxu1 %v18045_v38  ;;  %v18070_v38 = vld [vmem:[#allocation128_spill] sm:$0xff] }
 0x858   :  { %13705 = vmatpush3.bf16.msra.mxu0 %v18046_v31 }
 0x859   :  { %13727 = vmatpush3.bf16.msra.mxu1 %v18047_v24  ;;  %13706 = vmatprep.subr.bf16.mxu0 %v18048_v9 }
 0x85a   :  { %13728 = vmatprep.subr.bf16.mxu1 %v18049_v27 }
 0x85c   :  { %13707 = vmatpush3.bf16.msra.mxu0 %v18050_v20 }
 0x85d   :  { %13729 = vmatpush3.bf16.msra.mxu1 %v18051_v56  ;;  %13708 = vmatprep.subr.bf16.mxu0 %v18052_v51 }
 0x85e   :  { %13730 = vmatprep.subr.bf16.mxu1 %v18053_v17 }
 0x860   :  { %13709 = vmatpush3.bf16.msra.mxu0 %v18054_v34 }
 0x861   :  { %13731 = vmatpush3.bf16.msra.mxu1 %v18055_v59  ;;  %13710 = vmatprep.subr.bf16.mxu0 %v18056_v13 }
 0x862   :  { %13732 = vmatprep.subr.bf16.mxu1 %v18058_v61 }
 0x864   :  { %13711 = vmatpush3.bf16.msra.mxu0 %v18061_v60 }
 0x865   :  { %13733 = vmatpush3.bf16.msra.mxu1 %v18063_v44  ;;  %13712 = vmatprep.subr.bf16.mxu0 %v18064_v40 }
 0x866   :  { %v13410_v4 = vpop.f32.mrb[112].mxu0  ;;  %13734 = vmatprep.subr.bf16.mxu1 %v16343_v53 }
 0x867   :  { %v13432_v21 = vpop.f32.mrb[112].mxu1  ;;  %v13411_v33 = vpop.f32.mrb[113].mxu0 }
 0x868   :  { %v13412_v41 = vadd.f32 %v13411_v33, %v13410_v4  ;;  %v13433_v58 = vpop.f32.mrb[113].mxu1  ;;  %v13413_v8 = vpop.f32.mrb[114].mxu0  ;;  %13713 = vmatpush3.bf16.msra.mxu0 %v16348_v49  ;;  %v18072_v4 = vld [vmem:[#allocation130_spill] sm:$0xff]  ;;  %v8326_v33 = vsel %vm8198_vm0, %v7740_v57, %v8262_v29  ;;  %v18078_v57 = vld [vmem:[#allocation136_spill] sm:$0xff] }
 0x869   :  { %v13434_v54 = vadd.f32 %v13433_v58, %v13432_v21  ;;  %v13435_v16 = vpop.f32.mrb[114].mxu1  ;;  %13735 = vmatpush3.bf16.msra.mxu1 %v16352_v63  ;;  %v13414_v26 = vpop.f32.mrb[115].mxu0  ;;  %13714 = vmatprep.subr.bf16.mxu0 %v18069_v10  ;;  %v8329_v58 = vsel %vm8201_vm1, %v7783_v50, %v8265_v12  ;;  %v16634_v8 = vpack.c.bf16 %v8324_v48, %v8324_v48  ;;  %v18082_v29 = vld [vmem:[#allocation140_spill] sm:$0xff]  ;;  %v18083_v12 = vld [vmem:[#allocation141_spill] sm:$0xff] }
 0x86a   :  { %v10370_v39 = vadd.f32 %v13412_v41, %v10330_v18  ;;  %v13436_v35 = vpop.f32.mrb[115].mxu1  ;;  %13736 = vmatprep.subr.bf16.mxu1 %v18070_v38  ;;  %v18073_v18 = vld [vmem:[#allocation131_spill] sm:$0xff]  ;;  %v18074_v41 = vld [vmem:[#allocation132_spill] sm:$0xff]  ;;  %v8331_v16 = vsel %vm8203_vm2, %v7824_v3, %v8267_v30  ;;  %v16638_v26 = vpack.c.bf16 %v8326_v33, %v8326_v33  ;;  %v16642_v25 = vpack.c.bf16 %v8329_v58, %v8329_v58  ;;  %v18080_v3 = vld [vmem:[#allocation138_spill] sm:$0xff] }
 0x86b   :  { %v16646_v50 = vpack.c.bf16 %v8331_v16, %v8331_v16  ;;  %v18081_v35 = vld [vmem:[#allocation139_spill] sm:$0xff]  ;;  %v18089_v16 = vld [vmem:[#allocation66_spill] sm:$0xff] }
 0x86c   :  { %v10410_v2 = vadd.f32 %v13434_v54, %v10370_v39  ;;  %13715 = vmatpush3.bf16.msra.mxu0 %v18071_v45  ;;  %v18076_v54 = vld [vmem:[#allocation134_spill] sm:$0xff]  ;;  %v18079_v39 = vld [vmem:[#allocation137_spill] sm:$0xff]  ;;  %v18085_v30 = vld [vmem:[#allocation143_spill] sm:$0xff] }
 0x86d   :  { %13737 = vmatpush3.bf16.msra.mxu1 %v18072_v4  ;;  %13716 = vmatprep.subr.bf16.mxu0 %v16368_v43  ;;  %v18088_v58 = vld [vmem:[#allocation35_spill] sm:$0xff] }
 0x86e   :  { %v10415_v21 = vsub.f32 0.0, %v10410_v2  ;;  %13738 = vmatprep.subr.bf16.mxu1 %v18073_v18  ;;  %v18084_v2 = vld [vmem:[#allocation142_spill] sm:$0xff] }
 0x870   :  { %v10416_v32 = vmul.f32 1.442695, %v10415_v21  ;;  %13717 = vmatpush3.bf16.msra.mxu0 %v18074_v41  ;;  %v18086_v21 = vld [vmem:[#allocation34_spill] sm:$0xff] }
 0x871   :  { %13739 = vmatpush3.bf16.msra.mxu1 %v18075_v52  ;;  %13746 = vmatprep.subr.bf16.mxu0 %v18076_v54 }
 0x872   :  { %14329 = vpow2.f32 %v10416_v32  ;;  %13768 = vmatprep.subr.bf16.mxu1 %v18077_v23  ;;  %v18087_v32 = vld [vmem:[#allocation144_spill] sm:$0xff] }
 0x873   :  { %10940 = vmatmul.mubr.bf16.vlgmr.msra.gmra.mrb[140].mxu0 %v16634_v8 }
 0x874   :  { %10980 = vmatmul.mubr.bf16.vlgmr.msra.gmra.mrb[140].mxu1 %v16638_v26  ;;  %13747 = vmatpush3.bf16.msra.mxu0 %v18078_v57 }
 0x875   :  { %11019 = vmatprep.mubr.bf16.mxu0 %v16642_v25  ;;  %13769 = vmatpush3.bf16.msra.mxu1 %v18079_v39 }
 0x876   :  { %11059 = vmatprep.mubr.bf16.mxu1 %v16646_v50  ;;  %13748 = vmatprep.subr.bf16.mxu0 %v18080_v3  ;;  %v18094_v3 = vld [vmem:[#allocation70_spill] sm:$0xff] }
 0x877   :  { %13770 = vmatprep.subr.bf16.mxu1 %v18081_v35  ;;  %v18090_v35 = vld [vmem:[#allocation67_spill] sm:$0xff] }
 0x878   :  { %13749 = vmatpush3.bf16.msra.mxu0 %v18082_v29  ;;  %v18091_v29 = vld [vmem:[#allocation68_spill] sm:$0xff] }
 0x879   :  { %13771 = vmatpush3.bf16.msra.mxu1 %v18083_v12  ;;  %13750 = vmatprep.subr.bf16.mxu0 %v18084_v2  ;;  %v18092_v12 = vld [vmem:[#allocation69_spill] sm:$0xff]  ;;  %v18093_v2 = vld [vmem:[#allocation80_spill] sm:$0xff] }
 0x87a   :  { %13772 = vmatprep.subr.bf16.mxu1 %v18085_v30  ;;  %v1583_v30 = vrot.slane %v16558_v42, %v18093_v2 }
 0x87c   :  { %v14330_v48 = vpop.eup %14329  ;;  %13751 = vmatpush3.bf16.msra.mxu0 %v18086_v21  ;;  %v18095_v21 = vld [vmem:[#allocation82_spill] sm:$0xff] }
 0x87d   :  { %v10418_v33 = vadd.f32 1.0, %v14330_v48  ;;  %13773 = vmatpush3.bf16.msra.mxu1 %v18087_v32  ;;  %13752 = vmatprep.subr.bf16.mxu0 %v18088_v58  ;;  %v1591_v48 = vrot.slane %v16558_v42, %v18095_v21  ;;  %v18096_v32 = vld [vmem:[#allocation71_spill] sm:$0xff]  ;;  %v18097_v58 = vld [vmem:[#allocation72_spill] sm:$0xff] }
 0x87e   :  { %13774 = vmatprep.subr.bf16.mxu1 %v18089_v16  ;;  %v18098_v16 = vld [vmem:[#allocation73_spill] sm:$0xff] }
 0x87f   :  { %14331 = vrcp.f32 %v10418_v33  ;;  %v18099_v33 = vld [vmem:[#allocation50_spill] sm:$0xff] }
 0x880   :  { %13753 = vmatpush3.bf16.msra.mxu0 %v18090_v35  ;;  %v7781_v35 = vadd.f32 %v18099_v33, %v1583_v30  ;;  %v16700_v33 = vld [vmem:[#allocation12 + $0xc0] sm:$0xff]  }
 0x881   :  { %13775 = vmatpush3.bf16.msra.mxu1 %v18091_v29  ;;  %13754 = vmatprep.subr.bf16.mxu0 %v18092_v12  ;;  %v18100_v29 = vld [vmem:[#allocation74_spill] sm:$0xff]  ;;  %v18101_v12 = vld [vmem:[#allocation51_spill] sm:$0xff]  ;;  %18104 = vst [vmem:[#allocation77_spill] sm:$0xff] %v16700_v33 }
 0x882   :  { %13776 = vmatprep.subr.bf16.mxu1 %v18094_v3  ;;  %v7822_v57 = vadd.f32 %v18101_v12, %v1591_v48  ;;  %v8264_v30 = vmul.f32 0.2, %v7781_v35  ;;  %v16681_v12 = vld [vmem:[#allocation13] ss:$0 sm:$0xff]  ;;  %vm8200_vm3 = vcmp.gt.f32.partialorder %v7781_v35, 0.0 }
 0x883   :  { %v16695_v48 = vld [vmem:[#allocation12 + $0x40] sm:$0xff]  }
 0x884   :  { %13755 = vmatpush3.bf16.msra.mxu0 %v18096_v32  ;;  %vm8202_vm4 = vcmp.gt.f32.partialorder %v7822_v57, 0.0  ;;  %18103 = vst [vmem:[#allocation76_spill] sm:$0xff] %v16695_v48 }
 0x885   :  { %13777 = vmatpush3.bf16.msra.mxu1 %v18097_v58  ;;  %13756 = vmatprep.subr.bf16.mxu0 %v18098_v16 }
 0x886   :  { %v13454_v39 = vpop.f32.mrb[116].mxu0  ;;  %13778 = vmatprep.subr.bf16.mxu1 %v18100_v29 }
 0x887   :  { %v13476_v23 = vpop.f32.mrb[116].mxu1  ;;  %v13455_v2 = vpop.f32.mrb[117].mxu0 }
 0x888   :  { %v13456_v54 = vadd.f32 %v13455_v2, %v13454_v39  ;;  %v13477_v3 = vpop.f32.mrb[117].mxu1  ;;  %v13457_v52 = vpop.f32.mrb[118].mxu0  ;;  %13757 = vmatpush3.bf16.msra.mxu0 %v16465_v7  ;;  %v18102_v2 = vld [vmem:[#allocation75_spill] sm:$0xff] }
 0x889   :  { %v14332_v42 = vpop.eup %14331  ;;  %v13478_v32 = vadd.f32 %v13477_v3, %v13476_v23  ;;  %v13479_v21 = vpop.f32.mrb[118].mxu1  ;;  %13779 = vmatpush3.bf16.msra.mxu1 %v16468_v28  ;;  %13758 = vmatprep.subr.bf16.mxu0 %v16471_v0  ;;  %v8266_v23 = vmul.f32 0.2, %v7822_v57 }
 0x88a   :  { %v13458_v16 = vpop.f32.mrb[119].mxu0  ;;  %10420 = vst [vmem:[%s17163_s9 + $0x10] sm:$0xff] %v14332_v42  ;;  %v10456_v39 = vadd.f32 %v16681_v12, %v13456_v54  ;;  %v13480_v52 = vpop.f32.mrb[119].mxu1  ;;  %13780 = vmatprep.subr.bf16.mxu1 %v16478_v19  ;;  %v8328_v21 = vsel %vm8200_vm3, %v7781_v35, %v8264_v30  ;;  %v16709_v35 = vld [vmem:[#allocation12 + $0x80] sm:$0xff]   ;;  %v16713_v42 = vld [vmem:[#allocation12 + $0x48] sm:$0xff]  }
 0x88b   :  { %v8330_v16 = vsel %vm8202_vm4, %v7822_v57, %v8266_v23  ;;  %v16692_v54 = vpack.c.bf16 %v8328_v21, %v8328_v21  ;;  %v16705_v57 = vld [vmem:[#allocation12] sm:$0xff]   ;;  %18106 = vst [vmem:[#allocation79_spill] sm:$0xff] %v16709_v35  ;;  %18107 = vst [vmem:[#allocation81_spill] sm:$0xff] %v16713_v42  ;;  %v16716_v30 = vld [vmem:[#allocation12 + $0xc8] sm:$0xff]  }
 0x88c   :  { %v16685_v3 = vadd.f32 %v13478_v32, %v10456_v39  ;;  %13759 = vmatpush3.bf16.msra.mxu0 %v16481_v46  ;;  %v16698_v32 = vpack.c.bf16 %v8330_v16, %v8330_v16  ;;  %18105 = vst [vmem:[#allocation78_spill] sm:$0xff] %v16705_v57  ;;  %18108 = vst [vmem:[#allocation83_spill] sm:$0xff] %v16716_v30  ;;  %v16719_v39 = vld [vmem:[#allocation12 + $0x8] sm:$0xff]   ;;  %v16731_v23 = vld [vmem:[#allocation12 + $0x10] sm:$0xff]  }
 0x88d   :  { %13781 = vmatpush3.bf16.msra.mxu1 %v18102_v2  ;;  %13760 = vmatprep.subr.bf16.mxu0 %v16487_v22  ;;  %18109 = vst [vmem:[#allocation84_spill] sm:$0xff] %v16719_v39  ;;  %v16722_v52 = vld [vmem:[#allocation12 + $0x88] sm:$0xff]   ;;  %18113 = vst [vmem:[#allocation89_spill] sm:$0xff] %v16731_v23  ;;  %v16734_v21 = vld [vmem:[#allocation12 + $0x90] sm:$0xff]  }
 0x88e   :  { %13782 = vmatprep.subr.bf16.mxu1 %v16490_v55  ;;  %18110 = vst [vmem:[#allocation85_spill] sm:$0xff] %v16722_v52  ;;  %18114 = vst [vmem:[#allocation90_spill] sm:$0xff] %v16734_v21  ;;  %v16737_v16 = vld [vmem:[#allocation12 + $0x58] sm:$0xff]  }
 0x88f   :  { %18115 = vst [vmem:[#allocation40_spill] sm:$0xff] %v16737_v16 }
 0x890   :  { %13761 = vmatpush3.bf16.msra.mxu0 %v16493_v11 }
 0x891   :  { %13783 = vmatpush3.bf16.msra.mxu1 %v16498_v37  ;;  %13790 = vmatprep.subr.bf16.mxu0 %v16695_v48  ;;  %v16773_v48 = vld [vmem:[#allocation12 + $0x70] sm:$0xff]  }
 0x892   :  { %13812 = vmatprep.subr.bf16.mxu1 %v16700_v33  ;;  %v16770_v33 = vld [vmem:[#allocation12 + $0xa8] sm:$0xff]   ;;  %18127 = vst [vmem:[#allocation25_spill] sm:$0xff] %v16773_v48 }
 0x893   :  { %11020 = vmatmul.mubr.bf16.vlgmr.msra.gmra.mrb[144].mxu0 %v16692_v54  ;;  %18126 = vst [vmem:[#allocation87_spill] sm:$0xff] %v16770_v33 }
 0x894   :  { %11060 = vmatmul.mubr.bf16.vlgmr.msra.gmra.mrb[144].mxu1 %v16698_v32  ;;  %13791 = vmatpush3.bf16.msra.mxu0 %v16705_v57  ;;  %v16767_v57 = vld [vmem:[#allocation12 + $0x28] sm:$0xff]  }
 0x895   :  { %11105 = vmatprep.mubr.bf16.mxu0 %v16586_v15  ;;  %13813 = vmatpush3.bf16.msra.mxu1 %v16709_v35  ;;  %v16725_v15 = vld [vmem:[#allocation12 + $0x50] sm:$0xff]   ;;  %18125 = vst [vmem:[#allocation24_spill] sm:$0xff] %v16767_v57 }
 0x896   :  { %11145 = vmatprep.mubr.bf16.mxu1 %v16590_v1  ;;  %13792 = vmatprep.subr.bf16.mxu0 %v16713_v42  ;;  %18111 = vst [vmem:[#allocation86_spill] sm:$0xff] %v16725_v15  ;;  %v16728_v1 = vld [vmem:[#allocation12 + $0xd0] sm:$0xff]  }
 0x897   :  { %13814 = vmatprep.subr.bf16.mxu1 %v16716_v30  ;;  %18112 = vst [vmem:[#allocation88_spill] sm:$0xff] %v16728_v1 }
 0x898   :  { %13793 = vmatpush3.bf16.msra.mxu0 %v16719_v39  ;;  %v16764_v39 = vld [vmem:[#allocation12 + $0xe8] sm:$0xff]  }
 0x899   :  { %13815 = vmatpush3.bf16.msra.mxu1 %v16722_v52  ;;  %13794 = vmatprep.subr.bf16.mxu0 %v16725_v15  ;;  %v16740_v52 = vld [vmem:[#allocation12 + $0xd8] sm:$0xff]   ;;  %18124 = vst [vmem:[#allocation43_spill] sm:$0xff] %v16764_v39 }
 0x89a   :  { %13816 = vmatprep.subr.bf16.mxu1 %v16728_v1  ;;  %18116 = vst [vmem:[#allocation41_spill] sm:$0xff] %v16740_v52  ;;  %v16743_v15 = vld [vmem:[#allocation12 + $0x18] sm:$0xff]  }
 0x89b   :  { %18117 = vst [vmem:[#allocation117_spill] sm:$0xff] %v16743_v15  ;;  %v16746_v1 = vld [vmem:[#allocation12 + $0x98] sm:$0xff]  }
 0x89c   :  { %13795 = vmatpush3.bf16.msra.mxu0 %v16731_v23  ;;  %18118 = vst [vmem:[#allocation121_spill] sm:$0xff] %v16746_v1  ;;  %v16749_v23 = vld [vmem:[#allocation12 + $0x60] sm:$0xff]  }
 0x89d   :  { %13817 = vmatpush3.bf16.msra.mxu1 %v16734_v21  ;;  %13796 = vmatprep.subr.bf16.mxu0 %v16737_v16  ;;  %18119 = vst [vmem:[#allocation38_spill] sm:$0xff] %v16749_v23  ;;  %v16752_v21 = vld [vmem:[#allocation12 + $0xe0] sm:$0xff]  }
 0x89e   :  { %13818 = vmatprep.subr.bf16.mxu1 %v16740_v52  ;;  %18120 = vst [vmem:[#allocation39_spill] sm:$0xff] %v16752_v21  ;;  %v16755_v16 = vld [vmem:[#allocation12 + $0x20] sm:$0xff]  }
 0x89f   :  { %18121 = vst [vmem:[#allocation44_spill] sm:$0xff] %v16755_v16  ;;  %v16758_v52 = vld [vmem:[#allocation12 + $0xa0] sm:$0xff]  }
 0x8a0   :  { %13797 = vmatpush3.bf16.msra.mxu0 %v16743_v15  ;;  %18122 = vst [vmem:[#allocation45_spill] sm:$0xff] %v16758_v52  ;;  %v16761_v15 = vld [vmem:[#allocation12 + $0x68] sm:$0xff]  }
 0x8a1   :  { %13819 = vmatpush3.bf16.msra.mxu1 %v16746_v1  ;;  %13798 = vmatprep.subr.bf16.mxu0 %v16749_v23  ;;  %18123 = vst [vmem:[#allocation42_spill] sm:$0xff] %v16761_v15 }
 0x8a2   :  { %13820 = vmatprep.subr.bf16.mxu1 %v16752_v21 }
 0x8a4   :  { %13799 = vmatpush3.bf16.msra.mxu0 %v16755_v16 }
 0x8a5   :  { %13821 = vmatpush3.bf16.msra.mxu1 %v16758_v52  ;;  %13800 = vmatprep.subr.bf16.mxu0 %v16761_v15 }
 0x8a6   :  { %v13498_v1 = vpop.f32.mrb[120].mxu0  ;;  %13822 = vmatprep.subr.bf16.mxu1 %v16764_v39 }
 0x8a7   :  { %v13520_v23 = vpop.f32.mrb[120].mxu1  ;;  %v13499_v30 = vpop.f32.mrb[121].mxu0 }
 0x8a8   :  { %v13500_v21 = vadd.f32 %v13499_v30, %v13498_v1  ;;  %v13521_v42 = vpop.f32.mrb[121].mxu1  ;;  %v13501_v35 = vpop.f32.mrb[122].mxu0  ;;  %13801 = vmatpush3.bf16.msra.mxu0 %v16767_v57  ;;  %v16777_v1 = vld [vmem:[#allocation12 + $0xf0] sm:$0xff]  }
 0x8a9   :  { %v13522_v16 = vadd.f32 %v13521_v42, %v13520_v23  ;;  %v13523_v52 = vpop.f32.mrb[122].mxu1  ;;  %13823 = vmatpush3.bf16.msra.mxu1 %v16770_v33  ;;  %v13502_v15 = vpop.f32.mrb[123].mxu0  ;;  %13802 = vmatprep.subr.bf16.mxu0 %v16773_v48  ;;  %18128 = vst [vmem:[#allocation91_spill] sm:$0xff] %v16777_v1  ;;  %v16782_v42 = vld [vmem:[#allocation12 + $0x30] sm:$0xff]   ;;  %v16794_v23 = vld [vmem:[#allocation12 + $0x38] sm:$0xff]   ;;  %v16881_v33 = vld [vmem:[#allocation12 + $0x1a8] sm:$0xff]  }
 0x8aa   :  { %v10536_v39 = vadd.f32 %v13500_v21, %v16685_v3  ;;  %v13524_v30 = vpop.f32.mrb[123].mxu1  ;;  %13824 = vmatprep.subr.bf16.mxu1 %v16777_v1  ;;  %18129 = vst [vmem:[#allocation92_spill] sm:$0xff] %v16782_v42  ;;  %v16785_v52 = vld [vmem:[#allocation12 + $0xb0] sm:$0xff]   ;;  %v16788_v15 = vld [vmem:[#allocation12 + $0x78] sm:$0xff]   ;;  %18133 = vst [vmem:[#allocation96_spill] sm:$0xff] %v16794_v23 }
 0x8ab   :  { %18130 = vst [vmem:[#allocation93_spill] sm:$0xff] %v16785_v52  ;;  %18131 = vst [vmem:[#allocation94_spill] sm:$0xff] %v16788_v15  ;;  %v16791_v3 = vld [vmem:[#allocation12 + $0xf8] sm:$0xff]   ;;  %v16800_v21 = vld [vmem:[#allocation12 + $0x140] sm:$0xff]  }
 0x8ac   :  { %v16780_v35 = vadd.f32 %v13522_v16, %v10536_v39  ;;  %13803 = vmatpush3.bf16.msra.mxu0 %v16782_v42  ;;  %18132 = vst [vmem:[#allocation95_spill] sm:$0xff] %v16791_v3  ;;  %v16797_v39 = vld [vmem:[#allocation12 + $0xb8] sm:$0xff]   ;;  %18135 = vst [vmem:[#allocation98_spill] sm:$0xff] %v16800_v21  ;;  %v16803_v16 = vld [vmem:[#allocation12 + $0x1c0] sm:$0xff]  }
 0x8ad   :  { %13825 = vmatpush3.bf16.msra.mxu1 %v16785_v52  ;;  %13804 = vmatprep.subr.bf16.mxu0 %v16788_v15  ;;  %18134 = vst [vmem:[#allocation97_spill] sm:$0xff] %v16797_v39  ;;  %18136 = vst [vmem:[#allocation99_spill] sm:$0xff] %v16803_v16  ;;  %v16808_v30 = vld [vmem:[#allocation12 + $0x100] sm:$0xff]   ;;  %v16877_v42 = vld [vmem:[#allocation12 + $0x128] sm:$0xff]  }
 0x8ae   :  { %13826 = vmatprep.subr.bf16.mxu1 %v16791_v3  ;;  %18137 = vst [vmem:[#allocation100_spill] sm:$0xff] %v16808_v30  ;;  %v18157_v3 = vld [vmem:[#allocation60_spill] sm:$0xff]  ;;  %v16884_v57 = vld [vmem:[#allocation12 + $0x170] sm:$0xff]  }
 0x8b0   :  { %13805 = vmatpush3.bf16.msra.mxu0 %v16794_v23  ;;  %v16812_v23 = vld [vmem:[#allocation12 + $0x180] sm:$0xff]  }
 0x8b1   :  { %13827 = vmatpush3.bf16.msra.mxu1 %v16797_v39  ;;  %13834 = vmatprep.subr.bf16.mxu0 %v16800_v21  ;;  %18138 = vst [vmem:[#allocation101_spill] sm:$0xff] %v16812_v23  ;;  %v16816_v21 = vld [vmem:[#allocation12 + $0x148] sm:$0xff]  }
 0x8b2   :  { %13856 = vmatprep.subr.bf16.mxu1 %v16803_v16  ;;  %18139 = vst [vmem:[#allocation102_spill] sm:$0xff] %v16816_v21  ;;  %v16819_v16 = vld [vmem:[#allocation12 + $0x1c8] sm:$0xff]  }
 0x8b3   :  { %11106 = vmatmul.mubr.bf16.vlgmr.msra.gmra.mrb[148].mxu0 %v16634_v8  ;;  %18140 = vst [vmem:[#allocation103_spill] sm:$0xff] %v16819_v16  ;;  %v16822_v8 = vld [vmem:[#allocation12 + $0x108] sm:$0xff]  }
 0x8b4   :  { %11146 = vmatmul.mubr.bf16.vlgmr.msra.gmra.mrb[148].mxu1 %v16638_v26  ;;  %13835 = vmatpush3.bf16.msra.mxu0 %v16808_v30  ;;  %18141 = vst [vmem:[#allocation104_spill] sm:$0xff] %v16822_v8  ;;  %v16825_v26 = vld [vmem:[#allocation12 + $0x188] sm:$0xff]   ;;  %v16867_v30 = vld [vmem:[#allocation12 + $0x1a0] sm:$0xff]  }
 0x8b5   :  { %11185 = vmatprep.mubr.bf16.mxu0 %v16642_v25  ;;  %13857 = vmatpush3.bf16.msra.mxu1 %v16812_v23  ;;  %18142 = vst [vmem:[#allocation105_spill] sm:$0xff] %v16825_v26  ;;  %v16828_v25 = vld [vmem:[#allocation12 + $0x150] sm:$0xff]   ;;  %v16851_v23 = vld [vmem:[#allocation12 + $0x198] sm:$0xff]   ;;  %18154 = vst [vmem:[#allocation29_spill] sm:$0xff] %v16867_v30 }
 0x8b6   :  { %11225 = vmatprep.mubr.bf16.mxu1 %v16646_v50  ;;  %13836 = vmatprep.subr.bf16.mxu0 %v16816_v21  ;;  %18143 = vst [vmem:[#allocation106_spill] sm:$0xff] %v16828_v25  ;;  %v16831_v50 = vld [vmem:[#allocation12 + $0x1d0] sm:$0xff]   ;;  %18150 = vst [vmem:[#allocation22_spill] sm:$0xff] %v16851_v23 }
 0x8b7   :  { %13858 = vmatprep.subr.bf16.mxu1 %v16819_v16  ;;  %18144 = vst [vmem:[#allocation107_spill] sm:$0xff] %v16831_v50  ;;  %v16834_v21 = vld [vmem:[#allocation12 + $0x110] sm:$0xff]  }
 0x8b8   :  { %13837 = vmatpush3.bf16.msra.mxu0 %v16822_v8  ;;  %18145 = vst [vmem:[#allocation108_spill] sm:$0xff] %v16834_v21  ;;  %v16837_v16 = vld [vmem:[#allocation12 + $0x190] sm:$0xff]   ;;  %v16840_v8 = vld [vmem:[#allocation12 + $0x158] sm:$0xff]  }
 0x8b9   :  { %13859 = vmatpush3.bf16.msra.mxu1 %v16825_v26  ;;  %13838 = vmatprep.subr.bf16.mxu0 %v16828_v25  ;;  %18146 = vst [vmem:[#allocation109_spill] sm:$0xff] %v16837_v16  ;;  %18147 = vst [vmem:[#allocation110_spill] sm:$0xff] %v16840_v8  ;;  %v16843_v26 = vld [vmem:[#allocation12 + $0x1d8] sm:$0xff]  }
 0x8ba   :  { %13860 = vmatprep.subr.bf16.mxu1 %v16831_v50  ;;  %18148 = vst [vmem:[#allocation111_spill] sm:$0xff] %v16843_v26  ;;  %v16846_v25 = vld [vmem:[#allocation12 + $0x118] sm:$0xff]   ;;  %v16849_v50 = vld [vmem:[#allocation10 + $0x30] sm:$0xff] }
 0x8bb   :  { %18149 = vst [vmem:[#allocation112_spill] sm:$0xff] %v16846_v25 }
 0x8bc   :  { %13839 = vmatpush3.bf16.msra.mxu0 %v16834_v21  ;;  %v16854_v21 = vld [vmem:[#allocation12 + $0x160] sm:$0xff]  }
 0x8bd   :  { %13861 = vmatpush3.bf16.msra.mxu1 %v16837_v16  ;;  %13840 = vmatprep.subr.bf16.mxu0 %v16840_v8  ;;  %18151 = vst [vmem:[#allocation113_spill] sm:$0xff] %v16854_v21  ;;  %v16857_v16 = vld [vmem:[#allocation12 + $0x1e0] sm:$0xff]  }
 0x8be   :  { %13862 = vmatprep.subr.bf16.mxu1 %v16843_v26  ;;  %18152 = vst [vmem:[#allocation23_spill] sm:$0xff] %v16857_v16  ;;  %v1603_v26 = vrot.slane %v16849_v50, %v18036_v6  ;;  %v16862_v8 = vld [vmem:[#allocation12 + $0x120] sm:$0xff]  }
 0x8bf   :  { %18153 = vst [vmem:[#allocation28_spill] sm:$0xff] %v16862_v8 }
 0x8c0   :  { %13841 = vmatpush3.bf16.msra.mxu0 %v16846_v25  ;;  %v1611_v25 = vrot.slane %v16849_v50, %v18038_v14 }
 0x8c1   :  { %13863 = vmatpush3.bf16.msra.mxu1 %v16851_v23  ;;  %13842 = vmatprep.subr.bf16.mxu0 %v16854_v21  ;;  %v16870_v23 = vld [vmem:[#allocation12 + $0x168] sm:$0xff]  }
 0x8c2   :  { %13864 = vmatprep.subr.bf16.mxu1 %v16857_v16  ;;  %18155 = vst [vmem:[#allocation114_spill] sm:$0xff] %v16870_v23  ;;  %v16873_v16 = vld [vmem:[#allocation12 + $0x1e8] sm:$0xff]  }
 0x8c3   :  { %18156 = vst [vmem:[#allocation115_spill] sm:$0xff] %v16873_v16 }
 0x8c4   :  { %13843 = vmatpush3.bf16.msra.mxu0 %v16862_v8  ;;  %v7865_v8 = vadd.f32 %v18157_v3, %v1603_v26  ;;  %v16908_v26 = vld [vmem:[#allocation12 + $0x1b8] sm:$0xff]  }
 0x8c5   :  { %13865 = vmatpush3.bf16.msra.mxu1 %v16867_v30  ;;  %13844 = vmatprep.subr.bf16.mxu0 %v16870_v23  ;;  %v18158_v30 = vld [vmem:[#allocation61_spill] sm:$0xff] }
 0x8c6   :  { %v13542_v21 = vpop.f32.mrb[124].mxu0  ;;  %13866 = vmatprep.subr.bf16.mxu1 %v16873_v16  ;;  %v7906_v1 = vadd.f32 %v18158_v30, %v1611_v25  ;;  %vm8205_vm5 = vcmp.gt.f32.partialorder %v7865_v8, 0.0  ;;  %v16911_v25 = vld [vmem:[#allocation12 + $0x240] sm:$0xff]  }
 0x8c7   :  { %v13564_v6 = vpop.f32.mrb[124].mxu1  ;;  %v13543_v39 = vpop.f32.mrb[125].mxu0  ;;  %18160 = vst [vmem:[#allocation49_spill] sm:$0xff] %v16911_v25 }
 0x8c8   :  { %v13544_v15 = vadd.f32 %v13543_v39, %v13542_v21  ;;  %v13565_v52 = vpop.f32.mrb[125].mxu1  ;;  %v13545_v14 = vpop.f32.mrb[126].mxu0  ;;  %13845 = vmatpush3.bf16.msra.mxu0 %v16877_v42  ;;  %v16888_v39 = vld [vmem:[#allocation12 + $0x1f0] sm:$0xff]   ;;  %v8269_v21 = vmul.f32 0.2, %v7865_v8  ;;  %vm8207_vm6 = vcmp.gt.f32.partialorder %v7906_v1, 0.0 }
 0x8c9   :  { %v13566_v48 = vadd.f32 %v13565_v52, %v13564_v6  ;;  %v13567_v23 = vpop.f32.mrb[126].mxu1  ;;  %13867 = vmatpush3.bf16.msra.mxu1 %v16881_v33  ;;  %v13546_v16 = vpop.f32.mrb[127].mxu0  ;;  %13846 = vmatprep.subr.bf16.mxu0 %v16884_v57  ;;  %v16893_v6 = vld [vmem:[#allocation12 + $0x130] sm:$0xff]   ;;  %v8271_v52 = vmul.f32 0.2, %v7906_v1 }
 0x8ca   :  { %v10616_v3 = vadd.f32 %v13544_v15, %v16780_v35  ;;  %v13568_v14 = vpop.f32.mrb[127].mxu1  ;;  %13868 = vmatprep.subr.bf16.mxu1 %v16888_v39  ;;  %v16896_v23 = vld [vmem:[#allocation12 + $0x1b0] sm:$0xff]   ;;  %v16899_v16 = vld [vmem:[#allocation12 + $0x178] sm:$0xff]   ;;  %v8333_v15 = vsel %vm8205_vm5, %v7865_v8, %v8269_v21  ;;  %v16921_v8 = vld [vmem:[#allocation12 + $0x200] sm:$0xff]  }
 0x8cb   :  { %v16902_v35 = vld [vmem:[#allocation12 + $0x1f8] sm:$0xff]   ;;  %v16914_v14 = vld [vmem:[#allocation12 + $0x2c0] sm:$0xff]  }
 0x8cc   :  { %v16891_v30 = vadd.f32 %v13566_v48, %v10616_v3  ;;  %13847 = vmatpush3.bf16.msra.mxu0 %v16893_v6  ;;  %18159 = vst [vmem:[#allocation48_spill] sm:$0xff] %v16902_v35  ;;  %v16905_v48 = vld [vmem:[#allocation12 + $0x138] sm:$0xff]   ;;  %v8335_v3 = vsel %vm8207_vm6, %v7906_v1, %v8271_v52  ;;  %v16931_v1 = vld [vmem:[#allocation12 + $0x248] sm:$0xff]  }
 0x8cd   :  { %13869 = vmatpush3.bf16.msra.mxu1 %v16896_v23  ;;  %13848 = vmatprep.subr.bf16.mxu0 %v16899_v16  ;;  %v16924_v21 = vpack.c.bf16 %v8335_v3, %v8335_v3  ;;  %v18164_v3 = vld [vmem:[#allocation120_spill] sm:$0xff] }
 0x8ce   :  { %13870 = vmatprep.subr.bf16.mxu1 %v16902_v35  ;;  %v16918_v35 = vpack.c.bf16 %v8333_v15, %v8333_v15 }
 0x8d0   :  { %13849 = vmatpush3.bf16.msra.mxu0 %v16905_v48 }
 0x8d1   :  { %13871 = vmatpush3.bf16.msra.mxu1 %v16908_v26  ;;  %13878 = vmatprep.subr.bf16.mxu0 %v16911_v25  ;;  %v16927_v25 = vld [vmem:[#allocation12 + $0x280] sm:$0xff]  }
 0x8d2   :  { %13900 = vmatprep.subr.bf16.mxu1 %v16914_v14 }
 0x8d3   :  { %11186 = vmatmul.mubr.bf16.vlgmr.msra.gmra.mrb[152].mxu0 %v16692_v54  ;;  %v16934_v54 = vld [vmem:[#allocation12 + $0x2c8] sm:$0xff]  }
 0x8d4   :  { %11226 = vmatmul.mubr.bf16.vlgmr.msra.gmra.mrb[152].mxu1 %v16698_v32  ;;  %13879 = vmatpush3.bf16.msra.mxu0 %v16921_v8 }
 0x8d5   :  { %11265 = vmatprep.mubr.bf16.mxu0 %v16918_v35  ;;  %13901 = vmatpush3.bf16.msra.mxu1 %v16927_v25 }
 0x8d6   :  { %11305 = vmatprep.mubr.bf16.mxu1 %v16924_v21  ;;  %13880 = vmatprep.subr.bf16.mxu0 %v16931_v1 }
 0x8d7   :  { %13902 = vmatprep.subr.bf16.mxu1 %v16934_v54 }
 0x8d8   :  { %13881 = vmatpush3.bf16.msra.mxu0 %v18046_v31  ;;  %v1599_v31 = vrot.slane %v16849_v50, %v18057_v47 }
 0x8d9   :  { %13903 = vmatpush3.bf16.msra.mxu1 %v18047_v24  ;;  %13882 = vmatprep.subr.bf16.mxu0 %v18048_v9  ;;  %v1607_v24 = vrot.slane %v16849_v50, %v18059_v5  ;;  %v1619_v9 = vrot.slane %v16849_v50, %v18060_v62 }
 0x8da   :  { %13904 = vmatprep.subr.bf16.mxu1 %v18049_v27  ;;  %v1627_v27 = vrot.slane %v16849_v50, %v18062_v36 }
 0x8dc   :  { %13883 = vmatpush3.bf16.msra.mxu0 %v18050_v20  ;;  %v18161_v20 = vld [vmem:[#allocation58_spill] sm:$0xff] }
 0x8dd   :  { %13905 = vmatpush3.bf16.msra.mxu1 %v18051_v56  ;;  %13884 = vmatprep.subr.bf16.mxu0 %v18052_v51  ;;  %v7863_v56 = vadd.f32 %v18161_v20, %v1599_v31 }
 0x8de   :  { %13906 = vmatprep.subr.bf16.mxu1 %v18053_v17  ;;  %v18162_v17 = vld [vmem:[#allocation59_spill] sm:$0xff] }
 0x8df   :  { %vm8204_vm7 = vcmp.gt.f32.partialorder %v7863_v56, 0.0 }
 0x8e0   :  { %13885 = vmatpush3.bf16.msra.mxu0 %v18054_v34  ;;  %v7904_v34 = vadd.f32 %v18162_v17, %v1607_v24 }
 0x8e1   :  { %13907 = vmatpush3.bf16.msra.mxu1 %v18055_v59  ;;  %13886 = vmatprep.subr.bf16.mxu0 %v18056_v13 }
 0x8e2   :  { %13908 = vmatprep.subr.bf16.mxu1 %v18058_v61  ;;  %v18163_v61 = vld [vmem:[#allocation119_spill] sm:$0xff]  ;;  %vm8206_vm8 = vcmp.gt.f32.partialorder %v7904_v34, 0.0 }
 0x8e3   :  { %v7947_v32 = vadd.f32 %v18163_v61, %v1619_v9  ;;  %v8270_v9 = vmul.f32 0.2, %v7904_v34  ;;  %v18170_v61 = vld [vmem:[#allocation138_spill] sm:$0xff] }
 0x8e4   :  { %13887 = vmatpush3.bf16.msra.mxu0 %v18061_v60 }
 0x8e5   :  { %13909 = vmatpush3.bf16.msra.mxu1 %v18063_v44  ;;  %13888 = vmatprep.subr.bf16.mxu0 %v18064_v40  ;;  %v7988_v44 = vadd.f32 %v18164_v3, %v1627_v27  ;;  %vm8209_vm9 = vcmp.gt.f32.partialorder %v7947_v32, 0.0  ;;  %v18175_v3 = vld [vmem:[#allocation143_spill] sm:$0xff] }
 0x8e6   :  { %v13586_v51 = vpop.f32.mrb[128].mxu0  ;;  %13910 = vmatprep.subr.bf16.mxu1 %v16343_v53  ;;  %v8268_v53 = vmul.f32 0.2, %v7863_v56 }
 0x8e7   :  { %v13608_v59 = vpop.f32.mrb[128].mxu1  ;;  %v13587_v13 = vpop.f32.mrb[129].mxu0  ;;  %v8275_v27 = vmul.f32 0.2, %v7988_v44  ;;  %vm8211_vm10 = vcmp.gt.f32.partialorder %v7988_v44, 0.0 }
 0x8e8   :  { %v13588_v52 = vadd.f32 %v13587_v13, %v13586_v51  ;;  %v13609_v60 = vpop.f32.mrb[129].mxu1  ;;  %v13589_v15 = vpop.f32.mrb[130].mxu0  ;;  %13889 = vmatpush3.bf16.msra.mxu0 %v16348_v49  ;;  %v8273_v51 = vmul.f32 0.2, %v7947_v32 }
 0x8e9   :  { %v13610_v36 = vadd.f32 %v13609_v60, %v13608_v59  ;;  %v13611_v40 = vpop.f32.mrb[130].mxu1  ;;  %13911 = vmatpush3.bf16.msra.mxu1 %v16352_v63  ;;  %v13590_v31 = vpop.f32.mrb[131].mxu0  ;;  %13890 = vmatprep.subr.bf16.mxu0 %v18069_v10  ;;  %v8332_v63 = vsel %vm8204_vm7, %v7863_v56, %v8268_v53  ;;  %v8339_v13 = vsel %vm8211_vm10, %v7988_v44, %v8275_v27  ;;  %v18173_v60 = vld [vmem:[#allocation141_spill] sm:$0xff]  ;;  %v18174_v15 = vld [vmem:[#allocation142_spill] sm:$0xff]  ;;  %v18177_v53 = vld [vmem:[#allocation144_spill] sm:$0xff] }
 0x8ea   :  { %v10696_v24 = vadd.f32 %v13588_v52, %v16891_v30  ;;  %v13612_v20 = vpop.f32.mrb[131].mxu1  ;;  %13912 = vmatprep.subr.bf16.mxu1 %v18070_v38  ;;  %v8334_v30 = vsel %vm8206_vm8, %v7904_v34, %v8270_v9  ;;  %v8337_v17 = vsel %vm8209_vm9, %v7947_v32, %v8273_v51  ;;  %v16975_v59 = vpack.c.bf16 %v8332_v63, %v8332_v63  ;;  %v18169_v34 = vld [vmem:[#allocation137_spill] sm:$0xff]  ;;  %v18171_v32 = vld [vmem:[#allocation139_spill] sm:$0xff]  ;;  %v18172_v52 = vld [vmem:[#allocation140_spill] sm:$0xff] }
 0x8eb   :  { %v16987_v56 = vpack.c.bf16 %v8339_v13, %v8339_v13  ;;  %v18176_v40 = vld [vmem:[#allocation34_spill] sm:$0xff]  ;;  %v18180_v9 = vld [vmem:[#allocation67_spill] sm:$0xff]  ;;  %v18181_v51 = vld [vmem:[#allocation68_spill] sm:$0xff] }
 0x8ec   :  { %v10736_v49 = vadd.f32 %v13610_v36, %v10696_v24  ;;  %13891 = vmatpush3.bf16.msra.mxu0 %v18071_v45  ;;  %v18165_v36 = vld [vmem:[#allocation133_spill] sm:$0xff]  ;;  %v18166_v45 = vld [vmem:[#allocation134_spill] sm:$0xff]  ;;  %v18178_v24 = vld [vmem:[#allocation35_spill] sm:$0xff] }
 0x8ed   :  { %13913 = vmatpush3.bf16.msra.mxu1 %v18072_v4  ;;  %13892 = vmatprep.subr.bf16.mxu0 %v16368_v43  ;;  %v16979_v4 = vpack.c.bf16 %v8334_v30, %v8334_v30  ;;  %v18167_v43 = vld [vmem:[#allocation135_spill] sm:$0xff]  ;;  %v18179_v20 = vld [vmem:[#allocation66_spill] sm:$0xff]  ;;  %v18183_v27 = vld [vmem:[#allocation80_spill] sm:$0xff] }
 0x8ee   :  { %v10741_v10 = vsub.f32 0.0, %v10736_v49  ;;  %13914 = vmatprep.subr.bf16.mxu1 %v18073_v18  ;;  %v16983_v18 = vpack.c.bf16 %v8337_v17, %v8337_v17  ;;  %v18182_v49 = vld [vmem:[#allocation69_spill] sm:$0xff]  ;;  %v1615_v63 = vrot.slane %v16849_v50, %v18183_v27  ;;  %v18185_v30 = vld [vmem:[#allocation82_spill] sm:$0xff]  ;;  %v18186_v17 = vld [vmem:[#allocation71_spill] sm:$0xff] }
 0x8f0   :  { %v10742_v38 = vmul.f32 1.442695, %v10741_v10  ;;  %13893 = vmatpush3.bf16.msra.mxu0 %v18074_v41  ;;  %v18168_v41 = vld [vmem:[#allocation136_spill] sm:$0xff]  ;;  %v18184_v10 = vld [vmem:[#allocation70_spill] sm:$0xff] }
 0x8f1   :  { %13915 = vmatpush3.bf16.msra.mxu1 %v18165_v36  ;;  %13922 = vmatprep.subr.bf16.mxu0 %v18166_v45  ;;  %v18187_v36 = vld [vmem:[#allocation73_spill] sm:$0xff]  ;;  %v18188_v45 = vld [vmem:[#allocation116_spill] sm:$0xff] }
 0x8f2   :  { %14333 = vpow2.f32 %v10742_v38  ;;  %13944 = vmatprep.subr.bf16.mxu1 %v18167_v43  ;;  %v1623_v38 = vrot.slane %v16849_v50, %v18185_v30  ;;  %v7945_v13 = vadd.f32 %v18188_v45, %v1615_v63  ;;  %v18200_v63 = vld [vmem:[#allocation89_spill] sm:$0xff]  ;;  %v18207_v45 = vld [vmem:[#allocation39_spill] sm:$0xff] }
 0x8f3   :  { %11266 = vmatmul.mubr.bf16.vlgmr.msra.gmra.mrb[156].mxu0 %v16975_v59 }
 0x8f4   :  { %11306 = vmatmul.mubr.bf16.vlgmr.msra.gmra.mrb[156].mxu1 %v16979_v4  ;;  %13923 = vmatpush3.bf16.msra.mxu0 %v18168_v41  ;;  %v18189_v41 = vld [vmem:[#allocation118_spill] sm:$0xff]  ;;  %vm8208_vm11 = vcmp.gt.f32.partialorder %v7945_v13, 0.0 }
 0x8f5   :  { %11345 = vmatprep.mubr.bf16.mxu0 %v16983_v18  ;;  %13945 = vmatpush3.bf16.msra.mxu1 %v18169_v34  ;;  %v7986_v34 = vadd.f32 %v18189_v41, %v1623_v38  ;;  %v18203_v38 = vld [vmem:[#allocation41_spill] sm:$0xff]  ;;  %v18210_v41 = vld [vmem:[#allocation42_spill] sm:$0xff] }
 0x8f6   :  { %11385 = vmatprep.mubr.bf16.mxu1 %v16987_v56  ;;  %13924 = vmatprep.subr.bf16.mxu0 %v18170_v61 }
 0x8f7   :  { %13946 = vmatprep.subr.bf16.mxu1 %v18171_v32  ;;  %vm8210_vm12 = vcmp.gt.f32.partialorder %v7986_v34, 0.0 }
 0x8f8   :  { %13925 = vmatpush3.bf16.msra.mxu0 %v18172_v52 }
 0x8f9   :  { %13947 = vmatpush3.bf16.msra.mxu1 %v18173_v60  ;;  %13926 = vmatprep.subr.bf16.mxu0 %v18174_v15 }
 0x8fa   :  { %13948 = vmatprep.subr.bf16.mxu1 %v18175_v3 }
 0x8fc   :  { %v14334_v44 = vpop.eup %14333  ;;  %13927 = vmatpush3.bf16.msra.mxu0 %v18176_v40  ;;  %v8272_v40 = vmul.f32 0.2, %v7945_v13 }
 0x8fd   :  { %v10744_v31 = vadd.f32 1.0, %v14334_v44  ;;  %13949 = vmatpush3.bf16.msra.mxu1 %v18177_v53  ;;  %13928 = vmatprep.subr.bf16.mxu0 %v18178_v24 }
 0x8fe   :  { %13950 = vmatprep.subr.bf16.mxu1 %v18179_v20 }
 0x8ff   :  { %14335 = vrcp.f32 %v10744_v31 }
 0x900   :  { %13929 = vmatpush3.bf16.msra.mxu0 %v18180_v9  ;;  %v18191_v9 = vld [vmem:[#allocation77_spill] sm:$0xff] }
 0x901   :  { %13951 = vmatpush3.bf16.msra.mxu1 %v18181_v51  ;;  %13930 = vmatprep.subr.bf16.mxu0 %v18182_v49  ;;  %v18198_v51 = vld [vmem:[#allocation86_spill] sm:$0xff]  ;;  %v18199_v49 = vld [vmem:[#allocation88_spill] sm:$0xff] }
 0x902   :  { %13952 = vmatprep.subr.bf16.mxu1 %v18184_v10  ;;  %v18201_v10 = vld [vmem:[#allocation90_spill] sm:$0xff] }
 0x904   :  { %13931 = vmatpush3.bf16.msra.mxu0 %v18186_v17  ;;  %v18205_v17 = vld [vmem:[#allocation121_spill] sm:$0xff] }
 0x905   :  { %13953 = vmatpush3.bf16.msra.mxu1 %v18097_v58  ;;  %13932 = vmatprep.subr.bf16.mxu0 %v18187_v36  ;;  %v18206_v36 = vld [vmem:[#allocation38_spill] sm:$0xff] }
 0x906   :  { %v13630_v43 = vpop.f32.mrb[132].mxu0  ;;  %13954 = vmatprep.subr.bf16.mxu1 %v18100_v29 }
 0x907   :  { %v13652_v61 = vpop.f32.mrb[132].mxu1  ;;  %v13631_v32 = vpop.f32.mrb[133].mxu0 }
 0x908   :  { %v13632_v52 = vadd.f32 %v13631_v32, %v13630_v43  ;;  %v13653_v60 = vpop.f32.mrb[133].mxu1  ;;  %v13633_v15 = vpop.f32.mrb[134].mxu0  ;;  %13933 = vmatpush3.bf16.msra.mxu0 %v16465_v7  ;;  %v8274_v7 = vmul.f32 0.2, %v7986_v34  ;;  %v18209_v43 = vld [vmem:[#allocation45_spill] sm:$0xff] }
 0x909   :  { %v14336_v50 = vpop.eup %14335  ;;  %v13654_v3 = vadd.f32 %v13653_v60, %v13652_v61  ;;  %v13655_v44 = vpop.f32.mrb[134].mxu1  ;;  %13955 = vmatpush3.bf16.msra.mxu1 %v16468_v28  ;;  %13934 = vmatprep.subr.bf16.mxu0 %v16471_v0  ;;  %v8336_v0 = vsel %vm8208_vm11, %v7945_v13, %v8272_v40  ;;  %v18208_v13 = vld [vmem:[#allocation44_spill] sm:$0xff]  ;;  %v18211_v61 = vld [vmem:[#allocation43_spill] sm:$0xff] }
 0x90a   :  { %v13634_v58 = vpop.f32.mrb[135].mxu0  ;;  %10746 = vst [vmem:[%s17163_s9 + $0x18] sm:$0xff] %v14336_v50  ;;  %v10782_v29 = vadd.f32 %v16681_v12, %v13632_v52  ;;  %v13656_v31 = vpop.f32.mrb[135].mxu1  ;;  %13956 = vmatprep.subr.bf16.mxu1 %v16478_v19  ;;  %v8338_v28 = vsel %vm8210_vm12, %v7986_v34, %v8274_v7  ;;  %v17029_v24 = vpack.c.bf16 %v8336_v0, %v8336_v0  ;;  %v18190_v19 = vld [vmem:[#allocation76_spill] sm:$0xff]  ;;  %v18213_v40 = vld [vmem:[#allocation87_spill] sm:$0xff] }
 0x90b   :  { %v17033_v20 = vpack.c.bf16 %v8338_v28, %v8338_v28  ;;  %v18214_v31 = vld [vmem:[#allocation25_spill] sm:$0xff]  ;;  %v18215_v28 = vld [vmem:[#allocation91_spill] sm:$0xff] }
 0x90c   :  { %v10822_v53 = vadd.f32 %v13654_v3, %v10782_v29  ;;  %13935 = vmatpush3.bf16.msra.mxu0 %v16481_v46  ;;  %v18192_v46 = vld [vmem:[#allocation78_spill] sm:$0xff]  ;;  %v18212_v3 = vld [vmem:[#allocation24_spill] sm:$0xff] }
 0x90d   :  { %13957 = vmatpush3.bf16.msra.mxu1 %v18102_v2  ;;  %13936 = vmatprep.subr.bf16.mxu0 %v16487_v22  ;;  %v18193_v22 = vld [vmem:[#allocation79_spill] sm:$0xff]  ;;  %v18197_v2 = vld [vmem:[#allocation85_spill] sm:$0xff] }
 0x90e   :  { %13958 = vmatprep.subr.bf16.mxu1 %v16490_v55  ;;  %v18194_v55 = vld [vmem:[#allocation81_spill] sm:$0xff] }
 0x910   :  { %13937 = vmatpush3.bf16.msra.mxu0 %v16493_v11  ;;  %v18195_v11 = vld [vmem:[#allocation83_spill] sm:$0xff] }
 0x911   :  { %13959 = vmatpush3.bf16.msra.mxu1 %v16498_v37  ;;  %13966 = vmatprep.subr.bf16.mxu0 %v18190_v19  ;;  %v18196_v37 = vld [vmem:[#allocation84_spill] sm:$0xff] }
 0x912   :  { %13988 = vmatprep.subr.bf16.mxu1 %v18191_v9  ;;  %v18216_v9 = vld [vmem:[#allocation92_spill] sm:$0xff] }
 0x913   :  { %11346 = vmatmul.mubr.bf16.vlgmr.msra.gmra.mrb[160].mxu0 %v17029_v24 }
 0x914   :  { %11386 = vmatmul.mubr.bf16.vlgmr.msra.gmra.mrb[160].mxu1 %v17033_v20  ;;  %13967 = vmatpush3.bf16.msra.mxu0 %v18192_v46  ;;  %v18217_v46 = vld [vmem:[#allocation93_spill] sm:$0xff] }
 0x915   :  { %11431 = vmatprep.mubr.bf16.mxu0 %v16918_v35  ;;  %13989 = vmatpush3.bf16.msra.mxu1 %v18193_v22  ;;  %v18202_v35 = vld [vmem:[#allocation40_spill] sm:$0xff]  ;;  %v18218_v22 = vld [vmem:[#allocation94_spill] sm:$0xff] }
 0x916   :  { %11471 = vmatprep.mubr.bf16.mxu1 %v16924_v21  ;;  %13968 = vmatprep.subr.bf16.mxu0 %v18194_v55  ;;  %v18204_v21 = vld [vmem:[#allocation117_spill] sm:$0xff]  ;;  %v18219_v55 = vld [vmem:[#allocation95_spill] sm:$0xff] }
 0x917   :  { %13990 = vmatprep.subr.bf16.mxu1 %v18195_v11  ;;  %v18220_v11 = vld [vmem:[#allocation96_spill] sm:$0xff] }
 0x918   :  { %13969 = vmatpush3.bf16.msra.mxu0 %v18196_v37  ;;  %v18221_v37 = vld [vmem:[#allocation97_spill] sm:$0xff] }
 0x919   :  { %13991 = vmatpush3.bf16.msra.mxu1 %v18197_v2  ;;  %13970 = vmatprep.subr.bf16.mxu0 %v18198_v51  ;;  %v18222_v2 = vld [vmem:[#allocation98_spill] sm:$0xff]  ;;  %v18223_v51 = vld [vmem:[#allocation99_spill] sm:$0xff] }
 0x91a   :  { %13992 = vmatprep.subr.bf16.mxu1 %v18199_v49  ;;  %v18225_v49 = vld [vmem:[#allocation101_spill] sm:$0xff] }
 0x91c   :  { %13971 = vmatpush3.bf16.msra.mxu0 %v18200_v63  ;;  %v18226_v63 = vld [vmem:[#allocation102_spill] sm:$0xff] }
 0x91d   :  { %13993 = vmatpush3.bf16.msra.mxu1 %v18201_v10  ;;  %13972 = vmatprep.subr.bf16.mxu0 %v18202_v35  ;;  %v18227_v10 = vld [vmem:[#allocation103_spill] sm:$0xff]  ;;  %v18228_v35 = vld [vmem:[#allocation104_spill] sm:$0xff] }
 0x91e   :  { %13994 = vmatprep.subr.bf16.mxu1 %v18203_v38  ;;  %v18229_v38 = vld [vmem:[#allocation105_spill] sm:$0xff] }
 0x920   :  { %13973 = vmatpush3.bf16.msra.mxu0 %v18204_v21  ;;  %v18230_v21 = vld [vmem:[#allocation106_spill] sm:$0xff] }
 0x921   :  { %13995 = vmatpush3.bf16.msra.mxu1 %v18205_v17  ;;  %13974 = vmatprep.subr.bf16.mxu0 %v18206_v36  ;;  %v18233_v17 = vld [vmem:[#allocation109_spill] sm:$0xff]  ;;  %v18235_v36 = vld [vmem:[#allocation111_spill] sm:$0xff] }
 0x922   :  { %13996 = vmatprep.subr.bf16.mxu1 %v18207_v45  ;;  %v17089_v45 = vld [vmem:[#allocation10 + $0x38] sm:$0xff] }
 0x924   :  { %13975 = vmatpush3.bf16.msra.mxu0 %v18208_v13  ;;  %v18237_v13 = vld [vmem:[#allocation22_spill] sm:$0xff] }
 0x925   :  { %13997 = vmatpush3.bf16.msra.mxu1 %v18209_v43  ;;  %13976 = vmatprep.subr.bf16.mxu0 %v18210_v41  ;;  %v18238_v43 = vld [vmem:[#allocation113_spill] sm:$0xff]  ;;  %v18239_v41 = vld [vmem:[#allocation23_spill] sm:$0xff] }
 0x926   :  { %v13674_v34 = vpop.f32.mrb[136].mxu0  ;;  %13998 = vmatprep.subr.bf16.mxu1 %v18211_v61 }
 0x927   :  { %v13696_v32 = vpop.f32.mrb[136].mxu1  ;;  %v13675_v52 = vpop.f32.mrb[137].mxu0 }
 0x928   :  { %v13676_v60 = vadd.f32 %v13675_v52, %v13674_v34  ;;  %v13697_v15 = vpop.f32.mrb[137].mxu1  ;;  %v13677_v50 = vpop.f32.mrb[138].mxu0  ;;  %13977 = vmatpush3.bf16.msra.mxu0 %v18212_v3  ;;  %v18240_v34 = vld [vmem:[#allocation21_spill] sm:$0xff]  ;;  %v18242_v52 = vld [vmem:[#allocation54_spill] sm:$0xff] }
 0x929   :  { %v13698_v44 = vadd.f32 %v13697_v15, %v13696_v32  ;;  %v13699_v58 = vpop.f32.mrb[138].mxu1  ;;  %13999 = vmatpush3.bf16.msra.mxu1 %v18213_v40  ;;  %v13678_v29 = vpop.f32.mrb[139].mxu0  ;;  %13978 = vmatprep.subr.bf16.mxu0 %v18214_v31  ;;  %v1635_v61 = vrot.slane %v17089_v45, %v18240_v34  ;;  %v18241_v32 = vld [vmem:[#allocation28_spill] sm:$0xff]  ;;  %v18243_v15 = vld [vmem:[#allocation29_spill] sm:$0xff]  ;;  %v18244_v50 = vld [vmem:[#allocation114_spill] sm:$0xff] }
 0x92a   :  { %v10862_v7 = vadd.f32 %v13676_v60, %v10822_v53  ;;  %v13700_v0 = vpop.f32.mrb[139].mxu1  ;;  %14000 = vmatprep.subr.bf16.mxu1 %v18215_v28  ;;  %v18224_v53 = vld [vmem:[#allocation100_spill] sm:$0xff]  ;;  %v1643_v60 = vrot.slane %v17089_v45, %v18242_v52  ;;  %v18246_v29 = vld [vmem:[#allocation151_spill] sm:$0xff] }
 0x92b   :  { %v8029_v31 = vadd.f32 %v18246_v29, %v1635_v61  ;;  %v18253_v61 = vld [vmem:[#allocation64_spill] sm:$0xff] }
 0x92c   :  { %v10902_v19 = vadd.f32 %v13698_v44, %v10862_v7  ;;  %13979 = vmatpush3.bf16.msra.mxu0 %v18216_v9  ;;  %v18245_v44 = vld [vmem:[#allocation115_spill] sm:$0xff]  ;;  %v18247_v9 = vld [vmem:[#allocation152_spill] sm:$0xff] }
 0x92d   :  { %14001 = vmatpush3.bf16.msra.mxu1 %v18217_v46  ;;  %13980 = vmatprep.subr.bf16.mxu0 %v18218_v22  ;;  %v8070_v46 = vadd.f32 %v18247_v9, %v1643_v60  ;;  %vm8213_vm13 = vcmp.gt.f32.partialorder %v8029_v31, 0.0  ;;  %v14567_v9 = vld [vmem:[#allocation12 + $0x2f0] sm:$0xff]  }
 0x92e   :  { %14002 = vmatprep.subr.bf16.mxu1 %v18219_v55 }
 0x92f   :  { %vm8215_vm14 = vcmp.gt.f32.partialorder %v8070_v46, 0.0 }
 0x930   :  { %13981 = vmatpush3.bf16.msra.mxu0 %v18220_v11 }
 0x931   :  { %14003 = vmatpush3.bf16.msra.mxu1 %v18221_v37  ;;  %14010 = vmatprep.subr.bf16.mxu0 %v18222_v2 }
 0x932   :  { %14032 = vmatprep.subr.bf16.mxu1 %v18223_v51  ;;  %v8277_v51 = vmul.f32 0.2, %v8029_v31 }
 0x933   :  { %11432 = vmatmul.mubr.bf16.vlgmr.msra.gmra.mrb[164].mxu0 %v16975_v59  ;;  %v18231_v59 = vld [vmem:[#allocation107_spill] sm:$0xff] }
 0x934   :  { %11472 = vmatmul.mubr.bf16.vlgmr.msra.gmra.mrb[164].mxu1 %v16979_v4  ;;  %14011 = vmatpush3.bf16.msra.mxu0 %v18224_v53  ;;  %v18232_v4 = vld [vmem:[#allocation108_spill] sm:$0xff] }
 0x935   :  { %11511 = vmatprep.mubr.bf16.mxu0 %v16983_v18  ;;  %14033 = vmatpush3.bf16.msra.mxu1 %v18225_v49  ;;  %v18234_v18 = vld [vmem:[#allocation110_spill] sm:$0xff] }
 0x936   :  { %11551 = vmatprep.mubr.bf16.mxu1 %v16987_v56  ;;  %14012 = vmatprep.subr.bf16.mxu0 %v18226_v63  ;;  %v18236_v56 = vld [vmem:[#allocation112_spill] sm:$0xff]  ;;  %v14556_v49 = vld [vmem:[#allocation12 + $0x218] sm:$0xff]   ;;  %v1631_v63 = vrot.slane %v17089_v45, %v18057_v47 }
 0x937   :  { %14034 = vmatprep.subr.bf16.mxu1 %v18227_v10  ;;  %v14559_v10 = vld [vmem:[#allocation12 + $0x2e0] sm:$0xff]  }
 0x938   :  { %14013 = vmatpush3.bf16.msra.mxu0 %v18228_v35  ;;  %v1639_v35 = vrot.slane %v17089_v45, %v18059_v5 }
 0x939   :  { %14035 = vmatpush3.bf16.msra.mxu1 %v18229_v38  ;;  %14014 = vmatprep.subr.bf16.mxu0 %v18230_v21  ;;  %v1651_v38 = vrot.slane %v17089_v45, %v18060_v62  ;;  %v14560_v21 = vld [vmem:[#allocation12 + $0x220] sm:$0xff]  }
 0x93a   :  { %14036 = vmatprep.subr.bf16.mxu1 %v18231_v59  ;;  %v18250_v59 = vld [vmem:[#allocation57_spill] sm:$0xff] }
 0x93b   :  { %v8111_v62 = vadd.f32 %v18253_v61, %v1651_v38  ;;  %v14583_v38 = vld [vmem:[#allocation12 + $0x3d0] sm:$0xff]   ;;  %v14593_v61 = vld [vmem:[#allocation12 + $0x3a0] sm:$0xff]  }
 0x93c   :  { %14015 = vmatpush3.bf16.msra.mxu0 %v18232_v4  ;;  %v1659_v4 = vrot.slane %v17089_v45, %v18250_v59  ;;  %v14584_v59 = vld [vmem:[#allocation12 + $0x310] sm:$0xff]  }
 0x93d   :  { %14037 = vmatpush3.bf16.msra.mxu1 %v18233_v17  ;;  %14016 = vmatprep.subr.bf16.mxu0 %v18234_v18  ;;  %v14561_v17 = vld [vmem:[#allocation12 + $0x2a0] sm:$0xff]   ;;  %v14562_v18 = vld [vmem:[#allocation12 + $0x268] sm:$0xff]   ;;  %vm8217_vm1 = vcmp.gt.f32.partialorder %v8111_v62, 0.0 }
 0x93e   :  { %14038 = vmatprep.subr.bf16.mxu1 %v18235_v36  ;;  %v18251_v36 = vld [vmem:[#allocation149_spill] sm:$0xff] }
 0x940   :  { %14017 = vmatpush3.bf16.msra.mxu0 %v18236_v56  ;;  %v8027_v56 = vadd.f32 %v18251_v36, %v1631_v63  ;;  %v14580_v63 = vld [vmem:[#allocation12 + $0x308] sm:$0xff]   ;;  %v14587_v36 = vld [vmem:[#allocation12 + $0x3d8] sm:$0xff]  }
 0x941   :  { %14039 = vmatpush3.bf16.msra.mxu1 %v18237_v13  ;;  %14018 = vmatprep.subr.bf16.mxu0 %v18238_v43  ;;  %v14563_v13 = vld [vmem:[#allocation12 + $0x2e8] sm:$0xff]   ;;  %v18252_v43 = vld [vmem:[#allocation150_spill] sm:$0xff] }
 0x942   :  { %14040 = vmatprep.subr.bf16.mxu1 %v18239_v41  ;;  %v8068_v41 = vadd.f32 %v18252_v43, %v1639_v35  ;;  %vm8212_vm15 = vcmp.gt.f32.partialorder %v8027_v56, 0.0  ;;  %v14582_v35 = vld [vmem:[#allocation12 + $0x350] sm:$0xff]   ;;  %v1647_v43 = vrot.slane %v17089_v45, %v18183_v27 }
 0x944   :  { %14019 = vmatpush3.bf16.msra.mxu0 %v18241_v32  ;;  %vm8214_vm0 = vcmp.gt.f32.partialorder %v8068_v41, 0.0 }
 0x945   :  { %14041 = vmatpush3.bf16.msra.mxu1 %v18243_v15  ;;  %14020 = vmatprep.subr.bf16.mxu0 %v18244_v50  ;;  %v14564_v15 = vld [vmem:[#allocation12 + $0x228] sm:$0xff]  }
 0x946   :  { %v13718_v3 = vpop.f32.mrb[140].mxu0  ;;  %14042 = vmatprep.subr.bf16.mxu1 %v18245_v44  ;;  %v18254_v50 = vld [vmem:[#allocation65_spill] sm:$0xff] }
 0x947   :  { %v13740_v58 = vpop.f32.mrb[140].mxu1  ;;  %v13719_v40 = vpop.f32.mrb[141].mxu0 }
 0x948   :  { %v13720_v7 = vadd.f32 %v13719_v40, %v13718_v3  ;;  %v13741_v0 = vpop.f32.mrb[141].mxu1  ;;  %v13721_v28 = vpop.f32.mrb[142].mxu0  ;;  %14021 = vmatpush3.bf16.msra.mxu0 %v16877_v42  ;;  %v8279_v42 = vmul.f32 0.2, %v8070_v46  ;;  %v8152_v3 = vadd.f32 %v18254_v50, %v1659_v4  ;;  %v14565_v40 = vld [vmem:[#allocation12 + $0x2a8] sm:$0xff]   ;;  %v18256_v50 = vld [vmem:[#allocation63_spill] sm:$0xff] }
 0x949   :  { %v13742_v22 = vadd.f32 %v13741_v0, %v13740_v58  ;;  %v13743_v55 = vpop.f32.mrb[142].mxu1  ;;  %14043 = vmatpush3.bf16.msra.mxu1 %v16881_v33  ;;  %v13722_v11 = vpop.f32.mrb[143].mxu0  ;;  %14022 = vmatprep.subr.bf16.mxu0 %v16884_v57  ;;  %v18248_v33 = vld [vmem:[#allocation48_spill] sm:$0xff]  ;;  %v8341_v57 = vsel %vm8213_vm13, %v8029_v31, %v8277_v51  ;;  %v14566_v31 = vld [vmem:[#allocation12 + $0x270] sm:$0xff]   ;;  %v14570_v51 = vld [vmem:[#allocation12 + $0x278] sm:$0xff]  }
 0x94a   :  { %v10942_v37 = vadd.f32 %v13720_v7, %v10902_v19  ;;  %v13744_v2 = vpop.f32.mrb[143].mxu1  ;;  %14044 = vmatprep.subr.bf16.mxu1 %v16888_v39  ;;  %v18249_v39 = vld [vmem:[#allocation49_spill] sm:$0xff]  ;;  %v8343_v19 = vsel %vm8215_vm14, %v8070_v46, %v8279_v42  ;;  %v8276_v7 = vmul.f32 0.2, %v8027_v56  ;;  %v8278_v46 = vmul.f32 0.2, %v8068_v41 }
 0x94b   :  { %v14568_v11 = vld [vmem:[#allocation12 + $0x230] sm:$0xff]   ;;  %vm8219_vm2 = vcmp.gt.f32.partialorder %v8152_v3, 0.0 }
 0x94c   :  { %v17108_v53 = vadd.f32 %v13742_v22, %v10942_v37  ;;  %14023 = vmatpush3.bf16.msra.mxu0 %v16893_v6  ;;  %v8405_v6 = vpack.c.bf16 %v8341_v57, %v8341_v57  ;;  %v8281_v22 = vmul.f32 0.2, %v8111_v62  ;;  %v8283_v37 = vmul.f32 0.2, %v8152_v3  ;;  %v14569_v2 = vld [vmem:[#allocation12 + $0x2b0] sm:$0xff]  }
 0x94d   :  { %14045 = vmatpush3.bf16.msra.mxu1 %v16896_v23  ;;  %14024 = vmatprep.subr.bf16.mxu0 %v16899_v16  ;;  %v8407_v23 = vpack.c.bf16 %v8343_v19, %v8343_v19  ;;  %v14548_v16 = vld [vmem:[#allocation12 + $0x208] sm:$0xff]   ;;  %v8340_v42 = vsel %vm8212_vm15, %v8027_v56, %v8276_v7  ;;  %v8342_v57 = vsel %vm8214_vm0, %v8068_v41, %v8278_v46  ;;  %v14572_v19 = vld [vmem:[#allocation12 + $0x238] sm:$0xff]   ;;  %v14591_v41 = vld [vmem:[#allocation12 + $0x3e0] sm:$0xff]  }
 0x94e   :  { %14046 = vmatprep.subr.bf16.mxu1 %v18248_v33  ;;  %v14588_v56 = vld [vmem:[#allocation12 + $0x318] sm:$0xff]  }
 0x950   :  { %14025 = vmatpush3.bf16.msra.mxu0 %v16905_v48  ;;  %v14549_v48 = vld [vmem:[#allocation12 + $0x288] sm:$0xff]  }
 0x951   :  { %14047 = vmatpush3.bf16.msra.mxu1 %v16908_v26  ;;  %14054 = vmatprep.subr.bf16.mxu0 %v18249_v39  ;;  %v14550_v26 = vld [vmem:[#allocation12 + $0x250] sm:$0xff]  }
 0x952   :  { %14076 = vmatprep.subr.bf16.mxu1 %v16914_v14  ;;  %v14551_v14 = vld [vmem:[#allocation12 + $0x2d0] sm:$0xff]  }
 0x953   :  { %11512 = vmatmul.mubr.bf16.vlgmr.msra.gmra.mrb[168].mxu0 %v17029_v24  ;;  %v14552_v24 = vld [vmem:[#allocation12 + $0x210] sm:$0xff]  }
 0x954   :  { %11552 = vmatmul.mubr.bf16.vlgmr.msra.gmra.mrb[168].mxu1 %v17033_v20  ;;  %14055 = vmatpush3.bf16.msra.mxu0 %v16921_v8  ;;  %v14553_v8 = vld [vmem:[#allocation12 + $0x290] sm:$0xff]   ;;  %v14554_v20 = vld [vmem:[#allocation12 + $0x258] sm:$0xff]  }
 0x955   :  { %11591 = vmatprep.mubr.bf16.mxu0 %v8405_v6  ;;  %14077 = vmatpush3.bf16.msra.mxu1 %v16927_v25  ;;  %v14555_v25 = vld [vmem:[#allocation12 + $0x2d8] sm:$0xff]   ;;  %v8345_v6 = vsel %vm8217_vm1, %v8111_v62, %v8281_v22  ;;  %v14594_v62 = vld [vmem:[#allocation12 + $0x368] sm:$0xff]  }
 0x956   :  { %11631 = vmatprep.mubr.bf16.mxu1 %v8407_v23  ;;  %14056 = vmatprep.subr.bf16.mxu0 %v16931_v1  ;;  %v14557_v1 = vld [vmem:[#allocation12 + $0x298] sm:$0xff]   ;;  %v8404_v23 = vpack.c.bf16 %v8340_v42, %v8340_v42  ;;  %v14601_v42 = vld [vmem:[#allocation12 + $0x3b0] sm:$0xff]  }
 0x957   :  { %14078 = vmatprep.subr.bf16.mxu1 %v16934_v54  ;;  %v14558_v54 = vld [vmem:[#allocation12 + $0x260] sm:$0xff]  }
 0x958   :  { %14057 = vmatpush3.bf16.msra.mxu0 %v14548_v16  ;;  %v14573_v16 = vld [vmem:[#allocation12 + $0x2b8] sm:$0xff]  }
 0x959   :  { %14079 = vmatpush3.bf16.msra.mxu1 %v14549_v48  ;;  %14058 = vmatprep.subr.bf16.mxu0 %v14550_v26  ;;  %v14574_v48 = vld [vmem:[#allocation12 + $0x340] sm:$0xff]   ;;  %v8347_v26 = vsel %vm8219_vm2, %v8152_v3, %v8283_v37 }
 0x95a   :  { %14080 = vmatprep.subr.bf16.mxu1 %v14551_v14  ;;  %v8406_v14 = vpack.c.bf16 %v8342_v57, %v8342_v57  ;;  %v14603_v57 = vld [vmem:[#allocation12 + $0x3f8] sm:$0xff]  }
 0x95c   :  { %14059 = vmatpush3.bf16.msra.mxu0 %v14552_v24  ;;  %v14575_v24 = vld [vmem:[#allocation12 + $0x3c0] sm:$0xff]  }
 0x95d   :  { %14081 = vmatpush3.bf16.msra.mxu1 %v14553_v8  ;;  %14060 = vmatprep.subr.bf16.mxu0 %v14554_v20  ;;  %v8409_v8 = vpack.c.bf16 %v8345_v6, %v8345_v6  ;;  %v14576_v20 = vld [vmem:[#allocation12 + $0x300] sm:$0xff]   ;;  %v14605_v6 = vld [vmem:[#allocation12 + $0x3b8] sm:$0xff]  }
 0x95e   :  { %14082 = vmatprep.subr.bf16.mxu1 %v14555_v25  ;;  %v8411_v25 = vpack.c.bf16 %v8347_v26, %v8347_v26 }
 0x960   :  { %14061 = vmatpush3.bf16.msra.mxu0 %v14556_v49  ;;  %v14577_v49 = vld [vmem:[#allocation12 + $0x380] sm:$0xff]  }
 0x961   :  { %14083 = vmatpush3.bf16.msra.mxu1 %v14557_v1  ;;  %14062 = vmatprep.subr.bf16.mxu0 %v14558_v54  ;;  %v14578_v1 = vld [vmem:[#allocation12 + $0x348] sm:$0xff]  }
 0x962   :  { %14084 = vmatprep.subr.bf16.mxu1 %v14559_v10  ;;  %v14579_v54 = vld [vmem:[#allocation12 + $0x3c8] sm:$0xff]  }
 0x963   :  { %v14581_v10 = vld [vmem:[#allocation12 + $0x388] sm:$0xff]  }
 0x964   :  { %14063 = vmatpush3.bf16.msra.mxu0 %v14560_v21 }
 0x965   :  { %14085 = vmatpush3.bf16.msra.mxu1 %v14561_v17  ;;  %14064 = vmatprep.subr.bf16.mxu0 %v14562_v18  ;;  %v14585_v17 = vld [vmem:[#allocation12 + $0x390] sm:$0xff]   ;;  %v14586_v18 = vld [vmem:[#allocation12 + $0x358] sm:$0xff]  }
 0x966   :  { %v13762_v47 = vpop.f32.mrb[144].mxu0  ;;  %14086 = vmatprep.subr.bf16.mxu1 %v14563_v13  ;;  %v14590_v13 = vld [vmem:[#allocation12 + $0x360] sm:$0xff]  }
 0x967   :  { %v13784_v5 = vpop.f32.mrb[144].mxu1  ;;  %v13763_v34 = vpop.f32.mrb[145].mxu0 }
 0x968   :  { %v13764_v32 = vadd.f32 %v13763_v34, %v13762_v47  ;;  %v13785_v52 = vpop.f32.mrb[145].mxu1  ;;  %v13765_v60 = vpop.f32.mrb[146].mxu0  ;;  %14065 = vmatpush3.bf16.msra.mxu0 %v14564_v15  ;;  %v14589_v47 = vld [vmem:[#allocation12 + $0x398] sm:$0xff]   ;;  %v14592_v34 = vld [vmem:[#allocation12 + $0x320] sm:$0xff]   ;;  %v14595_v15 = vld [vmem:[#allocation12 + $0x3e8] sm:$0xff]  }
 0x969   :  { %v13786_v44 = vadd.f32 %v13785_v52, %v13784_v5  ;;  %v13787_v58 = vpop.f32.mrb[146].mxu1  ;;  %14087 = vmatpush3.bf16.msra.mxu1 %v14565_v40  ;;  %v13766_v29 = vpop.f32.mrb[147].mxu0  ;;  %14066 = vmatprep.subr.bf16.mxu0 %v14566_v31  ;;  %v1655_v5 = vrot.slane %v17089_v45, %v18185_v30  ;;  %v14596_v31 = vld [vmem:[#allocation12 + $0x328] sm:$0xff]  }
 0x96a   :  { %v11022_v0 = vadd.f32 %v13764_v32, %v17108_v53  ;;  %v13788_v28 = vpop.f32.mrb[147].mxu1  ;;  %14088 = vmatprep.subr.bf16.mxu1 %v14567_v9  ;;  %v14571_v53 = vld [vmem:[#allocation12 + $0x2f8] sm:$0xff]   ;;  %v14598_v9 = vld [vmem:[#allocation12 + $0x370] sm:$0xff]  }
 0x96b   :  { %v18255_v32 = vld [vmem:[#allocation62_spill] sm:$0xff]  ;;  %v8150_v3 = vadd.f32 %v18256_v50, %v1655_v5 }
 0x96c   :  { %v11062_v55 = vadd.f32 %v13786_v44, %v11022_v0  ;;  %14067 = vmatpush3.bf16.msra.mxu0 %v14568_v11  ;;  %v8109_v52 = vadd.f32 %v18255_v32, %v1647_v43  ;;  %v14597_v0 = vld [vmem:[#allocation12 + $0x3a8] sm:$0xff]   ;;  %v14599_v11 = vld [vmem:[#allocation12 + $0x3f0] sm:$0xff]  }
 0x96d   :  { %14089 = vmatpush3.bf16.msra.mxu1 %v14569_v2  ;;  %14068 = vmatprep.subr.bf16.mxu0 %v14570_v51  ;;  %v8282_v37 = vmul.f32 0.2, %v8150_v3  ;;  %vm8218_vm4 = vcmp.gt.f32.partialorder %v8150_v3, 0.0  ;;  %v14600_v51 = vld [vmem:[#allocation12 + $0x330] sm:$0xff]  }
 0x96e   :  { %v11067_v33 = vsub.f32 0.0, %v11062_v55  ;;  %14090 = vmatprep.subr.bf16.mxu1 %v14571_v53  ;;  %v8280_v46 = vmul.f32 0.2, %v8109_v52  ;;  %vm8216_vm3 = vcmp.gt.f32.partialorder %v8109_v52, 0.0 }
 0x970   :  { %v11068_v39 = vmul.f32 1.442695, %v11067_v33  ;;  %14069 = vmatpush3.bf16.msra.mxu0 %v14572_v19  ;;  %v14602_v33 = vld [vmem:[#allocation12 + $0x378] sm:$0xff]   ;;  %v8344_v53 = vsel %vm8216_vm3, %v8109_v52, %v8280_v46 }
 0x971   :  { %14091 = vmatpush3.bf16.msra.mxu1 %v14573_v16  ;;  %14098 = vmatprep.subr.bf16.mxu0 %v14574_v48  ;;  %v14604_v19 = vld [vmem:[#allocation12 + $0x338] sm:$0xff]  }
 0x972   :  { %14337 = vpow2.f32 %v11068_v39  ;;  %14120 = vmatprep.subr.bf16.mxu1 %v14575_v24  ;;  %v8346_v39 = vsel %vm8218_vm4, %v8150_v3, %v8282_v37 }
 0x973   :  { %11592 = vmatmul.mubr.bf16.vlgmr.msra.gmra.mrb[172].mxu0 %v8404_v23  ;;  %v8410_v23 = vpack.c.bf16 %v8346_v39, %v8346_v39 }
 0x974   :  { %11632 = vmatmul.mubr.bf16.vlgmr.msra.gmra.mrb[172].mxu1 %v8406_v14  ;;  %14099 = vmatpush3.bf16.msra.mxu0 %v14576_v20 }
 0x975   :  { %11671 = vmatprep.mubr.bf16.mxu0 %v8409_v8  ;;  %14121 = vmatpush3.bf16.msra.mxu1 %v14577_v49 }
 0x976   :  { %11711 = vmatprep.mubr.bf16.mxu1 %v8411_v25  ;;  %14100 = vmatprep.subr.bf16.mxu0 %v14578_v1 }
 0x977   :  { %14122 = vmatprep.subr.bf16.mxu1 %v14579_v54 }
 0x978   :  { %14101 = vmatpush3.bf16.msra.mxu0 %v14580_v63 }
 0x979   :  { %14123 = vmatpush3.bf16.msra.mxu1 %v14581_v10  ;;  %14102 = vmatprep.subr.bf16.mxu0 %v14582_v35 }
 0x97a   :  { %14124 = vmatprep.subr.bf16.mxu1 %v14583_v38 }
 0x97c   :  { %v14338_v21 = vpop.eup %14337  ;;  %14103 = vmatpush3.bf16.msra.mxu0 %v14584_v59 }
 0x97d   :  { %v11070_v4 = vadd.f32 1.0, %v14338_v21  ;;  %14125 = vmatpush3.bf16.msra.mxu1 %v14585_v17  ;;  %14104 = vmatprep.subr.bf16.mxu0 %v14586_v18 }
 0x97e   :  { %14126 = vmatprep.subr.bf16.mxu1 %v14587_v36 }
 0x97f   :  { %14339 = vrcp.f32 %v11070_v4 }
 0x980   :  { %14105 = vmatpush3.bf16.msra.mxu0 %v14588_v56 }
 0x981   :  { %14127 = vmatpush3.bf16.msra.mxu1 %v14589_v47  ;;  %14106 = vmatprep.subr.bf16.mxu0 %v14590_v13 }
 0x982   :  { %14128 = vmatprep.subr.bf16.mxu1 %v14591_v41 }
 0x984   :  { %14107 = vmatpush3.bf16.msra.mxu0 %v14592_v34 }
 0x985   :  { %14129 = vmatpush3.bf16.msra.mxu1 %v14593_v61  ;;  %14108 = vmatprep.subr.bf16.mxu0 %v14594_v62 }
 0x986   :  { %v13806_v60 = vpop.f32.mrb[148].mxu0  ;;  %14130 = vmatprep.subr.bf16.mxu1 %v14595_v15 }
 0x987   :  { %v13828_v44 = vpop.f32.mrb[148].mxu1  ;;  %v13807_v27 = vpop.f32.mrb[149].mxu0 }
 0x988   :  { %v13808_v58 = vadd.f32 %v13807_v27, %v13806_v60  ;;  %v13829_v40 = vpop.f32.mrb[149].mxu1  ;;  %v13809_v29 = vpop.f32.mrb[150].mxu0  ;;  %14109 = vmatpush3.bf16.msra.mxu0 %v14596_v31 }
 0x989   :  { %v14340_v30 = vpop.eup %14339  ;;  %v13830_v45 = vadd.f32 %v13829_v40, %v13828_v44  ;;  %v13831_v7 = vpop.f32.mrb[150].mxu1  ;;  %14131 = vmatpush3.bf16.msra.mxu1 %v14597_v0  ;;  %14110 = vmatprep.subr.bf16.mxu0 %v14598_v9 }
 0x98a   :  { %v13810_v28 = vpop.f32.mrb[151].mxu0  ;;  %11072 = vst [vmem:[%s17163_s9 + $0x20] sm:$0xff] %v14340_v30  ;;  %v11108_v22 = vadd.f32 %v16681_v12, %v13808_v58  ;;  %v13832_v55 = vpop.f32.mrb[151].mxu1  ;;  %14132 = vmatprep.subr.bf16.mxu1 %v14599_v11  ;;  %v8408_v12 = vpack.c.bf16 %v8344_v53, %v8344_v53 }
 0x98b   :  { %v14606_v55 = vld [vmem:[#allocation13] ss:$0 sm:$0xff] }
 0x98c   :  { %v11148_v2 = vadd.f32 %v13830_v45, %v11108_v22  ;;  %14111 = vmatpush3.bf16.msra.mxu0 %v14600_v51 }
 0x98d   :  { %14133 = vmatpush3.bf16.msra.mxu1 %v14601_v42  ;;  %14112 = vmatprep.subr.bf16.mxu0 %v14602_v33 }
 0x98e   :  { %14134 = vmatprep.subr.bf16.mxu1 %v14603_v57 }
 0x990   :  { %14113 = vmatpush3.bf16.msra.mxu0 %v14604_v19 }
 0x991   :  { %14135 = vmatpush3.bf16.msra.mxu1 %v14605_v6 }
 0x993   :  { %11672 = vmatmul.mubr.bf16.vlgmr.msra.gmra.mrb[176].mxu0 %v8408_v12 }
 0x994   :  { %11712 = vmatmul.mubr.bf16.vlgmr.msra.gmra.mrb[176].mxu1 %v8410_v23 }
 0x9a6   :  { %v13850_v16 = vpop.f32.mrb[152].mxu0 }
 0x9a7   :  { %v13872_v48 = vpop.f32.mrb[152].mxu1  ;;  %v13851_v26 = vpop.f32.mrb[153].mxu0 }
 0x9a8   :  { %v13852_v14 = vadd.f32 %v13851_v26, %v13850_v16  ;;  %v13873_v24 = vpop.f32.mrb[153].mxu1  ;;  %v13853_v8 = vpop.f32.mrb[154].mxu0 }
 0x9a9   :  { %v13874_v20 = vadd.f32 %v13873_v24, %v13872_v48  ;;  %v13875_v25 = vpop.f32.mrb[154].mxu1  ;;  %v13854_v49 = vpop.f32.mrb[155].mxu0 }
 0x9aa   :  { %v11188_v1 = vadd.f32 %v13852_v14, %v11148_v2  ;;  %v13876_v54 = vpop.f32.mrb[155].mxu1 }
 0x9ac   :  { %v11228_v63 = vadd.f32 %v13874_v20, %v11188_v1 }
 0x9c6   :  { %v13894_v10 = vpop.f32.mrb[156].mxu0 }
 0x9c7   :  { %v13916_v35 = vpop.f32.mrb[156].mxu1  ;;  %v13895_v38 = vpop.f32.mrb[157].mxu0 }
 0x9c8   :  { %v13896_v21 = vadd.f32 %v13895_v38, %v13894_v10  ;;  %v13917_v59 = vpop.f32.mrb[157].mxu1  ;;  %v13897_v4 = vpop.f32.mrb[158].mxu0 }
 0x9c9   :  { %v13918_v17 = vadd.f32 %v13917_v59, %v13916_v35  ;;  %v13919_v18 = vpop.f32.mrb[158].mxu1  ;;  %v13898_v36 = vpop.f32.mrb[159].mxu0 }
 0x9ca   :  { %v11268_v56 = vadd.f32 %v13896_v21, %v11228_v63  ;;  %v13920_v47 = vpop.f32.mrb[159].mxu1 }
 0x9cc   :  { %v11308_v13 = vadd.f32 %v13918_v17, %v11268_v56 }
 0x9e6   :  { %v13938_v43 = vpop.f32.mrb[160].mxu0 }
 0x9e7   :  { %v13960_v41 = vpop.f32.mrb[160].mxu1  ;;  %v13939_v5 = vpop.f32.mrb[161].mxu0 }
 0x9e8   :  { %v13940_v34 = vadd.f32 %v13939_v5, %v13938_v43  ;;  %v13961_v61 = vpop.f32.mrb[161].mxu1  ;;  %v13941_v62 = vpop.f32.mrb[162].mxu0 }
 0x9e9   :  { %v13962_v32 = vadd.f32 %v13961_v61, %v13960_v41  ;;  %v13963_v52 = vpop.f32.mrb[162].mxu1  ;;  %v13942_v60 = vpop.f32.mrb[163].mxu0 }
 0x9ea   :  { %v11348_v15 = vadd.f32 %v13940_v34, %v11308_v13  ;;  %v13964_v50 = vpop.f32.mrb[163].mxu1 }
 0x9ec   :  { %v11388_v3 = vadd.f32 %v13962_v32, %v11348_v15 }
 0x9ee   :  { %v11393_v44 = vsub.f32 0.0, %v11388_v3 }
 0x9f0   :  { %v11394_v27 = vmul.f32 1.442695, %v11393_v44 }
 0x9f2   :  { %14341 = vpow2.f32 %v11394_v27 }
 0x9fc   :  { %v14342_v58 = vpop.eup %14341 }
 0x9fd   :  { %v11396_v40 = vadd.f32 1.0, %v14342_v58 }
 0x9ff   :  { %14343 = vrcp.f32 %v11396_v40 }
 0xa06   :  { %v13982_v29 = vpop.f32.mrb[164].mxu0 }
 0xa07   :  { %v14004_v31 = vpop.f32.mrb[164].mxu1  ;;  %v13983_v30 = vpop.f32.mrb[165].mxu0 }
 0xa08   :  { %v13984_v45 = vadd.f32 %v13983_v30, %v13982_v29  ;;  %v14005_v7 = vpop.f32.mrb[165].mxu1  ;;  %v13985_v0 = vpop.f32.mrb[166].mxu0 }
 0xa09   :  { %v14344_v28 = vpop.eup %14343  ;;  %v14006_v9 = vadd.f32 %v14005_v7, %v14004_v31  ;;  %v14007_v46 = vpop.f32.mrb[166].mxu1 }
 0xa0a   :  { %v13986_v22 = vpop.f32.mrb[167].mxu0  ;;  %11398 = vst [vmem:[%s17163_s9 + $0x28] sm:$0xff] %v14344_v28  ;;  %v11434_v11 = vadd.f32 %v14606_v55, %v13984_v45  ;;  %v14008_v37 = vpop.f32.mrb[167].mxu1 }
 0xa0c   :  { %v11474_v2 = vadd.f32 %v14006_v9, %v11434_v11 }
 0xa26   :  { %v14026_v51 = vpop.f32.mrb[168].mxu0 }
 0xa27   :  { %v14048_v42 = vpop.f32.mrb[168].mxu1  ;;  %v14027_v33 = vpop.f32.mrb[169].mxu0 }
 0xa28   :  { %v14028_v53 = vadd.f32 %v14027_v33, %v14026_v51  ;;  %v14049_v57 = vpop.f32.mrb[169].mxu1  ;;  %v14029_v39 = vpop.f32.mrb[170].mxu0 }
 0xa29   :  { %v14050_v19 = vadd.f32 %v14049_v57, %v14048_v42  ;;  %v14051_v12 = vpop.f32.mrb[170].mxu1  ;;  %v14030_v6 = vpop.f32.mrb[171].mxu0 }
 0xa2a   :  { %v11514_v23 = vadd.f32 %v14028_v53, %v11474_v2  ;;  %v14052_v16 = vpop.f32.mrb[171].mxu1 }
 0xa2c   :  { %v11554_v48 = vadd.f32 %v14050_v19, %v11514_v23 }
 0xa46   :  { %v14070_v26 = vpop.f32.mrb[172].mxu0 }
 0xa47   :  { %v14092_v14 = vpop.f32.mrb[172].mxu1  ;;  %v14071_v24 = vpop.f32.mrb[173].mxu0 }
 0xa48   :  { %v14072_v8 = vadd.f32 %v14071_v24, %v14070_v26  ;;  %v14093_v20 = vpop.f32.mrb[173].mxu1  ;;  %v14073_v25 = vpop.f32.mrb[174].mxu0 }
 0xa49   :  { %v14094_v49 = vadd.f32 %v14093_v20, %v14092_v14  ;;  %v14095_v1 = vpop.f32.mrb[174].mxu1  ;;  %v14074_v54 = vpop.f32.mrb[175].mxu0 }
 0xa4a   :  { %v11594_v63 = vadd.f32 %v14072_v8, %v11554_v48  ;;  %v14096_v10 = vpop.f32.mrb[175].mxu1 }
 0xa4c   :  { %v11634_v35 = vadd.f32 %v14094_v49, %v11594_v63 }
 0xa66   :  { %v14114_v38 = vpop.f32.mrb[176].mxu0 }
 0xa67   :  { %v14136_v21 = vpop.f32.mrb[176].mxu1  ;;  %v14115_v59 = vpop.f32.mrb[177].mxu0 }
 0xa68   :  { %v14116_v4 = vadd.f32 %v14115_v59, %v14114_v38  ;;  %v14137_v17 = vpop.f32.mrb[177].mxu1  ;;  %v14117_v18 = vpop.f32.mrb[178].mxu0 }
 0xa69   :  { %v14138_v36 = vadd.f32 %v14137_v17, %v14136_v21  ;;  %v14139_v56 = vpop.f32.mrb[178].mxu1  ;;  %v14118_v47 = vpop.f32.mrb[179].mxu0 }
 0xa6a   :  { %v11674_v13 = vadd.f32 %v14116_v4, %v11634_v35  ;;  %v14140_v43 = vpop.f32.mrb[179].mxu1 }
 0xa6c   :  { %v11714_v41 = vadd.f32 %v14138_v36, %v11674_v13 }
 0xa6e   :  { %v11719_v5 = vsub.f32 0.0, %v11714_v41 }
 0xa70   :  { %v11720_v34 = vmul.f32 1.442695, %v11719_v5 }
 0xa72   :  { %14345 = vpow2.f32 %v11720_v34 }
 0xa7c   :  { %v14346_v61 = vpop.eup %14345 }
 0xa7d   :  { %v11722_v62 = vadd.f32 1.0, %v14346_v61 }
 0xa7f   :  { %14347 = vrcp.f32 %v11722_v62 }
 0xa89   :  { %v14348_v32 = vpop.eup %14347 }
 0xa8a   :  { %11724 = vst [vmem:[%s17163_s9 + $0x30] sm:$0xff] %v14348_v32 }
 0xa8b   :  { %11729 = vsyncpa [#allocation3], 1 }
 0xa8c   :  { %11730 = vsyncpa [#allocation5], 1 }
 0xa8d   :  { %11731 = vsyncpa [#allocation8], 1 }
 0xa8e   :  { %11732 = vsyncpa [#allocation11], 1 }
 0xa8f   :  { %11733 = vsyncpa [#allocation14], 1 }

</bundles_post_ra>
